<compile_context>
chip_gen: v5e
topology: v5e:2x2
jax: 0.10.0
libtpu: 0.0.40
codegen_flags: <defaults>
</compile_context>

<pallas_src>
import jax
import jax.numpy as jnp
from jax.experimental import pallas as pl
from jax.experimental.pallas import tpu as pltpu


def replicator_kernel(skip_ref, x_ref, c_ref, o_ref):
    # skip_ref: (1,) f32 SMEM scalar-prefetch; x_ref/o_ref: (TB, D) caller dtype;
    # c_ref: (1, D) f32 constant fitness (broadcasts over rows).
    x = x_ref[...].astype(jnp.float32)               # in-kernel cast, hidden under DMA
    f = c_ref[...]                                    # (1, D)
    xf = x * f                                        # fitness-weighted state (VPU)
    phi = jnp.sum(xf, axis=-1, keepdims=True)         # (TB, 1) per-row avg fitness (XLU)
    # x*(f - phi) + skip*x  ==  xf + (skip - phi)*x   (skip folded into per-row scalar)
    o_ref[...] = (xf + (skip_ref[0] - phi) * x).astype(o_ref.dtype)


def _round_up(n, m):
    return ((n + m - 1) // m) * m


def _pick_batch_tile(B, D, itemsize, target_block_bytes=4 << 20):
    """Rows per block.

    Sized by f32-equivalent bytes (bounds both HBM traffic and the in-kernel f32
    temporaries), rounded to the sublane packing (8 rows f32 / 16 rows bf16).
    No arbitrary row cap. If the whole array fits one block we still cap TB at
    ~B/2 so the batch grid has >= 2 blocks and v7x's two TensorCores both get
    work (neutral on v5e/v6e single-TC chips)."""
    sub = 16 if itemsize < 4 else 8
    row_bytes = D * 4                                   # f32-equivalent row
    tb = max(sub, (target_block_bytes // row_bytes) // sub * sub)
    if tb >= B:
        tb = B                                          # full array dims are always legal
    if B >= 2 * sub:                                    # guarantee >= 2 grid blocks
        tb = min(tb, _round_up(pl.cdiv(B, 2), sub))
    return int(tb)


def replicator_constant_forward(t, x, fitness_const, skip_scalar):
    """t is accepted for ODE-solver signature compatibility but unused
    (the fitness function is a learned constant)."""
    del t
    B, D = x.shape
    in_dtype = x.dtype
    itemsize = jnp.dtype(in_dtype).itemsize
    c2d = fitness_const.reshape(1, D).astype(jnp.float32)
    skip1 = jnp.reshape(skip_scalar, (1,)).astype(jnp.float32)

    # Tiny-call fallback: let XLA fuse the ~few-hundred-byte computation into the
    # surrounding ODE-solver step instead of paying custom-call launch overhead.
    if B * D * itemsize < (64 << 10):
        x32 = x.astype(jnp.float32)
        phi = jnp.sum(x32 * c2d, axis=-1, keepdims=True)
        return (x32 * (c2d - phi) + skip1[0] * x32).astype(in_dtype)

    TB = _pick_batch_tile(B, D, itemsize)
    grid = (pl.cdiv(B, TB),)

    # Double-buffered in + out blocks, plus in-kernel f32 temporaries, plus headroom.
    blk_bytes = TB * D * itemsize
    blk_f32 = TB * D * 4
    vmem_limit = min(2 * (blk_bytes + blk_bytes) + 2 * blk_f32 + (2 << 20), 30 << 20)

    cost = pl.CostEstimate(
        flops=4 * B * D,
        transcendentals=0,
        bytes_accessed=2 * B * D * itemsize + 4 * D + 4,
    )

    return pl.pallas_call(
        replicator_kernel,
        out_shape=jax.ShapeDtypeStruct((B, D), in_dtype),
        grid_spec=pltpu.PrefetchScalarGridSpec(
            num_scalar_prefetch=1,                               # skip scalar -> SMEM
            grid=grid,
            in_specs=[
                pl.BlockSpec((TB, D), lambda i, skip: (i, 0)),   # x tile
                pl.BlockSpec((1, D), lambda i, skip: (0, 0)),    # fitness constant (broadcast)
            ],
            out_specs=pl.BlockSpec((TB, D), lambda i, skip: (i, 0)),
        ),
        compiler_params=pltpu.CompilerParams(
            dimension_semantics=("parallel",),                   # batch blocks independent
            vmem_limit_bytes=vmem_limit,
        ),
        cost_estimate=cost,
    )(skip1, x, c2d)


def reference_forward(t, x, fitness_const, skip_scalar):
    del t
    x32 = x.astype(jnp.float32)
    f = fitness_const.astype(jnp.float32)[None, :]
    phi = jnp.sum(x32 * f, axis=-1, keepdims=True)
    out = x32 * (f - phi) + jnp.asarray(skip_scalar, jnp.float32) * x32
    return out.astype(x.dtype)


def _check(B, D, key, dtype=jnp.float32, learnable_skip=True):
    kx, kc, ks = jax.random.split(key, 3)
    x = jax.random.normal(kx, (B, D), dtype=jnp.float32).astype(dtype)
    t = jnp.float32(0.0)
    fitness_const = 0.1 * jax.random.normal(kc, (D,), dtype=jnp.float32)
    skip_scalar = (0.1 * jax.random.normal(ks, (), dtype=jnp.float32)
                   if learnable_skip else jnp.float32(0.0))

    out = jax.block_until_ready(
        replicator_constant_forward(t, x, fitness_const, skip_scalar))
    ref = reference_forward(t, x, fitness_const, skip_scalar)
    assert out.shape == (B, D), f"bad shape at B={B}, D={D}"
    assert out.dtype == dtype, f"bad dtype at B={B}, D={D}"
    tol = 1e-5 if dtype == jnp.float32 else 5e-2
    assert jnp.allclose(out.astype(jnp.float32), ref.astype(jnp.float32),
                        atol=tol, rtol=tol), f"mismatch at B={B}, D={D}, {dtype}"


if __name__ == "__main__":
    key = jax.random.PRNGKey(0)
    k1, k2, k3, k4 = jax.random.split(key, 4)

    # Module-consistent toy shape: batch=2, data_dim=32 (ODE state vector).
    # Below the size threshold -> fused jnp fallback path.
    _check(2, 32, k1, learnable_skip=True)

    # Pallas path: f32, whole array fits one block but split into 2 blocks
    # (v7x megacore) -> TB=1024, grid=(2,).
    _check(2048, 512, k2, learnable_skip=True)

    # Pallas path: ragged last block (padding rows must not leak into output).
    _check(2500, 512, k3, learnable_skip=False)

    # Pallas path: bf16 in/out, f32 math in-kernel, TB a multiple of 16 sublanes.
    _check(1024, 256, k4, dtype=jnp.bfloat16, learnable_skip=True)

    print("KERNEL_OK")
</pallas_src>

<mosaic_0001>
module attributes {stable_mosaic.version = 11 : i64} {
  func.func @replicator_kernel(%arg0: i32, %arg1: memref<1xf32, #tpu.memory_space<smem>>, %arg2: memref<1024x512xf32, #tpu.memory_space<vmem>>, %arg3: memref<1x512xf32, #tpu.memory_space<vmem>>, %arg4: memref<1024x512xf32, #tpu.memory_space<vmem>>) attributes {dimension_semantics = [#tpu.dimension_semantics<parallel>], iteration_bounds = array<i64: 2>, scalar_prefetch = 1 : i64, scratch_operands = 0 : i64, tpu.core_type = #tpu.core_type<tc>, window_params = [{transform_indices = @transform_0, window_bounds = array<i64: 1024, 512>}, {pipeline_mode = #tpu.pipeline_mode<synchronous>, transform_indices = @transform_1, window_bounds = array<i64: 1, 512>}, {transform_indices = @transform_2, window_bounds = array<i64: 1024, 512>}]} {
    %c0 = arith.constant 0 : index
    %c0_0 = arith.constant 0 : index
    %0 = vector.load %arg2[%c0, %c0_0] : memref<1024x512xf32, #tpu.memory_space<vmem>>, vector<1024x512xf32>
    %c0_1 = arith.constant 0 : index
    %c0_2 = arith.constant 0 : index
    %1 = vector.load %arg3[%c0_1, %c0_2] : memref<1x512xf32, #tpu.memory_space<vmem>>, vector<1x512xf32>
    %2 = vector.broadcast %1 : vector<1x512xf32> to vector<1024x512xf32>
    %3 = arith.mulf %0, %2 : vector<1024x512xf32>
    %cst = arith.constant dense<0.000000e+00> : vector<1024xf32>
    %4 = vector.multi_reduction <add>, %3, %cst [1] : vector<1024x512xf32> to vector<1024xf32>
    %5 = vector.shape_cast %4 : vector<1024xf32> to vector<1024x1xf32>
    %c0_3 = arith.constant 0 : index
    %6 = memref.load %arg1[%c0_3] : memref<1xf32, #tpu.memory_space<smem>>
    %7 = vector.broadcast %6 : f32 to vector<1024x1xf32>
    %8 = arith.subf %7, %5 : vector<1024x1xf32>
    %9 = vector.broadcast %8 : vector<1024x1xf32> to vector<1024x512xf32>
    %10 = arith.mulf %9, %0 : vector<1024x512xf32>
    %11 = arith.addf %3, %10 : vector<1024x512xf32>
    %c0_4 = arith.constant 0 : index
    %c0_5 = arith.constant 0 : index
    %12 = vector.load %arg4[%c0_4, %c0_5] : memref<1024x512xf32, #tpu.memory_space<vmem>>, vector<1024x512xf32>
    tpu.vector_store %arg4[%c0_4, %c0_5], %11 {strides = array<i32>} : memref<1024x512xf32, #tpu.memory_space<vmem>>, vector<1024x512xf32>,
    return
  }
  func.func @transform_0(%arg0: i32, %arg1: memref<1xf32, #tpu.memory_space<smem>>) -> (i32, i32) {
    %c0_i32 = arith.constant 0 : i32
    %c0_i32_0 = arith.constant 0 : i32
    return %arg0, %c0_i32 : i32, i32
  }
  func.func @transform_1(%arg0: i32, %arg1: memref<1xf32, #tpu.memory_space<smem>>) -> (i32, i32) {
    %c0_i32 = arith.constant 0 : i32
    %c0_i32_0 = arith.constant 0 : i32
    %c0_i32_1 = arith.constant 0 : i32
    return %c0_i32, %c0_i32_0 : i32, i32
  }
  func.func @transform_2(%arg0: i32, %arg1: memref<1xf32, #tpu.memory_space<smem>>) -> (i32, i32) {
    %c0_i32 = arith.constant 0 : i32
    %c0_i32_0 = arith.constant 0 : i32
    return %arg0, %c0_i32 : i32, i32
  }
}

</mosaic_0001>

<bundles_post_ra>
// kernel: tpu_custom_call.1
= control target key start
LH: loop header
LB: loop body
LE: loop exit
PB: predicated region body
PF: predicated region fallthrough
CT: control target
= control target key end

     0   :  { %s9256_s0 = inlined_call_operand.<no memory space> [shape: f32[1], index: 0, kind: input, shape index: {}]   ;;  %s9257_s1 = inlined_call_operand.hbm [shape: f32[2048,512], index: 1, kind: input, shape index: {}]   ;;  %s9258_s2 = inlined_call_operand.hbm [shape: f32[1,512], index: 2, kind: input, shape index: {}]   ;;  %s9259_s3 = inlined_call_operand.hbm [shape: f32[2048,512], index: 3, kind: output, shape index: {}]  }
   0x1   :  { %8 = sst [smem:[#allocation3]] %s9256_s0 }
   0x2   :  { %9 = vsyncpa [#allocation5], 0 }
   0x3   :  { %11 = vsyncpa [#allocation5 + $0x1], 0 }
   0x4   :  { %12 = vsyncpa [#allocation8], 0 }
   0x5   :  { %13 = vsyncpa [#allocation6], 0 }
   0x6   :  { %15 = vsyncpa [#allocation6 + $0x1], 0  ;;  %s4379_s14 = smov 0   ;;  %s4381_s15 = smov 0  }
   0x7   :  { %s4383_s16 = smov 0   ;;  %s4385_s17 = smov 0  }
   0x8 LB: > { %s4400_s0 = sadd.s32 4294967295, %s4349_s17   ;;  %s3624_s18 = sadd.s32 4294967294, %s4349_s17   ;;  %s4349_s17 = sphi %s4385_s17, %s10539_s17   ;;  %s4345_s16 = sphi %s4383_s16, %s10538_s16   ;;  %s4341_s15 = sphi %s4381_s15, %s10537_s15   ;;  %s4337_s14 = sphi %s4379_s14, %s10536_s14  }
   0x9   : > { %s4404_s19 = sadd.s32 1, %s4349_s17   ;;  %s28_s20 = sadd.s32 1, %s4345_s16 }
   0xa   : > { %s25_s21 = ssub.s32 %s4349_s17, %s4404_s19  ;;  %p35_p0 = scmp.ne.s32.totalorder %s4345_s16, %s4341_s15 }
   0xb   : > { %p26_p1 = scmp.eq.s32.totalorder %s25_s21, 0  ;;  %p36_p2 = scmp.eq.s32.totalorder %s4349_s17, 0 }
   0xc   : > { %p41_p3 = scmp.ne.s32.totalorder %s4341_s15, %s4337_s14  ;;  %p42_p4 = scmp.eq.s32.totalorder %s4400_s0, 0 }
   0xd   : > { %s4416_s22 = scalar_select %p26_p1, %s4345_s16, %s28_s20  }
   0xe   : > { %p4418_p5 = por %p36_p2, %p35_p0  ;;  %p4424_p6 = por %p42_p4, %p41_p3 }
   0xf   : > { %p86_p7 = scmp.eq.s32.totalorder %s4400_s0, 1  ;;  %p92_p8 = scmp.eq.s32.totalorder %s3624_s18, 1 }
  0x10   : > { %p3625_p9 = scmp.ge.s32.totalorder %s4349_s17, 1  ;;  %p99_p10 = scmp.lt.s32.totalorder %s4349_s17, 3 }
  0x11   : > { %p4431_p11 = por %p86_p7, %p35_p0  ;;  %p4435_p12 = por %p92_p8, %p41_p3 }
  0x12   : > { %p4439_p13 = pnand %p3625_p9, %p99_p10  ;;  %s111_s30 = sshll.u32 %s9258_s2, 4  ;;  %s112_s30 = int_to_ptr.hbm [resolvable:$true] %s111_s30 }
  0x13   : > { %s4351_s4 = smov [#allocation7]   ;;  %p3667_p3 = scmp.lt.s32.totalorder %s4349_s17, 2 }
  0x14   : > { %p3654_p1 = pneg %p4439_p13  ;;  %s113_s5 = sshll.u32 %s4351_s4, 4  ;;  %s114_s5 = int_to_ptr.vmem [resolvable:$true] %s113_s5 }
  0x15   : > { %s124_s6 = sand.u32 1, %s4345_s16   ;;  %p4455_p7 = pnand %p3667_p3, %p4418_p5 }
  0x16   : > { %p3655_p2 = pnand %p3654_p1, %p42_p4  ;;  %s3628_s8 = sshll.u32 %s124_s6, 12 }
  0x17   : > { %s3643_s9 = sshll.u32 %s4349_s17, 12  ;;  %s128_s18 = scalar_lea.vmem [#allocation4], %s3628_s8 }
  0x18   : > { %3657 = dma.hbm_to_vmem [thread:$0]  (!%p3655_p2), %s112_s30, 64, %s114_s5, [#allocation8]  }
  0x19   : > { %s134_s12 = scalar_lea.hbm %s9257_s1, %s3643_s9  ;;  %s137_s20 = sshll.u32 %s128_s18, 4  ;;  %s138_s20 = int_to_ptr.vmem [resolvable:$true] %s137_s20 }
  0x1a   : > { %s135_s13 = sshll.u32 %s134_s12, 4  ;;  %s125_s21 = scalar_lea.sflag [#allocation5], %s124_s6  ;;  %s136_s13 = int_to_ptr.hbm [resolvable:$true] %s135_s13 }
  0x1b   : > { %s4249_s28 = sshra.s32 %s136_s13, 4  ;;  %p4253_p8 = pneg %p4455_p7  ;;  %s4250_s28 = int_to_ptr.hbm [resolvable:$true] %s4249_s28 }
  0x1c   : > { %s4251_s23 = scalar_lea.hbm %s4250_s28, 4096  ;;  %s4256_s4 = scalar_lea.hbm %s9257_s1, 8192 }
  0x1d   : > { %p4252_p5 = scmp.ne.s32.totalorder %s4250_s28, %s4251_s23  ;;  %p4257_p1 = scmp.lt.s32.totalorder %s4250_s28, %s9257_s1 }
  0x1e   : > { %p4258_p2 = scmp.lt.s32.totalorder %s4256_s4, %s4251_s23 }
  0x1f   : > { %p4254_p9 = pnand %p4253_p8, %p4252_p5 }
  0x20   : > { %p4259_p3 = por %p4258_p2, %p4257_p1 }
  0x21   : > { %p4255_p10 = pneg %p4254_p9 }
  0x23   : > { %p4260_p0 = pnand %p4259_p3, %p4255_p10 }
  0x25   : > { %4263 = shalt.err (!%p4260_p0)
}
  0x26   : > { %s4352_s6 = smov 512   ;;  %s4353_s8 = smov 32  }
  0x27   : > { %3661 = dma.hbm_to_vmem [thread:$0]  (!%p4455_p7), %s136_s13, 65536, %s138_s20, %s125_s21, %s4352_s6, %s4352_s6, %s4353_s8  }
  0x28   : > { %149 = sbr.rel (%p4439_p13) target bundleno = 1006 (0x3ee), region = 28 }
  0x2d   : > { %s4476_s10 = sand.u32 1, %s4341_s15  }
  0x2e   : > { %s3633_s11 = sshll.u32 %s4476_s10, 12  ;;  %s152_s12 = scalar_lea.sflag [#allocation5], %s4476_s10 }
  0x2f   : > { %s4482_s18 = scalar_lea.vmem [#allocation4], %s3633_s11 }
  0x30   : > { %4324 = dma.done.wait (%p4424_p6), %s152_s12, 65536  }
  0x31   : > { %4326 = vsyncadd (%p4424_p6), %s152_s12, 4294901760 }
  0x32   : > { %4328 = dma.done.wait (%p42_p4), [#allocation8], 64  }
  0x33   : > { %4330 = vsyncadd (%p42_p4), [#allocation8], 4294967232  ;;  %v192_v0 = vld [vmem:[%s4482_s18 + $0x40] sm:$0xff]  ;;  %v193_v1 = vld [vmem:[%s4482_s18 + $0x48] sm:$0xff]  ;;  %s5437_s24 = sld [smem:[#allocation3]]  ;;  %s5588_s27 = scalar_lea.vmem [#allocation9], %s3633_s11 }
  0x34   : > { %v194_v2 = vld [vmem:[%s4482_s18 + $0x50] sm:$0xff]  ;;  %v195_v3 = vld [vmem:[%s4482_s18 + $0x58] sm:$0xff]  ;;  %v696_v4 = vld [vmem:[#allocation7] sm:$0xf]  ;;  %s3645_s7 = sshll.u32 %s4400_s0, 12  ;;  %s3538_s21 = sshll.u32 %s5588_s27, 4  ;;  %s3539_s21 = int_to_ptr.vmem [resolvable:$true] %s3538_s21 }
  0x35   : > { %v184_v5 = vld [vmem:[%s4482_s18] sm:$0xff]  ;;  %v4497_v6 = vperm.slane %v696_v4, 0  ;;  %v4499_v7 = vperm.slane %v696_v4, 1  ;;  %v4501_v8 = vperm.slane %v696_v4, 2  ;;  %v4503_v9 = vperm.slane %v696_v4, 3  ;;  %v185_v10 = vld [vmem:[%s4482_s18 + $0x8] sm:$0xff]  ;;  %s3537_s20 = scalar_lea.hbm %s9259_s3, %s3645_s7 }
  0x36   : > { %v186_v11 = vld [vmem:[%s4482_s18 + $0x10] sm:$0xff]  ;;  %v200_v12 = vld [vmem:[%s4482_s18 + $0x80] sm:$0xff]  ;;  %v201_v13 = vld [vmem:[%s4482_s18 + $0x88] sm:$0xff]  ;;  %s3540_s28 = sshll.u32 %s3537_s20, 4  ;;  %s3525_s23 = scalar_lea.sflag [#allocation6], %s4476_s10  ;;  %s3541_s28 = int_to_ptr.hbm [resolvable:$true] %s3540_s28 }
  0x37   : > { %v4510_v14 = vmul.f32 %v4497_v6, %v192_v0  ;;  %v4513_v15 = vmul.f32 %v4499_v7, %v193_v1  ;;  %v4516_v16 = vmul.f32 %v4501_v8, %v194_v2  ;;  %v187_v17 = vld [vmem:[%s4482_s18 + $0x18] sm:$0xff]  ;;  %v202_v18 = vld [vmem:[%s4482_s18 + $0x90] sm:$0xff]  ;;  %v196_v19 = vld [vmem:[%s4482_s18 + $0x60] sm:$0xff]  ;;  %v4522_v20 = vmul.f32 %v4503_v9, %v195_v3  ;;  %s4293_s29 = sshra.s32 %s3541_s28, 4  ;;  %s4299_s9 = scalar_lea.hbm %s9259_s3, 8192  ;;  %s4294_s29 = int_to_ptr.hbm [resolvable:$true] %s4293_s29 }
  0x38   : > { %v4525_v21 = vmul.f32 %v4497_v6, %v184_v5  ;;  %v4528_v22 = vmul.f32 %v4499_v7, %v185_v10  ;;  %v4531_v23 = vmul.f32 %v4501_v8, %v186_v11  ;;  %v203_v24 = vld [vmem:[%s4482_s18 + $0x98] sm:$0xff]  ;;  %v197_v25 = vld [vmem:[%s4482_s18 + $0x68] sm:$0xff]  ;;  %v198_v26 = vld [vmem:[%s4482_s18 + $0x70] sm:$0xff]  ;;  %v4539_v28 = vmul.f32 %v4497_v6, %v200_v12  ;;  %s4295_s30 = scalar_lea.hbm %s4294_s29, 4096  ;;  %p4300_p0 = scmp.lt.s32.totalorder %s4294_s29, %s9259_s3 }
  0x39   : > { %v1228_v27 = vadd.f32 %v4513_v15, %v4510_v14  ;;  %v4542_v29 = vmul.f32 %v4499_v7, %v201_v13  ;;  %v4545_v30 = vmul.f32 %v4501_v8, %v202_v18  ;;  %v188_v31 = vld [vmem:[%s4482_s18 + $0x20] sm:$0xff]  ;;  %v189_v32 = vld [vmem:[%s4482_s18 + $0x28] sm:$0xff]  ;;  %v4550_v33 = vmul.f32 %v4503_v9, %v187_v17  ;;  %v199_v35 = vld [vmem:[%s4482_s18 + $0x78] sm:$0xff]  ;;  %p4296_p4 = scmp.ne.s32.totalorder %s4294_s29, %s4295_s30  ;;  %p4301_p7 = scmp.lt.s32.totalorder %s4299_s9, %s4295_s30 }
  0x3a   : > { %v1218_v34 = vadd.f32 %v4528_v22, %v4525_v21  ;;  %v4556_v36 = vmul.f32 %v4497_v6, %v196_v19  ;;  %v4559_v37 = vmul.f32 %v4499_v7, %v197_v25  ;;  %v190_v38 = vld [vmem:[%s4482_s18 + $0x30] sm:$0xff]  ;;  %v4564_v40 = vmul.f32 %v4503_v9, %v203_v24  ;;  %v204_v43 = vld [vmem:[%s4482_s18 + $0xa0] sm:$0xff]  ;;  %v205_v48 = vld [vmem:[%s4482_s18 + $0xa8] sm:$0xff] }
  0x3b   : > { %v1229_v39 = vadd.f32 %v1228_v27, %v4516_v16  ;;  %v1238_v41 = vadd.f32 %v4542_v29, %v4539_v28  ;;  %v4569_v42 = vmul.f32 %v4501_v8, %v198_v26  ;;  %v4576_v46 = vmul.f32 %v4497_v6, %v188_v31  ;;  %v206_v49 = vld [vmem:[%s4482_s18 + $0xb0] sm:$0xff]  ;;  %v191_v53 = vld [vmem:[%s4482_s18 + $0x38] sm:$0xff]  ;;  %v212_v55 = vld [vmem:[%s4482_s18 + $0xe0] sm:$0xff]  ;;  %p4297_p6 = pnand %p4296_p4, %p4431_p11  ;;  %p4302_p5 = por %p4301_p7, %p4300_p0 }
  0x3c   : > { %v1219_v44 = vadd.f32 %v1218_v34, %v4531_v23  ;;  %v1233_v45 = vadd.f32 %v4559_v37, %v4556_v36  ;;  %v4579_v47 = vmul.f32 %v4499_v7, %v189_v32  ;;  %v4586_v52 = vmul.f32 %v4503_v9, %v199_v35  ;;  %v213_v56 = vld [vmem:[%s4482_s18 + $0xe8] sm:$0xff]  ;;  %v207_v60 = vld [vmem:[%s4482_s18 + $0xb8] sm:$0xff]  ;;  %v208_v62 = vld [vmem:[%s4482_s18 + $0xc0] sm:$0xff] }
  0x3d   : > { %v1230_v50 = vadd.f32 %v1229_v39, %v4522_v20  ;;  %v1239_v51 = vadd.f32 %v1238_v41, %v4545_v30  ;;  %v4590_v54 = vmul.f32 %v4501_v8, %v190_v38  ;;  %v4600_v61 = vmul.f32 %v4497_v6, %v204_v43  ;;  %v214_v2 = vld [vmem:[%s4482_s18 + $0xf0] sm:$0xff]  ;;  %v209_v3 = vld [vmem:[%s4482_s18 + $0xc8] sm:$0xff]  ;;  %v216_v12 = vld [vmem:[%s4482_s18 + $0x100] sm:$0xff]  ;;  %p4298_p13 = pneg %p4297_p6 }
  0x3e   : > { %v1220_v57 = vadd.f32 %v1219_v44, %v4550_v33  ;;  %v1234_v58 = vadd.f32 %v1233_v45, %v4569_v42  ;;  %v1223_v59 = vadd.f32 %v4579_v47, %v4576_v46  ;;  %v4605_v0 = vmul.f32 %v4499_v7, %v205_v48  ;;  %v217_v13 = vld [vmem:[%s4482_s18 + $0x108] sm:$0xff]  ;;  %v210_v19 = vld [vmem:[%s4482_s18 + $0xd0] sm:$0xff]  ;;  %v215_v41 = vld [vmem:[%s4482_s18 + $0xf8] sm:$0xff] }
  0x3f   : > { %1231 = vadd.xlane.f32.xlu1 %v1230_v50  ;;  %v1240_v63 = vadd.f32 %v1239_v51, %v4564_v40  ;;  %v4608_v1 = vmul.f32 %v4501_v8, %v206_v49  ;;  %v4613_v4 = vmul.f32 %v4503_v9, %v191_v53  ;;  %v4617_v10 = vmul.f32 %v4497_v6, %v212_v55  ;;  %v218_v31 = vld [vmem:[%s4482_s18 + $0x110] sm:$0xff]  ;;  %v224_v45 = vld [vmem:[%s4482_s18 + $0x140] sm:$0xff]  ;;  %v225_v48 = vld [vmem:[%s4482_s18 + $0x148] sm:$0xff]  ;;  %p4303_p8 = pnand %p4302_p5, %p4298_p13 }
  0x40   : > { %1221 = vadd.xlane.f32.xlu0 %v1220_v57  ;;  %v1224_v5 = vadd.f32 %v1223_v59, %v4590_v54  ;;  %v4620_v11 = vmul.f32 %v4499_v7, %v213_v56  ;;  %v4625_v17 = vmul.f32 %v4503_v9, %v207_v60  ;;  %v1243_v18 = vadd.f32 %v4605_v0, %v4600_v61  ;;  %v211_v50 = vld [vmem:[%s4482_s18 + $0xd8] sm:$0xff]  ;;  %v220_v55 = vld [vmem:[%s4482_s18 + $0x120] sm:$0xff]  ;;  %v221_v56 = vld [vmem:[%s4482_s18 + $0x128] sm:$0xff] }
  0x41   : > { %1241 = vadd.xlane.f32.xlu2 %v1240_v63  ;;  %v4631_v24 = vmul.f32 %v4497_v6, %v208_v62  ;;  %v1235_v25 = vadd.f32 %v1234_v58, %v4586_v52  ;;  %v4635_v26 = vmul.f32 %v4501_v8, %v214_v2  ;;  %v4638_v27 = vmul.f32 %v4499_v7, %v209_v3  ;;  %v219_v57 = vld [vmem:[%s4482_s18 + $0x118] sm:$0xff]  ;;  %v228_v58 = vld [vmem:[%s4482_s18 + $0x160] sm:$0xff]  ;;  %v229_v59 = vld [vmem:[%s4482_s18 + $0x168] sm:$0xff] }
  0x42   : > { %v1244_v32 = vadd.f32 %v1243_v18, %v4608_v1  ;;  %v1253_v34 = vadd.f32 %v4620_v11, %v4617_v10  ;;  %v4645_v35 = vmul.f32 %v4497_v6, %v216_v12  ;;  %v4648_v38 = vmul.f32 %v4499_v7, %v217_v13  ;;  %v226_v12 = vld [vmem:[%s4482_s18 + $0x150] sm:$0xff] }
  0x43   : > { %9689 = vst [vmem:[#allocation13_spill] sm:$0xff] %v4631_v24  ;;  %v1225_v39 = vadd.f32 %v1224_v5, %v4613_v4  ;;  %v4653_v43 = vmul.f32 %v4501_v8, %v210_v19  ;;  %v1248_v44 = vadd.f32 %v4638_v27, %v4631_v24  ;;  %v4662_v51 = vmul.f32 %v4501_v8, %v218_v31  ;;  %v222_v31 = vld [vmem:[%s4482_s18 + $0x130] sm:$0xff] }
  0x44   : > { %9690 = vst [vmem:[#allocation14_spill] sm:$0xff] %v4635_v26  ;;  %v1245_v49 = vadd.f32 %v1244_v32, %v4625_v17  ;;  %v1258_v53 = vadd.f32 %v4648_v38, %v4645_v35  ;;  %v4672_v60 = vmul.f32 %v4503_v9, %v215_v41  ;;  %v1254_v62 = vadd.f32 %v1253_v34, %v4635_v26 }
  0x45   : > { %9691 = vst [vmem:[#allocation15_spill] sm:$0xff] %v4638_v27  ;;  %v4676_v63 = vmul.f32 %v4497_v6, %v224_v45  ;;  %v4679_v2 = vmul.f32 %v4499_v7, %v225_v48  ;;  %v4682_v3 = vmul.f32 %v4503_v9, %v211_v50  ;;  %v1249_v5 = vadd.f32 %v1248_v44, %v4653_v43 }
  0x46   : > { %9692 = vst [vmem:[#allocation16_spill] sm:$0xff] %v4645_v35  ;;  %v4687_v13 = vmul.f32 %v4497_v6, %v220_v55  ;;  %v4690_v18 = vmul.f32 %v4499_v7, %v221_v56  ;;  %v4693_v19 = vmul.f32 %v4503_v9, %v219_v57  ;;  %v4698_v32 = vmul.f32 %v4497_v6, %v228_v58  ;;  %v236_v55 = vld [vmem:[%s4482_s18 + $0x1a0] sm:$0xff]  ;;  %v237_v56 = vld [vmem:[%s4482_s18 + $0x1a8] sm:$0xff]  ;;  %v223_v58 = vld [vmem:[%s4482_s18 + $0x138] sm:$0xff] }
  0x47   : > { %9693 = vst [vmem:[#allocation17_spill] sm:$0xff] %v4648_v38  ;;  %1236 = vadd.xlane.f32.xlu1 %v1235_v25  ;;  %v1259_v25 = vadd.f32 %v1258_v53, %v4662_v51  ;;  %v4701_v34 = vmul.f32 %v4499_v7, %v229_v59  ;;  %v1255_v41 = vadd.f32 %v1254_v62, %v4672_v60  ;;  %v331_v38 = vld [vmem:[%s4482_s18 + $0x498] sm:$0xff] }
  0x48   : > { %9694 = vst [vmem:[#allocation18_spill] sm:$0xff] %v4653_v43  ;;  %1226 = vadd.xlane.f32.xlu0 %v1225_v39  ;;  %v230_v39 = vld [vmem:[%s4482_s18 + $0x170] sm:$0xff]  ;;  %v4706_v44 = vmul.f32 %v4501_v8, %v226_v12  ;;  %v1268_v45 = vadd.f32 %v4679_v2, %v4676_v63  ;;  %v1250_v48 = vadd.f32 %v1249_v5, %v4682_v3  ;;  %v232_v5 = vld [vmem:[%s4482_s18 + $0x180] sm:$0xff]  ;;  %v233_v12 = vld [vmem:[%s4482_s18 + $0x188] sm:$0xff] }
  0x49   : > { %9695 = vst [vmem:[#allocation19_spill] sm:$0xff] %v4662_v51  ;;  %1246 = vadd.xlane.f32.xlu2 %v1245_v49  ;;  %v227_v49 = vld [vmem:[%s4482_s18 + $0x158] sm:$0xff]  ;;  %v4713_v50 = vmul.f32 %v4501_v8, %v222_v31  ;;  %v1263_v53 = vadd.f32 %v4690_v18, %v4687_v13  ;;  %v1260_v57 = vadd.f32 %v1259_v25, %v4693_v19  ;;  %v240_v31 = vld [vmem:[%s4482_s18 + $0x1c0] sm:$0xff]  ;;  %v366_v43 = vld [vmem:[%s4482_s18 + $0x5b0] sm:$0xff] }
  0x4a   : > { %9696 = vst [vmem:[#allocation20_spill] sm:$0xff] %v4672_v60  ;;  %v4722_v59 = vmul.f32 %v4501_v8, %v230_v39  ;;  %v1273_v62 = vadd.f32 %v4701_v34, %v4698_v32  ;;  %v1269_v25 = vadd.f32 %v1268_v45, %v4706_v44  ;;  %v4739_v39 = vmul.f32 %v4499_v7, %v237_v56  ;;  %v234_v56 = vld [vmem:[%s4482_s18 + $0x190] sm:$0xff] }
  0x4b   : > { %9697 = vst [vmem:[#allocation21_spill] sm:$0xff] %v4676_v63  ;;  %v241_v63 = vld [vmem:[%s4482_s18 + $0x1c8] sm:$0xff]  ;;  %v4750_v45 = vmul.f32 %v4499_v7, %v233_v12 }
  0x4c   : > { %9698 = vst [vmem:[#allocation22_spill] sm:$0xff] %v4679_v2  ;;  %v231_v2 = vld [vmem:[%s4482_s18 + $0x178] sm:$0xff] }
  0x4d   : > { %9699 = vst [vmem:[#allocation23_spill] sm:$0xff] %v4682_v3  ;;  %v355_v3 = vld [vmem:[%s4482_s18 + $0x558] sm:$0xff] }
  0x4e   : > { %9700 = vst [vmem:[#allocation24_spill] sm:$0xff] %v4687_v13  ;;  %v4736_v13 = vmul.f32 %v4497_v6, %v236_v55  ;;  %v4753_v55 = vmul.f32 %v4503_v9, %v231_v2 }
  0x4f   : > { %9701 = vst [vmem:[#allocation25_spill] sm:$0xff] %v4690_v18  ;;  %1256 = vadd.xlane.f32.xlu1 %v1255_v41  ;;  %v4732_v18 = vmul.f32 %v4503_v9, %v227_v49  ;;  %v238_v41 = vld [vmem:[%s4482_s18 + $0x1b0] sm:$0xff]  ;;  %v4747_v49 = vmul.f32 %v4497_v6, %v232_v5 }
  0x50   : > { %9702 = vst [vmem:[#allocation26_spill] sm:$0xff] %v4693_v19  ;;  %1251 = vadd.xlane.f32.xlu0 %v1250_v48  ;;  %v1274_v48 = vadd.f32 %v1273_v62, %v4722_v59  ;;  %v242_v5 = vld [vmem:[%s4482_s18 + $0x1d0] sm:$0xff]  ;;  %v4766_v2 = vmul.f32 %v4501_v8, %v238_v41  ;;  %v253_v19 = vld [vmem:[%s4482_s18 + $0x228] sm:$0xff] }
  0x51   : > { %9703 = vst [vmem:[#allocation27_spill] sm:$0xff] %v4698_v32  ;;  %v1264_v32 = vadd.f32 %v1263_v53, %v4713_v50  ;;  %1261 = vadd.xlane.f32.xlu2 %v1260_v57  ;;  %v4761_v53 = vmul.f32 %v4499_v7, %v241_v63  ;;  %v1270_v12 = vadd.f32 %v1269_v25, %v4732_v18 }
  0x52   : > { %9704 = vst [vmem:[#allocation28_spill] sm:$0xff] %v4701_v34  ;;  %v4742_v34 = vmul.f32 %v4503_v9, %v223_v58  ;;  %v4758_v58 = vmul.f32 %v4497_v6, %v240_v31  ;;  %v1283_v57 = vadd.f32 %v4739_v39, %v4736_v13  ;;  %v239_v31 = vld [vmem:[%s4482_s18 + $0x1b8] sm:$0xff]  ;;  %v1278_v63 = vadd.f32 %v4750_v45, %v4747_v49 }
  0x53   : > { %9705 = vst [vmem:[#allocation29_spill] sm:$0xff] %v4706_v44  ;;  %v249_v44 = vld [vmem:[%s4482_s18 + $0x208] sm:$0xff]  ;;  %v1275_v25 = vadd.f32 %v1274_v48, %v4753_v55  ;;  %v4782_v41 = vmul.f32 %v4501_v8, %v242_v5 }
  0x54   : > { %9706 = vst [vmem:[#allocation30_spill] sm:$0xff] %v4713_v50  ;;  %v1265_v62 = vadd.f32 %v1264_v32, %v4742_v34  ;;  %v248_v50 = vld [vmem:[%s4482_s18 + $0x200] sm:$0xff]  ;;  %v1284_v48 = vadd.f32 %v1283_v57, %v4766_v2  ;;  %v4799_v5 = vmul.f32 %v4499_v7, %v249_v44 }
  0x55   : > { %9707 = vst [vmem:[#allocation31_spill] sm:$0xff] %v4722_v59  ;;  %v4773_v59 = vmul.f32 %v4501_v8, %v234_v56  ;;  %v244_v32 = vld [vmem:[%s4482_s18 + $0x1e0] sm:$0xff] }
  0x56   : > { %9708 = vst [vmem:[#allocation32_spill] sm:$0xff] %v4732_v18  ;;  %v235_v18 = vld [vmem:[%s4482_s18 + $0x198] sm:$0xff]  ;;  %v252_v56 = vld [vmem:[%s4482_s18 + $0x220] sm:$0xff] }
  0x57   : > { %9709 = vst [vmem:[#allocation33_spill] sm:$0xff] %v4736_v13  ;;  %v245_v13 = vld [vmem:[%s4482_s18 + $0x1e8] sm:$0xff]  ;;  %1271 = vadd.xlane.f32.xlu1 %v1270_v12  ;;  %v250_v12 = vld [vmem:[%s4482_s18 + $0x210] sm:$0xff] }
  0x58   : > { %9710 = vst [vmem:[#allocation34_spill] sm:$0xff] %v4739_v39  ;;  %v1288_v39 = vadd.f32 %v4761_v53, %v4758_v58  ;;  %1266 = vadd.xlane.f32.xlu0 %v1265_v62  ;;  %v4810_v57 = vmul.f32 %v4499_v7, %v245_v13  ;;  %v4818_v62 = vmul.f32 %v4497_v6, %v252_v56  ;;  %v251_v56 = vld [vmem:[%s4482_s18 + $0x218] sm:$0xff] }
  0x59   : > { %9711 = vst [vmem:[#allocation35_spill] sm:$0xff] %v4742_v34  ;;  %v243_v34 = vld [vmem:[%s4482_s18 + $0x1d8] sm:$0xff]  ;;  %1276 = vadd.xlane.f32.xlu2 %v1275_v25 }
  0x5a   : > { %9712 = vst [vmem:[#allocation36_spill] sm:$0xff] %v4747_v49  ;;  %v4796_v49 = vmul.f32 %v4497_v6, %v248_v50  ;;  %v4813_v44 = vmul.f32 %v4503_v9, %v243_v34  ;;  %v246_v50 = vld [vmem:[%s4482_s18 + $0x1f0] sm:$0xff]  ;;  %v4826_v34 = vmul.f32 %v4501_v8, %v250_v12 }
  0x5b   : > { %9713 = vst [vmem:[#allocation37_spill] sm:$0xff] %v4750_v45  ;;  %v4792_v45 = vmul.f32 %v4503_v9, %v239_v31  ;;  %v4807_v31 = vmul.f32 %v4497_v6, %v244_v32  ;;  %v254_v32 = vld [vmem:[%s4482_s18 + $0x230] sm:$0xff] }
  0x5c   : > { %9714 = vst [vmem:[#allocation38_spill] sm:$0xff] %v4753_v55  ;;  %v4842_v12 = vmul.f32 %v4501_v8, %v254_v32  ;;  %v265_v55 = vld [vmem:[%s4482_s18 + $0x288] sm:$0xff] }
  0x5d   : > { %9715 = vst [vmem:[#allocation39_spill] sm:$0xff] %v4758_v58  ;;  %v1279_v58 = vadd.f32 %v1278_v63, %v4773_v59  ;;  %v4821_v63 = vmul.f32 %v4499_v7, %v253_v19  ;;  %v1285_v13 = vadd.f32 %v1284_v48, %v4792_v45  ;;  %v1293_v19 = vadd.f32 %v4810_v57, %v4807_v31 }
  0x5e   : > { %9716 = vst [vmem:[#allocation40_spill] sm:$0xff] %v4761_v53  ;;  %v4802_v53 = vmul.f32 %v4503_v9, %v235_v18  ;;  %v1289_v18 = vadd.f32 %v1288_v39, %v4782_v41  ;;  %v1298_v39 = vadd.f32 %v4799_v5, %v4796_v49 }
  0x5f   : > { %9717 = vst [vmem:[#allocation41_spill] sm:$0xff] %v4766_v2  ;;  %v261_v2 = vld [vmem:[%s4482_s18 + $0x268] sm:$0xff]  ;;  %1286 = vadd.xlane.f32.xlu1 %v1285_v13  ;;  %v262_v13 = vld [vmem:[%s4482_s18 + $0x270] sm:$0xff] }
  0x60   : > { %9718 = vst [vmem:[#allocation42_spill] sm:$0xff] %v4773_v59  ;;  %v1280_v25 = vadd.f32 %v1279_v58, %v4802_v53  ;;  %v260_v59 = vld [vmem:[%s4482_s18 + $0x260] sm:$0xff]  ;;  %v1290_v48 = vadd.f32 %v1289_v18, %v4813_v44  ;;  %v1299_v18 = vadd.f32 %v1298_v39, %v4826_v34  ;;  %v4859_v32 = vmul.f32 %v4499_v7, %v261_v2  ;;  %v258_v2 = vld [vmem:[%s4482_s18 + $0x250] sm:$0xff] }
  0x61   : > { %9719 = vst [vmem:[#allocation43_spill] sm:$0xff] %v4782_v41  ;;  %v4833_v41 = vmul.f32 %v4501_v8, %v246_v50  ;;  %v256_v58 = vld [vmem:[%s4482_s18 + $0x240] sm:$0xff] }
  0x62   : > { %9720 = vst [vmem:[#allocation44_spill] sm:$0xff] %v4792_v45  ;;  %v247_v45 = vld [vmem:[%s4482_s18 + $0x1f8] sm:$0xff]  ;;  %v264_v50 = vld [vmem:[%s4482_s18 + $0x280] sm:$0xff]  ;;  %1281 = vadd.xlane.f32.xlu0 %v1280_v25  ;;  %1291 = vadd.xlane.f32.xlu2 %v1290_v48 }
  0x63   : > { %9721 = vst [vmem:[#allocation45_spill] sm:$0xff] %v4796_v49  ;;  %v257_v49 = vld [vmem:[%s4482_s18 + $0x248] sm:$0xff]  ;;  %v4878_v25 = vmul.f32 %v4497_v6, %v264_v50  ;;  %v263_v50 = vld [vmem:[%s4482_s18 + $0x278] sm:$0xff] }
  0x64   : > { %9722 = vst [vmem:[#allocation46_spill] sm:$0xff] %v4799_v5  ;;  %v1303_v5 = vadd.f32 %v4821_v63, %v4818_v62  ;;  %v4870_v39 = vmul.f32 %v4499_v7, %v257_v49 }
  0x65   : > { %9723 = vst [vmem:[#allocation47_spill] sm:$0xff] %v4802_v53  ;;  %v255_v53 = vld [vmem:[%s4482_s18 + $0x238] sm:$0xff] }
  0x66   : > { %9724 = vst [vmem:[#allocation48_spill] sm:$0xff] %v4807_v31  ;;  %v4856_v31 = vmul.f32 %v4497_v6, %v260_v59  ;;  %v4873_v59 = vmul.f32 %v4503_v9, %v255_v53  ;;  %v4886_v53 = vmul.f32 %v4501_v8, %v262_v13 }
  0x67   : > { %9725 = vst [vmem:[#allocation49_spill] sm:$0xff] %v4810_v57  ;;  %v4852_v57 = vmul.f32 %v4503_v9, %v251_v56  ;;  %v4867_v56 = vmul.f32 %v4497_v6, %v256_v58  ;;  %v266_v58 = vld [vmem:[%s4482_s18 + $0x290] sm:$0xff] }
  0x68   : > { %9726 = vst [vmem:[#allocation50_spill] sm:$0xff] %v4813_v44  ;;  %v4902_v13 = vmul.f32 %v4501_v8, %v266_v58  ;;  %v277_v44 = vld [vmem:[%s4482_s18 + $0x2e8] sm:$0xff] }
  0x69   : > { %9727 = vst [vmem:[#allocation51_spill] sm:$0xff] %v4818_v62  ;;  %v1294_v62 = vadd.f32 %v1293_v19, %v4833_v41  ;;  %v4881_v19 = vmul.f32 %v4499_v7, %v265_v55  ;;  %v1300_v49 = vadd.f32 %v1299_v18, %v4852_v57  ;;  %v1308_v55 = vadd.f32 %v4870_v39, %v4867_v56 }
  0x6a   : > { %9728 = vst [vmem:[#allocation52_spill] sm:$0xff] %v4821_v63  ;;  %v4862_v63 = vmul.f32 %v4503_v9, %v247_v45  ;;  %v1304_v45 = vadd.f32 %v1303_v5, %v4842_v12  ;;  %v1313_v5 = vadd.f32 %v4859_v32, %v4856_v31 }
  0x6b   : > { %9729 = vst [vmem:[#allocation53_spill] sm:$0xff] %v4826_v34  ;;  %v273_v34 = vld [vmem:[%s4482_s18 + $0x2c8] sm:$0xff]  ;;  %1301 = vadd.xlane.f32.xlu1 %v1300_v49  ;;  %v274_v49 = vld [vmem:[%s4482_s18 + $0x2d0] sm:$0xff] }
  0x6c   : > { %9730 = vst [vmem:[#allocation54_spill] sm:$0xff] %v4833_v41  ;;  %v1295_v48 = vadd.f32 %v1294_v62, %v4862_v63  ;;  %v272_v41 = vld [vmem:[%s4482_s18 + $0x2c0] sm:$0xff]  ;;  %v1305_v18 = vadd.f32 %v1304_v45, %v4873_v59  ;;  %v1314_v45 = vadd.f32 %v1313_v5, %v4886_v53  ;;  %v4919_v58 = vmul.f32 %v4499_v7, %v273_v34  ;;  %v270_v34 = vld [vmem:[%s4482_s18 + $0x2b0] sm:$0xff] }
  0x6d   : > { %9731 = vst [vmem:[#allocation55_spill] sm:$0xff] %v4842_v12  ;;  %v4893_v12 = vmul.f32 %v4501_v8, %v258_v2  ;;  %v268_v62 = vld [vmem:[%s4482_s18 + $0x2a0] sm:$0xff] }
  0x6e   : > { %9732 = vst [vmem:[#allocation56_spill] sm:$0xff] %v4852_v57  ;;  %v259_v57 = vld [vmem:[%s4482_s18 + $0x258] sm:$0xff]  ;;  %v276_v2 = vld [vmem:[%s4482_s18 + $0x2e0] sm:$0xff]  ;;  %1296 = vadd.xlane.f32.xlu0 %v1295_v48  ;;  %1306 = vadd.xlane.f32.xlu2 %v1305_v18 }
  0x6f   : > { %9733 = vst [vmem:[#allocation57_spill] sm:$0xff] %v4856_v31  ;;  %v269_v31 = vld [vmem:[%s4482_s18 + $0x2a8] sm:$0xff]  ;;  %v4938_v48 = vmul.f32 %v4497_v6, %v276_v2  ;;  %v275_v2 = vld [vmem:[%s4482_s18 + $0x2d8] sm:$0xff] }
  0x70   : > { %9734 = vst [vmem:[#allocation58_spill] sm:$0xff] %v4859_v32  ;;  %v1318_v32 = vadd.f32 %v4881_v19, %v4878_v25  ;;  %v4930_v5 = vmul.f32 %v4499_v7, %v269_v31 }
  0x71   : > { %9735 = vst [vmem:[#allocation59_spill] sm:$0xff] %v4862_v63  ;;  %v267_v63 = vld [vmem:[%s4482_s18 + $0x298] sm:$0xff] }
  0x72   : > { %9736 = vst [vmem:[#allocation60_spill] sm:$0xff] %v4867_v56  ;;  %v4916_v56 = vmul.f32 %v4497_v6, %v272_v41  ;;  %v4933_v41 = vmul.f32 %v4503_v9, %v267_v63  ;;  %v4946_v63 = vmul.f32 %v4501_v8, %v274_v49 }
  0x73   : > { %9737 = vst [vmem:[#allocation61_spill] sm:$0xff] %v4870_v39  ;;  %v4912_v39 = vmul.f32 %v4503_v9, %v263_v50  ;;  %v4927_v50 = vmul.f32 %v4497_v6, %v268_v62  ;;  %v278_v62 = vld [vmem:[%s4482_s18 + $0x2f0] sm:$0xff] }
  0x74   : > { %9738 = vst [vmem:[#allocation62_spill] sm:$0xff] %v4873_v59  ;;  %v4962_v49 = vmul.f32 %v4501_v8, %v278_v62  ;;  %v289_v59 = vld [vmem:[%s4482_s18 + $0x348] sm:$0xff] }
  0x75   : > { %9739 = vst [vmem:[#allocation63_spill] sm:$0xff] %v4878_v25  ;;  %v1309_v25 = vadd.f32 %v1308_v55, %v4893_v12  ;;  %v4941_v55 = vmul.f32 %v4499_v7, %v277_v44  ;;  %v1315_v31 = vadd.f32 %v1314_v45, %v4912_v39  ;;  %v1323_v44 = vadd.f32 %v4930_v5, %v4927_v50 }
  0x76   : > { %9740 = vst [vmem:[#allocation64_spill] sm:$0xff] %v4881_v19  ;;  %v4922_v19 = vmul.f32 %v4503_v9, %v259_v57  ;;  %v1319_v57 = vadd.f32 %v1318_v32, %v4902_v13  ;;  %v1328_v32 = vadd.f32 %v4919_v58, %v4916_v56 }
  0x77   : > { %9741 = vst [vmem:[#allocation65_spill] sm:$0xff] %v4886_v53  ;;  %v285_v53 = vld [vmem:[%s4482_s18 + $0x328] sm:$0xff]  ;;  %1316 = vadd.xlane.f32.xlu1 %v1315_v31  ;;  %v286_v31 = vld [vmem:[%s4482_s18 + $0x330] sm:$0xff] }
  0x78   : > { %9742 = vst [vmem:[#allocation66_spill] sm:$0xff] %v4893_v12  ;;  %v1310_v18 = vadd.f32 %v1309_v25, %v4922_v19  ;;  %v284_v12 = vld [vmem:[%s4482_s18 + $0x320] sm:$0xff]  ;;  %v1320_v45 = vadd.f32 %v1319_v57, %v4933_v41  ;;  %v1329_v57 = vadd.f32 %v1328_v32, %v4946_v63  ;;  %v4979_v62 = vmul.f32 %v4499_v7, %v285_v53  ;;  %v282_v53 = vld [vmem:[%s4482_s18 + $0x310] sm:$0xff] }
  0x79   : > { %9743 = vst [vmem:[#allocation67_spill] sm:$0xff] %v4902_v13  ;;  %v4953_v13 = vmul.f32 %v4501_v8, %v270_v34  ;;  %v280_v25 = vld [vmem:[%s4482_s18 + $0x300] sm:$0xff] }
  0x7a   : > { %9744 = vst [vmem:[#allocation68_spill] sm:$0xff] %v4912_v39  ;;  %v271_v39 = vld [vmem:[%s4482_s18 + $0x2b8] sm:$0xff]  ;;  %v288_v34 = vld [vmem:[%s4482_s18 + $0x340] sm:$0xff]  ;;  %1311 = vadd.xlane.f32.xlu0 %v1310_v18  ;;  %1321 = vadd.xlane.f32.xlu2 %v1320_v45 }
  0x7b   : > { %9745 = vst [vmem:[#allocation69_spill] sm:$0xff] %v4916_v56  ;;  %v281_v56 = vld [vmem:[%s4482_s18 + $0x308] sm:$0xff]  ;;  %v4998_v18 = vmul.f32 %v4497_v6, %v288_v34  ;;  %v287_v34 = vld [vmem:[%s4482_s18 + $0x338] sm:$0xff] }
  0x7c   : > { %9746 = vst [vmem:[#allocation70_spill] sm:$0xff] %v4919_v58  ;;  %v1333_v58 = vadd.f32 %v4941_v55, %v4938_v48  ;;  %v4990_v32 = vmul.f32 %v4499_v7, %v281_v56 }
  0x7d   : > { %9747 = vst [vmem:[#allocation71_spill] sm:$0xff] %v4922_v19  ;;  %v279_v19 = vld [vmem:[%s4482_s18 + $0x2f8] sm:$0xff] }
  0x7e   : > { %9748 = vst [vmem:[#allocation72_spill] sm:$0xff] %v4927_v50  ;;  %v4976_v50 = vmul.f32 %v4497_v6, %v284_v12  ;;  %v4993_v12 = vmul.f32 %v4503_v9, %v279_v19  ;;  %v5006_v19 = vmul.f32 %v4501_v8, %v286_v31 }
  0x7f   : > { %9749 = vst [vmem:[#allocation73_spill] sm:$0xff] %v4930_v5  ;;  %v4972_v5 = vmul.f32 %v4503_v9, %v275_v2  ;;  %v4987_v2 = vmul.f32 %v4497_v6, %v280_v25  ;;  %v290_v25 = vld [vmem:[%s4482_s18 + $0x350] sm:$0xff] }
  0x80   : > { %9750 = vst [vmem:[#allocation74_spill] sm:$0xff] %v4933_v41  ;;  %v5022_v31 = vmul.f32 %v4501_v8, %v290_v25  ;;  %v301_v41 = vld [vmem:[%s4482_s18 + $0x3a8] sm:$0xff] }
  0x81   : > { %9751 = vst [vmem:[#allocation75_spill] sm:$0xff] %v4938_v48  ;;  %v1324_v48 = vadd.f32 %v1323_v44, %v4953_v13  ;;  %v5001_v44 = vmul.f32 %v4499_v7, %v289_v59  ;;  %v1330_v56 = vadd.f32 %v1329_v57, %v4972_v5  ;;  %v1338_v59 = vadd.f32 %v4990_v32, %v4987_v2 }
  0x82   : > { %9752 = vst [vmem:[#allocation76_spill] sm:$0xff] %v4941_v55  ;;  %v4982_v55 = vmul.f32 %v4503_v9, %v271_v39  ;;  %v1334_v39 = vadd.f32 %v1333_v58, %v4962_v49  ;;  %v1343_v58 = vadd.f32 %v4979_v62, %v4976_v50 }
  0x83   : > { %9753 = vst [vmem:[#allocation77_spill] sm:$0xff] %v4946_v63  ;;  %v297_v63 = vld [vmem:[%s4482_s18 + $0x388] sm:$0xff]  ;;  %1331 = vadd.xlane.f32.xlu1 %v1330_v56 }
  0x84   : > { %9754 = vst [vmem:[#allocation78_spill] sm:$0xff] %v4953_v13  ;;  %v1325_v45 = vadd.f32 %v1324_v48, %v4982_v55  ;;  %v296_v13 = vld [vmem:[%s4482_s18 + $0x380] sm:$0xff]  ;;  %v1335_v57 = vadd.f32 %v1334_v39, %v4993_v12  ;;  %v1344_v39 = vadd.f32 %v1343_v58, %v5006_v19  ;;  %v5039_v25 = vmul.f32 %v4499_v7, %v297_v63 }
  0x85   : > { %9755 = vst [vmem:[#allocation79_spill] sm:$0xff] %v4962_v49  ;;  %v5013_v49 = vmul.f32 %v4501_v8, %v282_v53  ;;  %v292_v48 = vld [vmem:[%s4482_s18 + $0x360] sm:$0xff] }
  0x86   : > { %9756 = vst [vmem:[#allocation80_spill] sm:$0xff] %v4972_v5  ;;  %v283_v5 = vld [vmem:[%s4482_s18 + $0x318] sm:$0xff]  ;;  %v300_v53 = vld [vmem:[%s4482_s18 + $0x3a0] sm:$0xff]  ;;  %1326 = vadd.xlane.f32.xlu0 %v1325_v45  ;;  %1336 = vadd.xlane.f32.xlu2 %v1335_v57 }
  0x87   : > { %9757 = vst [vmem:[#allocation81_spill] sm:$0xff] %v4976_v50  ;;  %v293_v50 = vld [vmem:[%s4482_s18 + $0x368] sm:$0xff]  ;;  %v1339_v56 = vadd.f32 %v1338_v59, %v5013_v49  ;;  %v5058_v45 = vmul.f32 %v4497_v6, %v300_v53  ;;  %v5061_v59 = vmul.f32 %v4499_v7, %v301_v41 }
  0x88   : > { %9758 = vst [vmem:[#allocation82_spill] sm:$0xff] %v4979_v62  ;;  %v1348_v62 = vadd.f32 %v5001_v44, %v4998_v18  ;;  %v5050_v58 = vmul.f32 %v4499_v7, %v293_v50  ;;  %v309_v53 = vld [vmem:[%s4482_s18 + $0x3e8] sm:$0xff] }
  0x89   : > { %9759 = vst [vmem:[#allocation83_spill] sm:$0xff] %v4982_v55  ;;  %v291_v55 = vld [vmem:[%s4482_s18 + $0x358] sm:$0xff] }
  0x8a   : > { %9760 = vst [vmem:[#allocation84_spill] sm:$0xff] %v4987_v2  ;;  %v5036_v2 = vmul.f32 %v4497_v6, %v296_v13  ;;  %v5053_v13 = vmul.f32 %v4503_v9, %v291_v55  ;;  %v1349_v63 = vadd.f32 %v1348_v62, %v5022_v31  ;;  %v308_v62 = vld [vmem:[%s4482_s18 + $0x3e0] sm:$0xff] }
  0x8b   : > { %9761 = vst [vmem:[#allocation85_spill] sm:$0xff] %v4990_v32  ;;  %v5032_v32 = vmul.f32 %v4503_v9, %v287_v34  ;;  %v5047_v34 = vmul.f32 %v4497_v6, %v292_v48  ;;  %v302_v48 = vld [vmem:[%s4482_s18 + $0x3b0] sm:$0xff] }
  0x8c   : > { %9762 = vst [vmem:[#allocation86_spill] sm:$0xff] %v4993_v12  ;;  %v1358_v55 = vadd.f32 %v5039_v25, %v5036_v2  ;;  %v305_v12 = vld [vmem:[%s4482_s18 + $0x3c8] sm:$0xff] }
  0x8d   : > { %9763 = vst [vmem:[#allocation87_spill] sm:$0xff] %v4998_v18  ;;  %v298_v18 = vld [vmem:[%s4482_s18 + $0x390] sm:$0xff]  ;;  %v1345_v50 = vadd.f32 %v1344_v39, %v5032_v32  ;;  %v1353_v39 = vadd.f32 %v5050_v58, %v5047_v34 }
  0x8e   : > { %9764 = vst [vmem:[#allocation88_spill] sm:$0xff] %v5001_v44  ;;  %v5042_v44 = vmul.f32 %v4503_v9, %v283_v5  ;;  %v294_v5 = vld [vmem:[%s4482_s18 + $0x370] sm:$0xff]  ;;  %v5066_v57 = vmul.f32 %v4501_v8, %v298_v18  ;;  %v1350_v18 = vadd.f32 %v1349_v63, %v5053_v13 }
  0x8f   : > { %9765 = vst [vmem:[#allocation89_spill] sm:$0xff] %v5006_v19  ;;  %v5075_v41 = vmul.f32 %v4501_v8, %v294_v5  ;;  %v5082_v19 = vmul.f32 %v4501_v8, %v302_v48  ;;  %v5093_v5 = vmul.f32 %v4499_v7, %v309_v53  ;;  %1346 = vadd.xlane.f32.xlu1 %v1345_v50 }
  0x90   : > { %9766 = vst [vmem:[#allocation90_spill] sm:$0xff] %v5013_v49  ;;  %v299_v49 = vld [vmem:[%s4482_s18 + $0x398] sm:$0xff]  ;;  %v1359_v48 = vadd.f32 %v1358_v55, %v5066_v57  ;;  %v5110_v50 = vmul.f32 %v4499_v7, %v305_v12  ;;  %1351 = vadd.xlane.f32.xlu2 %v1350_v18  ;;  %v306_v55 = vld [vmem:[%s4482_s18 + $0x3d0] sm:$0xff] }
  0x91   : > { %9767 = vst [vmem:[#allocation91_spill] sm:$0xff] %v5022_v31  ;;  %v1340_v31 = vadd.f32 %v1339_v56, %v5042_v44  ;;  %v303_v56 = vld [vmem:[%s4482_s18 + $0x3b8] sm:$0xff]  ;;  %v5098_v63 = vmul.f32 %v4503_v9, %v299_v49  ;;  %v314_v18 = vld [vmem:[%s4482_s18 + $0x410] sm:$0xff] }
  0x92   : > { %9768 = vst [vmem:[#allocation92_spill] sm:$0xff] %v5032_v32  ;;  %v295_v32 = vld [vmem:[%s4482_s18 + $0x378] sm:$0xff]  ;;  %v5113_v49 = vmul.f32 %v4503_v9, %v303_v56 }
  0x93   : > { %9769 = vst [vmem:[#allocation93_spill] sm:$0xff] %v5036_v2  ;;  %v304_v2 = vld [vmem:[%s4482_s18 + $0x3c0] sm:$0xff]  ;;  %1341 = vadd.xlane.f32.xlu0 %v1340_v31  ;;  %v1360_v56 = vadd.f32 %v1359_v48, %v5098_v63  ;;  %v5144_v48 = vmul.f32 %v4501_v8, %v314_v18 }
  0x94   : > { %9770 = vst [vmem:[#allocation94_spill] sm:$0xff] %v5039_v25  ;;  %v1363_v25 = vadd.f32 %v5061_v59, %v5058_v45  ;;  %v5107_v53 = vmul.f32 %v4497_v6, %v304_v2 }
  0x95   : > { %9771 = vst [vmem:[#allocation95_spill] sm:$0xff] %v5042_v44  ;;  %v5090_v44 = vmul.f32 %v4497_v6, %v308_v62  ;;  %v5103_v62 = vmul.f32 %v4503_v9, %v295_v32 }
  0x96   : > { %9772 = vst [vmem:[#allocation96_spill] sm:$0xff] %v5047_v34  ;;  %v313_v34 = vld [vmem:[%s4482_s18 + $0x408] sm:$0xff]  ;;  %v1364_v31 = vadd.f32 %v1363_v25, %v5082_v19  ;;  %v311_v25 = vld [vmem:[%s4482_s18 + $0x3f8] sm:$0xff] }
  0x97   : > { %9773 = vst [vmem:[#allocation97_spill] sm:$0xff] %v5050_v58  ;;  %v312_v58 = vld [vmem:[%s4482_s18 + $0x400] sm:$0xff]  ;;  %v5121_v2 = vmul.f32 %v4499_v7, %v313_v34  ;;  %v1368_v34 = vadd.f32 %v5110_v50, %v5107_v53  ;;  %1361 = vadd.xlane.f32.xlu1 %v1360_v56 }
  0x98   : > { %9774 = vst [vmem:[#allocation98_spill] sm:$0xff] %v5053_v13  ;;  %v5118_v32 = vmul.f32 %v4497_v6, %v312_v58  ;;  %v317_v13 = vld [vmem:[%s4482_s18 + $0x428] sm:$0xff] }
  0x99   : > { %9775 = vst [vmem:[#allocation99_spill] sm:$0xff] %v5058_v45  ;;  %v1354_v45 = vadd.f32 %v1353_v39, %v5075_v41  ;;  %v1373_v39 = vadd.f32 %v5093_v5, %v5090_v44 }
  0x9a   : > { %9776 = vst [vmem:[#allocation100_spill] sm:$0xff] %v5061_v59  ;;  %v310_v59 = vld [vmem:[%s4482_s18 + $0x3f0] sm:$0xff] }
  0x9b   : > { %9777 = vst [vmem:[#allocation101_spill] sm:$0xff] %v5066_v57  ;;  %v5124_v12 = vmul.f32 %v4501_v8, %v310_v59  ;;  %v1355_v58 = vadd.f32 %v1354_v45, %v5103_v62  ;;  %v321_v59 = vld [vmem:[%s4482_s18 + $0x448] sm:$0xff]  ;;  %v316_v57 = vld [vmem:[%s4482_s18 + $0x420] sm:$0xff]  ;;  %v1378_v45 = vadd.f32 %v5121_v2, %v5118_v32 }
  0x9c   : > { %9778 = vst [vmem:[#allocation102_spill] sm:$0xff] %v5075_v41  ;;  %v5134_v41 = vmul.f32 %v4501_v8, %v306_v55  ;;  %v325_v55 = vld [vmem:[%s4482_s18 + $0x468] sm:$0xff]  ;;  %v5159_v18 = vmul.f32 %v4499_v7, %v321_v59 }
  0x9d   : > { %9779 = vst [vmem:[#allocation103_spill] sm:$0xff] %v5082_v19  ;;  %v320_v19 = vld [vmem:[%s4482_s18 + $0x440] sm:$0xff]  ;;  %1356 = vadd.xlane.f32.xlu0 %v1355_v58  ;;  %v5177_v59 = vmul.f32 %v4499_v7, %v325_v55 }
  0x9e   : > { %9780 = vst [vmem:[#allocation104_spill] sm:$0xff] %v5090_v44  ;;  %v307_v44 = vld [vmem:[%s4482_s18 + $0x3d8] sm:$0xff]  ;;  %v1369_v56 = vadd.f32 %v1368_v34, %v5134_v41 }
  0x9f   : > { %9781 = vst [vmem:[#allocation105_spill] sm:$0xff] %v5093_v5  ;;  %v1365_v5 = vadd.f32 %v1364_v31, %v5113_v49  ;;  %v5156_v31 = vmul.f32 %v4497_v6, %v320_v19  ;;  %v318_v19 = vld [vmem:[%s4482_s18 + $0x430] sm:$0xff]  ;;  %v323_v34 = vld [vmem:[%s4482_s18 + $0x458] sm:$0xff] }
  0xa0   : > { %9782 = vst [vmem:[#allocation106_spill] sm:$0xff] %v5098_v63  ;;  %v5151_v63 = vmul.f32 %v4503_v9, %v311_v25  ;;  %v322_v25 = vld [vmem:[%s4482_s18 + $0x450] sm:$0xff]  ;;  %v5210_v51 = vmul.f32 %v4503_v9, %v323_v34 }
  0xa1   : > { %9783 = vst [vmem:[#allocation107_spill] sm:$0xff] %v5103_v62  ;;  %v324_v62 = vld [vmem:[%s4482_s18 + $0x460] sm:$0xff]  ;;  %1366 = vadd.xlane.f32.xlu2 %v1365_v5  ;;  %v1388_v55 = vadd.f32 %v5159_v18, %v5156_v31  ;;  %v319_v5 = vld [vmem:[%s4482_s18 + $0x438] sm:$0xff] }
  0xa2   : > { %9784 = vst [vmem:[#allocation108_spill] sm:$0xff] %v5107_v53  ;;  %v315_v53 = vld [vmem:[%s4482_s18 + $0x418] sm:$0xff] }
  0xa3   : > { %9785 = vst [vmem:[#allocation109_spill] sm:$0xff] %v5110_v50  ;;  %v1374_v50 = vadd.f32 %v1373_v39, %v5124_v12  ;;  %v5168_v39 = vmul.f32 %v4503_v9, %v307_v44  ;;  %v1379_v44 = vadd.f32 %v1378_v45, %v5144_v48 }
  0xa4   : > { %9786 = vst [vmem:[#allocation110_spill] sm:$0xff] %v5113_v49  ;;  %v5162_v49 = vmul.f32 %v4497_v6, %v316_v57  ;;  %v326_v57 = vld [vmem:[%s4482_s18 + $0x470] sm:$0xff] }
  0xa5   : > { %9787 = vst [vmem:[#allocation111_spill] sm:$0xff] %v5118_v32  ;;  %v5174_v32 = vmul.f32 %v4497_v6, %v324_v62  ;;  %v1375_v58 = vadd.f32 %v1374_v50, %v5151_v63  ;;  %v5187_v62 = vmul.f32 %v4501_v8, %v322_v25  ;;  %v5199_v50 = vmul.f32 %v4501_v8, %v326_v57  ;;  %v336_v57 = vld [vmem:[%s4482_s18 + $0x4c0] sm:$0xff] }
  0xa6   : > { %9788 = vst [vmem:[#allocation112_spill] sm:$0xff] %v5121_v2  ;;  %v5165_v2 = vmul.f32 %v4499_v7, %v317_v13  ;;  %v5180_v13 = vmul.f32 %v4503_v9, %v315_v53  ;;  %v5193_v53 = vmul.f32 %v4501_v8, %v318_v19  ;;  %v329_v19 = vld [vmem:[%s4482_s18 + $0x488] sm:$0xff] }
  0xa7   : > { %9789 = vst [vmem:[#allocation113_spill] sm:$0xff] %v5124_v12  ;;  %v1393_v25 = vadd.f32 %v5177_v59, %v5174_v32  ;;  %v328_v12 = vld [vmem:[%s4482_s18 + $0x480] sm:$0xff]  ;;  %1376 = vadd.xlane.f32.xlu1 %v1375_v58 }
  0xa8   : > { %9790 = vst [vmem:[#allocation114_spill] sm:$0xff] %v5134_v41  ;;  %v1383_v45 = vadd.f32 %v5165_v2, %v5162_v49  ;;  %v332_v41 = vld [vmem:[%s4482_s18 + $0x4a0] sm:$0xff] }
  0xa9   : > { %9791 = vst [vmem:[#allocation115_spill] sm:$0xff] %v5144_v48  ;;  %v1370_v48 = vadd.f32 %v1369_v56, %v5168_v39  ;;  %v5213_v56 = vmul.f32 %v4503_v9, %v319_v5  ;;  %v1394_v58 = vadd.f32 %v1393_v25, %v5199_v50  ;;  %v344_v25 = vld [vmem:[%s4482_s18 + $0x500] sm:$0xff] }
  0xaa   : > { %9792 = vst [vmem:[#allocation116_spill] sm:$0xff] %v5151_v63  ;;  %v333_v63 = vld [vmem:[%s4482_s18 + $0x4a8] sm:$0xff] }
  0xab   : > { %9793 = vst [vmem:[#allocation117_spill] sm:$0xff] %v5156_v31  ;;  %v327_v31 = vld [vmem:[%s4482_s18 + $0x478] sm:$0xff]  ;;  %v5223_v34 = vmul.f32 %v4499_v7, %v333_v63  ;;  %1371 = vadd.xlane.f32.xlu0 %v1370_v48  ;;  %v5238_v63 = vmul.f32 %v4497_v6, %v336_v57  ;;  %v341_v57 = vld [vmem:[%s4482_s18 + $0x4e8] sm:$0xff] }
  0xac   : > { %9794 = vst [vmem:[#allocation118_spill] sm:$0xff] %v5159_v18  ;;  %v1380_v18 = vadd.f32 %v1379_v44, %v5180_v13  ;;  %v1384_v44 = vadd.f32 %v1383_v45, %v5193_v53  ;;  %v5226_v5 = vmul.f32 %v4503_v9, %v327_v31  ;;  %v5234_v45 = vmul.f32 %v4499_v7, %v329_v19  ;;  %v338_v31 = vld [vmem:[%s4482_s18 + $0x4d0] sm:$0xff]  ;;  %v340_v19 = vld [vmem:[%s4482_s18 + $0x4e0] sm:$0xff] }
  0xad   : > { %9795 = vst [vmem:[#allocation119_spill] sm:$0xff] %v5162_v49  ;;  %v334_v49 = vld [vmem:[%s4482_s18 + $0x4b0] sm:$0xff] }
  0xae   : > { %9796 = vst [vmem:[#allocation120_spill] sm:$0xff] %v5165_v2  ;;  %v337_v2 = vld [vmem:[%s4482_s18 + $0x4c8] sm:$0xff]  ;;  %1381 = vadd.xlane.f32.xlu2 %v1380_v18 }
  0xaf   : > { %9797 = vst [vmem:[#allocation121_spill] sm:$0xff] %v5168_v39  ;;  %v5241_v48 = vmul.f32 %v4499_v7, %v337_v2  ;;  %v1395_v2 = vadd.f32 %v1394_v58, %v5226_v5 }
  0xb0   : > { %9798 = vst [vmem:[#allocation122_spill] sm:$0xff] %v5174_v32  ;;  %v5220_v32 = vmul.f32 %v4497_v6, %v332_v41  ;;  %v330_v41 = vld [vmem:[%s4482_s18 + $0x490] sm:$0xff] }
  0xb1   : > { %9799 = vst [vmem:[#allocation123_spill] sm:$0xff] %v5177_v59  ;;  %v1389_v59 = vadd.f32 %v1388_v55, %v5187_v62  ;;  %v5231_v55 = vmul.f32 %v4497_v6, %v328_v12  ;;  %v5258_v39 = vmul.f32 %v4501_v8, %v330_v41  ;;  %v339_v41 = vld [vmem:[%s4482_s18 + $0x4d8] sm:$0xff] }
  0xb2   : > { %9800 = vst [vmem:[#allocation124_spill] sm:$0xff] %v5180_v13  ;;  %v1403_v18 = vadd.f32 %v5223_v34, %v5220_v32  ;;  %v335_v13 = vld [vmem:[%s4482_s18 + $0x4b8] sm:$0xff] }
  0xb3   : > { %9801 = vst [vmem:[#allocation125_spill] sm:$0xff] %v5187_v62  ;;  %v1390_v12 = vadd.f32 %v1389_v59, %v5210_v51  ;;  %v1385_v62 = vadd.f32 %v1384_v44, %v5213_v56  ;;  %v348_v59 = vld [vmem:[%s4482_s18 + $0x520] sm:$0xff]  ;;  %v5271_v44 = vmul.f32 %v4497_v6, %v344_v25  ;;  %v342_v25 = vld [vmem:[%s4482_s18 + $0x4f0] sm:$0xff] }
  0xb4   : > { %9802 = vst [vmem:[#allocation126_spill] sm:$0xff] %v5193_v53  ;;  %v5248_v53 = vmul.f32 %v4501_v8, %v334_v49  ;;  %v1398_v49 = vadd.f32 %v5234_v45, %v5231_v55 }
  0xb5   : > { %9803 = vst [vmem:[#allocation127_spill] sm:$0xff] %v5199_v50  ;;  %v345_v50 = vld [vmem:[%s4482_s18 + $0x508] sm:$0xff]  ;;  %1391 = vadd.xlane.f32.xlu1 %v1390_v12  ;;  %1386 = vadd.xlane.f32.xlu0 %v1385_v62  ;;  %v347_v62 = vld [vmem:[%s4482_s18 + $0x518] sm:$0xff] }
  0xb6   : > { %9804 = vst [vmem:[#allocation128_spill] sm:$0xff] %v5210_v51  ;;  %v349_v51 = vld [vmem:[%s4482_s18 + $0x528] sm:$0xff]  ;;  %v5274_v58 = vmul.f32 %v4499_v7, %v345_v50  ;;  %v5290_v50 = vmul.f32 %v4497_v6, %v348_v59  ;;  %v1399_v12 = vadd.f32 %v1398_v49, %v5258_v39  ;;  %1396 = vadd.xlane.f32.xlu2 %v1395_v2 }
  0xb7   : > { %9805 = vst [vmem:[#allocation129_spill] sm:$0xff] %v5213_v56  ;;  %v5311_v49 = vmul.f32 %v4501_v8, %v342_v25  ;;  %v351_v25 = vld [vmem:[%s4482_s18 + $0x538] sm:$0xff]  ;;  %v381_v56 = vld [vmem:[%s4482_s18 + $0x628] sm:$0xff] }
  0xb8   : > { %9806 = vst [vmem:[#allocation130_spill] sm:$0xff] %v5220_v32  ;;  %v1408_v32 = vadd.f32 %v5241_v48, %v5238_v63 }
  0xb9   : > { %9807 = vst [vmem:[#allocation131_spill] sm:$0xff] %v5223_v34  ;;  %v5266_v34 = vmul.f32 %v4501_v8, %v338_v31  ;;  %v5285_v31 = vmul.f32 %v4503_v9, %v335_v13  ;;  %v350_v13 = vld [vmem:[%s4482_s18 + $0x530] sm:$0xff] }
  0xba   : > { %9808 = vst [vmem:[#allocation132_spill] sm:$0xff] %v5226_v5  ;;  %v346_v5 = vld [vmem:[%s4482_s18 + $0x510] sm:$0xff] }
  0xbb   : > { %9809 = vst [vmem:[#allocation133_spill] sm:$0xff] %v5231_v55  ;;  %v5282_v55 = vmul.f32 %v4499_v7, %v341_v57  ;;  %v1409_v57 = vadd.f32 %v1408_v32, %v5266_v34  ;;  %v5318_v32 = vmul.f32 %v4501_v8, %v350_v13 }
  0xbc   : > { %9810 = vst [vmem:[#allocation134_spill] sm:$0xff] %v5234_v45  ;;  %v5279_v45 = vmul.f32 %v4497_v6, %v340_v19  ;;  %v5296_v19 = vmul.f32 %v4503_v9, %v331_v38  ;;  %v1418_v38 = vadd.f32 %v5274_v58, %v5271_v44 }
  0xbd   : > { %9811 = vst [vmem:[#allocation135_spill] sm:$0xff] %v5238_v63  ;;  %v5293_v63 = vmul.f32 %v4499_v7, %v349_v51  ;;  %v5305_v51 = vmul.f32 %v4501_v8, %v346_v5 }
  0xbe   : > { %9812 = vst [vmem:[#allocation136_spill] sm:$0xff] %v5241_v48  ;;  %v1404_v48 = vadd.f32 %v1403_v18, %v5248_v53  ;;  %v5301_v18 = vmul.f32 %v4503_v9, %v339_v41  ;;  %v1413_v2 = vadd.f32 %v5282_v55, %v5279_v45  ;;  %v343_v41 = vld [vmem:[%s4482_s18 + $0x4f8] sm:$0xff] }
  0xbf   : > { %9813 = vst [vmem:[#allocation137_spill] sm:$0xff] %v5248_v53  ;;  %v1423_v5 = vadd.f32 %v5293_v63, %v5290_v50  ;;  %v353_v53 = vld [vmem:[%s4482_s18 + $0x548] sm:$0xff]  ;;  %v1419_v13 = vadd.f32 %v1418_v38, %v5305_v51  ;;  %v5346_v38 = vmul.f32 %v4503_v9, %v351_v25 }
  0xc0   : > { %9814 = vst [vmem:[#allocation138_spill] sm:$0xff] %v5258_v39  ;;  %v1405_v59 = vadd.f32 %v1404_v48, %v5285_v31  ;;  %v352_v39 = vld [vmem:[%s4482_s18 + $0x540] sm:$0xff]  ;;  %v5330_v48 = vmul.f32 %v4503_v9, %v347_v62  ;;  %v369_v25 = vld [vmem:[%s4482_s18 + $0x5c8] sm:$0xff] }
  0xc1   : > { %9815 = vst [vmem:[#allocation139_spill] sm:$0xff] %v5266_v34  ;;  %v356_v34 = vld [vmem:[%s4482_s18 + $0x560] sm:$0xff]  ;;  %v1424_v62 = vadd.f32 %v1423_v5, %v5318_v32 }
  0xc2   : > { %9816 = vst [vmem:[#allocation140_spill] sm:$0xff] %v5271_v44  ;;  %v1400_v44 = vadd.f32 %v1399_v12, %v5296_v19  ;;  %v1414_v12 = vadd.f32 %v1413_v2, %v5311_v49  ;;  %1406 = vadd.xlane.f32.xlu1 %v1405_v59  ;;  %v5352_v2 = vmul.f32 %v4497_v6, %v352_v39  ;;  %v368_v5 = vld [vmem:[%s4482_s18 + $0x5c0] sm:$0xff] }
  0xc3   : > { %9817 = vst [vmem:[#allocation141_spill] sm:$0xff] %v5274_v58  ;;  %v357_v58 = vld [vmem:[%s4482_s18 + $0x568] sm:$0xff]  ;;  %v1420_v39 = vadd.f32 %v1419_v13, %v5330_v48  ;;  %v1425_v35 = vadd.f32 %v1424_v62, %v5346_v38 }
  0xc4   : > { %9818 = vst [vmem:[#allocation142_spill] sm:$0xff] %v5279_v45  ;;  %v360_v45 = vld [vmem:[%s4482_s18 + $0x580] sm:$0xff]  ;;  %1401 = vadd.xlane.f32.xlu0 %v1400_v44  ;;  %v365_v44 = vld [vmem:[%s4482_s18 + $0x5a8] sm:$0xff] }
  0xc5   : > { %9819 = vst [vmem:[#allocation143_spill] sm:$0xff] %v5282_v55  ;;  %v1410_v55 = vadd.f32 %v1409_v57, %v5301_v18  ;;  %v5343_v57 = vmul.f32 %v4499_v7, %v357_v58  ;;  %v5358_v58 = vmul.f32 %v4497_v6, %v360_v45  ;;  %v373_v13 = vld [vmem:[%s4482_s18 + $0x5e8] sm:$0xff] }
  0xc6   : > { %9820 = vst [vmem:[#allocation144_spill] sm:$0xff] %v5285_v31  ;;  %v361_v31 = vld [vmem:[%s4482_s18 + $0x588] sm:$0xff]  ;;  %v5413_v27 = vmul.f32 %v4499_v7, %v373_v13 }
  0xc7   : > { %9821 = vst [vmem:[#allocation145_spill] sm:$0xff] %v5290_v50  ;;  %v5340_v50 = vmul.f32 %v4497_v6, %v356_v34  ;;  %v5355_v34 = vmul.f32 %v4499_v7, %v353_v53  ;;  %v5361_v59 = vmul.f32 %v4499_v7, %v361_v31  ;;  %1411 = vadd.xlane.f32.xlu2 %v1410_v55  ;;  %v362_v53 = vld [vmem:[%s4482_s18 + $0x590] sm:$0xff] }
  0xc8   : > { %9822 = vst [vmem:[#allocation146_spill] sm:$0xff] %v5293_v63  ;;  %v5336_v63 = vmul.f32 %v4503_v9, %v343_v41  ;;  %v358_v41 = vld [vmem:[%s4482_s18 + $0x570] sm:$0xff] }
  0xc9   : > { %9823 = vst [vmem:[#allocation147_spill] sm:$0xff] %v5296_v19  ;;  %v5373_v31 = vmul.f32 %v4501_v8, %v358_v41  ;;  %v1433_v19 = vadd.f32 %v5343_v57, %v5340_v50  ;;  %v5388_v41 = vmul.f32 %v4497_v6, %v368_v5  ;;  %v1438_v62 = vadd.f32 %v5361_v59, %v5358_v58 }
  0xca   : > { %9824 = vst [vmem:[#allocation148_spill] sm:$0xff] %v5301_v18  ;;  %v372_v18 = vld [vmem:[%s4482_s18 + $0x5e0] sm:$0xff]  ;;  %v1415_v45 = vadd.f32 %v1414_v12, %v5336_v63  ;;  %v1428_v12 = vadd.f32 %v5355_v34, %v5352_v2  ;;  %v5406_v5 = vmul.f32 %v4499_v7, %v365_v44  ;;  %v5425_v44 = vmul.f32 %v4503_v9, %v355_v3 }
  0xcb   : > { %9825 = vst [vmem:[#allocation149_spill] sm:$0xff] %v5305_v51  ;;  %v354_v51 = vld [vmem:[%s4482_s18 + $0x550] sm:$0xff]  ;;  %1421 = vadd.xlane.f32.xlu1 %v1420_v39 }
  0xcc   : > { %9826 = vst [vmem:[#allocation150_spill] sm:$0xff] %v5311_v49  ;;  %v359_v49 = vld [vmem:[%s4482_s18 + $0x578] sm:$0xff]  ;;  %v5378_v55 = vmul.f32 %v4501_v8, %v354_v51  ;;  %v377_v51 = vld [vmem:[%s4482_s18 + $0x608] sm:$0xff]  ;;  %1416 = vadd.xlane.f32.xlu0 %v1415_v45 }
  0xcd   : > { %9827 = vst [vmem:[#allocation151_spill] sm:$0xff] %v5318_v32  ;;  %v364_v32 = vld [vmem:[%s4482_s18 + $0x5a0] sm:$0xff]  ;;  %v5433_v13 = vmul.f32 %v4499_v7, %v377_v51 }
  0xce   : > { %9828 = vst [vmem:[#allocation152_spill] sm:$0xff] %v5330_v48  ;;  %v380_v48 = vld [vmem:[%s4482_s18 + $0x620] sm:$0xff] }
  0xcf   : > { %9829 = vst [vmem:[#allocation153_spill] sm:$0xff] %v5336_v63  ;;  %v5391_v63 = vmul.f32 %v4499_v7, %v369_v25  ;;  %v363_v25 = vld [vmem:[%s4482_s18 + $0x598] sm:$0xff]  ;;  %1426 = vadd.xlane.f32.xlu2 %v1425_v35 }
  0xd0   : > { %9830 = vst [vmem:[#allocation154_spill] sm:$0xff] %v5340_v50  ;;  %v5396_v50 = vmul.f32 %v4501_v8, %v362_v53  ;;  %v5416_v53 = vmul.f32 %v4497_v6, %v380_v48  ;;  %v5443_v48 = vmul.f32 %v4501_v8, %v366_v43  ;;  %v5447_v51 = vmul.f32 %v4503_v9, %v363_v25 }
  0xd1   : > { %9831 = vst [vmem:[#allocation155_spill] sm:$0xff] %v5343_v57  ;;  %v376_v57 = vld [vmem:[%s4482_s18 + $0x600] sm:$0xff] }
  0xd2   : > { %9832 = vst [vmem:[#allocation156_spill] sm:$0xff] %v5346_v38  ;;  %v370_v38 = vld [vmem:[%s4482_s18 + $0x5d0] sm:$0xff]  ;;  %v5430_v24 = vmul.f32 %v4497_v6, %v376_v57  ;;  %v1439_v39 = vadd.f32 %v1438_v62, %v5396_v50 }
  0xd3   : > { %9833 = vst [vmem:[#allocation157_spill] sm:$0xff] %v5352_v2  ;;  %v5410_v2 = vmul.f32 %v4497_v6, %v372_v18  ;;  %v382_v18 = vld [vmem:[%s4482_s18 + $0x630] sm:$0xff]  ;;  %v5440_v3 = vmul.f32 %v4501_v8, %v370_v38 }
  0xd4   : > { %9834 = vst [vmem:[#allocation158_spill] sm:$0xff] %v5355_v34  ;;  %v5403_v34 = vmul.f32 %v4497_v6, %v364_v32  ;;  %v5422_v32 = vmul.f32 %v4503_v9, %v359_v49  ;;  %v1429_v49 = vadd.f32 %v1428_v12, %v5378_v55  ;;  %v378_v57 = vld [vmem:[%s4482_s18 + $0x610] sm:$0xff]  ;;  %v1448_v12 = vadd.f32 %v5391_v63, %v5388_v41 }
  0xd5   : > { %9835 = vst [vmem:[#allocation159_spill] sm:$0xff] %v5358_v58  ;;  %v374_v58 = vld [vmem:[%s4482_s18 + $0x5f0] sm:$0xff]  ;;  %v1453_v45 = vadd.f32 %v5413_v27, %v5410_v2  ;;  %v5463_v25 = vmul.f32 %v4501_v8, %v382_v18  ;;  %v1458_v35 = vadd.f32 %v5433_v13, %v5430_v24 }
  0xd6   : > { %9836 = vst [vmem:[#allocation160_spill] sm:$0xff] %v5361_v59  ;;  %v5419_v59 = vmul.f32 %v4499_v7, %v381_v56  ;;  %v1434_v56 = vadd.f32 %v1433_v19, %v5373_v31  ;;  %v371_v19 = vld [vmem:[%s4482_s18 + $0x5d8] sm:$0xff]  ;;  %v1443_v38 = vadd.f32 %v5406_v5, %v5403_v34  ;;  %v5458_v43 = vmul.f32 %v4501_v8, %v374_v58 }
  0xd7   : > { %9837 = vst [vmem:[#allocation161_spill] sm:$0xff] %v5373_v31  ;;  %v375_v31 = vld [vmem:[%s4482_s18 + $0x5f8] sm:$0xff]  ;;  %v5477_v18 = vmul.f32 %v4503_v9, %v371_v19  ;;  %v384_v19 = vld [vmem:[%s4482_s18 + $0x640] sm:$0xff] }
  0xd8   : > { %9838 = vst [vmem:[#allocation162_spill] sm:$0xff] %v5378_v55  ;;  %v367_v55 = vld [vmem:[%s4482_s18 + $0x5b8] sm:$0xff]  ;;  %v1463_v62 = vadd.f32 %v5419_v59, %v5416_v53  ;;  %v1435_v58 = vadd.f32 %v1434_v56, %v5422_v32  ;;  %v1454_v56 = vadd.f32 %v1453_v45, %v5458_v43 }
  0xd9   : > { %9839 = vst [vmem:[#allocation163_spill] sm:$0xff] %v5388_v41  ;;  %v387_v41 = vld [vmem:[%s4482_s18 + $0x658] sm:$0xff] }
  0xda   : > { %9840 = vst [vmem:[#allocation164_spill] sm:$0xff] %v5391_v63  ;;  %v379_v63 = vld [vmem:[%s4482_s18 + $0x618] sm:$0xff]  ;;  %1436 = vadd.xlane.f32.xlu1 %v1435_v58 }
  0xdb   : > { %9841 = vst [vmem:[#allocation165_spill] sm:$0xff] %v5396_v50  ;;  %v383_v50 = vld [vmem:[%s4482_s18 + $0x638] sm:$0xff] }
  0xdc   : > { %9842 = vst [vmem:[#allocation166_spill] sm:$0xff] %v5403_v34 }
  0xdd   : > { %9843 = vst [vmem:[#allocation167_spill] sm:$0xff] %v5406_v5  ;;  %v5470_v5 = vmul.f32 %v4501_v8, %v378_v57  ;;  %v1449_v57 = vadd.f32 %v1448_v12, %v5440_v3  ;;  %v385_v12 = vld [vmem:[%s4482_s18 + $0x648] sm:$0xff] }
  0xde   : > { %9844 = vst [vmem:[#allocation168_spill] sm:$0xff] %v5410_v2  ;;  %v1444_v2 = vadd.f32 %v1443_v38, %v5443_v48  ;;  %v392_v38 = vld [vmem:[%s4482_s18 + $0x680] sm:$0xff]  ;;  %v5504_v45 = vmul.f32 %v4499_v7, %v385_v12 }
  0xdf   : > { %9845 = vst [vmem:[#allocation169_spill] sm:$0xff] %v5413_v27  ;;  %v1430_v27 = vadd.f32 %v1429_v49, %v5425_v44  ;;  %v5490_v49 = vmul.f32 %v4503_v9, %v383_v50  ;;  %v393_v50 = vld [vmem:[%s4482_s18 + $0x688] sm:$0xff] }
  0xe0   : > { %9846 = vst [vmem:[#allocation170_spill] sm:$0xff] %v5416_v53  ;;  %v1440_v53 = vadd.f32 %v1439_v39, %v5447_v51  ;;  %v5494_v39 = vmul.f32 %v4503_v9, %v379_v63  ;;  %v5513_v63 = vstv %s5437_s24 }
  0xe1   : > { %9847 = vst [vmem:[#allocation171_spill] sm:$0xff] %v5419_v59  ;;  %v5480_v59 = vmul.f32 %v4503_v9, %v367_v55  ;;  %v1464_v55 = vadd.f32 %v1463_v62, %v5463_v25  ;;  %v388_v62 = vld [vmem:[%s4482_s18 + $0x660] sm:$0xff]  ;;  %1431 = vadd.xlane.f32.xlu0 %v1430_v27 }
  0xe2   : > { %9848 = vst [vmem:[#allocation172_spill] sm:$0xff] %v5422_v32  ;;  %v5522_v12 = vmul.f32 %v4497_v6, %v388_v62  ;;  %1441 = vadd.xlane.f32.xlu2 %v1440_v53  ;;  %v1450_v62 = vadd.f32 %v1449_v57, %v5477_v18 }
  0xe3   : > { %9849 = vst [vmem:[#allocation173_spill] sm:$0xff] %v5425_v44  ;;  %v5549_v53 = vadd.f32 %v1464_v55, %v5490_v49  ;;  %v1242_v55 = vpop.xlane.xlu2 %1241  ;;  %v3712_v44 = vld [vmem:[%s4482_s18 + $0x8] sm:$0xff] }
  0xe4   : > { %9850 = vst [vmem:[#allocation174_spill] sm:$0xff] %v5430_v24  ;;  %v5501_v24 = vmul.f32 %v4497_v6, %v384_v19  ;;  %v5518_v19 = vmul.f32 %v4499_v7, %v393_v50  ;;  %1451 = vadd.xlane.f32.xlu1 %v1450_v62 }
  0xe5   : > { %9851 = vst [vmem:[#allocation175_spill] sm:$0xff] %v5433_v13  ;;  %v5486_v13 = vmul.f32 %v4503_v9, %v375_v31  ;;  %v1459_v31 = vadd.f32 %v1458_v35, %v5470_v5  ;;  %v394_v35 = vld [vmem:[%s4482_s18 + $0x690] sm:$0xff] }
  0xe6   : > { %9852 = vst [vmem:[#allocation176_spill] sm:$0xff] %v5440_v3  ;;  %v1468_v58 = vadd.f32 %v5504_v45, %v5501_v24  ;;  %v5533_v3 = vmul.f32 %v4501_v8, %v394_v35  ;;  %v1445_v35 = vadd.f32 %v1444_v2, %v5480_v59 }
  0xe7   : > { %9853 = vst [vmem:[#allocation177_spill] sm:$0xff] %v5443_v48  ;;  %v386_v48 = vld [vmem:[%s4482_s18 + $0x650] sm:$0xff]  ;;  %v5552_v57 = vadd.f32 %v1459_v31, %v5494_v39 }
  0xe8   : > { %9854 = vst [vmem:[#allocation178_spill] sm:$0xff] %v5447_v51  ;;  %v5528_v34 = vmul.f32 %v4501_v8, %v386_v48  ;;  %v395_v51 = vld [vmem:[%s4482_s18 + $0x698] sm:$0xff] }
  0xe9   : > { %9855 = vst [vmem:[#allocation179_spill] sm:$0xff] %v5458_v43  ;;  %v5508_v43 = vmul.f32 %v4497_v6, %v392_v38  ;;  %1446 = vadd.xlane.f32.xlu0 %v1445_v35 }
  0xea   : > { %9856 = vst [vmem:[#allocation180_spill] sm:$0xff] %v5463_v25  ;;  %v389_v25 = vld [vmem:[%s4482_s18 + $0x668] sm:$0xff]  ;;  %v1469_v2 = vadd.f32 %v1468_v58, %v5528_v34 }
  0xeb   : > { %9857 = vst [vmem:[#allocation181_spill] sm:$0xff] %v5470_v5  ;;  %v390_v5 = vld [vmem:[%s4482_s18 + $0x670] sm:$0xff]  ;;  %v5525_v38 = vmul.f32 %v4499_v7, %v389_v25  ;;  %v1478_v27 = vadd.f32 %v5518_v19, %v5508_v43  ;;  %v391_v25 = vld [vmem:[%s4482_s18 + $0x678] sm:$0xff] }
  0xec   : > { %9858 = vst [vmem:[#allocation182_spill] sm:$0xff] %v5477_v18  ;;  %v5536_v50 = vmul.f32 %v4501_v8, %v390_v5  ;;  %v1455_v5 = vadd.f32 %v1454_v56, %v5486_v13  ;;  %v3711_v18 = vld [vmem:[%s4482_s18] sm:$0xff]  ;;  %1466 = vadd.xlane.f32.xlu1 %v5549_v53 }
  0xed   : > { %9859 = vst [vmem:[#allocation183_spill] sm:$0xff] %v5480_v59  ;;  %v1473_v48 = vadd.f32 %v5525_v38, %v5522_v12  ;;  %v1479_v31 = vadd.f32 %v1478_v27, %v5533_v3  ;;  %v3713_v27 = vld [vmem:[%s4482_s18 + $0x10] sm:$0xff] }
  0xee   : > { %9860 = vst [vmem:[#allocation184_spill] sm:$0xff] %v5486_v13  ;;  %v3710_v13 = vld [vmem:[%s4482_s18 + $0x58] sm:$0xff]  ;;  %1456 = vadd.xlane.f32.xlu2 %v1455_v5 }
  0xef   : > { %9861 = vst [vmem:[#allocation185_spill] sm:$0xff] %v5490_v49  ;;  %v3708_v49 = vld [vmem:[%s4482_s18 + $0x48] sm:$0xff]  ;;  %v3718_v5 = vld [vmem:[%s4482_s18 + $0x98] sm:$0xff] }
  0xf0   : > { %9862 = vst [vmem:[#allocation186_spill] sm:$0xff] %v5494_v39 }
  0xf1   : > { %9863 = vst [vmem:[#allocation187_spill] sm:$0xff] %v5501_v24  ;;  %v3707_v24 = vld [vmem:[%s4482_s18 + $0x40] sm:$0xff]  ;;  %1461 = vadd.xlane.f32.xlu0 %v5552_v57 }
  0xf2   : > { %9864 = vst [vmem:[#allocation188_spill] sm:$0xff] %v5504_v45  ;;  %v1232_v45 = vpop.xlane.xlu1 %1231  ;;  %v3727_v57 = vld [vmem:[%s4482_s18 + $0xa0] sm:$0xff] }
  0xf3   : > { %9865 = vst [vmem:[#allocation189_spill] sm:$0xff] %v5508_v43  ;;  %v1222_v43 = vpop.xlane.xlu0 %1221 }
  0xf4   : > { %9866 = vst [vmem:[#allocation190_spill] sm:$0xff] %v5518_v19  ;;  %v1862_v19 = vsub.f32 %v5513_v63, %v1232_v45  ;;  %v1860_v56 = vsub.f32 %v5513_v63, %v1222_v43  ;;  %v5565_v45 = vmul.f32 %v4503_v9, %v391_v25  ;;  %v3714_v25 = vld [vmem:[%s4482_s18 + $0x18] sm:$0xff] }
  0xf5   : > { %9867 = vst [vmem:[#allocation191_spill] sm:$0xff] %v5522_v12  ;;  %v5560_v12 = vmul.f32 %v4503_v9, %v395_v51 }
  0xf6   : > { %9868 = vst [vmem:[#allocation192_spill] sm:$0xff] %v5525_v38  ;;  %v5556_v38 = vmul.f32 %v4503_v9, %v387_v41  ;;  %v1474_v41 = vadd.f32 %v1473_v48, %v5536_v50  ;;  %v1996_v39 = vmul.f32 %v3707_v24, %v1862_v19  ;;  %v1997_v58 = vmul.f32 %v3708_v49, %v1862_v19  ;;  %v3717_v48 = vld [vmem:[%s4482_s18 + $0x90] sm:$0xff] }
  0xf7   : > { %9869 = vst [vmem:[#allocation193_spill] sm:$0xff] %v5528_v34  ;;  %v3709_v34 = vld [vmem:[%s4482_s18 + $0x50] sm:$0xff]  ;;  %v1999_v59 = vmul.f32 %v3710_v13, %v1862_v19  ;;  %v1988_v43 = vmul.f32 %v3711_v18, %v1860_v56  ;;  %v1989_v32 = vmul.f32 %v3712_v44, %v1860_v56  ;;  %v1991_v60 = vmul.f32 %v3714_v25, %v1860_v56 }
  0xf8   : > { %9870 = vst [vmem:[#allocation194_spill] sm:$0xff] %v5533_v3  ;;  %v1998_v51 = vmul.f32 %v3709_v34, %v1862_v19  ;;  %v1990_v3 = vmul.f32 %v3713_v27, %v1860_v56  ;;  %v2508_v26 = vadd.f32 %v1996_v39, %v4510_v14  ;;  %v2509_v24 = vadd.f32 %v1997_v58, %v4513_v15  ;;  %v3716_v39 = vld [vmem:[%s4482_s18 + $0x88] sm:$0xff]  ;;  %v1247_v58 = vpop.xlane.xlu2 %1246 }
  0xf9   : > { %v5580_v34 = vadd.f32 %v1469_v2, %v5556_v38  ;;  %v2511_v13 = vadd.f32 %v1999_v59, %v4522_v20  ;;  %v2500_v44 = vadd.f32 %v1988_v43, %v4525_v21  ;;  %v2501_v18 = vadd.f32 %v1989_v32, %v4528_v22  ;;  %v396_v20 = vld [vmem:[%s4482_s18 + $0x6a0] sm:$0xff]  ;;  %v397_v21 = vld [vmem:[%s4482_s18 + $0x6a8] sm:$0xff] }
  0xfa   : > { %v2510_v49 = vadd.f32 %v1998_v51, %v4516_v16  ;;  %v2502_v19 = vadd.f32 %v1990_v3, %v4531_v23  ;;  %3020 = vst [vmem:[%s5588_s27 + $0x40] sm:$0xff] %v2508_v26  ;;  %v2503_v14 = vadd.f32 %v1991_v60, %v4550_v33  ;;  %v1864_v15 = vsub.f32 %v5513_v63, %v1242_v55  ;;  %v404_v22 = vld [vmem:[%s4482_s18 + $0x6e0] sm:$0xff]  ;;  %v1237_v23 = vpop.xlane.xlu1 %1236  ;;  %v398_v55 = vld [vmem:[%s4482_s18 + $0x6b0] sm:$0xff] }
  0xfb   : > { %v5594_v16 = vadd.f32 %v1479_v31, %v5560_v12  ;;  %3021 = vst [vmem:[%s5588_s27 + $0x48] sm:$0xff] %v2509_v24  ;;  %v5601_v26 = vadd.f32 %v1474_v41, %v5565_v45  ;;  %v5604_v33 = vmul.f32 %v4497_v6, %v396_v20  ;;  %v5607_v60 = vmul.f32 %v4499_v7, %v397_v21  ;;  %v3715_v32 = vld [vmem:[%s4482_s18 + $0x80] sm:$0xff]  ;;  %v1227_v56 = vpop.xlane.xlu0 %1226  ;;  %v3720_v20 = vld [vmem:[%s4482_s18 + $0x68] sm:$0xff] }
  0xfc   : > { %v5610_v59 = vmul.f32 %v4497_v6, %v404_v22  ;;  %3022 = vst [vmem:[%s5588_s27 + $0x50] sm:$0xff] %v2510_v49  ;;  %v2004_v3 = vmul.f32 %v3715_v32, %v1864_v15  ;;  %v2005_v62 = vmul.f32 %v3716_v39, %v1864_v15  ;;  %v2006_v35 = vmul.f32 %v3717_v48, %v1864_v15  ;;  %v3721_v22 = vld [vmem:[%s4482_s18 + $0x70] sm:$0xff]  ;;  %v3724_v32 = vld [vmem:[%s4482_s18 + $0x28] sm:$0xff]  ;;  %v3726_v39 = vld [vmem:[%s4482_s18 + $0x38] sm:$0xff] }
  0xfd   : > { %v2007_v2 = vmul.f32 %v3718_v5, %v1864_v15  ;;  %3023 = vst [vmem:[%s5588_s27 + $0x58] sm:$0xff] %v2511_v13  ;;  %v1863_v31 = vsub.f32 %v5513_v63, %v1237_v23  ;;  %v1861_v41 = vsub.f32 %v5513_v63, %v1227_v56  ;;  %v5622_v51 = vmul.f32 %v4501_v8, %v398_v55  ;;  %v3719_v13 = vld [vmem:[%s4482_s18 + $0x60] sm:$0xff]  ;;  %v3722_v23 = vld [vmem:[%s4482_s18 + $0x78] sm:$0xff]  ;;  %v405_v56 = vld [vmem:[%s4482_s18 + $0x6e8] sm:$0xff] }
  0xfe   : > { %v1483_v43 = vadd.f32 %v5607_v60, %v5604_v33  ;;  %3012 = vst [vmem:[%s5588_s27] sm:$0xff] %v2500_v44  ;;  %v2516_v27 = vadd.f32 %v2004_v3, %v4539_v28  ;;  %v2517_v25 = vadd.f32 %v2005_v62, %v4542_v29  ;;  %v2518_v24 = vadd.f32 %v2006_v35, %v4545_v30  ;;  %v3723_v29 = vld [vmem:[%s4482_s18 + $0x20] sm:$0xff]  ;;  %v399_v48 = vld [vmem:[%s4482_s18 + $0x6b8] sm:$0xff]  ;;  %v406_v55 = vld [vmem:[%s4482_s18 + $0x6f0] sm:$0xff] }
  0xff   : > { %v2519_v49 = vadd.f32 %v2007_v2, %v4564_v40  ;;  %3013 = vst [vmem:[%s5588_s27 + $0x8] sm:$0xff] %v2501_v18  ;;  %v2000_v15 = vmul.f32 %v3719_v13, %v1863_v31  ;;  %v2001_v21 = vmul.f32 %v3720_v20, %v1863_v31  ;;  %v2002_v44 = vmul.f32 %v3721_v22, %v1863_v31  ;;  %v3725_v18 = vld [vmem:[%s4482_s18 + $0x30] sm:$0xff]  ;;  %v3731_v20 = vld [vmem:[%s4482_s18 + $0xe0] sm:$0xff] }
 0x100   : > { %v2003_v28 = vmul.f32 %v3722_v23, %v1863_v31  ;;  %3014 = vst [vmem:[%s5588_s27 + $0x10] sm:$0xff] %v2502_v19  ;;  %v1992_v30 = vmul.f32 %v3723_v29, %v1861_v41  ;;  %v1993_v40 = vmul.f32 %v3724_v32, %v1861_v41  ;;  %v1994_v3 = vmul.f32 %v3725_v18, %v1861_v41 }
 0x101   : > { %v1995_v62 = vmul.f32 %v3726_v39, %v1861_v41  ;;  %3015 = vst [vmem:[%s5588_s27 + $0x18] sm:$0xff] %v2503_v14  ;;  %v2512_v35 = vadd.f32 %v2000_v15, %v4556_v36  ;;  %v2513_v5 = vadd.f32 %v2001_v21, %v4559_v37  ;;  %v2514_v2 = vadd.f32 %v2002_v44, %v4569_v42  ;;  %v1262_v15 = vpop.xlane.xlu2 %1261  ;;  %v3733_v44 = vld [vmem:[%s4482_s18 + $0xf0] sm:$0xff]  ;;  %v400_v39 = vld [vmem:[%s4482_s18 + $0x6c0] sm:$0xff] }
 0x102   : > { %v2515_v19 = vadd.f32 %v2003_v28, %v4586_v52  ;;  %3028 = vst [vmem:[%s5588_s27 + $0x80] sm:$0xff] %v2516_v27  ;;  %v2504_v31 = vadd.f32 %v1992_v30, %v4576_v46  ;;  %v2505_v13 = vadd.f32 %v1993_v40, %v4579_v47  ;;  %v5653_v41 = vadd.f32 %v1994_v3, %v4590_v54  ;;  %v1257_v42 = vpop.xlane.xlu1 %1256  ;;  %v3729_v27 = vld [vmem:[%s4482_s18 + $0xb0] sm:$0xff]  ;;  %v3734_v28 = vld [vmem:[%s4482_s18 + $0xf8] sm:$0xff] }
 0x103   : > { %v5656_v36 = vadd.f32 %v1995_v62, %v4613_v4  ;;  %3029 = vst [vmem:[%s5588_s27 + $0x88] sm:$0xff] %v2517_v25  ;;  %v1865_v37 = vsub.f32 %v5513_v63, %v1247_v58  ;;  %v5663_v46 = vmul.f32 %v4503_v9, %v399_v48  ;;  %v1484_v47 = vadd.f32 %v1483_v43, %v5622_v51  ;;  %v1252_v54 = vpop.xlane.xlu0 %1251  ;;  %v3728_v58 = vld [vmem:[%s4482_s18 + $0xa8] sm:$0xff]  ;;  %v407_v30 = vld [vmem:[%s4482_s18 + $0x6f8] sm:$0xff]  ;;  %v402_v48 = vld [vmem:[%s4482_s18 + $0x6d0] sm:$0xff] }
 0x104   : > { %3030 = vst [vmem:[%s5588_s27 + $0x90] sm:$0xff] %v2518_v24  ;;  %v1867_v52 = vsub.f32 %v5513_v63, %v1257_v42  ;;  %1471 = vadd.xlane.f32.xlu2 %v5580_v34  ;;  %v5670_v4 = vmul.f32 %v4499_v7, %v405_v56  ;;  %v5673_v53 = vmul.f32 %v4501_v8, %v406_v55  ;;  %v3730_v24 = vld [vmem:[%s4482_s18 + $0xb8] sm:$0xff]  ;;  %v401_v62 = vld [vmem:[%s4482_s18 + $0x6c8] sm:$0xff] }
 0x105   : > { %3031 = vst [vmem:[%s5588_s27 + $0x98] sm:$0xff] %v2519_v49  ;;  %v2008_v14 = vmul.f32 %v3727_v57, %v1865_v37  ;;  %v2009_v43 = vmul.f32 %v3728_v58, %v1865_v37  ;;  %v2010_v25 = vmul.f32 %v3729_v27, %v1865_v37  ;;  %v2011_v34 = vmul.f32 %v3730_v24, %v1865_v37  ;;  %v3732_v49 = vld [vmem:[%s4482_s18 + $0xe8] sm:$0xff]  ;;  %v9872_v56 = vld [vmem:[#allocation20_spill] sm:$0xff]  ;;  %v3737_v57 = vld [vmem:[%s4482_s18 + $0xd0] sm:$0xff] }
 0x106   : > { %3024 = vst [vmem:[%s5588_s27 + $0x60] sm:$0xff] %v2512_v35  ;;  %v2016_v21 = vmul.f32 %v3731_v20, %v1867_v52  ;;  %v2017_v22 = vmul.f32 %v3732_v49, %v1867_v52  ;;  %v2018_v23 = vmul.f32 %v3733_v44, %v1867_v52  ;;  %v2019_v29 = vmul.f32 %v3734_v28, %v1867_v52  ;;  %v3738_v58 = vld [vmem:[%s4482_s18 + $0xd8] sm:$0xff]  ;;  %v3740_v24 = vld [vmem:[%s4482_s18 + $0x108] sm:$0xff] }
 0x107   : > { %3025 = vst [vmem:[%s5588_s27 + $0x68] sm:$0xff] %v2513_v5  ;;  %v2520_v32 = vadd.f32 %v2008_v14, %v4600_v61  ;;  %v2521_v40 = vadd.f32 %v2009_v43, %v4605_v0  ;;  %v2522_v18 = vadd.f32 %v2010_v25, %v4608_v1  ;;  %v2523_v3 = vadd.f32 %v2011_v34, %v4625_v17  ;;  %v9871_v61 = vld [vmem:[#allocation14_spill] sm:$0xff]  ;;  %v9873_v49 = vld [vmem:[#allocation13_spill] sm:$0xff]  ;;  %v9874_v44 = vld [vmem:[#allocation15_spill] sm:$0xff] }
 0x108   : > { %3026 = vst [vmem:[%s5588_s27 + $0x70] sm:$0xff] %v2514_v2  ;;  %v5696_v35 = vadd.f32 %v2016_v21, %v4617_v10  ;;  %v5699_v5 = vadd.f32 %v2017_v22, %v4620_v11  ;;  %v5702_v0 = vadd.f32 %v2018_v23, %v9871_v61  ;;  %v5705_v1 = vadd.f32 %v2019_v29, %v9872_v56  ;;  %v403_v29 = vld [vmem:[%s4482_s18 + $0x6d8] sm:$0xff]  ;;  %v9878_v61 = vld [vmem:[#allocation17_spill] sm:$0xff] }
 0x109   : > { %3027 = vst [vmem:[%s5588_s27 + $0x78] sm:$0xff] %v2515_v19  ;;  %v1866_v17 = vsub.f32 %v5513_v63, %v1252_v54  ;;  %v1868_v2 = vsub.f32 %v5513_v63, %v1262_v15  ;;  %v1485_v10 = vadd.f32 %v1484_v47, %v5663_v46  ;;  %v5712_v55 = vmul.f32 %v4503_v9, %v407_v30  ;;  %v3735_v47 = vld [vmem:[%s4482_s18 + $0xc0] sm:$0xff]  ;;  %v3736_v54 = vld [vmem:[%s4482_s18 + $0xc8] sm:$0xff]  ;;  %v3741_v15 = vld [vmem:[%s4482_s18 + $0x110] sm:$0xff]  ;;  %v1277_v30 = vpop.xlane.xlu2 %1276 }
 0x10a   : > { %3016 = vst [vmem:[%s5588_s27 + $0x20] sm:$0xff] %v2504_v31  ;;  %v1493_v11 = vadd.f32 %v5670_v4, %v5610_v59  ;;  %v5718_v37 = vmul.f32 %v4497_v6, %v400_v39  ;;  %v5721_v19 = vmul.f32 %v4499_v7, %v401_v62  ;;  %v5724_v42 = vmul.f32 %v4501_v8, %v402_v48  ;;  %v1272_v27 = vpop.xlane.xlu1 %1271  ;;  %v3742_v39 = vld [vmem:[%s4482_s18 + $0x118] sm:$0xff] }
 0x10b   : > { %3017 = vst [vmem:[%s5588_s27 + $0x28] sm:$0xff] %v2505_v13  ;;  %v2012_v52 = vmul.f32 %v3735_v47, %v1866_v17  ;;  %v2013_v31 = vmul.f32 %v3736_v54, %v1866_v17  ;;  %v2014_v14 = vmul.f32 %v3737_v57, %v1866_v17  ;;  %v2015_v43 = vmul.f32 %v3738_v58, %v1866_v17  ;;  %v3739_v13 = vld [vmem:[%s4482_s18 + $0x100] sm:$0xff]  ;;  %v1267_v21 = vpop.xlane.xlu0 %1266  ;;  %v9879_v17 = vld [vmem:[#allocation19_spill] sm:$0xff]  ;;  %v9880_v54 = vld [vmem:[#allocation26_spill] sm:$0xff] }
 0x10c   : > { %3018 = vst [vmem:[%s5588_s27 + $0x30] sm:$0xff] %v5653_v41  ;;  %1481 = vadd.xlane.f32.xlu1 %v5594_v16  ;;  %1476 = vadd.xlane.f32.xlu0 %v5601_v26  ;;  %v2020_v25 = vmul.f32 %v3739_v13, %v1868_v2  ;;  %v2021_v34 = vmul.f32 %v3740_v24, %v1868_v2  ;;  %v9875_v16 = vld [vmem:[#allocation18_spill] sm:$0xff]  ;;  %v9876_v26 = vld [vmem:[#allocation23_spill] sm:$0xff]  ;;  %v3747_v24 = vld [vmem:[%s4482_s18 + $0x120] sm:$0xff] }
 0x10d   : > { %v2022_v20 = vmul.f32 %v3741_v15, %v1868_v2  ;;  %3019 = vst [vmem:[%s5588_s27 + $0x38] sm:$0xff] %v5656_v36  ;;  %v2524_v22 = vadd.f32 %v2012_v52, %v9873_v49  ;;  %v5742_v41 = vadd.f32 %v2013_v31, %v9874_v44  ;;  %v5745_v23 = vadd.f32 %v2014_v14, %v9875_v16  ;;  %v9877_v36 = vld [vmem:[#allocation16_spill] sm:$0xff]  ;;  %v3748_v15 = vld [vmem:[%s4482_s18 + $0x128] sm:$0xff] }
 0x10e   : > { %v5748_v28 = vadd.f32 %v2015_v43, %v9876_v26  ;;  %3032 = vst [vmem:[%s5588_s27 + $0xa0] sm:$0xff] %v2520_v32  ;;  %v2023_v62 = vmul.f32 %v3742_v39, %v1868_v2  ;;  %v5754_v48 = vadd.f32 %v2020_v25, %v9877_v36  ;;  %v5757_v56 = vadd.f32 %v2021_v34, %v9878_v61  ;;  %v3745_v43 = vld [vmem:[%s4482_s18 + $0x150] sm:$0xff]  ;;  %v3746_v13 = vld [vmem:[%s4482_s18 + $0x158] sm:$0xff]  ;;  %v9881_v16 = vld [vmem:[#allocation21_spill] sm:$0xff] }
 0x10f   : > { %v5760_v47 = vadd.f32 %v2022_v20, %v9879_v17  ;;  %3033 = vst [vmem:[%s5588_s27 + $0xa8] sm:$0xff] %v2521_v40  ;;  %v1870_v52 = vsub.f32 %v5513_v63, %v1272_v27  ;;  %v1869_v32 = vsub.f32 %v5513_v63, %v1267_v21  ;;  %1486 = vadd.xlane.f32.xlu2 %v1485_v10  ;;  %v3743_v10 = vld [vmem:[%s4482_s18 + $0x140] sm:$0xff]  ;;  %v3749_v21 = vld [vmem:[%s4482_s18 + $0x130] sm:$0xff]  ;;  %v3750_v49 = vld [vmem:[%s4482_s18 + $0x138] sm:$0xff] }
 0x110   : > { %v1494_v2 = vadd.f32 %v1493_v11, %v5673_v53  ;;  %3034 = vst [vmem:[%s5588_s27 + $0xb0] sm:$0xff] %v2522_v18  ;;  %v5768_v31 = vadd.f32 %v2023_v62, %v9880_v54  ;;  %v5771_v57 = vmul.f32 %v4503_v9, %v403_v29  ;;  %v1488_v40 = vadd.f32 %v5721_v19, %v5718_v37  ;;  %v3744_v11 = vld [vmem:[%s4482_s18 + $0x148] sm:$0xff]  ;;  %v9884_v62 = vld [vmem:[#allocation32_spill] sm:$0xff] }
 0x111   : > { %v1871_v14 = vsub.f32 %v5513_v63, %v1277_v30  ;;  %3035 = vst [vmem:[%s5588_s27 + $0xb8] sm:$0xff] %v2523_v3  ;;  %v2028_v58 = vmul.f32 %v3743_v10, %v1870_v52  ;;  %v2029_v18 = vmul.f32 %v3744_v11, %v1870_v52  ;;  %v2030_v27 = vmul.f32 %v3745_v43, %v1870_v52  ;;  %v9882_v29 = vld [vmem:[#allocation22_spill] sm:$0xff]  ;;  %v9885_v17 = vld [vmem:[#allocation24_spill] sm:$0xff] }
 0x112   : > { %v2031_v25 = vmul.f32 %v3746_v13, %v1870_v52  ;;  %3040 = vst [vmem:[%s5588_s27 + $0xe0] sm:$0xff] %v5696_v35  ;;  %v2024_v34 = vmul.f32 %v3747_v24, %v1869_v32  ;;  %v2025_v20 = vmul.f32 %v3748_v15, %v1869_v32  ;;  %v2026_v3 = vmul.f32 %v3749_v21, %v1869_v32  ;;  %v9883_v35 = vld [vmem:[#allocation29_spill] sm:$0xff]  ;;  %v1287_v61 = vpop.xlane.xlu1 %1286  ;;  %v9887_v54 = vld [vmem:[#allocation30_spill] sm:$0xff] }
 0x113   : > { %v2027_v44 = vmul.f32 %v3750_v49, %v1869_v32  ;;  %3041 = vst [vmem:[%s5588_s27 + $0xe8] sm:$0xff] %v5699_v5  ;;  %v5790_v26 = vadd.f32 %v2028_v58, %v9881_v16  ;;  %v5793_v30 = vadd.f32 %v2029_v18, %v9882_v29  ;;  %v5796_v39 = vadd.f32 %v2030_v27, %v9883_v35  ;;  %v9886_v52 = vld [vmem:[#allocation25_spill] sm:$0xff]  ;;  %v9888_v58 = vld [vmem:[#allocation35_spill] sm:$0xff]  ;;  %v1282_v18 = vpop.xlane.xlu0 %1281  ;;  %v9890_v49 = vld [vmem:[#allocation28_spill] sm:$0xff] }
 0x114   : > { %v5799_v36 = vadd.f32 %v2031_v25, %v9884_v62  ;;  %3042 = vst [vmem:[%s5588_s27 + $0xf0] sm:$0xff] %v5702_v0  ;;  %v5804_v5 = vadd.f32 %v2024_v34, %v9885_v17  ;;  %v5807_v32 = vadd.f32 %v2025_v20, %v9886_v52  ;;  %v5810_v10 = vadd.f32 %v2026_v3, %v9887_v54  ;;  %v3751_v27 = vld [vmem:[%s4482_s18 + $0x160] sm:$0xff]  ;;  %v3752_v25 = vld [vmem:[%s4482_s18 + $0x168] sm:$0xff]  ;;  %v3753_v34 = vld [vmem:[%s4482_s18 + $0x170] sm:$0xff] }
 0x115   : > { %v5813_v11 = vadd.f32 %v2027_v44, %v9888_v58  ;;  %3043 = vst [vmem:[%s5588_s27 + $0xf8] sm:$0xff] %v5705_v1  ;;  %v1495_v43 = vadd.f32 %v1494_v2, %v5712_v55  ;;  %v1489_v0 = vadd.f32 %v1488_v40, %v5724_v42  ;;  %v2032_v13 = vmul.f32 %v3751_v27, %v1871_v14  ;;  %v3754_v20 = vld [vmem:[%s4482_s18 + $0x178] sm:$0xff]  ;;  %v9892_v29 = vld [vmem:[#allocation38_spill] sm:$0xff]  ;;  %v3755_v35 = vld [vmem:[%s4482_s18 + $0x1a0] sm:$0xff] }
 0x116   : > { %v2033_v24 = vmul.f32 %v3752_v25, %v1871_v14  ;;  %3036 = vst [vmem:[%s5588_s27 + $0xc0] sm:$0xff] %v2524_v22  ;;  %v2034_v15 = vmul.f32 %v3753_v34, %v1871_v14  ;;  %v2035_v21 = vmul.f32 %v3754_v20, %v1871_v14  ;;  %v1873_v3 = vsub.f32 %v5513_v63, %v1287_v61  ;;  %v9889_v40 = vld [vmem:[#allocation27_spill] sm:$0xff]  ;;  %v3756_v61 = vld [vmem:[%s4482_s18 + $0x1a8] sm:$0xff] }
 0x117   : > { %v1872_v1 = vsub.f32 %v5513_v63, %v1282_v18  ;;  %3037 = vst [vmem:[%s5588_s27 + $0xc8] sm:$0xff] %v5742_v41  ;;  %1496 = vadd.xlane.f32.xlu1 %v1495_v43  ;;  %v1490_v2 = vadd.f32 %v1489_v0, %v5771_v57  ;;  %v5830_v22 = vadd.f32 %v2032_v13, %v9889_v40  ;;  %v9891_v14 = vld [vmem:[#allocation31_spill] sm:$0xff]  ;;  %v3759_v18 = vld [vmem:[%s4482_s18 + $0x180] sm:$0xff]  ;;  %v409_v27 = vld [vmem:[%s4482_s18 + $0x708] sm:$0xff] }
 0x118   : > { %v5833_v44 = vadd.f32 %v2033_v24, %v9890_v49  ;;  %3038 = vst [vmem:[%s5588_s27 + $0xd0] sm:$0xff] %v5745_v23  ;;  %v5838_v16 = vadd.f32 %v2034_v15, %v9891_v14  ;;  %v5841_v41 = vadd.f32 %v2035_v21, %v9892_v29  ;;  %v2040_v62 = vmul.f32 %v3755_v35, %v1873_v3  ;;  %v3757_v52 = vld [vmem:[%s4482_s18 + $0x1b0] sm:$0xff]  ;;  %v3758_v54 = vld [vmem:[%s4482_s18 + $0x1b8] sm:$0xff]  ;;  %v408_v0 = vld [vmem:[%s4482_s18 + $0x700] sm:$0xff] }
 0x119   : > { %v2041_v17 = vmul.f32 %v3756_v61, %v1873_v3  ;;  %3039 = vst [vmem:[%s5588_s27 + $0xd8] sm:$0xff] %v5748_v28  ;;  %1491 = vadd.xlane.f32.xlu0 %v1490_v2  ;;  %v2042_v23 = vmul.f32 %v3757_v52, %v1873_v3  ;;  %v2043_v58 = vmul.f32 %v3758_v54, %v1873_v3  ;;  %v416_v13 = vld [vmem:[%s4482_s18 + $0x740] sm:$0xff]  ;;  %v9894_v24 = vld [vmem:[#allocation34_spill] sm:$0xff]  ;;  %v411_v40 = vld [vmem:[%s4482_s18 + $0x718] sm:$0xff] }
 0x11a   : > { %v2036_v43 = vmul.f32 %v3759_v18, %v1872_v1  ;;  %3044 = vst [vmem:[%s5588_s27 + $0x100] sm:$0xff] %v5754_v48  ;;  %v9893_v25 = vld [vmem:[#allocation33_spill] sm:$0xff]  ;;  %v3761_v21 = vld [vmem:[%s4482_s18 + $0x190] sm:$0xff]  ;;  %v9896_v29 = vld [vmem:[#allocation44_spill] sm:$0xff] }
 0x11b   : > { %v5856_v28 = vadd.f32 %v2040_v62, %v9893_v25  ;;  %v5859_v34 = vadd.f32 %v2041_v17, %v9894_v24  ;;  %v3760_v15 = vld [vmem:[%s4482_s18 + $0x188] sm:$0xff]  ;;  %v2038_v3 = vmul.f32 %v3761_v21, %v1872_v1  ;;  %v410_v2 = vld [vmem:[%s4482_s18 + $0x710] sm:$0xff]  ;;  %3045 = vst [vmem:[%s5588_s27 + $0x108] sm:$0xff] %v5757_v56  ;;  %v5872_v35 = vadd.f32 %v2043_v58, %v9896_v29  ;;  %v3762_v62 = vld [vmem:[%s4482_s18 + $0x198] sm:$0xff]  ;;  %v1292_v29 = vpop.xlane.xlu2 %1291 }
 0x11c   : > { %v2037_v20 = vmul.f32 %v3760_v15, %v1872_v1  ;;  %v417_v49 = vld [vmem:[%s4482_s18 + $0x748] sm:$0xff]  ;;  %v2039_v61 = vmul.f32 %v3762_v62, %v1872_v1  ;;  %v9897_v17 = vld [vmem:[#allocation36_spill] sm:$0xff]  ;;  %v418_v54 = vld [vmem:[%s4482_s18 + $0x750] sm:$0xff]  ;;  %3046 = vst [vmem:[%s5588_s27 + $0x110] sm:$0xff] %v5760_v47  ;;  %v5890_v58 = vmul.f32 %v4497_v6, %v408_v0  ;;  %v5893_v1 = vmul.f32 %v4499_v7, %v409_v27  ;;  %v1302_v62 = vpop.xlane.xlu1 %1301 }
 0x11d   : > { %v9895_v48 = vld [vmem:[#allocation41_spill] sm:$0xff]  ;;  %v5876_v52 = vadd.f32 %v2036_v43, %v9897_v17  ;;  %v419_v18 = vld [vmem:[%s4482_s18 + $0x758] sm:$0xff]  ;;  %v414_v21 = vld [vmem:[%s4482_s18 + $0x730] sm:$0xff]  ;;  %3047 = vst [vmem:[%s5588_s27 + $0x118] sm:$0xff] %v5768_v31  ;;  %v5907_v0 = vmul.f32 %v4503_v9, %v411_v40  ;;  %v5910_v27 = vmul.f32 %v4497_v6, %v416_v13  ;;  %v1297_v13 = vpop.xlane.xlu0 %1296 }
 0x11e   : > { %v5869_v14 = vadd.f32 %v2042_v23, %v9895_v48  ;;  %v412_v25 = vld [vmem:[%s4482_s18 + $0x720] sm:$0xff]  ;;  %v9899_v23 = vld [vmem:[#allocation42_spill] sm:$0xff]  ;;  %9900 = vst [vmem:[#allocation14_spill] sm:$0xff] %v5893_v1  ;;  %v415_v48 = vld [vmem:[%s4482_s18 + $0x738] sm:$0xff]  ;;  %v1498_v31 = vadd.f32 %v5893_v1, %v5890_v58  ;;  %v5923_v40 = vmul.f32 %v4503_v9, %v419_v18 }
 0x11f   : > { %v9898_v56 = vld [vmem:[#allocation37_spill] sm:$0xff]  ;;  %v5887_v15 = vadd.f32 %v2038_v3, %v9899_v23  ;;  %v9901_v47 = vld [vmem:[#allocation47_spill] sm:$0xff]  ;;  %v5904_v3 = vmul.f32 %v4501_v8, %v410_v2  ;;  %9903 = vst [vmem:[#allocation13_spill] sm:$0xff] %v5907_v0  ;;  %v5920_v2 = vmul.f32 %v4501_v8, %v418_v54  ;;  %v5939_v54 = vmul.f32 %v4503_v9, %v415_v48 }
 0x120   : > { %v5884_v24 = vadd.f32 %v2037_v20, %v9898_v56  ;;  %v413_v43 = vld [vmem:[%s4482_s18 + $0x728] sm:$0xff]  ;;  %v5901_v20 = vadd.f32 %v2039_v61, %v9901_v47  ;;  %9904 = vst [vmem:[#allocation15_spill] sm:$0xff] %v5910_v27  ;;  %v5917_v61 = vmul.f32 %v4499_v7, %v417_v49  ;;  %v420_v17 = vld [vmem:[%s4482_s18 + $0x760] sm:$0xff]  ;;  %v5936_v49 = vmul.f32 %v4501_v8, %v414_v21 }
 0x121   : > { %9902 = vst [vmem:[#allocation20_spill] sm:$0xff] %v5904_v3  ;;  %v421_v56 = vld [vmem:[%s4482_s18 + $0x768] sm:$0xff]  ;;  %v5933_v23 = vmul.f32 %v4499_v7, %v413_v43  ;;  %v1499_v18 = vadd.f32 %v1498_v31, %v5904_v3  ;;  %v1876_v43 = vsub.f32 %v5513_v63, %v1302_v62  ;;  %v1875_v48 = vsub.f32 %v5513_v63, %v1297_v13  ;;  %v3763_v62 = vld [vmem:[%s4482_s18 + $0x1c0] sm:$0xff] }
 0x122   : > { %3052 = vst [vmem:[%s5588_s27 + $0x140] sm:$0xff] %v5790_v26  ;;  %v5930_v26 = vmul.f32 %v4497_v6, %v412_v25  ;;  %v1874_v25 = vsub.f32 %v5513_v63, %v1292_v29  ;;  %v5957_v47 = vmul.f32 %v4499_v7, %v421_v56 }
 0x123   : > { %9905 = vst [vmem:[#allocation18_spill] sm:$0xff] %v5917_v61  ;;  %v1500_v29 = vadd.f32 %v1499_v18, %v5907_v0 }
 0x124   : > { %9906 = vst [vmem:[#allocation23_spill] sm:$0xff] %v5920_v2  ;;  %v1503_v21 = vadd.f32 %v5933_v23, %v5930_v26  ;;  %v2044_v31 = vmul.f32 %v3763_v62, %v1874_v25  ;;  %v1317_v0 = vpop.xlane.xlu1 %1316 }
 0x125   : > { %9907 = vst [vmem:[#allocation16_spill] sm:$0xff] %v5923_v40  ;;  %1501 = vadd.xlane.f32.xlu2 %v1500_v29  ;;  %v1312_v3 = vpop.xlane.xlu0 %1311 }
 0x126   : > { %3053 = vst [vmem:[%s5588_s27 + $0x148] sm:$0xff] %v5793_v30  ;;  %v1508_v30 = vadd.f32 %v5917_v61, %v5910_v27  ;;  %v1504_v13 = vadd.f32 %v1503_v21, %v5936_v49  ;;  %v3766_v61 = vld [vmem:[%s4482_s18 + $0x1d8] sm:$0xff] }
 0x127   : > { %9908 = vst [vmem:[#allocation17_spill] sm:$0xff] %v5930_v26  ;;  %v2047_v27 = vmul.f32 %v3766_v61, %v1874_v25  ;;  %v9913_v21 = vld [vmem:[#allocation40_spill] sm:$0xff] }
 0x128   : > { %9909 = vst [vmem:[#allocation19_spill] sm:$0xff] %v5933_v23  ;;  %v3764_v23 = vld [vmem:[%s4482_s18 + $0x1c8] sm:$0xff]  ;;  %v1505_v61 = vadd.f32 %v1504_v13, %v5939_v54 }
 0x129   : > { %9910 = vst [vmem:[#allocation26_spill] sm:$0xff] %v5936_v49  ;;  %v2045_v26 = vmul.f32 %v3764_v23, %v1874_v25  ;;  %v9912_v23 = vld [vmem:[#allocation39_spill] sm:$0xff] }
 0x12a   : > { %9911 = vst [vmem:[#allocation21_spill] sm:$0xff] %v5939_v54  ;;  %1506 = vadd.xlane.f32.xlu0 %v1505_v61  ;;  %v9919_v61 = vld [vmem:[#allocation56_spill] sm:$0xff]  ;;  %v430_v49 = vld [vmem:[%s4482_s18 + $0x7b0] sm:$0xff] }
 0x12b   : > { %3054 = vst [vmem:[%s5588_s27 + $0x150] sm:$0xff] %v5796_v39  ;;  %v5954_v39 = vmul.f32 %v4497_v6, %v420_v17  ;;  %v3765_v17 = vld [vmem:[%s4482_s18 + $0x1d0] sm:$0xff]  ;;  %v5978_v62 = vadd.f32 %v2045_v26, %v9913_v21  ;;  %v3774_v54 = vld [vmem:[%s4482_s18 + $0x1f8] sm:$0xff] }
 0x12c   : > { %3055 = vst [vmem:[%s5588_s27 + $0x158] sm:$0xff] %v5799_v36  ;;  %v1509_v36 = vadd.f32 %v1508_v30, %v5920_v2  ;;  %v2046_v56 = vmul.f32 %v3765_v17, %v1874_v25  ;;  %v9914_v25 = vld [vmem:[#allocation43_spill] sm:$0xff]  ;;  %v9920_v2 = vld [vmem:[#allocation48_spill] sm:$0xff] }
 0x12d   : > { %3048 = vst [vmem:[%s5588_s27 + $0x120] sm:$0xff] %v5804_v5  ;;  %v3767_v5 = vld [vmem:[%s4482_s18 + $0x200] sm:$0xff]  ;;  %v3769_v26 = vld [vmem:[%s4482_s18 + $0x210] sm:$0xff] }
 0x12e   : > { %3049 = vst [vmem:[%s5588_s27 + $0x128] sm:$0xff] %v5807_v32  ;;  %v2052_v18 = vmul.f32 %v3767_v5, %v1876_v43  ;;  %v1510_v30 = vadd.f32 %v1509_v36, %v5923_v40  ;;  %v5975_v32 = vadd.f32 %v2044_v31, %v9912_v23  ;;  %v5984_v17 = vadd.f32 %v2046_v56, %v9914_v25  ;;  %v3768_v36 = vld [vmem:[%s4482_s18 + $0x208] sm:$0xff]  ;;  %v3770_v5 = vld [vmem:[%s4482_s18 + $0x218] sm:$0xff]  ;;  %v422_v21 = vld [vmem:[%s4482_s18 + $0x770] sm:$0xff] }
 0x12f   : > { %3050 = vst [vmem:[%s5588_s27 + $0x130] sm:$0xff] %v5810_v10  ;;  %v9915_v10 = vld [vmem:[#allocation50_spill] sm:$0xff]  ;;  %v2053_v31 = vmul.f32 %v3768_v36, %v1876_v43  ;;  %v2055_v13 = vmul.f32 %v3770_v5, %v1876_v43  ;;  %v9916_v23 = vld [vmem:[#allocation45_spill] sm:$0xff] }
 0x130   : > { %3051 = vst [vmem:[%s5588_s27 + $0x138] sm:$0xff] %v5813_v11  ;;  %v5987_v29 = vadd.f32 %v2047_v27, %v9915_v10  ;;  %1511 = vadd.xlane.f32.xlu1 %v1510_v30  ;;  %v2054_v11 = vmul.f32 %v3769_v26, %v1876_v43  ;;  %v5995_v56 = vadd.f32 %v2052_v18, %v9916_v23  ;;  %v423_v27 = vld [vmem:[%s4482_s18 + $0x778] sm:$0xff]  ;;  %v3771_v25 = vld [vmem:[%s4482_s18 + $0x1e0] sm:$0xff]  ;;  %v3772_v43 = vld [vmem:[%s4482_s18 + $0x1e8] sm:$0xff] }
 0x131   : > { %3056 = vst [vmem:[%s5588_s27 + $0x160] sm:$0xff] %v5830_v22  ;;  %v9917_v22 = vld [vmem:[#allocation46_spill] sm:$0xff]  ;;  %v2048_v10 = vmul.f32 %v3771_v25, %v1875_v48  ;;  %v2049_v36 = vmul.f32 %v3772_v43, %v1875_v48  ;;  %v428_v26 = vld [vmem:[%s4482_s18 + $0x7a0] sm:$0xff]  ;;  %v6014_v23 = vadd.f32 %v2055_v13, %v9919_v61  ;;  %v2051_v25 = vmul.f32 %v3774_v54, %v1875_v48  ;;  %v431_v43 = vld [vmem:[%s4482_s18 + $0x7b8] sm:$0xff] }
 0x132   : > { %3057 = vst [vmem:[%s5588_s27 + $0x168] sm:$0xff] %v5833_v44  ;;  %v6002_v30 = vadd.f32 %v2053_v31, %v9917_v22  ;;  %v429_v18 = vld [vmem:[%s4482_s18 + $0x7a8] sm:$0xff]  ;;  %v3773_v31 = vld [vmem:[%s4482_s18 + $0x1f0] sm:$0xff]  ;;  %v424_v40 = vld [vmem:[%s4482_s18 + $0x780] sm:$0xff]  ;;  %v6030_v13 = vmul.f32 %v4501_v8, %v422_v21  ;;  %v6033_v61 = vmul.f32 %v4503_v9, %v423_v27  ;;  %v1513_v21 = vadd.f32 %v5957_v47, %v5954_v39 }
 0x133   : > { %3058 = vst [vmem:[%s5588_s27 + $0x170] sm:$0xff] %v5838_v16  ;;  %v9918_v5 = vld [vmem:[#allocation53_spill] sm:$0xff]  ;;  %v2050_v22 = vmul.f32 %v3773_v31, %v1875_v48  ;;  %v6024_v16 = vadd.f32 %v2048_v10, %v9920_v2  ;;  %v426_v54 = vld [vmem:[%s4482_s18 + $0x790] sm:$0xff]  ;;  %v427_v48 = vld [vmem:[%s4482_s18 + $0x798] sm:$0xff]  ;;  %v6049_v27 = vmul.f32 %v4497_v6, %v428_v26  ;;  %v6054_v1 = vmul.f32 %v4499_v7, %v429_v18 }
 0x134   : > { %v6011_v44 = vadd.f32 %v2054_v11, %v9918_v5  ;;  %3059 = vst [vmem:[%s5588_s27 + $0x178] sm:$0xff] %v5841_v41  ;;  %v9921_v11 = vld [vmem:[#allocation49_spill] sm:$0xff]  ;;  %v1307_v41 = vpop.xlane.xlu2 %1306  ;;  %v9924_v2 = vld [vmem:[#allocation54_spill] sm:$0xff] }
 0x135   : > { %v6027_v5 = vadd.f32 %v2049_v36, %v9921_v11  ;;  %9922 = vst [vmem:[#allocation22_spill] sm:$0xff] %v6030_v13  ;;  %v425_v31 = vld [vmem:[%s4482_s18 + $0x788] sm:$0xff]  ;;  %v6041_v10 = vadd.f32 %v2050_v22, %v9924_v2  ;;  %v9925_v36 = vld [vmem:[#allocation59_spill] sm:$0xff]  ;;  %v6060_v22 = vmul.f32 %v4503_v9, %v431_v43  ;;  %v432_v2 = vld [vmem:[%s4482_s18 + $0x7c0] sm:$0xff]  ;;  %v6077_v43 = vmul.f32 %v4503_v9, %v427_v48 }
 0x136   : > { %9923 = vst [vmem:[#allocation29_spill] sm:$0xff] %v6033_v61  ;;  %v6044_v11 = vadd.f32 %v2051_v25, %v9925_v36  ;;  %v6063_v25 = vmul.f32 %v4497_v6, %v424_v40  ;;  %v433_v26 = vld [vmem:[%s4482_s18 + $0x7c8] sm:$0xff]  ;;  %v6071_v18 = vmul.f32 %v4499_v7, %v425_v31  ;;  %v1523_v40 = vadd.f32 %v6054_v1, %v6049_v27 }
 0x137   : > { %3064 = vst [vmem:[%s5588_s27 + $0x1a0] sm:$0xff] %v5856_v28  ;;  %v6057_v28 = vmul.f32 %v4501_v8, %v430_v49  ;;  %v6074_v49 = vmul.f32 %v4501_v8, %v426_v54  ;;  %v1879_v36 = vsub.f32 %v5513_v63, %v1317_v0  ;;  %v1878_v31 = vsub.f32 %v5513_v63, %v1312_v3  ;;  %v3775_v0 = vld [vmem:[%s4482_s18 + $0x220] sm:$0xff] }
 0x138   : > { %9926 = vst [vmem:[#allocation32_spill] sm:$0xff] %v6049_v27  ;;  %v1518_v48 = vadd.f32 %v6071_v18, %v6063_v25 }
 0x139   : > { %3065 = vst [vmem:[%s5588_s27 + $0x1a8] sm:$0xff] %v5859_v34  ;;  %v1514_v34 = vadd.f32 %v1513_v21, %v6030_v13  ;;  %v6095_v21 = vmul.f32 %v4499_v7, %v433_v26  ;;  %v1524_v3 = vadd.f32 %v1523_v40, %v6057_v28  ;;  %v3778_v26 = vld [vmem:[%s4482_s18 + $0x238] sm:$0xff] }
 0x13a   : > { %9927 = vst [vmem:[#allocation24_spill] sm:$0xff] %v6054_v1  ;;  %v3777_v1 = vld [vmem:[%s4482_s18 + $0x230] sm:$0xff] }
 0x13b   : > { %9928 = vst [vmem:[#allocation25_spill] sm:$0xff] %v6057_v28  ;;  %v1515_v54 = vadd.f32 %v1514_v34, %v6033_v61  ;;  %v9945_v28 = vld [vmem:[#allocation61_spill] sm:$0xff]  ;;  %v1327_v61 = vpop.xlane.xlu0 %1326 }
 0x13c   : > { %9929 = vst [vmem:[#allocation30_spill] sm:$0xff] %v6060_v22 }
 0x13d   : > { %9930 = vst [vmem:[#allocation35_spill] sm:$0xff] %v6063_v25  ;;  %1516 = vadd.xlane.f32.xlu2 %v1515_v54  ;;  %v9937_v25 = vld [vmem:[#allocation52_spill] sm:$0xff]  ;;  %v9938_v54 = vld [vmem:[#allocation55_spill] sm:$0xff] }
 0x13e   : > { %3066 = vst [vmem:[%s5588_s27 + $0x1b0] sm:$0xff] %v5869_v14  ;;  %v1877_v14 = vsub.f32 %v5513_v63, %v1307_v41  ;;  %v3776_v41 = vld [vmem:[%s4482_s18 + $0x228] sm:$0xff] }
 0x13f   : > { %9931 = vst [vmem:[#allocation27_spill] sm:$0xff] %v6071_v18 }
 0x140   : > { %9932 = vst [vmem:[#allocation28_spill] sm:$0xff] %v6074_v49  ;;  %v2057_v34 = vmul.f32 %v3776_v41, %v1877_v14  ;;  %v2058_v27 = vmul.f32 %v3777_v1, %v1877_v14  ;;  %v2059_v18 = vmul.f32 %v3778_v26, %v1877_v14  ;;  %v9936_v41 = vld [vmem:[#allocation51_spill] sm:$0xff] }
 0x141   : > { %9933 = vst [vmem:[#allocation31_spill] sm:$0xff] %v6077_v43 }
 0x142   : > { %3067 = vst [vmem:[%s5588_s27 + $0x1b8] sm:$0xff] %v5872_v35  ;;  %v6092_v35 = vmul.f32 %v4497_v6, %v432_v2  ;;  %v1519_v2 = vadd.f32 %v1518_v48, %v6074_v49  ;;  %v6118_v48 = vadd.f32 %v2058_v27, %v9938_v54  ;;  %v3782_v27 = vld [vmem:[%s4482_s18 + $0x278] sm:$0xff]  ;;  %v434_v54 = vld [vmem:[%s4482_s18 + $0x7d0] sm:$0xff] }
 0x143   : > { %3060 = vst [vmem:[%s5588_s27 + $0x180] sm:$0xff] %v5876_v52  ;;  %v2056_v52 = vmul.f32 %v3775_v0, %v1877_v14  ;;  %v1525_v0 = vadd.f32 %v1524_v3, %v6060_v22  ;;  %v3780_v3 = vld [vmem:[%s4482_s18 + $0x268] sm:$0xff]  ;;  %v9944_v49 = vld [vmem:[#allocation60_spill] sm:$0xff] }
 0x144   : > { %9934 = vst [vmem:[#allocation38_spill] sm:$0xff] %v6092_v35  ;;  %v1520_v14 = vadd.f32 %v1519_v2, %v6077_v43  ;;  %v3783_v2 = vld [vmem:[%s4482_s18 + $0x240] sm:$0xff] }
 0x145   : > { %9935 = vst [vmem:[#allocation33_spill] sm:$0xff] %v6095_v21  ;;  %v6112_v1 = vadd.f32 %v2056_v52, %v9936_v41  ;;  %v3781_v52 = vld [vmem:[%s4482_s18 + $0x270] sm:$0xff]  ;;  %1526 = vadd.xlane.f32.xlu1 %v1525_v0  ;;  %v436_v22 = vld [vmem:[%s4482_s18 + $0x7e0] sm:$0xff] }
 0x146   : > { %3061 = vst [vmem:[%s5588_s27 + $0x188] sm:$0xff] %v5884_v24  ;;  %v3779_v24 = vld [vmem:[%s4482_s18 + $0x260] sm:$0xff]  ;;  %v2066_v41 = vmul.f32 %v3781_v52, %v1879_v36  ;;  %1521 = vadd.xlane.f32.xlu0 %v1520_v14  ;;  %v3785_v14 = vld [vmem:[%s4482_s18 + $0x250] sm:$0xff] }
 0x147   : > { %3062 = vst [vmem:[%s5588_s27 + $0x190] sm:$0xff] %v5887_v15  ;;  %v2064_v40 = vmul.f32 %v3779_v24, %v1879_v36  ;;  %v6115_v15 = vadd.f32 %v2057_v34, %v9937_v25  ;;  %v2065_v24 = vmul.f32 %v3780_v3, %v1879_v36  ;;  %v2067_v25 = vmul.f32 %v3782_v27, %v1879_v36  ;;  %v9942_v3 = vld [vmem:[#allocation65_spill] sm:$0xff] }
 0x148   : > { %3063 = vst [vmem:[%s5588_s27 + $0x198] sm:$0xff] %v5901_v20  ;;  %v9939_v20 = vld [vmem:[#allocation62_spill] sm:$0xff]  ;;  %v6143_v36 = vadd.f32 %v2066_v41, %v9942_v3  ;;  %v440_v27 = vld [vmem:[%s4482_s18 + $0x800] sm:$0xff]  ;;  %v2062_v43 = vmul.f32 %v3785_v14, %v1878_v31  ;;  %v439_v14 = vld [vmem:[%s4482_s18 + $0x7f8] sm:$0xff] }
 0x149   : > { %3068 = vst [vmem:[%s5588_s27 + $0x1c0] sm:$0xff] %v5975_v32  ;;  %v6124_v26 = vadd.f32 %v2059_v18, %v9939_v20  ;;  %v9940_v32 = vld [vmem:[#allocation57_spill] sm:$0xff]  ;;  %v2060_v18 = vmul.f32 %v3783_v2, %v1878_v31  ;;  %v435_v20 = vld [vmem:[%s4482_s18 + $0x7d8] sm:$0xff]  ;;  %v442_v3 = vld [vmem:[%s4482_s18 + $0x810] sm:$0xff] }
 0x14a   : > { %3069 = vst [vmem:[%s5588_s27 + $0x1c8] sm:$0xff] %v5978_v62  ;;  %v6132_v34 = vadd.f32 %v2064_v40, %v9940_v32  ;;  %v9941_v62 = vld [vmem:[#allocation58_spill] sm:$0xff]  ;;  %v9943_v2 = vld [vmem:[#allocation68_spill] sm:$0xff] }
 0x14b   : > { %3070 = vst [vmem:[%s5588_s27 + $0x1d0] sm:$0xff] %v5984_v17  ;;  %v6140_v0 = vadd.f32 %v2065_v24, %v9941_v62  ;;  %v3784_v40 = vld [vmem:[%s4482_s18 + $0x248] sm:$0xff]  ;;  %v6151_v17 = vadd.f32 %v2067_v25, %v9943_v2  ;;  %v3786_v24 = vld [vmem:[%s4482_s18 + $0x258] sm:$0xff]  ;;  %v6156_v41 = vadd.f32 %v2060_v18, %v9944_v49  ;;  %v6167_v25 = vmul.f32 %v4501_v8, %v434_v54  ;;  %v438_v18 = vld [vmem:[%s4482_s18 + $0x7f0] sm:$0xff] }
 0x14c   : > { %v2061_v52 = vmul.f32 %v3784_v40, %v1878_v31  ;;  %v441_v32 = vld [vmem:[%s4482_s18 + $0x808] sm:$0xff]  ;;  %3071 = vst [vmem:[%s5588_s27 + $0x1d8] sm:$0xff] %v5987_v29  ;;  %v2063_v62 = vmul.f32 %v3786_v24, %v1878_v31  ;;  %v443_v40 = vld [vmem:[%s4482_s18 + $0x818] sm:$0xff]  ;;  %v6170_v2 = vmul.f32 %v4503_v9, %v435_v20  ;;  %v1528_v31 = vadd.f32 %v6095_v21, %v6092_v35  ;;  %v1332_v35 = vpop.xlane.xlu1 %1331 }
 0x14d   : > { %3076 = vst [vmem:[%s5588_s27 + $0x200] sm:$0xff] %v5995_v56  ;;  %v437_v49 = vld [vmem:[%s4482_s18 + $0x7e8] sm:$0xff]  ;;  %v1322_v56 = vpop.xlane.xlu2 %1321  ;;  %v9948_v54 = vld [vmem:[#allocation71_spill] sm:$0xff]  ;;  %v6186_v20 = vmul.f32 %v4497_v6, %v440_v27  ;;  %v6189_v21 = vmul.f32 %v4499_v7, %v441_v32  ;;  %v6201_v27 = vmul.f32 %v4497_v6, %v436_v22 }
 0x14e   : > { %v6164_v29 = vadd.f32 %v2061_v52, %v9945_v28  ;;  %9946 = vst [vmem:[#allocation34_spill] sm:$0xff] %v6170_v2  ;;  %v9947_v28 = vld [vmem:[#allocation66_spill] sm:$0xff]  ;;  %v6183_v24 = vadd.f32 %v2063_v62, %v9948_v54  ;;  %v1529_v13 = vadd.f32 %v1528_v31, %v6167_v25  ;;  %v444_v62 = vld [vmem:[%s4482_s18 + $0x820] sm:$0xff]  ;;  %v6210_v32 = vmul.f32 %v4499_v7, %v437_v49 }
 0x14f   : > { %3077 = vst [vmem:[%s5588_s27 + $0x208] sm:$0xff] %v6002_v30  ;;  %v6180_v52 = vadd.f32 %v2062_v43, %v9947_v28  ;;  %v6195_v30 = vmul.f32 %v4501_v8, %v442_v3  ;;  %v6198_v43 = vmul.f32 %v4503_v9, %v443_v40  ;;  %v445_v28 = vld [vmem:[%s4482_s18 + $0x828] sm:$0xff]  ;;  %v6213_v3 = vmul.f32 %v4501_v8, %v438_v18  ;;  %v3789_v54 = vld [vmem:[%s4482_s18 + $0x290] sm:$0xff] }
 0x150   : > { %9949 = vst [vmem:[#allocation41_spill] sm:$0xff] %v6186_v20  ;;  %v6216_v40 = vmul.f32 %v4503_v9, %v439_v14  ;;  %v1530_v22 = vadd.f32 %v1529_v13, %v6170_v2  ;;  %v1882_v31 = vsub.f32 %v5513_v63, %v1332_v35  ;;  %v1881_v49 = vsub.f32 %v5513_v63, %v1327_v61  ;;  %v3787_v61 = vld [vmem:[%s4482_s18 + $0x280] sm:$0xff]  ;;  %v9972_v2 = vld [vmem:[#allocation83_spill] sm:$0xff] }
 0x151   : > { %9950 = vst [vmem:[#allocation44_spill] sm:$0xff] %v6189_v21  ;;  %v1533_v14 = vadd.f32 %v6210_v32, %v6201_v27  ;;  %v6233_v13 = vmul.f32 %v4499_v7, %v445_v28 }
 0x152   : > { %3078 = vst [vmem:[%s5588_s27 + $0x210] sm:$0xff] %v6011_v44  ;;  %v1538_v44 = vadd.f32 %v6189_v21, %v6186_v20  ;;  %1531 = vadd.xlane.f32.xlu2 %v1530_v22  ;;  %v449_v21 = vld [vmem:[%s4482_s18 + $0x848] sm:$0xff] }
 0x153   : > { %9951 = vst [vmem:[#allocation36_spill] sm:$0xff] %v6195_v30  ;;  %v1534_v28 = vadd.f32 %v1533_v14, %v6213_v3  ;;  %v3792_v14 = vld [vmem:[%s4482_s18 + $0x2c8] sm:$0xff] }
 0x154   : > { %9952 = vst [vmem:[#allocation37_spill] sm:$0xff] %v6198_v43  ;;  %v1539_v18 = vadd.f32 %v1538_v44, %v6195_v30  ;;  %v9969_v20 = vld [vmem:[#allocation73_spill] sm:$0xff] }
 0x155   : > { %9953 = vst [vmem:[#allocation42_spill] sm:$0xff] %v6201_v27 }
 0x156   : > { %3079 = vst [vmem:[%s5588_s27 + $0x218] sm:$0xff] %v6014_v23  ;;  %v1880_v23 = vsub.f32 %v5513_v63, %v1322_v56 }
 0x157   : > { %9954 = vst [vmem:[#allocation47_spill] sm:$0xff] %v6210_v32  ;;  %v3790_v32 = vld [vmem:[%s4482_s18 + $0x298] sm:$0xff] }
 0x158   : > { %9955 = vst [vmem:[#allocation39_spill] sm:$0xff] %v6213_v3  ;;  %v2068_v35 = vmul.f32 %v3787_v61, %v1880_v23  ;;  %v2070_v44 = vmul.f32 %v3789_v54, %v1880_v23  ;;  %v2071_v27 = vmul.f32 %v3790_v32, %v1880_v23  ;;  %v9959_v61 = vld [vmem:[#allocation63_spill] sm:$0xff]  ;;  %v9960_v54 = vld [vmem:[#allocation64_spill] sm:$0xff]  ;;  %v2077_v3 = vmul.f32 %v3792_v14, %v1882_v31 }
 0x159   : > { %9956 = vst [vmem:[#allocation40_spill] sm:$0xff] %v6216_v40  ;;  %v1535_v32 = vadd.f32 %v1534_v28, %v6216_v40  ;;  %v447_v14 = vld [vmem:[%s4482_s18 + $0x838] sm:$0xff] }
 0x15a   : > { %3072 = vst [vmem:[%s5588_s27 + $0x1e0] sm:$0xff] %v6024_v16  ;;  %v6230_v16 = vmul.f32 %v4497_v6, %v444_v62  ;;  %v1540_v62 = vadd.f32 %v1539_v18, %v6198_v43  ;;  %v448_v43 = vld [vmem:[%s4482_s18 + $0x840] sm:$0xff] }
 0x15b   : > { %3073 = vst [vmem:[%s5588_s27 + $0x1e8] sm:$0xff] %v6027_v5  ;;  %v3788_v5 = vld [vmem:[%s4482_s18 + $0x288] sm:$0xff]  ;;  %1536 = vadd.xlane.f32.xlu0 %v1535_v32  ;;  %v3798_v32 = vld [vmem:[%s4482_s18 + $0x2b8] sm:$0xff] }
 0x15c   : > { %9957 = vst [vmem:[#allocation43_spill] sm:$0xff] %v6230_v16  ;;  %v2069_v56 = vmul.f32 %v3788_v5, %v1880_v23  ;;  %v6249_v5 = vadd.f32 %v2068_v35, %v9959_v61  ;;  %1541 = vadd.xlane.f32.xlu1 %v1540_v62  ;;  %v3793_v35 = vld [vmem:[%s4482_s18 + $0x2d0] sm:$0xff] }
 0x15d   : > { %9958 = vst [vmem:[#allocation50_spill] sm:$0xff] %v6233_v13  ;;  %v9964_v62 = vld [vmem:[#allocation70_spill] sm:$0xff] }
 0x15e   : > { %3074 = vst [vmem:[%s5588_s27 + $0x1f0] sm:$0xff] %v6041_v10  ;;  %v3791_v10 = vld [vmem:[%s4482_s18 + $0x2c0] sm:$0xff]  ;;  %v6252_v30 = vadd.f32 %v2069_v56, %v9960_v54  ;;  %v2078_v56 = vmul.f32 %v3793_v35, %v1882_v31  ;;  %v6273_v28 = vadd.f32 %v2077_v3, %v9964_v62  ;;  %v3797_v35 = vld [vmem:[%s4482_s18 + $0x2b0] sm:$0xff] }
 0x15f   : > { %3075 = vst [vmem:[%s5588_s27 + $0x1f8] sm:$0xff] %v6044_v11  ;;  %v2076_v22 = vmul.f32 %v3791_v10, %v1882_v31  ;;  %v9961_v11 = vld [vmem:[#allocation67_spill] sm:$0xff]  ;;  %v9963_v54 = vld [vmem:[#allocation69_spill] sm:$0xff] }
 0x160   : > { %3080 = vst [vmem:[%s5588_s27 + $0x220] sm:$0xff] %v6112_v1  ;;  %v6255_v18 = vadd.f32 %v2070_v44, %v9961_v11  ;;  %v9962_v1 = vld [vmem:[#allocation74_spill] sm:$0xff]  ;;  %v3794_v44 = vld [vmem:[%s4482_s18 + $0x2d8] sm:$0xff]  ;;  %v452_v3 = vld [vmem:[%s4482_s18 + $0x860] sm:$0xff] }
 0x161   : > { %3081 = vst [vmem:[%s5588_s27 + $0x228] sm:$0xff] %v6115_v15  ;;  %v6262_v23 = vadd.f32 %v2071_v27, %v9962_v1  ;;  %v446_v10 = vld [vmem:[%s4482_s18 + $0x830] sm:$0xff]  ;;  %v2079_v61 = vmul.f32 %v3794_v44, %v1882_v31  ;;  %v6270_v15 = vadd.f32 %v2076_v22, %v9963_v54  ;;  %v3795_v27 = vld [vmem:[%s4482_s18 + $0x2a0] sm:$0xff]  ;;  %v3796_v31 = vld [vmem:[%s4482_s18 + $0x2a8] sm:$0xff]  ;;  %v2074_v44 = vmul.f32 %v3797_v35, %v1881_v49 }
 0x162   : > { %3082 = vst [vmem:[%s5588_s27 + $0x230] sm:$0xff] %v6118_v48  ;;  %v2072_v11 = vmul.f32 %v3795_v27, %v1881_v49  ;;  %v9965_v48 = vld [vmem:[#allocation77_spill] sm:$0xff]  ;;  %v2073_v22 = vmul.f32 %v3796_v31, %v1881_v49  ;;  %v454_v62 = vld [vmem:[%s4482_s18 + $0x870] sm:$0xff]  ;;  %v6297_v31 = vmul.f32 %v4501_v8, %v446_v10  ;;  %v455_v35 = vld [vmem:[%s4482_s18 + $0x878] sm:$0xff] }
 0x163   : > { %3083 = vst [vmem:[%s5588_s27 + $0x238] sm:$0xff] %v6124_v26  ;;  %v6280_v1 = vadd.f32 %v2078_v56, %v9965_v48  ;;  %v453_v54 = vld [vmem:[%s4482_s18 + $0x868] sm:$0xff]  ;;  %v9966_v26 = vld [vmem:[#allocation80_spill] sm:$0xff]  ;;  %v2075_v56 = vmul.f32 %v3798_v32, %v1881_v49  ;;  %v6311_v49 = vmul.f32 %v4503_v9, %v447_v14  ;;  %v450_v10 = vld [vmem:[%s4482_s18 + $0x850] sm:$0xff]  ;;  %v6329_v14 = vmul.f32 %v4501_v8, %v454_v62 }
 0x164   : > { %3088 = vst [vmem:[%s5588_s27 + $0x260] sm:$0xff] %v6132_v34  ;;  %v6290_v27 = vadd.f32 %v2079_v61, %v9966_v26  ;;  %v9967_v48 = vld [vmem:[#allocation72_spill] sm:$0xff]  ;;  %v6305_v34 = vadd.f32 %v2073_v22, %v9969_v20  ;;  %v9970_v61 = vld [vmem:[#allocation78_spill] sm:$0xff]  ;;  %v6323_v20 = vmul.f32 %v4497_v6, %v452_v3  ;;  %v6326_v22 = vmul.f32 %v4499_v7, %v453_v54 }
 0x165   : > { %v6294_v40 = vadd.f32 %v2072_v11, %v9967_v48  ;;  %9968 = vst [vmem:[#allocation45_spill] sm:$0xff] %v6297_v31  ;;  %v6308_v26 = vadd.f32 %v2074_v44, %v9970_v61  ;;  %v1543_v11 = vadd.f32 %v6233_v13, %v6230_v16  ;;  %v451_v32 = vld [vmem:[%s4482_s18 + $0x858] sm:$0xff]  ;;  %v1337_v48 = vpop.xlane.xlu2 %1336  ;;  %v1347_v44 = vpop.xlane.xlu1 %1346  ;;  %v6338_v3 = vmul.f32 %v4497_v6, %v448_v43 }
 0x166   : > { %3089 = vst [vmem:[%s5588_s27 + $0x268] sm:$0xff] %v6140_v0  ;;  %v6320_v0 = vadd.f32 %v2075_v56, %v9972_v2  ;;  %v1342_v61 = vpop.xlane.xlu0 %1341  ;;  %v6335_v2 = vmul.f32 %v4503_v9, %v455_v35  ;;  %v6341_v54 = vmul.f32 %v4499_v7, %v449_v21  ;;  %v1553_v62 = vadd.f32 %v6326_v22, %v6323_v20 }
 0x167   : > { %9971 = vst [vmem:[#allocation46_spill] sm:$0xff] %v6311_v49  ;;  %v6351_v56 = vmul.f32 %v4503_v9, %v451_v32  ;;  %v1883_v43 = vsub.f32 %v5513_v63, %v1337_v48  ;;  %v1885_v35 = vsub.f32 %v5513_v63, %v1347_v44  ;;  %v3799_v32 = vld [vmem:[%s4482_s18 + $0x2e0] sm:$0xff] }
 0x168   : > { %3090 = vst [vmem:[%s5588_s27 + $0x270] sm:$0xff] %v6143_v36  ;;  %v1544_v36 = vadd.f32 %v1543_v11, %v6297_v31  ;;  %v1884_v11 = vsub.f32 %v5513_v63, %v1342_v61  ;;  %v3802_v61 = vld [vmem:[%s4482_s18 + $0x2f8] sm:$0xff] }
 0x169   : > { %9973 = vst [vmem:[#allocation53_spill] sm:$0xff] %v6323_v20  ;;  %v2080_v48 = vmul.f32 %v3799_v32, %v1883_v43  ;;  %v3801_v20 = vld [vmem:[%s4482_s18 + $0x2f0] sm:$0xff] }
 0x16a   : > { %9974 = vst [vmem:[#allocation56_spill] sm:$0xff] %v6326_v22  ;;  %v1545_v21 = vadd.f32 %v1544_v36, %v6311_v49  ;;  %v3800_v22 = vld [vmem:[%s4482_s18 + $0x2e8] sm:$0xff]  ;;  %v2082_v36 = vmul.f32 %v3801_v20, %v1883_v43  ;;  %v460_v49 = vld [vmem:[%s4482_s18 + $0x8a0] sm:$0xff] }
 0x16b   : > { %9975 = vst [vmem:[#allocation48_spill] sm:$0xff] %v6329_v14 }
 0x16c   : > { %3091 = vst [vmem:[%s5588_s27 + $0x278] sm:$0xff] %v6151_v17  ;;  %v6348_v17 = vmul.f32 %v4501_v8, %v450_v10  ;;  %v1554_v10 = vadd.f32 %v1553_v62, %v6329_v14  ;;  %1546 = vadd.xlane.f32.xlu2 %v1545_v21  ;;  %v9983_v21 = vld [vmem:[#allocation79_spill] sm:$0xff] }
 0x16d   : > { %9976 = vst [vmem:[#allocation49_spill] sm:$0xff] %v6335_v2  ;;  %v467_v14 = vld [vmem:[%s4482_s18 + $0x8d8] sm:$0xff]  ;;  %v1362_v13 = vpop.xlane.xlu1 %1361 }
 0x16e   : > { %9977 = vst [vmem:[#allocation54_spill] sm:$0xff] %v6338_v3  ;;  %v1555_v32 = vadd.f32 %v1554_v10, %v6335_v2 }
 0x16f   : > { %9978 = vst [vmem:[#allocation59_spill] sm:$0xff] %v6341_v54 }
 0x170   : > { %3084 = vst [vmem:[%s5588_s27 + $0x240] sm:$0xff] %v6156_v41  ;;  %v1548_v41 = vadd.f32 %v6341_v54, %v6338_v3  ;;  %v2083_v54 = vmul.f32 %v3802_v61, %v1883_v43  ;;  %v9982_v3 = vld [vmem:[#allocation76_spill] sm:$0xff]  ;;  %v3804_v61 = vld [vmem:[%s4482_s18 + $0x328] sm:$0xff]  ;;  %1556 = vadd.xlane.f32.xlu1 %v1555_v32 }
 0x171   : > { %9979 = vst [vmem:[#allocation51_spill] sm:$0xff] %v6348_v17 }
 0x172   : > { %9980 = vst [vmem:[#allocation52_spill] sm:$0xff] %v6351_v56  ;;  %v1549_v44 = vadd.f32 %v1548_v41, %v6348_v17  ;;  %v6382_v41 = vadd.f32 %v2082_v36, %v9983_v21  ;;  %v9985_v36 = vld [vmem:[#allocation81_spill] sm:$0xff]  ;;  %v3810_v17 = vld [vmem:[%s4482_s18 + $0x318] sm:$0xff] }
 0x173   : > { %3085 = vst [vmem:[%s5588_s27 + $0x248] sm:$0xff] %v6164_v29  ;;  %v2081_v29 = vmul.f32 %v3800_v22, %v1883_v43  ;;  %v9981_v22 = vld [vmem:[#allocation75_spill] sm:$0xff]  ;;  %v456_v21 = vld [vmem:[%s4482_s18 + $0x880] sm:$0xff] }
 0x174   : > { %3086 = vst [vmem:[%s5588_s27 + $0x250] sm:$0xff] %v6180_v52  ;;  %v3803_v52 = vld [vmem:[%s4482_s18 + $0x320] sm:$0xff]  ;;  %v6376_v20 = vadd.f32 %v2080_v48, %v9981_v22  ;;  %v1550_v43 = vadd.f32 %v1549_v44, %v6351_v56  ;;  %v2089_v48 = vmul.f32 %v3804_v61, %v1885_v35  ;;  %v458_v61 = vld [vmem:[%s4482_s18 + $0x890] sm:$0xff]  ;;  %v465_v56 = vld [vmem:[%s4482_s18 + $0x8c8] sm:$0xff] }
 0x175   : > { %3087 = vst [vmem:[%s5588_s27 + $0x258] sm:$0xff] %v6183_v24  ;;  %v2088_v62 = vmul.f32 %v3803_v52, %v1885_v35  ;;  %v6379_v24 = vadd.f32 %v2081_v29, %v9982_v3  ;;  %v3805_v52 = vld [vmem:[%s4482_s18 + $0x330] sm:$0xff]  ;;  %v3806_v29 = vld [vmem:[%s4482_s18 + $0x338] sm:$0xff]  ;;  %v3807_v22 = vld [vmem:[%s4482_s18 + $0x300] sm:$0xff] }
 0x176   : > { %3092 = vst [vmem:[%s5588_s27 + $0x280] sm:$0xff] %v6249_v5  ;;  %v9984_v5 = vld [vmem:[#allocation86_spill] sm:$0xff]  ;;  %v2090_v3 = vmul.f32 %v3805_v52, %v1885_v35  ;;  %1551 = vadd.xlane.f32.xlu0 %v1550_v43 }
 0x177   : > { %3093 = vst [vmem:[%s5588_s27 + $0x288] sm:$0xff] %v6252_v30  ;;  %v6388_v10 = vadd.f32 %v2083_v54, %v9984_v5  ;;  %v2091_v30 = vmul.f32 %v3806_v29, %v1885_v35  ;;  %v6396_v44 = vadd.f32 %v2088_v62, %v9985_v36  ;;  %v2084_v54 = vmul.f32 %v3807_v22, %v1884_v11  ;;  %v457_v5 = vld [vmem:[%s4482_s18 + $0x888] sm:$0xff]  ;;  %v459_v36 = vld [vmem:[%s4482_s18 + $0x898] sm:$0xff]  ;;  %v464_v22 = vld [vmem:[%s4482_s18 + $0x8c0] sm:$0xff] }
 0x178   : > { %3094 = vst [vmem:[%s5588_s27 + $0x290] sm:$0xff] %v6255_v18  ;;  %v9986_v18 = vld [vmem:[#allocation82_spill] sm:$0xff]  ;;  %v9987_v35 = vld [vmem:[#allocation89_spill] sm:$0xff] }
 0x179   : > { %3095 = vst [vmem:[%s5588_s27 + $0x298] sm:$0xff] %v6262_v23  ;;  %v6405_v32 = vadd.f32 %v2089_v48, %v9986_v18  ;;  %v6408_v52 = vadd.f32 %v2090_v3, %v9987_v35  ;;  %v3808_v62 = vld [vmem:[%s4482_s18 + $0x308] sm:$0xff]  ;;  %v9988_v23 = vld [vmem:[#allocation92_spill] sm:$0xff]  ;;  %v3809_v48 = vld [vmem:[%s4482_s18 + $0x310] sm:$0xff]  ;;  %v2087_v3 = vmul.f32 %v3810_v17, %v1884_v11  ;;  %v6439_v17 = vmul.f32 %v4501_v8, %v458_v61 }
 0x17a   : > { %v2085_v29 = vmul.f32 %v3808_v62, %v1884_v11  ;;  %3100 = vst [vmem:[%s5588_s27 + $0x2c0] sm:$0xff] %v6270_v15  ;;  %v6417_v43 = vadd.f32 %v2091_v30, %v9988_v23  ;;  %v2086_v18 = vmul.f32 %v3809_v48, %v1884_v11  ;;  %v9989_v35 = vld [vmem:[#allocation84_spill] sm:$0xff]  ;;  %v466_v62 = vld [vmem:[%s4482_s18 + $0x8d0] sm:$0xff]  ;;  %v9990_v15 = vld [vmem:[#allocation85_spill] sm:$0xff]  ;;  %v6433_v30 = vmul.f32 %v4497_v6, %v456_v21 }
 0x17b   : > { %v6422_v2 = vadd.f32 %v2084_v54, %v9989_v35  ;;  %3101 = vst [vmem:[%s5588_s27 + $0x2c8] sm:$0xff] %v6273_v28  ;;  %v6436_v23 = vmul.f32 %v4499_v7, %v457_v5  ;;  %v461_v11 = vld [vmem:[%s4482_s18 + $0x8a8] sm:$0xff]  ;;  %v462_v54 = vld [vmem:[%s4482_s18 + $0x8b0] sm:$0xff]  ;;  %v463_v48 = vld [vmem:[%s4482_s18 + $0x8b8] sm:$0xff]  ;;  %v6453_v5 = vmul.f32 %v4503_v9, %v459_v36  ;;  %v6456_v61 = vmul.f32 %v4497_v6, %v464_v22  ;;  %v1357_v22 = vpop.xlane.xlu0 %1356 }
 0x17c   : > { %v6430_v31 = vadd.f32 %v2085_v29, %v9990_v15  ;;  %9991 = vst [vmem:[#allocation55_spill] sm:$0xff] %v6433_v30  ;;  %v9994_v28 = vld [vmem:[#allocation90_spill] sm:$0xff]  ;;  %v9995_v35 = vld [vmem:[#allocation95_spill] sm:$0xff]  ;;  %v1352_v15 = vpop.xlane.xlu2 %1351  ;;  %v6469_v36 = vmul.f32 %v4503_v9, %v467_v14 }
 0x17d   : > { %9992 = vst [vmem:[#allocation62_spill] sm:$0xff] %v6436_v23  ;;  %v6447_v29 = vadd.f32 %v2086_v18, %v9994_v28  ;;  %v6450_v21 = vadd.f32 %v2087_v3, %v9995_v35  ;;  %v6463_v18 = vmul.f32 %v4499_v7, %v465_v56  ;;  %v6466_v3 = vmul.f32 %v4501_v8, %v466_v62  ;;  %v468_v28 = vld [vmem:[%s4482_s18 + $0x8e0] sm:$0xff]  ;;  %v469_v35 = vld [vmem:[%s4482_s18 + $0x8e8] sm:$0xff] }
 0x17e   : > { %9993 = vst [vmem:[#allocation57_spill] sm:$0xff] %v6439_v17  ;;  %v6482_v56 = vmul.f32 %v4501_v8, %v462_v54  ;;  %v6485_v62 = vmul.f32 %v4503_v9, %v463_v48  ;;  %v1887_v48 = vsub.f32 %v5513_v63, %v1357_v22 }
 0x17f   : > { %3102 = vst [vmem:[%s5588_s27 + $0x2d0] sm:$0xff] %v6280_v1  ;;  %v1558_v1 = vadd.f32 %v6436_v23, %v6433_v30  ;;  %v6479_v23 = vmul.f32 %v4499_v7, %v461_v11  ;;  %v1888_v11 = vsub.f32 %v5513_v63, %v1362_v13 }
 0x180   : > { %9996 = vst [vmem:[#allocation58_spill] sm:$0xff] %v6453_v5 }
 0x181   : > { %9997 = vst [vmem:[#allocation65_spill] sm:$0xff] %v6456_v61  ;;  %v1559_v14 = vadd.f32 %v1558_v1, %v6439_v17  ;;  %v6503_v1 = vmul.f32 %v4499_v7, %v469_v35 }
 0x182   : > { %3103 = vst [vmem:[%s5588_s27 + $0x2d8] sm:$0xff] %v6290_v27  ;;  %v6476_v27 = vmul.f32 %v4497_v6, %v460_v49  ;;  %v1886_v49 = vsub.f32 %v5513_v63, %v1352_v15  ;;  %v3811_v15 = vld [vmem:[%s4482_s18 + $0x340] sm:$0xff] }
 0x183   : > { %9998 = vst [vmem:[#allocation68_spill] sm:$0xff] %v6463_v18  ;;  %v1560_v13 = vadd.f32 %v1559_v14, %v6453_v5  ;;  %v1377_v5 = vpop.xlane.xlu1 %1376  ;;  %v1372_v30 = vpop.xlane.xlu0 %1371 }
 0x184   : > { %9999 = vst [vmem:[#allocation60_spill] sm:$0xff] %v6466_v3  ;;  %v1563_v54 = vadd.f32 %v6479_v23, %v6476_v27 }
 0x185   : > { %10000 = vst [vmem:[#allocation61_spill] sm:$0xff] %v6469_v36  ;;  %1561 = vadd.xlane.f32.xlu2 %v1560_v13 }
 0x186   : > { %3096 = vst [vmem:[%s5588_s27 + $0x2a0] sm:$0xff] %v6294_v40  ;;  %v1568_v40 = vadd.f32 %v6463_v18, %v6456_v61  ;;  %v2092_v18 = vmul.f32 %v3811_v15, %v1886_v49  ;;  %v1564_v22 = vadd.f32 %v1563_v54, %v6482_v56  ;;  %v3814_v61 = vld [vmem:[%s4482_s18 + $0x358] sm:$0xff] }
 0x187   : > { %10001 = vst [vmem:[#allocation66_spill] sm:$0xff] %v6476_v27  ;;  %v2095_v17 = vmul.f32 %v3814_v61, %v1886_v49  ;;  %v10006_v54 = vld [vmem:[#allocation88_spill] sm:$0xff] }
 0x188   : > { %10002 = vst [vmem:[#allocation71_spill] sm:$0xff] %v6479_v23  ;;  %v3812_v23 = vld [vmem:[%s4482_s18 + $0x348] sm:$0xff]  ;;  %v1565_v61 = vadd.f32 %v1564_v22, %v6485_v62 }
 0x189   : > { %10003 = vst [vmem:[#allocation63_spill] sm:$0xff] %v6482_v56  ;;  %v2093_v27 = vmul.f32 %v3812_v23, %v1886_v49  ;;  %v10005_v23 = vld [vmem:[#allocation87_spill] sm:$0xff] }
 0x18a   : > { %10004 = vst [vmem:[#allocation64_spill] sm:$0xff] %v6485_v62  ;;  %1566 = vadd.xlane.f32.xlu0 %v1565_v61  ;;  %v10012_v61 = vld [vmem:[#allocation106_spill] sm:$0xff]  ;;  %v3822_v62 = vld [vmem:[%s4482_s18 + $0x378] sm:$0xff] }
 0x18b   : > { %3097 = vst [vmem:[%s5588_s27 + $0x2a8] sm:$0xff] %v6305_v34  ;;  %v6500_v34 = vmul.f32 %v4497_v6, %v468_v28  ;;  %v3813_v28 = vld [vmem:[%s4482_s18 + $0x350] sm:$0xff]  ;;  %v6524_v15 = vadd.f32 %v2093_v27, %v10006_v54 }
 0x18c   : > { %3098 = vst [vmem:[%s5588_s27 + $0x2b0] sm:$0xff] %v6308_v26  ;;  %v1569_v26 = vadd.f32 %v1568_v40, %v6466_v3  ;;  %v2094_v35 = vmul.f32 %v3813_v28, %v1886_v49  ;;  %v10007_v49 = vld [vmem:[#allocation91_spill] sm:$0xff]  ;;  %v10013_v3 = vld [vmem:[#allocation96_spill] sm:$0xff] }
 0x18d   : > { %3099 = vst [vmem:[%s5588_s27 + $0x2b8] sm:$0xff] %v6320_v0  ;;  %v3815_v0 = vld [vmem:[%s4482_s18 + $0x380] sm:$0xff]  ;;  %v3817_v27 = vld [vmem:[%s4482_s18 + $0x390] sm:$0xff] }
 0x18e   : > { %3104 = vst [vmem:[%s5588_s27 + $0x2e0] sm:$0xff] %v6376_v20  ;;  %v2100_v14 = vmul.f32 %v3815_v0, %v1888_v11  ;;  %v1570_v40 = vadd.f32 %v1569_v26, %v6469_v36  ;;  %v6521_v20 = vadd.f32 %v2092_v18, %v10005_v23  ;;  %v6530_v28 = vadd.f32 %v2094_v35, %v10007_v49  ;;  %v3816_v26 = vld [vmem:[%s4482_s18 + $0x388] sm:$0xff]  ;;  %v3818_v0 = vld [vmem:[%s4482_s18 + $0x398] sm:$0xff]  ;;  %v470_v54 = vld [vmem:[%s4482_s18 + $0x8f0] sm:$0xff] }
 0x18f   : > { %3105 = vst [vmem:[%s5588_s27 + $0x2e8] sm:$0xff] %v6379_v24  ;;  %v10008_v24 = vld [vmem:[#allocation98_spill] sm:$0xff]  ;;  %v2101_v18 = vmul.f32 %v3816_v26, %v1888_v11  ;;  %v2103_v22 = vmul.f32 %v3818_v0, %v1888_v11  ;;  %v10009_v23 = vld [vmem:[#allocation93_spill] sm:$0xff] }
 0x190   : > { %3106 = vst [vmem:[%s5588_s27 + $0x2f0] sm:$0xff] %v6382_v41  ;;  %v6533_v13 = vadd.f32 %v2095_v17, %v10008_v24  ;;  %1571 = vadd.xlane.f32.xlu1 %v1570_v40  ;;  %v2102_v41 = vmul.f32 %v3817_v27, %v1888_v11  ;;  %v6541_v35 = vadd.f32 %v2100_v14, %v10009_v23  ;;  %v471_v17 = vld [vmem:[%s4482_s18 + $0x8f8] sm:$0xff]  ;;  %v3819_v49 = vld [vmem:[%s4482_s18 + $0x360] sm:$0xff]  ;;  %v3820_v11 = vld [vmem:[%s4482_s18 + $0x368] sm:$0xff] }
 0x191   : > { %3107 = vst [vmem:[%s5588_s27 + $0x2f8] sm:$0xff] %v6388_v10  ;;  %v10010_v10 = vld [vmem:[#allocation94_spill] sm:$0xff]  ;;  %v2096_v24 = vmul.f32 %v3819_v49, %v1887_v48  ;;  %v2097_v26 = vmul.f32 %v3820_v11, %v1887_v48  ;;  %v476_v27 = vld [vmem:[%s4482_s18 + $0x920] sm:$0xff]  ;;  %v6560_v23 = vadd.f32 %v2103_v22, %v10012_v61  ;;  %v2099_v49 = vmul.f32 %v3822_v62, %v1887_v48  ;;  %v479_v11 = vld [vmem:[%s4482_s18 + $0x938] sm:$0xff] }
 0x192   : > { %3112 = vst [vmem:[%s5588_s27 + $0x320] sm:$0xff] %v6396_v44  ;;  %v6548_v40 = vadd.f32 %v2101_v18, %v10010_v10  ;;  %v477_v14 = vld [vmem:[%s4482_s18 + $0x928] sm:$0xff]  ;;  %v3821_v18 = vld [vmem:[%s4482_s18 + $0x370] sm:$0xff]  ;;  %v472_v36 = vld [vmem:[%s4482_s18 + $0x900] sm:$0xff]  ;;  %v6576_v22 = vmul.f32 %v4501_v8, %v470_v54  ;;  %v6579_v61 = vmul.f32 %v4503_v9, %v471_v17  ;;  %v1573_v54 = vadd.f32 %v6503_v1, %v6500_v34 }
 0x193   : > { %3113 = vst [vmem:[%s5588_s27 + $0x328] sm:$0xff] %v6405_v32  ;;  %v10011_v0 = vld [vmem:[#allocation101_spill] sm:$0xff]  ;;  %v2098_v10 = vmul.f32 %v3821_v18, %v1887_v48  ;;  %v478_v56 = vld [vmem:[%s4482_s18 + $0x930] sm:$0xff]  ;;  %v6570_v32 = vadd.f32 %v2096_v24, %v10013_v3  ;;  %v475_v48 = vld [vmem:[%s4482_s18 + $0x918] sm:$0xff]  ;;  %v6595_v17 = vmul.f32 %v4497_v6, %v476_v27  ;;  %v6600_v16 = vmul.f32 %v4499_v7, %v477_v14 }
 0x194   : > { %v6557_v44 = vadd.f32 %v2102_v41, %v10011_v0  ;;  %3114 = vst [vmem:[%s5588_s27 + $0x330] sm:$0xff] %v6408_v52  ;;  %v10014_v41 = vld [vmem:[#allocation97_spill] sm:$0xff]  ;;  %v474_v62 = vld [vmem:[%s4482_s18 + $0x910] sm:$0xff]  ;;  %v1367_v52 = vpop.xlane.xlu2 %1366 }
 0x195   : > { %v6573_v0 = vadd.f32 %v2097_v26, %v10014_v41  ;;  %10015 = vst [vmem:[#allocation67_spill] sm:$0xff] %v6576_v22  ;;  %v473_v18 = vld [vmem:[%s4482_s18 + $0x908] sm:$0xff]  ;;  %v10018_v26 = vld [vmem:[#allocation107_spill] sm:$0xff] }
 0x196   : > { %10016 = vst [vmem:[#allocation74_spill] sm:$0xff] %v6579_v61  ;;  %v10017_v3 = vld [vmem:[#allocation102_spill] sm:$0xff]  ;;  %v6590_v41 = vadd.f32 %v2099_v49, %v10018_v26  ;;  %v6609_v49 = vmul.f32 %v4497_v6, %v472_v36  ;;  %v6617_v14 = vmul.f32 %v4499_v7, %v473_v18  ;;  %v1583_v36 = vadd.f32 %v6600_v16, %v6595_v17 }
 0x197   : > { %3115 = vst [vmem:[%s5588_s27 + $0x338] sm:$0xff] %v6417_v43  ;;  %v6587_v24 = vadd.f32 %v2098_v10, %v10017_v3  ;;  %v6603_v43 = vmul.f32 %v4501_v8, %v478_v56  ;;  %v6606_v10 = vmul.f32 %v4503_v9, %v479_v11  ;;  %v480_v3 = vld [vmem:[%s4482_s18 + $0x940] sm:$0xff]  ;;  %v481_v27 = vld [vmem:[%s4482_s18 + $0x948] sm:$0xff]  ;;  %v6620_v56 = vmul.f32 %v4501_v8, %v474_v62 }
 0x198   : > { %10019 = vst [vmem:[#allocation69_spill] sm:$0xff] %v6595_v17  ;;  %v6623_v11 = vmul.f32 %v4503_v9, %v475_v48  ;;  %v1891_v26 = vsub.f32 %v5513_v63, %v1377_v5  ;;  %v1890_v18 = vsub.f32 %v5513_v63, %v1372_v30  ;;  %v1578_v48 = vadd.f32 %v6617_v14, %v6609_v49  ;;  %v3823_v5 = vld [vmem:[%s4482_s18 + $0x3a0] sm:$0xff] }
 0x199   : > { %3108 = vst [vmem:[%s5588_s27 + $0x300] sm:$0xff] %v6422_v2  ;;  %v1574_v2 = vadd.f32 %v1573_v54, %v6576_v22  ;;  %v6641_v54 = vmul.f32 %v4499_v7, %v481_v27  ;;  %v1584_v30 = vadd.f32 %v1583_v36, %v6603_v43  ;;  %v3826_v27 = vld [vmem:[%s4482_s18 + $0x3b8] sm:$0xff] }
 0x19a   : > { %10020 = vst [vmem:[#allocation70_spill] sm:$0xff] %v6600_v16  ;;  %v3825_v16 = vld [vmem:[%s4482_s18 + $0x3b0] sm:$0xff] }
 0x19b   : > { %10021 = vst [vmem:[#allocation77_spill] sm:$0xff] %v6603_v43  ;;  %v1575_v62 = vadd.f32 %v1574_v2, %v6579_v61  ;;  %v10038_v43 = vld [vmem:[#allocation109_spill] sm:$0xff]  ;;  %v1387_v61 = vpop.xlane.xlu0 %1386 }
 0x19c   : > { %10022 = vst [vmem:[#allocation80_spill] sm:$0xff] %v6606_v10 }
 0x19d   : > { %10023 = vst [vmem:[#allocation72_spill] sm:$0xff] %v6609_v49  ;;  %1576 = vadd.xlane.f32.xlu2 %v1575_v62  ;;  %v10030_v49 = vld [vmem:[#allocation100_spill] sm:$0xff]  ;;  %v10031_v62 = vld [vmem:[#allocation103_spill] sm:$0xff] }
 0x19e   : > { %3109 = vst [vmem:[%s5588_s27 + $0x308] sm:$0xff] %v6430_v31  ;;  %v1889_v31 = vsub.f32 %v5513_v63, %v1367_v52  ;;  %v3824_v52 = vld [vmem:[%s4482_s18 + $0x3a8] sm:$0xff] }
 0x19f   : > { %10024 = vst [vmem:[#allocation73_spill] sm:$0xff] %v6617_v14 }
 0x1a0   : > { %10025 = vst [vmem:[#allocation78_spill] sm:$0xff] %v6620_v56  ;;  %v2105_v2 = vmul.f32 %v3824_v52, %v1889_v31  ;;  %v2106_v17 = vmul.f32 %v3825_v16, %v1889_v31  ;;  %v2107_v14 = vmul.f32 %v3826_v27, %v1889_v31  ;;  %v10029_v52 = vld [vmem:[#allocation99_spill] sm:$0xff] }
 0x1a1   : > { %10026 = vst [vmem:[#allocation83_spill] sm:$0xff] %v6623_v11 }
 0x1a2   : > { %3110 = vst [vmem:[%s5588_s27 + $0x310] sm:$0xff] %v6447_v29  ;;  %v6638_v29 = vmul.f32 %v4497_v6, %v480_v3  ;;  %v1579_v3 = vadd.f32 %v1578_v48, %v6620_v56  ;;  %v6664_v48 = vadd.f32 %v2106_v17, %v10031_v62  ;;  %v3830_v17 = vld [vmem:[%s4482_s18 + $0x3f8] sm:$0xff]  ;;  %v482_v62 = vld [vmem:[%s4482_s18 + $0x950] sm:$0xff] }
 0x1a3   : > { %3111 = vst [vmem:[%s5588_s27 + $0x318] sm:$0xff] %v6450_v21  ;;  %v2104_v21 = vmul.f32 %v3823_v5, %v1889_v31  ;;  %v1585_v5 = vadd.f32 %v1584_v30, %v6606_v10  ;;  %v3828_v30 = vld [vmem:[%s4482_s18 + $0x3e8] sm:$0xff]  ;;  %v10037_v56 = vld [vmem:[#allocation108_spill] sm:$0xff] }
 0x1a4   : > { %10027 = vst [vmem:[#allocation75_spill] sm:$0xff] %v6638_v29  ;;  %v1580_v31 = vadd.f32 %v1579_v3, %v6623_v11  ;;  %v3831_v3 = vld [vmem:[%s4482_s18 + $0x3c0] sm:$0xff] }
 0x1a5   : > { %10028 = vst [vmem:[#allocation76_spill] sm:$0xff] %v6641_v54  ;;  %v6658_v16 = vadd.f32 %v2104_v21, %v10029_v52  ;;  %v3829_v21 = vld [vmem:[%s4482_s18 + $0x3f0] sm:$0xff]  ;;  %1586 = vadd.xlane.f32.xlu1 %v1585_v5  ;;  %v484_v10 = vld [vmem:[%s4482_s18 + $0x960] sm:$0xff] }
 0x1a6   : > { %3116 = vst [vmem:[%s5588_s27 + $0x340] sm:$0xff] %v6521_v20  ;;  %v3827_v20 = vld [vmem:[%s4482_s18 + $0x3e0] sm:$0xff]  ;;  %v2114_v52 = vmul.f32 %v3829_v21, %v1891_v26  ;;  %1581 = vadd.xlane.f32.xlu0 %v1580_v31  ;;  %v3833_v31 = vld [vmem:[%s4482_s18 + $0x3d0] sm:$0xff] }
 0x1a7   : > { %3117 = vst [vmem:[%s5588_s27 + $0x348] sm:$0xff] %v6524_v15  ;;  %v2112_v36 = vmul.f32 %v3827_v20, %v1891_v26  ;;  %v6661_v15 = vadd.f32 %v2105_v2, %v10030_v49  ;;  %v2113_v20 = vmul.f32 %v3828_v30, %v1891_v26  ;;  %v2115_v49 = vmul.f32 %v3830_v17, %v1891_v26  ;;  %v10035_v30 = vld [vmem:[#allocation113_spill] sm:$0xff] }
 0x1a8   : > { %3118 = vst [vmem:[%s5588_s27 + $0x350] sm:$0xff] %v6530_v28  ;;  %v10032_v28 = vld [vmem:[#allocation110_spill] sm:$0xff]  ;;  %v6689_v26 = vadd.f32 %v2114_v52, %v10035_v30  ;;  %v488_v17 = vld [vmem:[%s4482_s18 + $0x980] sm:$0xff]  ;;  %v2110_v11 = vmul.f32 %v3833_v31, %v1890_v18  ;;  %v487_v31 = vld [vmem:[%s4482_s18 + $0x978] sm:$0xff] }
 0x1a9   : > { %3119 = vst [vmem:[%s5588_s27 + $0x358] sm:$0xff] %v6533_v13  ;;  %v6670_v27 = vadd.f32 %v2107_v14, %v10032_v28  ;;  %v10033_v13 = vld [vmem:[#allocation104_spill] sm:$0xff]  ;;  %v2108_v14 = vmul.f32 %v3831_v3, %v1890_v18  ;;  %v490_v30 = vld [vmem:[%s4482_s18 + $0x990] sm:$0xff] }
 0x1aa   : > { %3124 = vst [vmem:[%s5588_s27 + $0x380] sm:$0xff] %v6541_v35  ;;  %v6678_v2 = vadd.f32 %v2112_v36, %v10033_v13  ;;  %v483_v28 = vld [vmem:[%s4482_s18 + $0x958] sm:$0xff]  ;;  %v10034_v35 = vld [vmem:[#allocation105_spill] sm:$0xff] }
 0x1ab   : > { %3125 = vst [vmem:[%s5588_s27 + $0x388] sm:$0xff] %v6548_v40  ;;  %v6686_v5 = vadd.f32 %v2113_v20, %v10034_v35  ;;  %v3832_v36 = vld [vmem:[%s4482_s18 + $0x3c8] sm:$0xff]  ;;  %v10036_v3 = vld [vmem:[#allocation116_spill] sm:$0xff]  ;;  %v6702_v52 = vadd.f32 %v2108_v14, %v10037_v56  ;;  %v486_v14 = vld [vmem:[%s4482_s18 + $0x970] sm:$0xff] }
 0x1ac   : > { %v2109_v21 = vmul.f32 %v3832_v36, %v1890_v18  ;;  %v489_v13 = vld [vmem:[%s4482_s18 + $0x988] sm:$0xff]  ;;  %3126 = vst [vmem:[%s5588_s27 + $0x390] sm:$0xff] %v6557_v44  ;;  %v6697_v40 = vadd.f32 %v2115_v49, %v10036_v3  ;;  %v3834_v20 = vld [vmem:[%s4482_s18 + $0x3d8] sm:$0xff]  ;;  %v6713_v49 = vmul.f32 %v4501_v8, %v482_v62  ;;  %v6716_v3 = vmul.f32 %v4503_v9, %v483_v28 }
 0x1ad   : > { %v2111_v35 = vmul.f32 %v3834_v20, %v1890_v18  ;;  %v491_v36 = vld [vmem:[%s4482_s18 + $0x998] sm:$0xff]  ;;  %3127 = vst [vmem:[%s5588_s27 + $0x398] sm:$0xff] %v6560_v23  ;;  %v1588_v18 = vadd.f32 %v6641_v54, %v6638_v29  ;;  %v485_v56 = vld [vmem:[%s4482_s18 + $0x968] sm:$0xff]  ;;  %v1382_v23 = vpop.xlane.xlu2 %1381  ;;  %v6732_v28 = vmul.f32 %v4497_v6, %v488_v17  ;;  %v6735_v54 = vmul.f32 %v4499_v7, %v489_v13  ;;  %v1392_v29 = vpop.xlane.xlu1 %1391 }
 0x1ae   : > { %v6710_v44 = vadd.f32 %v2109_v21, %v10038_v43  ;;  %10039 = vst [vmem:[#allocation79_spill] sm:$0xff] %v6716_v3  ;;  %v10040_v43 = vld [vmem:[#allocation114_spill] sm:$0xff]  ;;  %v10041_v62 = vld [vmem:[#allocation121_spill] sm:$0xff]  ;;  %v6747_v17 = vmul.f32 %v4497_v6, %v484_v10  ;;  %v6756_v13 = vmul.f32 %v4499_v7, %v485_v56  ;;  %v1893_v56 = vsub.f32 %v5513_v63, %v1387_v61 }
 0x1af   : > { %3120 = vst [vmem:[%s5588_s27 + $0x360] sm:$0xff] %v6570_v32  ;;  %v6726_v21 = vadd.f32 %v2110_v11, %v10040_v43  ;;  %v6729_v20 = vadd.f32 %v2111_v35, %v10041_v62  ;;  %v1589_v22 = vadd.f32 %v1588_v18, %v6713_v49  ;;  %v6741_v32 = vmul.f32 %v4501_v8, %v490_v30  ;;  %v492_v35 = vld [vmem:[%s4482_s18 + $0x9a0] sm:$0xff]  ;;  %v493_v43 = vld [vmem:[%s4482_s18 + $0x9a8] sm:$0xff]  ;;  %v3837_v62 = vld [vmem:[%s4482_s18 + $0x410] sm:$0xff] }
 0x1b0   : > { %10042 = vst [vmem:[#allocation86_spill] sm:$0xff] %v6732_v28  ;;  %v6744_v11 = vmul.f32 %v4503_v9, %v491_v36  ;;  %v6759_v30 = vmul.f32 %v4501_v8, %v486_v14  ;;  %v6762_v36 = vmul.f32 %v4503_v9, %v487_v31  ;;  %v1894_v18 = vsub.f32 %v5513_v63, %v1392_v29  ;;  %v3835_v61 = vld [vmem:[%s4482_s18 + $0x400] sm:$0xff] }
 0x1b1   : > { %10043 = vst [vmem:[#allocation81_spill] sm:$0xff] %v6735_v54  ;;  %v1590_v10 = vadd.f32 %v1589_v22, %v6716_v3  ;;  %v1593_v31 = vadd.f32 %v6756_v13, %v6747_v17  ;;  %v6779_v22 = vmul.f32 %v4499_v7, %v493_v43  ;;  %v10065_v3 = vld [vmem:[#allocation129_spill] sm:$0xff] }
 0x1b2   : > { %3121 = vst [vmem:[%s5588_s27 + $0x368] sm:$0xff] %v6573_v0  ;;  %v1598_v0 = vadd.f32 %v6735_v54, %v6732_v28  ;;  %v497_v54 = vld [vmem:[%s4482_s18 + $0x9c8] sm:$0xff]  ;;  %v10062_v28 = vld [vmem:[#allocation120_spill] sm:$0xff] }
 0x1b3   : > { %10044 = vst [vmem:[#allocation82_spill] sm:$0xff] %v6741_v32  ;;  %1591 = vadd.xlane.f32.xlu2 %v1590_v10  ;;  %v1594_v43 = vadd.f32 %v1593_v31, %v6759_v30  ;;  %v3840_v31 = vld [vmem:[%s4482_s18 + $0x448] sm:$0xff] }
 0x1b4   : > { %10045 = vst [vmem:[#allocation89_spill] sm:$0xff] %v6744_v11  ;;  %v1599_v14 = vadd.f32 %v1598_v0, %v6741_v32 }
 0x1b5   : > { %10046 = vst [vmem:[#allocation92_spill] sm:$0xff] %v6747_v17 }
 0x1b6   : > { %3122 = vst [vmem:[%s5588_s27 + $0x370] sm:$0xff] %v6587_v24  ;;  %v1892_v24 = vsub.f32 %v5513_v63, %v1382_v23 }
 0x1b7   : > { %10047 = vst [vmem:[#allocation84_spill] sm:$0xff] %v6756_v13  ;;  %v3838_v13 = vld [vmem:[%s4482_s18 + $0x418] sm:$0xff] }
 0x1b8   : > { %10048 = vst [vmem:[#allocation85_spill] sm:$0xff] %v6759_v30  ;;  %v2116_v29 = vmul.f32 %v3835_v61, %v1892_v24  ;;  %v2118_v0 = vmul.f32 %v3837_v62, %v1892_v24  ;;  %v2119_v17 = vmul.f32 %v3838_v13, %v1892_v24  ;;  %v10052_v61 = vld [vmem:[#allocation111_spill] sm:$0xff]  ;;  %v10053_v62 = vld [vmem:[#allocation112_spill] sm:$0xff]  ;;  %v2125_v30 = vmul.f32 %v3840_v31, %v1894_v18 }
 0x1b9   : > { %10049 = vst [vmem:[#allocation90_spill] sm:$0xff] %v6762_v36  ;;  %v1595_v13 = vadd.f32 %v1594_v43, %v6762_v36  ;;  %v495_v31 = vld [vmem:[%s4482_s18 + $0x9b8] sm:$0xff] }
 0x1ba   : > { %3123 = vst [vmem:[%s5588_s27 + $0x378] sm:$0xff] %v6590_v41  ;;  %v6776_v41 = vmul.f32 %v4497_v6, %v492_v35  ;;  %v1600_v35 = vadd.f32 %v1599_v14, %v6744_v11  ;;  %v496_v11 = vld [vmem:[%s4482_s18 + $0x9c0] sm:$0xff] }
 0x1bb   : > { %3128 = vst [vmem:[%s5588_s27 + $0x3a0] sm:$0xff] %v6658_v16  ;;  %v3836_v16 = vld [vmem:[%s4482_s18 + $0x408] sm:$0xff]  ;;  %1596 = vadd.xlane.f32.xlu0 %v1595_v13  ;;  %v3846_v13 = vld [vmem:[%s4482_s18 + $0x438] sm:$0xff] }
 0x1bc   : > { %10050 = vst [vmem:[#allocation95_spill] sm:$0xff] %v6776_v41  ;;  %v2117_v23 = vmul.f32 %v3836_v16, %v1892_v24  ;;  %v6795_v16 = vadd.f32 %v2116_v29, %v10052_v61  ;;  %1601 = vadd.xlane.f32.xlu1 %v1600_v35  ;;  %v3841_v29 = vld [vmem:[%s4482_s18 + $0x450] sm:$0xff] }
 0x1bd   : > { %10051 = vst [vmem:[#allocation87_spill] sm:$0xff] %v6779_v22  ;;  %v10057_v35 = vld [vmem:[#allocation118_spill] sm:$0xff] }
 0x1be   : > { %3129 = vst [vmem:[%s5588_s27 + $0x3a8] sm:$0xff] %v6661_v15  ;;  %v3839_v15 = vld [vmem:[%s4482_s18 + $0x440] sm:$0xff]  ;;  %v6798_v32 = vadd.f32 %v2117_v23, %v10053_v62  ;;  %v2126_v23 = vmul.f32 %v3841_v29, %v1894_v18  ;;  %v6819_v43 = vadd.f32 %v2125_v30, %v10057_v35  ;;  %v3845_v29 = vld [vmem:[%s4482_s18 + $0x430] sm:$0xff] }
 0x1bf   : > { %3130 = vst [vmem:[%s5588_s27 + $0x3b0] sm:$0xff] %v6664_v48  ;;  %v2124_v10 = vmul.f32 %v3839_v15, %v1894_v18  ;;  %v10054_v48 = vld [vmem:[#allocation115_spill] sm:$0xff]  ;;  %v10056_v62 = vld [vmem:[#allocation117_spill] sm:$0xff] }
 0x1c0   : > { %3131 = vst [vmem:[%s5588_s27 + $0x3b8] sm:$0xff] %v6670_v27  ;;  %v6801_v14 = vadd.f32 %v2118_v0, %v10054_v48  ;;  %v10055_v27 = vld [vmem:[#allocation124_spill] sm:$0xff]  ;;  %v494_v15 = vld [vmem:[%s4482_s18 + $0x9b0] sm:$0xff] }
 0x1c1   : > { %3136 = vst [vmem:[%s5588_s27 + $0x3e0] sm:$0xff] %v6678_v2  ;;  %v6808_v24 = vadd.f32 %v2119_v17, %v10055_v27  ;;  %v3842_v0 = vld [vmem:[%s4482_s18 + $0x458] sm:$0xff]  ;;  %v6816_v2 = vadd.f32 %v2124_v10, %v10056_v62  ;;  %v3843_v17 = vld [vmem:[%s4482_s18 + $0x420] sm:$0xff]  ;;  %v501_v62 = vld [vmem:[%s4482_s18 + $0x9e8] sm:$0xff] }
 0x1c2   : > { %3137 = vst [vmem:[%s5588_s27 + $0x3e8] sm:$0xff] %v6686_v5  ;;  %v2127_v61 = vmul.f32 %v3842_v0, %v1894_v18  ;;  %v2120_v48 = vmul.f32 %v3843_v17, %v1893_v56  ;;  %v10058_v5 = vld [vmem:[#allocation125_spill] sm:$0xff]  ;;  %v2122_v0 = vmul.f32 %v3845_v29, %v1893_v56  ;;  %v502_v35 = vld [vmem:[%s4482_s18 + $0x9f0] sm:$0xff]  ;;  %v503_v29 = vld [vmem:[%s4482_s18 + $0x9f8] sm:$0xff] }
 0x1c3   : > { %3138 = vst [vmem:[%s5588_s27 + $0x3f0] sm:$0xff] %v6689_v26  ;;  %v6826_v27 = vadd.f32 %v2126_v23, %v10058_v5  ;;  %v3844_v18 = vld [vmem:[%s4482_s18 + $0x428] sm:$0xff]  ;;  %v500_v30 = vld [vmem:[%s4482_s18 + $0x9e0] sm:$0xff]  ;;  %v2123_v23 = vmul.f32 %v3846_v13, %v1893_v56  ;;  %v10060_v5 = vld [vmem:[#allocation119_spill] sm:$0xff] }
 0x1c4   : > { %v2121_v10 = vmul.f32 %v3844_v18, %v1893_v56  ;;  %3139 = vst [vmem:[%s5588_s27 + $0x3f8] sm:$0xff] %v6697_v40  ;;  %v10059_v26 = vld [vmem:[#allocation128_spill] sm:$0xff]  ;;  %v6840_v36 = vadd.f32 %v2120_v48, %v10060_v5  ;;  %v6843_v18 = vmul.f32 %v4501_v8, %v494_v15  ;;  %v6857_v56 = vmul.f32 %v4503_v9, %v495_v31  ;;  %v498_v15 = vld [vmem:[%s4482_s18 + $0x9d0] sm:$0xff]  ;;  %v1397_v5 = vpop.xlane.xlu2 %1396 }
 0x1c5   : > { %v6836_v17 = vadd.f32 %v2127_v61, %v10059_v26  ;;  %3132 = vst [vmem:[%s5588_s27 + $0x3c0] sm:$0xff] %v6702_v52  ;;  %v10063_v61 = vld [vmem:[#allocation126_spill] sm:$0xff]  ;;  %v1603_v48 = vadd.f32 %v6779_v22, %v6776_v41  ;;  %v499_v13 = vld [vmem:[%s4482_s18 + $0x9d8] sm:$0xff]  ;;  %v6866_v52 = vadd.f32 %v2123_v23, %v10065_v3  ;;  %v6875_v31 = vmul.f32 %v4501_v8, %v502_v35 }
 0x1c6   : > { %10061 = vst [vmem:[#allocation88_spill] sm:$0xff] %v6843_v18  ;;  %v6851_v40 = vadd.f32 %v2121_v10, %v10062_v28  ;;  %v6854_v26 = vadd.f32 %v2122_v0, %v10063_v61  ;;  %v6869_v28 = vmul.f32 %v4497_v6, %v500_v30  ;;  %v6872_v10 = vmul.f32 %v4499_v7, %v501_v62  ;;  %v1407_v0 = vpop.xlane.xlu1 %1406  ;;  %v1402_v61 = vpop.xlane.xlu0 %1401 }
 0x1c7   : > { %10064 = vst [vmem:[#allocation91_spill] sm:$0xff] %v6857_v56  ;;  %v6881_v3 = vmul.f32 %v4503_v9, %v503_v29  ;;  %v6884_v30 = vmul.f32 %v4497_v6, %v496_v11  ;;  %v6887_v62 = vmul.f32 %v4499_v7, %v497_v54  ;;  %v6897_v23 = vmul.f32 %v4503_v9, %v499_v13  ;;  %v3847_v13 = vld [vmem:[%s4482_s18 + $0x460] sm:$0xff] }
 0x1c8   : > { %3133 = vst [vmem:[%s5588_s27 + $0x3c8] sm:$0xff] %v6710_v44  ;;  %v1604_v44 = vadd.f32 %v1603_v48, %v6843_v18  ;;  %v1613_v35 = vadd.f32 %v6872_v10, %v6869_v28  ;;  %v1895_v11 = vsub.f32 %v5513_v63, %v1397_v5  ;;  %v1897_v29 = vsub.f32 %v5513_v63, %v1407_v0 }
 0x1c9   : > { %10066 = vst [vmem:[#allocation98_spill] sm:$0xff] %v6869_v28  ;;  %v1896_v48 = vsub.f32 %v5513_v63, %v1402_v61  ;;  %v3849_v28 = vld [vmem:[%s4482_s18 + $0x470] sm:$0xff]  ;;  %v3850_v61 = vld [vmem:[%s4482_s18 + $0x478] sm:$0xff] }
 0x1ca   : > { %10067 = vst [vmem:[#allocation93_spill] sm:$0xff] %v6872_v10  ;;  %v1605_v54 = vadd.f32 %v1604_v44, %v6857_v56  ;;  %v2128_v5 = vmul.f32 %v3847_v13, %v1895_v11  ;;  %v3848_v10 = vld [vmem:[%s4482_s18 + $0x468] sm:$0xff]  ;;  %v2130_v44 = vmul.f32 %v3849_v28, %v1895_v11  ;;  %v508_v56 = vld [vmem:[%s4482_s18 + $0xa20] sm:$0xff] }
 0x1cb   : > { %10068 = vst [vmem:[#allocation94_spill] sm:$0xff] %v6875_v31 }
 0x1cc   : > { %3134 = vst [vmem:[%s5588_s27 + $0x3d0] sm:$0xff] %v6726_v21  ;;  %v6894_v21 = vmul.f32 %v4501_v8, %v498_v15  ;;  %v1614_v15 = vadd.f32 %v1613_v35, %v6875_v31  ;;  %1606 = vadd.xlane.f32.xlu2 %v1605_v54  ;;  %v10076_v54 = vld [vmem:[#allocation127_spill] sm:$0xff] }
 0x1cd   : > { %10069 = vst [vmem:[#allocation101_spill] sm:$0xff] %v6881_v3  ;;  %v515_v31 = vld [vmem:[%s4482_s18 + $0xa58] sm:$0xff] }
 0x1ce   : > { %10070 = vst [vmem:[#allocation106_spill] sm:$0xff] %v6884_v30  ;;  %v1615_v13 = vadd.f32 %v1614_v15, %v6881_v3  ;;  %v1422_v22 = vpop.xlane.xlu1 %1421 }
 0x1cf   : > { %10071 = vst [vmem:[#allocation96_spill] sm:$0xff] %v6887_v62 }
 0x1d0   : > { %3135 = vst [vmem:[%s5588_s27 + $0x3d8] sm:$0xff] %v6729_v20  ;;  %v1608_v20 = vadd.f32 %v6887_v62, %v6884_v30  ;;  %v2131_v62 = vmul.f32 %v3850_v61, %v1895_v11  ;;  %v10075_v30 = vld [vmem:[#allocation123_spill] sm:$0xff]  ;;  %v3852_v61 = vld [vmem:[%s4482_s18 + $0x4a8] sm:$0xff]  ;;  %1616 = vadd.xlane.f32.xlu1 %v1615_v13 }
 0x1d1   : > { %10072 = vst [vmem:[#allocation97_spill] sm:$0xff] %v6894_v21 }
 0x1d2   : > { %10073 = vst [vmem:[#allocation102_spill] sm:$0xff] %v6897_v23  ;;  %v1609_v0 = vadd.f32 %v1608_v20, %v6894_v21  ;;  %v6928_v20 = vadd.f32 %v2130_v44, %v10076_v54  ;;  %v10078_v44 = vld [vmem:[#allocation130_spill] sm:$0xff]  ;;  %v504_v54 = vld [vmem:[%s4482_s18 + $0xa00] sm:$0xff]  ;;  %v3858_v21 = vld [vmem:[%s4482_s18 + $0x498] sm:$0xff] }
 0x1d3   : > { %3140 = vst [vmem:[%s5588_s27 + $0x400] sm:$0xff] %v6795_v16  ;;  %v2129_v16 = vmul.f32 %v3848_v10, %v1895_v11  ;;  %v10074_v10 = vld [vmem:[#allocation122_spill] sm:$0xff] }
 0x1d4   : > { %3141 = vst [vmem:[%s5588_s27 + $0x408] sm:$0xff] %v6798_v32  ;;  %v3851_v32 = vld [vmem:[%s4482_s18 + $0x4a0] sm:$0xff]  ;;  %v6922_v28 = vadd.f32 %v2128_v5, %v10074_v10  ;;  %v1610_v11 = vadd.f32 %v1609_v0, %v6897_v23  ;;  %v2137_v5 = vmul.f32 %v3852_v61, %v1897_v29  ;;  %v506_v61 = vld [vmem:[%s4482_s18 + $0xa10] sm:$0xff]  ;;  %v513_v23 = vld [vmem:[%s4482_s18 + $0xa48] sm:$0xff] }
 0x1d5   : > { %3142 = vst [vmem:[%s5588_s27 + $0x410] sm:$0xff] %v6801_v14  ;;  %v2136_v35 = vmul.f32 %v3851_v32, %v1897_v29  ;;  %v6925_v14 = vadd.f32 %v2129_v16, %v10075_v30  ;;  %v3853_v32 = vld [vmem:[%s4482_s18 + $0x4b0] sm:$0xff]  ;;  %v3854_v16 = vld [vmem:[%s4482_s18 + $0x4b8] sm:$0xff]  ;;  %v3855_v10 = vld [vmem:[%s4482_s18 + $0x480] sm:$0xff] }
 0x1d6   : > { %3143 = vst [vmem:[%s5588_s27 + $0x418] sm:$0xff] %v6808_v24  ;;  %v10077_v24 = vld [vmem:[#allocation132_spill] sm:$0xff]  ;;  %v2138_v30 = vmul.f32 %v3853_v32, %v1897_v29  ;;  %1611 = vadd.xlane.f32.xlu0 %v1610_v11 }
 0x1d7   : > { %3148 = vst [vmem:[%s5588_s27 + $0x440] sm:$0xff] %v6816_v2  ;;  %v6934_v15 = vadd.f32 %v2131_v62, %v10077_v24  ;;  %v2139_v2 = vmul.f32 %v3854_v16, %v1897_v29  ;;  %v6942_v0 = vadd.f32 %v2136_v35, %v10078_v44  ;;  %v2132_v62 = vmul.f32 %v3855_v10, %v1896_v48  ;;  %v505_v24 = vld [vmem:[%s4482_s18 + $0xa08] sm:$0xff]  ;;  %v507_v44 = vld [vmem:[%s4482_s18 + $0xa18] sm:$0xff]  ;;  %v512_v10 = vld [vmem:[%s4482_s18 + $0xa40] sm:$0xff] }
 0x1d8   : > { %3149 = vst [vmem:[%s5588_s27 + $0x448] sm:$0xff] %v6819_v43  ;;  %v10079_v43 = vld [vmem:[#allocation131_spill] sm:$0xff]  ;;  %v10080_v29 = vld [vmem:[#allocation137_spill] sm:$0xff] }
 0x1d9   : > { %3150 = vst [vmem:[%s5588_s27 + $0x450] sm:$0xff] %v6826_v27  ;;  %v6951_v13 = vadd.f32 %v2137_v5, %v10079_v43  ;;  %v6954_v32 = vadd.f32 %v2138_v30, %v10080_v29  ;;  %v3856_v35 = vld [vmem:[%s4482_s18 + $0x488] sm:$0xff]  ;;  %v10081_v27 = vld [vmem:[#allocation144_spill] sm:$0xff]  ;;  %v3857_v5 = vld [vmem:[%s4482_s18 + $0x490] sm:$0xff]  ;;  %v2135_v30 = vmul.f32 %v3858_v21, %v1896_v48  ;;  %v6985_v21 = vmul.f32 %v4501_v8, %v506_v61 }
 0x1da   : > { %v2133_v16 = vmul.f32 %v3856_v35, %v1896_v48  ;;  %3151 = vst [vmem:[%s5588_s27 + $0x458] sm:$0xff] %v6836_v17  ;;  %v6963_v11 = vadd.f32 %v2139_v2, %v10081_v27  ;;  %v2134_v43 = vmul.f32 %v3857_v5, %v1896_v48  ;;  %v10082_v29 = vld [vmem:[#allocation133_spill] sm:$0xff]  ;;  %v514_v35 = vld [vmem:[%s4482_s18 + $0xa50] sm:$0xff]  ;;  %v6979_v2 = vmul.f32 %v4497_v6, %v504_v54  ;;  %v511_v5 = vld [vmem:[%s4482_s18 + $0xa38] sm:$0xff] }
 0x1db   : > { %v6968_v3 = vadd.f32 %v2132_v62, %v10082_v29  ;;  %3144 = vst [vmem:[%s5588_s27 + $0x420] sm:$0xff] %v6840_v36  ;;  %v10083_v17 = vld [vmem:[#allocation134_spill] sm:$0xff]  ;;  %v6982_v27 = vmul.f32 %v4499_v7, %v505_v24  ;;  %v10088_v29 = vld [vmem:[#allocation147_spill] sm:$0xff]  ;;  %v6999_v24 = vmul.f32 %v4503_v9, %v507_v44  ;;  %v7002_v61 = vmul.f32 %v4497_v6, %v512_v10  ;;  %v1417_v10 = vpop.xlane.xlu0 %1416 }
 0x1dc   : > { %v6976_v18 = vadd.f32 %v2133_v16, %v10083_v17  ;;  %10084 = vst [vmem:[#allocation107_spill] sm:$0xff] %v6979_v2  ;;  %v509_v48 = vld [vmem:[%s4482_s18 + $0xa28] sm:$0xff]  ;;  %v510_v62 = vld [vmem:[%s4482_s18 + $0xa30] sm:$0xff]  ;;  %v6996_v54 = vadd.f32 %v2135_v30, %v10088_v29  ;;  %v1412_v17 = vpop.xlane.xlu2 %1411  ;;  %v7012_v30 = vmul.f32 %v4501_v8, %v514_v35  ;;  %v7015_v44 = vmul.f32 %v4503_v9, %v515_v31 }
 0x1dd   : > { %10085 = vst [vmem:[#allocation99_spill] sm:$0xff] %v6982_v27  ;;  %v10087_v36 = vld [vmem:[#allocation138_spill] sm:$0xff]  ;;  %v7031_v35 = vmul.f32 %v4503_v9, %v511_v5  ;;  %v1899_v5 = vsub.f32 %v5513_v63, %v1417_v10 }
 0x1de   : > { %10086 = vst [vmem:[#allocation100_spill] sm:$0xff] %v6985_v21  ;;  %v6993_v16 = vadd.f32 %v2134_v43, %v10087_v36  ;;  %v7009_v43 = vmul.f32 %v4499_v7, %v513_v23  ;;  %v516_v36 = vld [vmem:[%s4482_s18 + $0xa60] sm:$0xff]  ;;  %v517_v29 = vld [vmem:[%s4482_s18 + $0xa68] sm:$0xff]  ;;  %v7028_v23 = vmul.f32 %v4501_v8, %v510_v62 }
 0x1df   : > { %3145 = vst [vmem:[%s5588_s27 + $0x428] sm:$0xff] %v6851_v40  ;;  %v1618_v40 = vadd.f32 %v6982_v27, %v6979_v2  ;;  %v7025_v27 = vmul.f32 %v4499_v7, %v509_v48  ;;  %v1900_v48 = vsub.f32 %v5513_v63, %v1422_v22 }
 0x1e0   : > { %10089 = vst [vmem:[#allocation103_spill] sm:$0xff] %v6999_v24 }
 0x1e1   : > { %10090 = vst [vmem:[#allocation110_spill] sm:$0xff] %v7002_v61  ;;  %v1619_v31 = vadd.f32 %v1618_v40, %v6985_v21  ;;  %v7049_v40 = vmul.f32 %v4499_v7, %v517_v29 }
 0x1e2   : > { %3146 = vst [vmem:[%s5588_s27 + $0x430] sm:$0xff] %v6854_v26  ;;  %v7022_v26 = vmul.f32 %v4497_v6, %v508_v56  ;;  %v1628_v56 = vadd.f32 %v7009_v43, %v7002_v61  ;;  %v3862_v61 = vld [vmem:[%s4482_s18 + $0x4d8] sm:$0xff] }
 0x1e3   : > { %10091 = vst [vmem:[#allocation104_spill] sm:$0xff] %v7009_v43  ;;  %v1620_v22 = vadd.f32 %v1619_v31, %v6999_v24  ;;  %v1437_v24 = vpop.xlane.xlu1 %1436  ;;  %v1432_v2 = vpop.xlane.xlu0 %1431 }
 0x1e4   : > { %10092 = vst [vmem:[#allocation105_spill] sm:$0xff] %v7012_v30  ;;  %v1623_v62 = vadd.f32 %v7025_v27, %v7022_v26 }
 0x1e5   : > { %10093 = vst [vmem:[#allocation113_spill] sm:$0xff] %v7015_v44  ;;  %1621 = vadd.xlane.f32.xlu2 %v1620_v22  ;;  %v3864_v22 = vld [vmem:[%s4482_s18 + $0x508] sm:$0xff] }
 0x1e6   : > { %3147 = vst [vmem:[%s5588_s27 + $0x438] sm:$0xff] %v6866_v52  ;;  %v1898_v52 = vsub.f32 %v5513_v63, %v1412_v17  ;;  %v3859_v17 = vld [vmem:[%s4482_s18 + $0x4c0] sm:$0xff]  ;;  %v1624_v10 = vadd.f32 %v1623_v62, %v7028_v23 }
 0x1e7   : > { %10094 = vst [vmem:[#allocation116_spill] sm:$0xff] %v7022_v26 }
 0x1e8   : > { %10095 = vst [vmem:[#allocation108_spill] sm:$0xff] %v7025_v27  ;;  %v2140_v43 = vmul.f32 %v3859_v17, %v1898_v52  ;;  %v3860_v27 = vld [vmem:[%s4482_s18 + $0x4c8] sm:$0xff]  ;;  %v2143_v21 = vmul.f32 %v3862_v61, %v1898_v52  ;;  %v10099_v17 = vld [vmem:[#allocation136_spill] sm:$0xff]  ;;  %v1625_v61 = vadd.f32 %v1624_v10, %v7031_v35 }
 0x1e9   : > { %10096 = vst [vmem:[#allocation109_spill] sm:$0xff] %v7028_v23  ;;  %v2141_v26 = vmul.f32 %v3860_v27, %v1898_v52  ;;  %v10098_v27 = vld [vmem:[#allocation135_spill] sm:$0xff] }
 0x1ea   : > { %10097 = vst [vmem:[#allocation114_spill] sm:$0xff] %v7031_v35  ;;  %1626 = vadd.xlane.f32.xlu0 %v1625_v61  ;;  %v10105_v61 = vld [vmem:[#allocation152_spill] sm:$0xff]  ;;  %v526_v23 = vld [vmem:[%s4482_s18 + $0xab0] sm:$0xff] }
 0x1eb   : > { %3152 = vst [vmem:[%s5588_s27 + $0x460] sm:$0xff] %v6922_v28  ;;  %v7046_v28 = vmul.f32 %v4497_v6, %v516_v36  ;;  %v3861_v36 = vld [vmem:[%s4482_s18 + $0x4d0] sm:$0xff]  ;;  %v7068_v62 = vadd.f32 %v2141_v26, %v10099_v17  ;;  %v3866_v26 = vld [vmem:[%s4482_s18 + $0x518] sm:$0xff] }
 0x1ec   : > { %3153 = vst [vmem:[%s5588_s27 + $0x468] sm:$0xff] %v6925_v14  ;;  %v1629_v14 = vadd.f32 %v1628_v56, %v7012_v30  ;;  %v2142_v29 = vmul.f32 %v3861_v36, %v1898_v52  ;;  %v10100_v52 = vld [vmem:[#allocation139_spill] sm:$0xff]  ;;  %v2151_v10 = vmul.f32 %v3866_v26, %v1900_v48  ;;  %v10104_v26 = vld [vmem:[#allocation149_spill] sm:$0xff]  ;;  %v10106_v30 = vld [vmem:[#allocation142_spill] sm:$0xff] }
 0x1ed   : > { %3154 = vst [vmem:[%s5588_s27 + $0x470] sm:$0xff] %v6928_v20  ;;  %v3863_v20 = vld [vmem:[%s4482_s18 + $0x500] sm:$0xff]  ;;  %v518_v17 = vld [vmem:[%s4482_s18 + $0xa70] sm:$0xff]  ;;  %v3870_v35 = vld [vmem:[%s4482_s18 + $0x4f8] sm:$0xff] }
 0x1ee   : > { %3155 = vst [vmem:[%s5588_s27 + $0x478] sm:$0xff] %v6934_v15  ;;  %v2148_v31 = vmul.f32 %v3863_v20, %v1900_v48  ;;  %v1630_v56 = vadd.f32 %v1629_v14, %v7015_v44  ;;  %v2652_v15 = vadd.f32 %v2140_v43, %v10098_v27  ;;  %v7074_v36 = vadd.f32 %v2142_v29, %v10100_v52  ;;  %v10101_v20 = vld [vmem:[#allocation148_spill] sm:$0xff]  ;;  %v3865_v43 = vld [vmem:[%s4482_s18 + $0x510] sm:$0xff] }
 0x1ef   : > { %3160 = vst [vmem:[%s5588_s27 + $0x4a0] sm:$0xff] %v6942_v0  ;;  %v7077_v0 = vadd.f32 %v2143_v21, %v10101_v20  ;;  %v2149_v14 = vmul.f32 %v3864_v22, %v1900_v48  ;;  %v10102_v27 = vld [vmem:[#allocation140_spill] sm:$0xff] }
 0x1f0   : > { %3161 = vst [vmem:[%s5588_s27 + $0x4a8] sm:$0xff] %v6951_v13  ;;  %1631 = vadd.xlane.f32.xlu1 %v1630_v56  ;;  %v2150_v13 = vmul.f32 %v3865_v43, %v1900_v48  ;;  %v7085_v29 = vadd.f32 %v2148_v31, %v10102_v27  ;;  %v519_v21 = vld [vmem:[%s4482_s18 + $0xa78] sm:$0xff]  ;;  %v3867_v52 = vld [vmem:[%s4482_s18 + $0x4e0] sm:$0xff]  ;;  %v3868_v48 = vld [vmem:[%s4482_s18 + $0x4e8] sm:$0xff]  ;;  %v7104_v27 = vadd.f32 %v2151_v10, %v10105_v61 }
 0x1f1   : > { %3162 = vst [vmem:[%s5588_s27 + $0x4b0] sm:$0xff] %v6954_v32  ;;  %v10103_v32 = vld [vmem:[#allocation141_spill] sm:$0xff]  ;;  %v2144_v20 = vmul.f32 %v3867_v52, %v1899_v5  ;;  %v2145_v22 = vmul.f32 %v3868_v48, %v1899_v5  ;;  %v2147_v52 = vmul.f32 %v3870_v35, %v1899_v5  ;;  %v527_v48 = vld [vmem:[%s4482_s18 + $0xab8] sm:$0xff]  ;;  %v7120_v10 = vmul.f32 %v4501_v8, %v518_v17  ;;  %v522_v35 = vld [vmem:[%s4482_s18 + $0xa90] sm:$0xff] }
 0x1f2   : > { %3163 = vst [vmem:[%s5588_s27 + $0x4b8] sm:$0xff] %v6963_v11  ;;  %v7092_v56 = vadd.f32 %v2149_v14, %v10103_v32  ;;  %v524_v43 = vld [vmem:[%s4482_s18 + $0xaa0] sm:$0xff]  ;;  %v525_v31 = vld [vmem:[%s4482_s18 + $0xaa8] sm:$0xff]  ;;  %v7101_v11 = vadd.f32 %v2150_v13, %v10104_v26  ;;  %v3869_v14 = vld [vmem:[%s4482_s18 + $0x4f0] sm:$0xff]  ;;  %v7123_v61 = vmul.f32 %v4503_v9, %v519_v21  ;;  %v1633_v17 = vadd.f32 %v7049_v40, %v7046_v28 }
 0x1f3   : > { %3156 = vst [vmem:[%s5588_s27 + $0x480] sm:$0xff] %v6968_v3  ;;  %v2146_v32 = vmul.f32 %v3869_v14, %v1899_v5  ;;  %v520_v44 = vld [vmem:[%s4482_s18 + $0xa80] sm:$0xff]  ;;  %v7114_v3 = vadd.f32 %v2144_v20, %v10106_v30  ;;  %v10107_v13 = vld [vmem:[#allocation143_spill] sm:$0xff]  ;;  %v521_v14 = vld [vmem:[%s4482_s18 + $0xa88] sm:$0xff]  ;;  %v7139_v21 = vmul.f32 %v4497_v6, %v524_v43  ;;  %v7144_v41 = vmul.f32 %v4499_v7, %v525_v31 }
 0x1f4   : > { %3157 = vst [vmem:[%s5588_s27 + $0x488] sm:$0xff] %v6976_v18  ;;  %v7117_v26 = vadd.f32 %v2145_v22, %v10107_v13  ;;  %v523_v5 = vld [vmem:[%s4482_s18 + $0xa98] sm:$0xff]  ;;  %v1427_v18 = vpop.xlane.xlu2 %1426  ;;  %v10110_v30 = vld [vmem:[#allocation150_spill] sm:$0xff]  ;;  %v10111_v22 = vld [vmem:[#allocation153_spill] sm:$0xff]  ;;  %v7163_v31 = vmul.f32 %v4501_v8, %v522_v35 }
 0x1f5   : > { %10108 = vst [vmem:[#allocation121_spill] sm:$0xff] %v7120_v10  ;;  %v7131_v20 = vadd.f32 %v2146_v32, %v10110_v30  ;;  %v7134_v13 = vadd.f32 %v2147_v52, %v10111_v22  ;;  %v7150_v32 = vmul.f32 %v4503_v9, %v527_v48  ;;  %v7153_v52 = vmul.f32 %v4497_v6, %v520_v44  ;;  %v528_v30 = vld [vmem:[%s4482_s18 + $0xac0] sm:$0xff]  ;;  %v529_v43 = vld [vmem:[%s4482_s18 + $0xac8] sm:$0xff] }
 0x1f6   : > { %10109 = vst [vmem:[#allocation111_spill] sm:$0xff] %v7123_v61  ;;  %v1634_v22 = vadd.f32 %v1633_v17, %v7120_v10  ;;  %v1643_v44 = vadd.f32 %v7144_v41, %v7139_v21  ;;  %v1903_v48 = vsub.f32 %v5513_v63, %v1437_v24  ;;  %v7184_v17 = vmul.f32 %v4499_v7, %v529_v43  ;;  %v3871_v24 = vld [vmem:[%s4482_s18 + $0x520] sm:$0xff]  ;;  %v3874_v43 = vld [vmem:[%s4482_s18 + $0x538] sm:$0xff] }
 0x1f7   : > { %3158 = vst [vmem:[%s5588_s27 + $0x490] sm:$0xff] %v6993_v16  ;;  %v7147_v16 = vmul.f32 %v4501_v8, %v526_v23  ;;  %v7166_v23 = vmul.f32 %v4503_v9, %v523_v5 }
 0x1f8   : > { %10112 = vst [vmem:[#allocation112_spill] sm:$0xff] %v7139_v21  ;;  %v1635_v35 = vadd.f32 %v1634_v22, %v7123_v61  ;;  %v1447_v61 = vpop.xlane.xlu0 %1446 }
 0x1f9   : > { %3159 = vst [vmem:[%s5588_s27 + $0x498] sm:$0xff] %v6996_v54  ;;  %v7160_v54 = vmul.f32 %v4499_v7, %v521_v14  ;;  %v1902_v14 = vsub.f32 %v5513_v63, %v1432_v2  ;;  %v1644_v2 = vadd.f32 %v1643_v44, %v7147_v16 }
 0x1fa   : > { %10113 = vst [vmem:[#allocation115_spill] sm:$0xff] %v7144_v41  ;;  %v3873_v41 = vld [vmem:[%s4482_s18 + $0x530] sm:$0xff]  ;;  %1636 = vadd.xlane.f32.xlu2 %v1635_v35 }
 0x1fb   : > { %10114 = vst [vmem:[#allocation124_spill] sm:$0xff] %v7147_v16  ;;  %v1638_v5 = vadd.f32 %v7160_v54, %v7153_v52 }
 0x1fc   : > { %10115 = vst [vmem:[#allocation117_spill] sm:$0xff] %v7150_v32 }
 0x1fd   : > { %10116 = vst [vmem:[#allocation118_spill] sm:$0xff] %v7153_v52  ;;  %v10123_v52 = vld [vmem:[#allocation146_spill] sm:$0xff] }
 0x1fe   : > { %3164 = vst [vmem:[%s5588_s27 + $0x4c0] sm:$0xff] %v2652_v15  ;;  %v1901_v15 = vsub.f32 %v5513_v63, %v1427_v18  ;;  %v3872_v18 = vld [vmem:[%s4482_s18 + $0x528] sm:$0xff] }
 0x1ff   : > { %10117 = vst [vmem:[#allocation125_spill] sm:$0xff] %v7160_v54 }
 0x200   : > { %10118 = vst [vmem:[#allocation128_spill] sm:$0xff] %v7163_v31  ;;  %v2153_v22 = vmul.f32 %v3872_v18, %v1901_v15  ;;  %v2154_v21 = vmul.f32 %v3873_v41, %v1901_v15  ;;  %v2155_v54 = vmul.f32 %v3874_v43, %v1901_v15  ;;  %v10122_v18 = vld [vmem:[#allocation145_spill] sm:$0xff] }
 0x201   : > { %10119 = vst [vmem:[#allocation119_spill] sm:$0xff] %v7166_v23 }
 0x202   : > { %3165 = vst [vmem:[%s5588_s27 + $0x4c8] sm:$0xff] %v7068_v62  ;;  %v7181_v62 = vmul.f32 %v4497_v6, %v528_v30  ;;  %v1639_v30 = vadd.f32 %v1638_v5, %v7163_v31  ;;  %v2665_v16 = vadd.f32 %v2153_v22, %v10123_v52  ;;  %v10125_v5 = vld [vmem:[#allocation156_spill] sm:$0xff] }
 0x203   : > { %3166 = vst [vmem:[%s5588_s27 + $0x4d0] sm:$0xff] %v7074_v36  ;;  %v2152_v36 = vmul.f32 %v3871_v24, %v1901_v15  ;;  %v1645_v24 = vadd.f32 %v1644_v2, %v7150_v32  ;;  %v7209_v43 = vadd.f32 %v2155_v54, %v10125_v5  ;;  %v10127_v5 = vld [vmem:[#allocation155_spill] sm:$0xff]  ;;  %v532_v31 = vld [vmem:[%s4482_s18 + $0xae0] sm:$0xff]  ;;  %v10131_v32 = vld [vmem:[#allocation158_spill] sm:$0xff] }
 0x204   : > { %10120 = vst [vmem:[#allocation120_spill] sm:$0xff] %v7181_v62  ;;  %v1640_v15 = vadd.f32 %v1639_v30, %v7166_v23  ;;  %v3879_v30 = vld [vmem:[%s4482_s18 + $0x540] sm:$0xff] }
 0x205   : > { %10121 = vst [vmem:[#allocation126_spill] sm:$0xff] %v7184_v17  ;;  %v2664_v41 = vadd.f32 %v2152_v36, %v10122_v18  ;;  %1646 = vadd.xlane.f32.xlu1 %v1645_v24  ;;  %v2156_v54 = vmul.f32 %v3879_v30, %v1902_v14  ;;  %v530_v18 = vld [vmem:[%s4482_s18 + $0xad0] sm:$0xff]  ;;  %v10128_v24 = vld [vmem:[#allocation161_spill] sm:$0xff] }
 0x206   : > { %3167 = vst [vmem:[%s5588_s27 + $0x4d8] sm:$0xff] %v7077_v0  ;;  %v3875_v0 = vld [vmem:[%s4482_s18 + $0x560] sm:$0xff]  ;;  %1641 = vadd.xlane.f32.xlu0 %v1640_v15 }
 0x207   : > { %3172 = vst [vmem:[%s5588_s27 + $0x500] sm:$0xff] %v7085_v29  ;;  %v2160_v44 = vmul.f32 %v3875_v0, %v1903_v48  ;;  %v10124_v29 = vld [vmem:[#allocation151_spill] sm:$0xff]  ;;  %v10130_v23 = vld [vmem:[#allocation157_spill] sm:$0xff] }
 0x208   : > { %3173 = vst [vmem:[%s5588_s27 + $0x508] sm:$0xff] %v7092_v56  ;;  %v7203_v35 = vadd.f32 %v2154_v21, %v10124_v29  ;;  %v3876_v56 = vld [vmem:[%s4482_s18 + $0x568] sm:$0xff]  ;;  %v3877_v0 = vld [vmem:[%s4482_s18 + $0x570] sm:$0xff]  ;;  %v3878_v21 = vld [vmem:[%s4482_s18 + $0x578] sm:$0xff] }
 0x209   : > { %3174 = vst [vmem:[%s5588_s27 + $0x510] sm:$0xff] %v7101_v11  ;;  %v2161_v2 = vmul.f32 %v3876_v56, %v1903_v48  ;;  %v2162_v36 = vmul.f32 %v3877_v0, %v1903_v48  ;;  %v2163_v52 = vmul.f32 %v3878_v21, %v1903_v48  ;;  %v10126_v11 = vld [vmem:[#allocation154_spill] sm:$0xff]  ;;  %v531_v29 = vld [vmem:[%s4482_s18 + $0xad8] sm:$0xff] }
 0x20a   : > { %3175 = vst [vmem:[%s5588_s27 + $0x518] sm:$0xff] %v7104_v27  ;;  %v2672_v22 = vadd.f32 %v2160_v44, %v10126_v11  ;;  %v3880_v48 = vld [vmem:[%s4482_s18 + $0x548] sm:$0xff]  ;;  %v536_v44 = vld [vmem:[%s4482_s18 + $0xb00] sm:$0xff] }
 0x20b   : > { %3168 = vst [vmem:[%s5588_s27 + $0x4e0] sm:$0xff] %v7114_v3  ;;  %v2673_v27 = vadd.f32 %v2161_v2, %v10127_v5  ;;  %v7224_v56 = vadd.f32 %v2162_v36, %v10128_v24  ;;  %v2157_v0 = vmul.f32 %v3880_v48, %v1902_v14  ;;  %v537_v21 = vld [vmem:[%s4482_s18 + $0xb08] sm:$0xff]  ;;  %v10129_v11 = vld [vmem:[#allocation172_spill] sm:$0xff]  ;;  %v3881_v3 = vld [vmem:[%s4482_s18 + $0x550] sm:$0xff]  ;;  %v7237_v36 = vadd.f32 %v2156_v54, %v10130_v23 }
 0x20c   : > { %3169 = vst [vmem:[%s5588_s27 + $0x4e8] sm:$0xff] %v7117_v26  ;;  %v7232_v30 = vadd.f32 %v2163_v52, %v10129_v11  ;;  %v2158_v15 = vmul.f32 %v3881_v3, %v1902_v14  ;;  %v3882_v2 = vld [vmem:[%s4482_s18 + $0x558] sm:$0xff]  ;;  %v538_v24 = vld [vmem:[%s4482_s18 + $0xb10] sm:$0xff]  ;;  %v7248_v52 = vmul.f32 %v4501_v8, %v530_v18  ;;  %v7251_v11 = vmul.f32 %v4503_v9, %v531_v29  ;;  %v533_v23 = vld [vmem:[%s4482_s18 + $0xae8] sm:$0xff] }
 0x20d   : > { %v2159_v5 = vmul.f32 %v3882_v2, %v1902_v14  ;;  %v539_v48 = vld [vmem:[%s4482_s18 + $0xb18] sm:$0xff]  ;;  %3170 = vst [vmem:[%s5588_s27 + $0x4f0] sm:$0xff] %v7131_v20  ;;  %v7245_v26 = vadd.f32 %v2157_v0, %v10131_v32  ;;  %v1648_v14 = vadd.f32 %v7184_v17, %v7181_v62  ;;  %v534_v54 = vld [vmem:[%s4482_s18 + $0xaf0] sm:$0xff]  ;;  %v1442_v20 = vpop.xlane.xlu2 %1441  ;;  %v10135_v18 = vld [vmem:[#allocation173_spill] sm:$0xff]  ;;  %v7267_v29 = vmul.f32 %v4497_v6, %v536_v44  ;;  %v1452_v62 = vpop.xlane.xlu1 %1451 }
 0x20e   : > { %10132 = vst [vmem:[#allocation129_spill] sm:$0xff] %v7248_v52  ;;  %v535_v3 = vld [vmem:[%s4482_s18 + $0xaf8] sm:$0xff]  ;;  %v10134_v32 = vld [vmem:[#allocation162_spill] sm:$0xff]  ;;  %v7270_v17 = vmul.f32 %v4499_v7, %v537_v21  ;;  %v540_v44 = vld [vmem:[%s4482_s18 + $0xb20] sm:$0xff] }
 0x20f   : > { %10133 = vst [vmem:[#allocation122_spill] sm:$0xff] %v7251_v11  ;;  %v7261_v0 = vadd.f32 %v2158_v15, %v10134_v32  ;;  %v7264_v2 = vadd.f32 %v2159_v5, %v10135_v18  ;;  %v1649_v10 = vadd.f32 %v1648_v14, %v7248_v52  ;;  %v7278_v15 = vmul.f32 %v4503_v9, %v539_v48  ;;  %v541_v32 = vld [vmem:[%s4482_s18 + $0xb28] sm:$0xff]  ;;  %v3885_v18 = vld [vmem:[%s4482_s18 + $0x590] sm:$0xff] }
 0x210   : > { %3171 = vst [vmem:[%s5588_s27 + $0x4f8] sm:$0xff] %v7134_v13  ;;  %v7275_v13 = vmul.f32 %v4501_v8, %v538_v24  ;;  %v7281_v5 = vmul.f32 %v4497_v6, %v532_v31  ;;  %v1658_v21 = vadd.f32 %v7270_v17, %v7267_v29  ;;  %v7292_v24 = vmul.f32 %v4501_v8, %v534_v54 }
 0x211   : > { %10136 = vst [vmem:[#allocation123_spill] sm:$0xff] %v7267_v29  ;;  %v7295_v48 = vmul.f32 %v4503_v9, %v535_v3  ;;  %v1650_v31 = vadd.f32 %v1649_v10, %v7251_v11  ;;  %v1906_v14 = vsub.f32 %v5513_v63, %v1452_v62  ;;  %v7312_v10 = vmul.f32 %v4499_v7, %v541_v32  ;;  %v3883_v62 = vld [vmem:[%s4482_s18 + $0x580] sm:$0xff]  ;;  %v10155_v29 = vld [vmem:[#allocation167_spill] sm:$0xff] }
 0x212   : > { %10137 = vst [vmem:[#allocation127_spill] sm:$0xff] %v7270_v17  ;;  %v1659_v54 = vadd.f32 %v1658_v21, %v7275_v13 }
 0x213   : > { %3176 = vst [vmem:[%s5588_s27 + $0x520] sm:$0xff] %v2664_v41  ;;  %v7289_v41 = vmul.f32 %v4499_v7, %v533_v23  ;;  %v1905_v23 = vsub.f32 %v5513_v63, %v1447_v61  ;;  %1651 = vadd.xlane.f32.xlu2 %v1650_v31 }
 0x214   : > { %10138 = vst [vmem:[#allocation132_spill] sm:$0xff] %v7275_v13  ;;  %v10146_v13 = vld [vmem:[#allocation160_spill] sm:$0xff] }
 0x215   : > { %10139 = vst [vmem:[#allocation130_spill] sm:$0xff] %v7278_v15  ;;  %v1653_v3 = vadd.f32 %v7289_v41, %v7281_v5 }
 0x216   : > { %10140 = vst [vmem:[#allocation131_spill] sm:$0xff] %v7281_v5  ;;  %v3886_v5 = vld [vmem:[%s4482_s18 + $0x598] sm:$0xff] }
 0x217   : > { %3177 = vst [vmem:[%s5588_s27 + $0x528] sm:$0xff] %v2665_v16  ;;  %v1904_v16 = vsub.f32 %v5513_v63, %v1442_v20 }
 0x218   : > { %10141 = vst [vmem:[#allocation137_spill] sm:$0xff] %v7289_v41  ;;  %v1660_v41 = vadd.f32 %v1659_v54, %v7278_v15  ;;  %v3888_v54 = vld [vmem:[%s4482_s18 + $0x5c8] sm:$0xff] }
 0x219   : > { %10142 = vst [vmem:[#allocation144_spill] sm:$0xff] %v7292_v24  ;;  %v2164_v61 = vmul.f32 %v3883_v62, %v1904_v16  ;;  %v2166_v21 = vmul.f32 %v3885_v18, %v1904_v16  ;;  %v2167_v32 = vmul.f32 %v3886_v5, %v1904_v16  ;;  %v10145_v62 = vld [vmem:[#allocation159_spill] sm:$0xff]  ;;  %v10147_v18 = vld [vmem:[#allocation165_spill] sm:$0xff]  ;;  %v2173_v15 = vmul.f32 %v3888_v54, %v1906_v14  ;;  %v10151_v54 = vld [vmem:[#allocation176_spill] sm:$0xff] }
 0x21a   : > { %10143 = vst [vmem:[#allocation133_spill] sm:$0xff] %v7295_v48  ;;  %1661 = vadd.xlane.f32.xlu1 %v1660_v41  ;;  %v10150_v41 = vld [vmem:[#allocation164_spill] sm:$0xff] }
 0x21b   : > { %3178 = vst [vmem:[%s5588_s27 + $0x530] sm:$0xff] %v7203_v35  ;;  %v7309_v35 = vmul.f32 %v4497_v6, %v540_v44  ;;  %v1654_v44 = vadd.f32 %v1653_v3, %v7292_v24  ;;  %v544_v24 = vld [vmem:[%s4482_s18 + $0xb40] sm:$0xff] }
 0x21c   : > { %3179 = vst [vmem:[%s5588_s27 + $0x538] sm:$0xff] %v7209_v43  ;;  %v3884_v43 = vld [vmem:[%s4482_s18 + $0x588] sm:$0xff] }
 0x21d   : > { %10144 = vst [vmem:[#allocation134_spill] sm:$0xff] %v7312_v10  ;;  %v2165_v20 = vmul.f32 %v3884_v43, %v1904_v16  ;;  %v2676_v43 = vadd.f32 %v2164_v61, %v10145_v62  ;;  %v1655_v5 = vadd.f32 %v1654_v44, %v7295_v48  ;;  %v10148_v16 = vld [vmem:[#allocation178_spill] sm:$0xff]  ;;  %v2685_v62 = vadd.f32 %v2173_v15, %v10150_v41  ;;  %v3891_v44 = vld [vmem:[%s4482_s18 + $0x5a0] sm:$0xff] }
 0x21e   : > { %3184 = vst [vmem:[%s5588_s27 + $0x560] sm:$0xff] %v2672_v22  ;;  %v3887_v22 = vld [vmem:[%s4482_s18 + $0x5c0] sm:$0xff]  ;;  %v2679_v3 = vadd.f32 %v2167_v32, %v10148_v16  ;;  %v543_v32 = vld [vmem:[%s4482_s18 + $0xb38] sm:$0xff]  ;;  %v3892_v16 = vld [vmem:[%s4482_s18 + $0x5a8] sm:$0xff] }
 0x21f   : > { %3185 = vst [vmem:[%s5588_s27 + $0x568] sm:$0xff] %v2673_v27  ;;  %v2172_v31 = vmul.f32 %v3887_v22, %v1906_v14  ;;  %v2677_v17 = vadd.f32 %v2165_v20, %v10146_v13  ;;  %v2678_v27 = vadd.f32 %v2166_v21, %v10147_v18  ;;  %v542_v22 = vld [vmem:[%s4482_s18 + $0xb30] sm:$0xff]  ;;  %v3890_v13 = vld [vmem:[%s4482_s18 + $0x5d8] sm:$0xff]  ;;  %v2168_v18 = vmul.f32 %v3891_v44, %v1905_v23 }
 0x220   : > { %3186 = vst [vmem:[%s5588_s27 + $0x570] sm:$0xff] %v7224_v56  ;;  %v3889_v56 = vld [vmem:[%s4482_s18 + $0x5d0] sm:$0xff]  ;;  %v2175_v20 = vmul.f32 %v3890_v13, %v1906_v14  ;;  %1656 = vadd.xlane.f32.xlu0 %v1655_v5  ;;  %v3894_v5 = vld [vmem:[%s4482_s18 + $0x5b8] sm:$0xff] }
 0x221   : > { %3187 = vst [vmem:[%s5588_s27 + $0x578] sm:$0xff] %v7232_v30  ;;  %v2174_v61 = vmul.f32 %v3889_v56, %v1906_v14  ;;  %v10149_v21 = vld [vmem:[#allocation163_spill] sm:$0xff]  ;;  %v2169_v14 = vmul.f32 %v3892_v16, %v1905_v23  ;;  %v10152_v41 = vld [vmem:[#allocation182_spill] sm:$0xff]  ;;  %v2171_v44 = vmul.f32 %v3894_v5, %v1905_v23 }
 0x222   : > { %3180 = vst [vmem:[%s5588_s27 + $0x540] sm:$0xff] %v7237_v36  ;;  %v2684_v30 = vadd.f32 %v2172_v31, %v10149_v21  ;;  %v3893_v56 = vld [vmem:[%s4482_s18 + $0x5b0] sm:$0xff]  ;;  %v548_v31 = vld [vmem:[%s4482_s18 + $0xb60] sm:$0xff]  ;;  %v549_v21 = vld [vmem:[%s4482_s18 + $0xb68] sm:$0xff] }
 0x223   : > { %3181 = vst [vmem:[%s5588_s27 + $0x548] sm:$0xff] %v7245_v26  ;;  %v2686_v36 = vadd.f32 %v2174_v61, %v10151_v54  ;;  %v2170_v13 = vmul.f32 %v3893_v56, %v1905_v23  ;;  %v550_v15 = vld [vmem:[%s4482_s18 + $0xb70] sm:$0xff]  ;;  %v2687_v26 = vadd.f32 %v2175_v20, %v10152_v41  ;;  %v7356_v54 = vmul.f32 %v4501_v8, %v542_v22  ;;  %v551_v16 = vld [vmem:[%s4482_s18 + $0xb78] sm:$0xff]  ;;  %v545_v56 = vld [vmem:[%s4482_s18 + $0xb48] sm:$0xff] }
 0x224   : > { %3182 = vst [vmem:[%s5588_s27 + $0x550] sm:$0xff] %v7261_v0  ;;  %v10153_v48 = vld [vmem:[#allocation166_spill] sm:$0xff]  ;;  %v7364_v11 = vadd.f32 %v2169_v14, %v10155_v29  ;;  %v10156_v0 = vld [vmem:[#allocation177_spill] sm:$0xff]  ;;  %v7370_v20 = vmul.f32 %v4503_v9, %v543_v32  ;;  %v547_v22 = vld [vmem:[%s4482_s18 + $0xb58] sm:$0xff]  ;;  %v7384_v29 = vmul.f32 %v4499_v7, %v549_v21  ;;  %v7387_v32 = vmul.f32 %v4501_v8, %v550_v15  ;;  %v1467_v14 = vpop.xlane.xlu1 %1466 }
 0x225   : > { %v2680_v61 = vadd.f32 %v2168_v18, %v10153_v48  ;;  %10154 = vst [vmem:[#allocation138_spill] sm:$0xff] %v7356_v54  ;;  %v7367_v52 = vadd.f32 %v2170_v13, %v10156_v0  ;;  %v1663_v48 = vadd.f32 %v7312_v10, %v7309_v35  ;;  %v546_v23 = vld [vmem:[%s4482_s18 + $0xb50] sm:$0xff]  ;;  %v1457_v18 = vpop.xlane.xlu2 %1456  ;;  %v1462_v13 = vpop.xlane.xlu0 %1461  ;;  %v7407_v15 = vmul.f32 %v4503_v9, %v547_v22  ;;  %v3895_v22 = vld [vmem:[%s4482_s18 + $0x5e0] sm:$0xff] }
 0x226   : > { %3183 = vst [vmem:[%s5588_s27 + $0x558] sm:$0xff] %v7264_v2  ;;  %v10158_v41 = vld [vmem:[#allocation183_spill] sm:$0xff]  ;;  %v7381_v2 = vmul.f32 %v4497_v6, %v548_v31  ;;  %v7398_v31 = vmul.f32 %v4499_v7, %v545_v56  ;;  %v1909_v56 = vsub.f32 %v5513_v63, %v1467_v14 }
 0x227   : > { %10157 = vst [vmem:[#allocation147_spill] sm:$0xff] %v7370_v20  ;;  %v7378_v5 = vadd.f32 %v2171_v44, %v10158_v41  ;;  %v1664_v0 = vadd.f32 %v1663_v48, %v7356_v54  ;;  %v7395_v44 = vmul.f32 %v4497_v6, %v544_v24  ;;  %v1908_v48 = vsub.f32 %v5513_v63, %v1462_v13  ;;  %v3898_v14 = vld [vmem:[%s4482_s18 + $0x5f8] sm:$0xff] }
 0x228   : > { %3188 = vst [vmem:[%s5588_s27 + $0x580] sm:$0xff] %v2676_v43  ;;  %v7392_v43 = vmul.f32 %v4503_v9, %v551_v16  ;;  %v1673_v21 = vadd.f32 %v7384_v29, %v7381_v2  ;;  %v1907_v16 = vsub.f32 %v5513_v63, %v1457_v18  ;;  %v3897_v18 = vld [vmem:[%s4482_s18 + $0x5f0] sm:$0xff] }
 0x229   : > { %10159 = vst [vmem:[#allocation135_spill] sm:$0xff] %v7381_v2  ;;  %v1665_v24 = vadd.f32 %v1664_v0, %v7370_v20  ;;  %v10176_v20 = vld [vmem:[#allocation175_spill] sm:$0xff] }
 0x22a   : > { %10160 = vst [vmem:[#allocation136_spill] sm:$0xff] %v7384_v29  ;;  %v2176_v41 = vmul.f32 %v3895_v22, %v1907_v16  ;;  %v3896_v29 = vld [vmem:[%s4482_s18 + $0x5e8] sm:$0xff]  ;;  %v2178_v2 = vmul.f32 %v3897_v18, %v1907_v16  ;;  %v2179_v13 = vmul.f32 %v3898_v14, %v1907_v16  ;;  %v10167_v22 = vld [vmem:[#allocation168_spill] sm:$0xff]  ;;  %v3901_v14 = vld [vmem:[%s4482_s18 + $0x630] sm:$0xff] }
 0x22b   : > { %10161 = vst [vmem:[#allocation139_spill] sm:$0xff] %v7387_v32  ;;  %1666 = vadd.xlane.f32.xlu2 %v1665_v24 }
 0x22c   : > { %3189 = vst [vmem:[%s5588_s27 + $0x588] sm:$0xff] %v2677_v17  ;;  %v7404_v17 = vmul.f32 %v4501_v8, %v546_v23  ;;  %v1674_v23 = vadd.f32 %v1673_v21, %v7387_v32  ;;  %v10169_v32 = vld [vmem:[#allocation179_spill] sm:$0xff] }
 0x22d   : > { %10162 = vst [vmem:[#allocation148_spill] sm:$0xff] %v7392_v43 }
 0x22e   : > { %10163 = vst [vmem:[#allocation140_spill] sm:$0xff] %v7395_v44  ;;  %v1675_v21 = vadd.f32 %v1674_v23, %v7392_v43  ;;  %v2186_v23 = vmul.f32 %v3901_v14, %v1909_v56  ;;  %v555_v14 = vld [vmem:[%s4482_s18 + $0xb98] sm:$0xff] }
 0x22f   : > { %10164 = vst [vmem:[#allocation141_spill] sm:$0xff] %v7398_v31  ;;  %v563_v43 = vld [vmem:[%s4482_s18 + $0xbd8] sm:$0xff] }
 0x230   : > { %3190 = vst [vmem:[%s5588_s27 + $0x590] sm:$0xff] %v2678_v27  ;;  %v1668_v27 = vadd.f32 %v7398_v31, %v7395_v44  ;;  %v3899_v31 = vld [vmem:[%s4482_s18 + $0x620] sm:$0xff]  ;;  %1676 = vadd.xlane.f32.xlu1 %v1675_v21 }
 0x231   : > { %10165 = vst [vmem:[#allocation149_spill] sm:$0xff] %v7404_v17  ;;  %v10168_v44 = vld [vmem:[#allocation169_spill] sm:$0xff] }
 0x232   : > { %10166 = vst [vmem:[#allocation152_spill] sm:$0xff] %v7407_v15  ;;  %v1669_v0 = vadd.f32 %v1668_v27, %v7404_v17  ;;  %v10175_v17 = vld [vmem:[#allocation174_spill] sm:$0xff] }
 0x233   : > { %3191 = vst [vmem:[%s5588_s27 + $0x598] sm:$0xff] %v2679_v3  ;;  %v2177_v3 = vmul.f32 %v3896_v29, %v1907_v16  ;;  %v2688_v29 = vadd.f32 %v2176_v41, %v10167_v22  ;;  %v10170_v16 = vld [vmem:[#allocation184_spill] sm:$0xff]  ;;  %v554_v22 = vld [vmem:[%s4482_s18 + $0xb90] sm:$0xff] }
 0x234   : > { %3196 = vst [vmem:[%s5588_s27 + $0x5c0] sm:$0xff] %v2684_v30  ;;  %v2184_v30 = vmul.f32 %v3899_v31, %v1909_v56  ;;  %v1670_v24 = vadd.f32 %v1669_v0, %v7407_v15  ;;  %v2691_v27 = vadd.f32 %v2179_v13, %v10170_v16  ;;  %v3900_v31 = vld [vmem:[%s4482_s18 + $0x628] sm:$0xff]  ;;  %v3903_v41 = vld [vmem:[%s4482_s18 + $0x600] sm:$0xff] }
 0x235   : > { %3197 = vst [vmem:[%s5588_s27 + $0x5c8] sm:$0xff] %v2685_v62  ;;  %v2689_v18 = vadd.f32 %v2177_v3, %v10168_v44  ;;  %v2690_v62 = vadd.f32 %v2178_v2, %v10169_v32  ;;  %v3902_v44 = vld [vmem:[%s4482_s18 + $0x638] sm:$0xff]  ;;  %v10171_v32 = vld [vmem:[#allocation170_spill] sm:$0xff]  ;;  %v2180_v3 = vmul.f32 %v3903_v41, %v1908_v48  ;;  %v552_v0 = vld [vmem:[%s4482_s18 + $0xb80] sm:$0xff] }
 0x236   : > { %3198 = vst [vmem:[%s5588_s27 + $0x5d0] sm:$0xff] %v2686_v36  ;;  %v2185_v36 = vmul.f32 %v3900_v31, %v1909_v56  ;;  %v2187_v2 = vmul.f32 %v3902_v44, %v1909_v56  ;;  %v553_v13 = vld [vmem:[%s4482_s18 + $0xb88] sm:$0xff]  ;;  %1671 = vadd.xlane.f32.xlu0 %v1670_v24  ;;  %v10173_v16 = vld [vmem:[#allocation180_spill] sm:$0xff]  ;;  %v3905_v24 = vld [vmem:[%s4482_s18 + $0x610] sm:$0xff] }
 0x237   : > { %3199 = vst [vmem:[%s5588_s27 + $0x5d8] sm:$0xff] %v2687_v26  ;;  %v2696_v26 = vadd.f32 %v2184_v30, %v10171_v32  ;;  %v2698_v56 = vadd.f32 %v2186_v23, %v10173_v16  ;;  %v3904_v31 = vld [vmem:[%s4482_s18 + $0x608] sm:$0xff]  ;;  %v560_v44 = vld [vmem:[%s4482_s18 + $0xbc0] sm:$0xff]  ;;  %v2182_v15 = vmul.f32 %v3905_v24, %v1908_v48  ;;  %v2692_v23 = vadd.f32 %v2180_v3, %v10175_v17  ;;  %v562_v16 = vld [vmem:[%s4482_s18 + $0xbd0] sm:$0xff] }
 0x238   : > { %3192 = vst [vmem:[%s5588_s27 + $0x5a0] sm:$0xff] %v2680_v61  ;;  %v10172_v61 = vld [vmem:[#allocation171_spill] sm:$0xff]  ;;  %v2181_v30 = vmul.f32 %v3904_v31, %v1908_v48  ;;  %v561_v32 = vld [vmem:[%s4482_s18 + $0xbc8] sm:$0xff]  ;;  %v556_v31 = vld [vmem:[%s4482_s18 + $0xba0] sm:$0xff] }
 0x239   : > { %3193 = vst [vmem:[%s5588_s27 + $0x5a8] sm:$0xff] %v7364_v11  ;;  %v2697_v21 = vadd.f32 %v2185_v36, %v10172_v61  ;;  %v10174_v41 = vld [vmem:[#allocation185_spill] sm:$0xff]  ;;  %v3906_v36 = vld [vmem:[%s4482_s18 + $0x618] sm:$0xff]  ;;  %v558_v17 = vld [vmem:[%s4482_s18 + $0xbb0] sm:$0xff] }
 0x23a   : > { %3194 = vst [vmem:[%s5588_s27 + $0x5b0] sm:$0xff] %v7367_v52  ;;  %v2699_v11 = vadd.f32 %v2187_v2, %v10174_v41  ;;  %v2183_v61 = vmul.f32 %v3906_v36, %v1908_v48  ;;  %v7462_v54 = vadd.f32 %v2181_v30, %v10176_v20  ;;  %v7465_v52 = vmul.f32 %v4497_v6, %v552_v0  ;;  %v557_v48 = vld [vmem:[%s4482_s18 + $0xba8] sm:$0xff]  ;;  %v559_v3 = vld [vmem:[%s4482_s18 + $0xbb8] sm:$0xff]  ;;  %v1482_v36 = vpop.xlane.xlu1 %1481 }
 0x23b   : > { %3195 = vst [vmem:[%s5588_s27 + $0x5b8] sm:$0xff] %v7378_v5  ;;  %v7468_v2 = vmul.f32 %v4499_v7, %v553_v13  ;;  %v7471_v41 = vmul.f32 %v4501_v8, %v554_v22  ;;  %v10179_v5 = vld [vmem:[#allocation181_spill] sm:$0xff]  ;;  %v10180_v20 = vld [vmem:[#allocation186_spill] sm:$0xff]  ;;  %v7484_v0 = vmul.f32 %v4503_v9, %v555_v14  ;;  %v7487_v13 = vmul.f32 %v4497_v6, %v560_v44  ;;  %v1472_v22 = vpop.xlane.xlu2 %1471 }
 0x23c   : > { %3200 = vst [vmem:[%s5588_s27 + $0x5e0] sm:$0xff] %v2688_v29  ;;  %v7478_v24 = vadd.f32 %v2182_v15, %v10179_v5  ;;  %v7481_v30 = vadd.f32 %v2183_v61, %v10180_v20  ;;  %v7493_v29 = vmul.f32 %v4499_v7, %v561_v32  ;;  %v7496_v15 = vmul.f32 %v4501_v8, %v562_v16  ;;  %v1477_v61 = vpop.xlane.xlu0 %1476  ;;  %v564_v44 = vld [vmem:[%s4482_s18 + $0xbe0] sm:$0xff]  ;;  %v565_v5 = vld [vmem:[%s4482_s18 + $0xbe8] sm:$0xff] }
 0x23d   : > { %10177 = vst [vmem:[#allocation142_spill] sm:$0xff] %v7468_v2  ;;  %v1678_v10 = vadd.f32 %v7468_v2, %v7465_v52  ;;  %v7499_v14 = vmul.f32 %v4503_v9, %v563_v43  ;;  %v7508_v20 = vmul.f32 %v4499_v7, %v557_v48  ;;  %v7511_v32 = vmul.f32 %v4501_v8, %v558_v17 }
 0x23e   : > { %10178 = vst [vmem:[#allocation143_spill] sm:$0xff] %v7471_v41  ;;  %v7514_v16 = vmul.f32 %v4503_v9, %v559_v3  ;;  %v1912_v48 = vsub.f32 %v5513_v63, %v1482_v36  ;;  %v1911_v3 = vsub.f32 %v5513_v63, %v1477_v61 }
 0x23f   : > { %10181 = vst [vmem:[#allocation150_spill] sm:$0xff] %v7487_v13  ;;  %v1679_v43 = vadd.f32 %v1678_v10, %v7471_v41  ;;  %v7530_v10 = vmul.f32 %v4499_v7, %v565_v5  ;;  %v3910_v5 = vld [vmem:[%s4482_s18 + $0x658] sm:$0xff] }
 0x240   : > { %3201 = vst [vmem:[%s5588_s27 + $0x5e8] sm:$0xff] %v2689_v18  ;;  %v7505_v18 = vmul.f32 %v4497_v6, %v556_v31  ;;  %v1910_v31 = vsub.f32 %v5513_v63, %v1472_v22 }
 0x241   : > { %10182 = vst [vmem:[#allocation153_spill] sm:$0xff] %v7493_v29  ;;  %v1680_v22 = vadd.f32 %v1679_v43, %v7484_v0 }
 0x242   : > { %10183 = vst [vmem:[#allocation145_spill] sm:$0xff] %v7496_v15  ;;  %v1683_v17 = vadd.f32 %v7508_v20, %v7505_v18  ;;  %v2191_v41 = vmul.f32 %v3910_v5, %v1910_v31 }
 0x243   : > { %10184 = vst [vmem:[#allocation146_spill] sm:$0xff] %v7499_v14  ;;  %1681 = vadd.xlane.f32.xlu2 %v1680_v22  ;;  %v3914_v22 = vld [vmem:[%s4482_s18 + $0x698] sm:$0xff] }
 0x244   : > { %3202 = vst [vmem:[%s5588_s27 + $0x5f0] sm:$0xff] %v2690_v62  ;;  %v1688_v62 = vadd.f32 %v7493_v29, %v7487_v13  ;;  %v3908_v13 = vld [vmem:[%s4482_s18 + $0x648] sm:$0xff]  ;;  %v1684_v61 = vadd.f32 %v1683_v17, %v7511_v32  ;;  %v2703_v5 = vadd.f32 %v2191_v41, %v5556_v38  ;;  %v3915_v41 = vld [vmem:[%s4482_s18 + $0x660] sm:$0xff] }
 0x245   : > { %10185 = vst [vmem:[#allocation151_spill] sm:$0xff] %v7505_v18  ;;  %v10193_v38 = vld [vmem:[#allocation190_spill] sm:$0xff] }
 0x246   : > { %10186 = vst [vmem:[#allocation156_spill] sm:$0xff] %v7508_v20  ;;  %v1689_v36 = vadd.f32 %v1688_v62, %v7496_v15  ;;  %v2189_v20 = vmul.f32 %v3908_v13, %v1910_v31  ;;  %v10189_v62 = vld [vmem:[#allocation187_spill] sm:$0xff] }
 0x247   : > { %10187 = vst [vmem:[#allocation154_spill] sm:$0xff] %v7511_v32 }
 0x248   : > { %10188 = vst [vmem:[#allocation155_spill] sm:$0xff] %v7514_v16  ;;  %v1690_v43 = vadd.f32 %v1689_v36, %v7499_v14  ;;  %v10192_v36 = vld [vmem:[#allocation189_spill] sm:$0xff]  ;;  %v10196_v14 = vld [vmem:[#allocation192_spill] sm:$0xff] }
 0x249   : > { %3203 = vst [vmem:[%s5588_s27 + $0x5f8] sm:$0xff] %v2691_v27  ;;  %v7527_v27 = vmul.f32 %v4497_v6, %v564_v44  ;;  %v3909_v44 = vld [vmem:[%s4482_s18 + $0x650] sm:$0xff] }
 0x24a   : > { %3208 = vst [vmem:[%s5588_s27 + $0x620] sm:$0xff] %v2696_v26  ;;  %v3907_v26 = vld [vmem:[%s4482_s18 + $0x640] sm:$0xff]  ;;  %v2190_v18 = vmul.f32 %v3909_v44, %v1910_v31  ;;  %1691 = vadd.xlane.f32.xlu1 %v1690_v43  ;;  %v2192_v43 = vmul.f32 %v3915_v41, %v1911_v3  ;;  %v575_v41 = vld [vmem:[%s4482_s18 + $0xc38] sm:$0xff] }
 0x24b   : > { %3209 = vst [vmem:[%s5588_s27 + $0x628] sm:$0xff] %v2697_v21  ;;  %v2188_v29 = vmul.f32 %v3907_v26, %v1910_v31  ;;  %v3911_v21 = vld [vmem:[%s4482_s18 + $0x680] sm:$0xff]  ;;  %v1685_v26 = vadd.f32 %v1684_v61, %v7514_v16 }
 0x24c   : > { %3210 = vst [vmem:[%s5588_s27 + $0x630] sm:$0xff] %v2698_v56  ;;  %v2196_v2 = vmul.f32 %v3911_v21, %v1912_v48  ;;  %v10190_v56 = vld [vmem:[#allocation188_spill] sm:$0xff]  ;;  %v10191_v44 = vld [vmem:[#allocation193_spill] sm:$0xff] }
 0x24d   : > { %3211 = vst [vmem:[%s5588_s27 + $0x638] sm:$0xff] %v2699_v11  ;;  %v2700_v13 = vadd.f32 %v2188_v29, %v10189_v62  ;;  %v2701_v17 = vadd.f32 %v2189_v20, %v10190_v56  ;;  %v2702_v31 = vadd.f32 %v2190_v18, %v10191_v44  ;;  %v3912_v21 = vld [vmem:[%s4482_s18 + $0x688] sm:$0xff]  ;;  %v3913_v29 = vld [vmem:[%s4482_s18 + $0x690] sm:$0xff]  ;;  %v567_v62 = vld [vmem:[%s4482_s18 + $0xbf8] sm:$0xff]  ;;  %1686 = vadd.xlane.f32.xlu0 %v1685_v26 }
 0x24e   : > { %3204 = vst [vmem:[%s5588_s27 + $0x600] sm:$0xff] %v2692_v23  ;;  %v2197_v11 = vmul.f32 %v3912_v21, %v1912_v48  ;;  %v2198_v20 = vmul.f32 %v3913_v29, %v1912_v48  ;;  %v2199_v23 = vmul.f32 %v3914_v22, %v1912_v48  ;;  %v2708_v61 = vadd.f32 %v2196_v2, %v10192_v36  ;;  %v566_v18 = vld [vmem:[%s4482_s18 + $0xbf0] sm:$0xff]  ;;  %v3916_v56 = vld [vmem:[%s4482_s18 + $0x668] sm:$0xff]  ;;  %v572_v48 = vld [vmem:[%s4482_s18 + $0xc20] sm:$0xff] }
 0x24f   : > { %3205 = vst [vmem:[%s5588_s27 + $0x608] sm:$0xff] %v7462_v54  ;;  %v2193_v44 = vmul.f32 %v3916_v56, %v1911_v3  ;;  %v573_v21 = vld [vmem:[%s4482_s18 + $0xc28] sm:$0xff]  ;;  %v3917_v26 = vld [vmem:[%s4482_s18 + $0x670] sm:$0xff]  ;;  %v3918_v22 = vld [vmem:[%s4482_s18 + $0x678] sm:$0xff]  ;;  %v7578_v15 = vmul.f32 %v4501_v8, %v566_v18  ;;  %v7592_v18 = vmul.f32 %v4497_v6, %v572_v48 }
 0x250   : > { %3206 = vst [vmem:[%s5588_s27 + $0x610] sm:$0xff] %v7478_v24  ;;  %v2709_v54 = vadd.f32 %v2197_v11, %v10193_v38  ;;  %v10194_v2 = vld [vmem:[#allocation194_spill] sm:$0xff]  ;;  %v2711_v24 = vadd.f32 %v2199_v23, %v5560_v12  ;;  %v2194_v11 = vmul.f32 %v3917_v26, %v1911_v3  ;;  %v2195_v36 = vmul.f32 %v3918_v22, %v1911_v3  ;;  %v568_v16 = vld [vmem:[%s4482_s18 + $0xc00] sm:$0xff]  ;;  %v10195_v56 = vld [vmem:[#allocation191_spill] sm:$0xff] }
 0x251   : > { %3207 = vst [vmem:[%s5588_s27 + $0x618] sm:$0xff] %v7481_v30  ;;  %v2710_v29 = vadd.f32 %v2198_v20, %v10194_v2  ;;  %v574_v38 = vld [vmem:[%s4482_s18 + $0xc30] sm:$0xff]  ;;  %v2704_v32 = vadd.f32 %v2192_v43, %v10195_v56  ;;  %v2705_v30 = vadd.f32 %v2193_v44, %v10196_v14  ;;  %v7581_v20 = vmul.f32 %v4503_v9, %v567_v62  ;;  %v569_v12 = vld [vmem:[%s4482_s18 + $0xc08] sm:$0xff]  ;;  %v571_v3 = vld [vmem:[%s4482_s18 + $0xc18] sm:$0xff]  ;;  %v1487_v2 = vpop.xlane.xlu2 %1486  ;;  %v1497_v62 = vpop.xlane.xlu1 %1496 }
 0x252   : > { %3212 = vst [vmem:[%s5588_s27 + $0x640] sm:$0xff] %v2700_v13  ;;  %v570_v23 = vld [vmem:[%s4482_s18 + $0xc10] sm:$0xff]  ;;  %v2706_v13 = vadd.f32 %v2194_v11, %v5536_v50  ;;  %v2707_v43 = vadd.f32 %v2195_v36, %v5565_v45  ;;  %v1693_v14 = vadd.f32 %v7530_v10, %v7527_v27  ;;  %v1492_v44 = vpop.xlane.xlu0 %1491  ;;  %v7596_v26 = vmul.f32 %v4499_v7, %v573_v21  ;;  %v576_v11 = vld [vmem:[%s4482_s18 + $0xc40] sm:$0xff]  ;;  %v577_v22 = vld [vmem:[%s4482_s18 + $0xc48] sm:$0xff] }
 0x253   : > { %3213 = vst [vmem:[%s5588_s27 + $0x648] sm:$0xff] %v2701_v17  ;;  %v7599_v17 = vmul.f32 %v4501_v8, %v574_v38  ;;  %v7602_v50 = vmul.f32 %v4503_v9, %v575_v41  ;;  %v7605_v45 = vmul.f32 %v4497_v6, %v568_v16  ;;  %v7615_v21 = vmul.f32 %v4501_v8, %v570_v23 }
 0x254   : > { %3214 = vst [vmem:[%s5588_s27 + $0x650] sm:$0xff] %v2702_v31  ;;  %v1694_v48 = vadd.f32 %v1693_v14, %v7578_v15  ;;  %v7612_v31 = vmul.f32 %v4499_v7, %v569_v12  ;;  %v7618_v36 = vmul.f32 %v4503_v9, %v571_v3  ;;  %v1703_v16 = vadd.f32 %v7596_v26, %v7592_v18 }
 0x255   : > { %10197 = vst [vmem:[#allocation161_spill] sm:$0xff] %v7605_v45  ;;  %v1915_v38 = vsub.f32 %v5513_v63, %v1497_v62  ;;  %v1914_v41 = vsub.f32 %v5513_v63, %v1492_v44  ;;  %v7634_v23 = vmul.f32 %v4499_v7, %v577_v22  ;;  %v3921_v44 = vld [vmem:[%s4482_s18 + $0x6b0] sm:$0xff] }
 0x256   : > { %3215 = vst [vmem:[%s5588_s27 + $0x658] sm:$0xff] %v2703_v5  ;;  %v1913_v5 = vsub.f32 %v5513_v63, %v1487_v2  ;;  %v1695_v56 = vadd.f32 %v1694_v48, %v7581_v20  ;;  %v1698_v12 = vadd.f32 %v7612_v31, %v7605_v45  ;;  %v1704_v3 = vadd.f32 %v1703_v16, %v7599_v17  ;;  %v3919_v2 = vld [vmem:[%s4482_s18 + $0x6a0] sm:$0xff] }
 0x257   : > { %10198 = vst [vmem:[#allocation172_spill] sm:$0xff] %v7612_v31  ;;  %v3922_v31 = vld [vmem:[%s4482_s18 + $0x6b8] sm:$0xff]  ;;  %v3923_v45 = vld [vmem:[%s4482_s18 + $0x6e0] sm:$0xff] }
 0x258   : > { %3220 = vst [vmem:[%s5588_s27 + $0x680] sm:$0xff] %v2708_v61  ;;  %v7631_v61 = vmul.f32 %v4497_v6, %v576_v11  ;;  %v2200_v14 = vmul.f32 %v3919_v2, %v1913_v5  ;;  %v2202_v48 = vmul.f32 %v3921_v44, %v1913_v5  ;;  %1696 = vadd.xlane.f32.xlu2 %v1695_v56  ;;  %v3928_v44 = vld [vmem:[%s4482_s18 + $0x6c8] sm:$0xff] }
 0x259   : > { %3221 = vst [vmem:[%s5588_s27 + $0x688] sm:$0xff] %v2709_v54  ;;  %v3920_v54 = vld [vmem:[%s4482_s18 + $0x6a8] sm:$0xff]  ;;  %v1699_v11 = vadd.f32 %v1698_v12, %v7615_v21  ;;  %v2203_v22 = vmul.f32 %v3922_v31, %v1913_v5  ;;  %v1705_v16 = vadd.f32 %v1704_v3, %v7602_v50 }
 0x25a   : > { %3222 = vst [vmem:[%s5588_s27 + $0x690] sm:$0xff] %v2710_v29  ;;  %v2201_v62 = vmul.f32 %v3920_v54, %v1913_v5  ;;  %v2208_v29 = vmul.f32 %v3923_v45, %v1915_v38  ;;  %v2712_v2 = vadd.f32 %v2200_v14, %v5604_v33  ;;  %v3924_v5 = vld [vmem:[%s4482_s18 + $0x6e8] sm:$0xff]  ;;  %v3926_v33 = vld [vmem:[%s4482_s18 + $0x6f8] sm:$0xff]  ;;  %v578_v14 = vld [vmem:[%s4482_s18 + $0xc50] sm:$0xff] }
 0x25b   : > { %3223 = vst [vmem:[%s5588_s27 + $0x698] sm:$0xff] %v2711_v24  ;;  %v2714_v24 = vadd.f32 %v2202_v48, %v5622_v51  ;;  %v1700_v56 = vadd.f32 %v1699_v11, %v7618_v36  ;;  %v2715_v31 = vadd.f32 %v2203_v22, %v5663_v46  ;;  %v2209_v45 = vmul.f32 %v3924_v5, %v1915_v38  ;;  %v579_v46 = vld [vmem:[%s4482_s18 + $0xc58] sm:$0xff]  ;;  %v584_v48 = vld [vmem:[%s4482_s18 + $0xc80] sm:$0xff]  ;;  %v585_v11 = vld [vmem:[%s4482_s18 + $0xc88] sm:$0xff] }
 0x25c   : > { %3216 = vst [vmem:[%s5588_s27 + $0x660] sm:$0xff] %v2704_v32  ;;  %v2713_v54 = vadd.f32 %v2201_v62, %v5607_v60  ;;  %v3925_v32 = vld [vmem:[%s4482_s18 + $0x6f0] sm:$0xff]  ;;  %1706 = vadd.xlane.f32.xlu1 %v1705_v16  ;;  %v2211_v60 = vmul.f32 %v3926_v33, %v1915_v38  ;;  %v2720_v51 = vadd.f32 %v2208_v29, %v5610_v59  ;;  %v3930_v29 = vld [vmem:[%s4482_s18 + $0x6d8] sm:$0xff]  ;;  %v1502_v33 = vpop.xlane.xlu2 %1501 }
 0x25d   : > { %3217 = vst [vmem:[%s5588_s27 + $0x668] sm:$0xff] %v2705_v30  ;;  %v2210_v12 = vmul.f32 %v3925_v32, %v1915_v38  ;;  %v3927_v30 = vld [vmem:[%s4482_s18 + $0x6c0] sm:$0xff]  ;;  %1701 = vadd.xlane.f32.xlu0 %v1700_v56  ;;  %v2205_v38 = vmul.f32 %v3928_v44, %v1914_v41  ;;  %v3929_v22 = vld [vmem:[%s4482_s18 + $0x6d0] sm:$0xff]  ;;  %v2207_v16 = vmul.f32 %v3930_v29, %v1914_v41  ;;  %v587_v5 = vld [vmem:[%s4482_s18 + $0xc98] sm:$0xff] }
 0x25e   : > { %3218 = vst [vmem:[%s5588_s27 + $0x670] sm:$0xff] %v2706_v13  ;;  %v2204_v3 = vmul.f32 %v3927_v30, %v1914_v41  ;;  %v2721_v13 = vadd.f32 %v2209_v45, %v5670_v4  ;;  %v2723_v59 = vadd.f32 %v2211_v60, %v5712_v55  ;;  %v586_v56 = vld [vmem:[%s4482_s18 + $0xc90] sm:$0xff]  ;;  %v7681_v55 = vmul.f32 %v4503_v9, %v579_v46 }
 0x25f   : > { %3219 = vst [vmem:[%s5588_s27 + $0x678] sm:$0xff] %v2707_v43  ;;  %v2722_v62 = vadd.f32 %v2210_v12, %v5673_v53  ;;  %v2206_v43 = vmul.f32 %v3929_v22, %v1914_v41  ;;  %v580_v53 = vld [vmem:[%s4482_s18 + $0xc60] sm:$0xff]  ;;  %v2717_v45 = vadd.f32 %v2205_v38, %v5721_v19  ;;  %v1708_v32 = vadd.f32 %v7634_v23, %v7631_v61  ;;  %v581_v12 = vld [vmem:[%s4482_s18 + $0xc68] sm:$0xff]  ;;  %v582_v41 = vld [vmem:[%s4482_s18 + $0xc70] sm:$0xff] }
 0x260   : > { %3224 = vst [vmem:[%s5588_s27 + $0x6a0] sm:$0xff] %v2712_v2  ;;  %v2716_v4 = vadd.f32 %v2204_v3, %v5718_v37  ;;  %v7678_v2 = vmul.f32 %v4501_v8, %v578_v14  ;;  %v583_v37 = vld [vmem:[%s4482_s18 + $0xc78] sm:$0xff]  ;;  %v2719_v19 = vadd.f32 %v2207_v16, %v5771_v57  ;;  %v7692_v60 = vmul.f32 %v4497_v6, %v584_v48  ;;  %v1512_v3 = vpop.xlane.xlu1 %1511  ;;  %v1507_v14 = vpop.xlane.xlu0 %1506  ;;  %v589_v38 = vld [vmem:[%s4482_s18 + $0xca8] sm:$0xff] }
 0x261   : > { %3225 = vst [vmem:[%s5588_s27 + $0x6a8] sm:$0xff] %v2713_v54  ;;  %v2718_v54 = vadd.f32 %v2206_v43, %v5724_v42  ;;  %v7695_v30 = vmul.f32 %v4499_v7, %v585_v11  ;;  %v7700_v44 = vmul.f32 %v4501_v8, %v586_v56  ;;  %v7703_v42 = vmul.f32 %v4503_v9, %v587_v5 }
 0x262   : > { %3226 = vst [vmem:[%s5588_s27 + $0x6b0] sm:$0xff] %v2714_v24  ;;  %v1709_v46 = vadd.f32 %v1708_v32, %v7678_v2  ;;  %v7706_v57 = vmul.f32 %v4497_v6, %v580_v53  ;;  %v588_v24 = vld [vmem:[%s4482_s18 + $0xca0] sm:$0xff]  ;;  %v7717_v11 = vmul.f32 %v4501_v8, %v582_v41  ;;  %v7720_v22 = vmul.f32 %v4503_v9, %v583_v37  ;;  %v3933_v37 = vld [vmem:[%s4482_s18 + $0x710] sm:$0xff] }
 0x263   : > { %3227 = vst [vmem:[%s5588_s27 + $0x6b8] sm:$0xff] %v2715_v31  ;;  %v1718_v48 = vadd.f32 %v7695_v30, %v7692_v60  ;;  %v7714_v31 = vmul.f32 %v4499_v7, %v581_v12  ;;  %v1918_v29 = vsub.f32 %v5513_v63, %v1512_v3  ;;  %v1917_v16 = vsub.f32 %v5513_v63, %v1507_v14  ;;  %v3931_v32 = vld [vmem:[%s4482_s18 + $0x700] sm:$0xff] }
 0x264   : > { %10199 = vst [vmem:[#allocation157_spill] sm:$0xff] %v7700_v44  ;;  %v1710_v43 = vadd.f32 %v1709_v46, %v7681_v55  ;;  %v7735_v53 = vmul.f32 %v4499_v7, %v589_v38  ;;  %v3934_v46 = vld [vmem:[%s4482_s18 + $0x718] sm:$0xff] }
 0x265   : > { %10200 = vst [vmem:[#allocation158_spill] sm:$0xff] %v7703_v42  ;;  %v1719_v56 = vadd.f32 %v1718_v48, %v7700_v44  ;;  %v1713_v5 = vadd.f32 %v7714_v31, %v7706_v57 }
 0x266   : > { %10201 = vst [vmem:[#allocation162_spill] sm:$0xff] %v7706_v57  ;;  %1711 = vadd.xlane.f32.xlu2 %v1710_v43  ;;  %v10205_v43 = vld [vmem:[#allocation14_spill] sm:$0xff] }
 0x267   : > { %3232 = vst [vmem:[%s5588_s27 + $0x6e0] sm:$0xff] %v2720_v51  ;;  %v1916_v51 = vsub.f32 %v5513_v63, %v1502_v33  ;;  %v1720_v3 = vadd.f32 %v1719_v56, %v7703_v42  ;;  %v1714_v14 = vadd.f32 %v1713_v5, %v7717_v11  ;;  %v10207_v5 = vld [vmem:[#allocation13_spill] sm:$0xff]  ;;  %v10214_v42 = vld [vmem:[#allocation26_spill] sm:$0xff] }
 0x268   : > { %10202 = vst [vmem:[#allocation173_spill] sm:$0xff] %v7714_v31  ;;  %v593_v31 = vld [vmem:[%s4482_s18 + $0xcc8] sm:$0xff] }
 0x269   : > { %10203 = vst [vmem:[#allocation159_spill] sm:$0xff] %v7717_v11  ;;  %v2212_v12 = vmul.f32 %v3931_v32, %v1916_v51  ;;  %v2214_v33 = vmul.f32 %v3933_v37, %v1916_v51  ;;  %v3936_v37 = vld [vmem:[%s4482_s18 + $0x748] sm:$0xff]  ;;  %1721 = vadd.xlane.f32.xlu1 %v1720_v3 }
 0x26a   : > { %10204 = vst [vmem:[#allocation160_spill] sm:$0xff] %v7720_v22  ;;  %v2221_v56 = vmul.f32 %v3936_v37, %v1918_v29  ;;  %v591_v37 = vld [vmem:[%s4482_s18 + $0xcb8] sm:$0xff] }
 0x26b   : > { %3233 = vst [vmem:[%s5588_s27 + $0x6e8] sm:$0xff] %v2721_v13  ;;  %v7732_v13 = vmul.f32 %v4497_v6, %v588_v24  ;;  %v2215_v24 = vmul.f32 %v3934_v46, %v1916_v51  ;;  %v2724_v48 = vadd.f32 %v2212_v12, %v5890_v58  ;;  %v590_v58 = vld [vmem:[%s4482_s18 + $0xcb0] sm:$0xff]  ;;  %v3938_v12 = vld [vmem:[%s4482_s18 + $0x758] sm:$0xff] }
 0x26c   : > { %3234 = vst [vmem:[%s5588_s27 + $0x6f0] sm:$0xff] %v2722_v62  ;;  %v3932_v62 = vld [vmem:[%s4482_s18 + $0x708] sm:$0xff] }
 0x26d   : > { %3235 = vst [vmem:[%s5588_s27 + $0x6f8] sm:$0xff] %v2723_v59  ;;  %v2213_v41 = vmul.f32 %v3932_v62, %v1916_v51  ;;  %v3935_v59 = vld [vmem:[%s4482_s18 + $0x740] sm:$0xff]  ;;  %v1715_v51 = vadd.f32 %v1714_v14, %v7720_v22  ;;  %v2727_v46 = vadd.f32 %v2215_v24, %v10207_v5  ;;  %v10210_v24 = vld [vmem:[#allocation23_spill] sm:$0xff] }
 0x26e   : > { %3228 = vst [vmem:[%s5588_s27 + $0x6c0] sm:$0xff] %v2716_v4  ;;  %v2220_v38 = vmul.f32 %v3935_v59, %v1918_v29  ;;  %v10206_v62 = vld [vmem:[#allocation20_spill] sm:$0xff]  ;;  %v3937_v59 = vld [vmem:[%s4482_s18 + $0x750] sm:$0xff] }
 0x26f   : > { %3229 = vst [vmem:[%s5588_s27 + $0x6c8] sm:$0xff] %v2717_v45  ;;  %v2725_v32 = vadd.f32 %v2213_v41, %v10205_v43  ;;  %v2726_v4 = vadd.f32 %v2214_v33, %v10206_v62  ;;  %v2222_v45 = vmul.f32 %v3937_v59, %v1918_v29  ;;  %v2223_v41 = vmul.f32 %v3938_v12, %v1918_v29  ;;  %v10208_v33 = vld [vmem:[#allocation15_spill] sm:$0xff]  ;;  %v10209_v43 = vld [vmem:[#allocation18_spill] sm:$0xff]  ;;  %v3939_v14 = vld [vmem:[%s4482_s18 + $0x720] sm:$0xff] }
 0x270   : > { %3230 = vst [vmem:[%s5588_s27 + $0x6d0] sm:$0xff] %v2718_v54  ;;  %v2732_v54 = vadd.f32 %v2220_v38, %v10208_v33  ;;  %v2733_v3 = vadd.f32 %v2221_v56, %v10209_v43  ;;  %v2216_v62 = vmul.f32 %v3939_v14, %v1917_v16  ;;  %1716 = vadd.xlane.f32.xlu0 %v1715_v51  ;;  %v3941_v29 = vld [vmem:[%s4482_s18 + $0x730] sm:$0xff]  ;;  %v596_v22 = vld [vmem:[%s4482_s18 + $0xce0] sm:$0xff]  ;;  %v597_v38 = vld [vmem:[%s4482_s18 + $0xce8] sm:$0xff] }
 0x271   : > { %3231 = vst [vmem:[%s5588_s27 + $0x6d8] sm:$0xff] %v2719_v19  ;;  %v2734_v5 = vadd.f32 %v2222_v45, %v10210_v24  ;;  %v3940_v19 = vld [vmem:[%s4482_s18 + $0x728] sm:$0xff]  ;;  %v2218_v12 = vmul.f32 %v3941_v29, %v1917_v16  ;;  %v598_v56 = vld [vmem:[%s4482_s18 + $0xcf0] sm:$0xff]  ;;  %v10211_v33 = vld [vmem:[#allocation16_spill] sm:$0xff]  ;;  %v7774_v45 = vmul.f32 %v4501_v8, %v590_v58  ;;  %v1517_v58 = vpop.xlane.xlu2 %1516 }
 0x272   : > { %3236 = vst [vmem:[%s5588_s27 + $0x700] sm:$0xff] %v2724_v48  ;;  %v2217_v59 = vmul.f32 %v3940_v19, %v1917_v16  ;;  %v2735_v43 = vadd.f32 %v2223_v41, %v10211_v33  ;;  %v3942_v51 = vld [vmem:[%s4482_s18 + $0x738] sm:$0xff]  ;;  %v10212_v14 = vld [vmem:[#allocation17_spill] sm:$0xff]  ;;  %v594_v41 = vld [vmem:[%s4482_s18 + $0xcd0] sm:$0xff] }
 0x273   : > { %3237 = vst [vmem:[%s5588_s27 + $0x708] sm:$0xff] %v2725_v32  ;;  %v2219_v48 = vmul.f32 %v3942_v51, %v1917_v16  ;;  %v2728_v11 = vadd.f32 %v2216_v62, %v10212_v14  ;;  %v599_v24 = vld [vmem:[%s4482_s18 + $0xcf8] sm:$0xff]  ;;  %v592_v19 = vld [vmem:[%s4482_s18 + $0xcc0] sm:$0xff]  ;;  %v2730_v44 = vadd.f32 %v2218_v12, %v10214_v42  ;;  %v7783_v32 = vmul.f32 %v4503_v9, %v591_v37  ;;  %v1527_v37 = vpop.xlane.xlu1 %1526  ;;  %v1522_v12 = vpop.xlane.xlu0 %1521 }
 0x274   : > { %3238 = vst [vmem:[%s5588_s27 + $0x710] sm:$0xff] %v2726_v4  ;;  %v10213_v29 = vld [vmem:[#allocation19_spill] sm:$0xff]  ;;  %v1723_v16 = vadd.f32 %v7735_v53, %v7732_v13  ;;  %v10216_v33 = vld [vmem:[#allocation21_spill] sm:$0xff]  ;;  %v7792_v4 = vmul.f32 %v4497_v6, %v596_v22  ;;  %v7798_v42 = vmul.f32 %v4501_v8, %v598_v56  ;;  %v7809_v22 = vmul.f32 %v4499_v7, %v593_v31 }
 0x275   : > { %v2729_v57 = vadd.f32 %v2217_v59, %v10213_v29  ;;  %10215 = vst [vmem:[#allocation165_spill] sm:$0xff] %v7783_v32  ;;  %v595_v62 = vld [vmem:[%s4482_s18 + $0xcd8] sm:$0xff]  ;;  %v2731_v51 = vadd.f32 %v2219_v48, %v10216_v33  ;;  %v7795_v59 = vmul.f32 %v4499_v7, %v597_v38  ;;  %v7806_v48 = vmul.f32 %v4497_v6, %v592_v19  ;;  %v3944_v33 = vld [vmem:[%s4482_s18 + $0x768] sm:$0xff] }
 0x276   : > { %3239 = vst [vmem:[%s5588_s27 + $0x718] sm:$0xff] %v2727_v46  ;;  %v1724_v14 = vadd.f32 %v1723_v16, %v7774_v45  ;;  %v7803_v46 = vmul.f32 %v4503_v9, %v599_v24  ;;  %v7818_v56 = vmul.f32 %v4503_v9, %v595_v62  ;;  %v1919_v24 = vsub.f32 %v5513_v63, %v1517_v58  ;;  %v3945_v58 = vld [vmem:[%s4482_s18 + $0x770] sm:$0xff] }
 0x277   : > { %10217 = vst [vmem:[#allocation178_spill] sm:$0xff] %v7792_v4  ;;  %v1733_v38 = vadd.f32 %v7795_v59, %v7792_v4  ;;  %v1728_v31 = vadd.f32 %v7809_v22, %v7806_v48  ;;  %v1920_v29 = vsub.f32 %v5513_v63, %v1522_v12 }
 0x278   : > { %10218 = vst [vmem:[#allocation163_spill] sm:$0xff] %v7795_v59  ;;  %v1725_v19 = vadd.f32 %v1724_v14, %v7783_v32  ;;  %v2226_v59 = vmul.f32 %v3945_v58, %v1919_v24  ;;  %v10225_v58 = vld [vmem:[#allocation22_spill] sm:$0xff] }
 0x279   : > { %10219 = vst [vmem:[#allocation164_spill] sm:$0xff] %v7798_v42  ;;  %v1734_v16 = vadd.f32 %v1733_v38, %v7798_v42 }
 0x27a   : > { %3244 = vst [vmem:[%s5588_s27 + $0x740] sm:$0xff] %v2732_v54  ;;  %v7815_v54 = vmul.f32 %v4501_v8, %v594_v41  ;;  %v3943_v41 = vld [vmem:[%s4482_s18 + $0x760] sm:$0xff]  ;;  %1726 = vadd.xlane.f32.xlu2 %v1725_v19 }
 0x27b   : > { %10220 = vst [vmem:[#allocation176_spill] sm:$0xff] %v7803_v46  ;;  %v2224_v62 = vmul.f32 %v3943_v41, %v1919_v24  ;;  %v1735_v38 = vadd.f32 %v1734_v16, %v7803_v46  ;;  %v604_v46 = vld [vmem:[%s4482_s18 + $0xd20] sm:$0xff] }
 0x27c   : > { %10221 = vst [vmem:[#allocation182_spill] sm:$0xff] %v7806_v48  ;;  %v1729_v14 = vadd.f32 %v1728_v31, %v7815_v54 }
 0x27d   : > { %10222 = vst [vmem:[#allocation166_spill] sm:$0xff] %v7809_v22  ;;  %v3947_v22 = vld [vmem:[%s4482_s18 + $0x7a0] sm:$0xff]  ;;  %v2736_v41 = vadd.f32 %v2224_v62, %v5954_v39  ;;  %1736 = vadd.xlane.f32.xlu1 %v1735_v38  ;;  %v3950_v39 = vld [vmem:[%s4482_s18 + $0x7b8] sm:$0xff] }
 0x27e   : > { %3245 = vst [vmem:[%s5588_s27 + $0x748] sm:$0xff] %v2733_v3  ;;  %v1921_v3 = vsub.f32 %v5513_v63, %v1527_v37  ;;  %v3946_v37 = vld [vmem:[%s4482_s18 + $0x778] sm:$0xff]  ;;  %v1730_v19 = vadd.f32 %v1729_v14, %v7818_v56  ;;  %v3951_v62 = vld [vmem:[%s4482_s18 + $0x780] sm:$0xff] }
 0x27f   : > { %10223 = vst [vmem:[#allocation167_spill] sm:$0xff] %v7815_v54  ;;  %v2227_v12 = vmul.f32 %v3946_v37, %v1919_v24  ;;  %v3949_v37 = vld [vmem:[%s4482_s18 + $0x7b0] sm:$0xff]  ;;  %v600_v14 = vld [vmem:[%s4482_s18 + $0xd00] sm:$0xff]  ;;  %v3954_v54 = vld [vmem:[%s4482_s18 + $0x798] sm:$0xff] }
 0x280   : > { %10224 = vst [vmem:[#allocation177_spill] sm:$0xff] %v7818_v56  ;;  %v2234_v16 = vmul.f32 %v3949_v37, %v1921_v3  ;;  %1731 = vadd.xlane.f32.xlu0 %v1730_v19  ;;  %v3953_v19 = vld [vmem:[%s4482_s18 + $0x790] sm:$0xff] }
 0x281   : > { %3246 = vst [vmem:[%s5588_s27 + $0x750] sm:$0xff] %v2734_v5  ;;  %v2225_v5 = vmul.f32 %v3944_v33, %v1919_v24  ;;  %v10226_v24 = vld [vmem:[#allocation29_spill] sm:$0xff] }
 0x282   : > { %3247 = vst [vmem:[%s5588_s27 + $0x758] sm:$0xff] %v2735_v43  ;;  %v2232_v43 = vmul.f32 %v3947_v22, %v1921_v3  ;;  %v2739_v31 = vadd.f32 %v2227_v12, %v10226_v24  ;;  %v3948_v22 = vld [vmem:[%s4482_s18 + $0x7a8] sm:$0xff] }
 0x283   : > { %3240 = vst [vmem:[%s5588_s27 + $0x720] sm:$0xff] %v2728_v11  ;;  %v2737_v33 = vadd.f32 %v2225_v5, %v5957_v47  ;;  %v2738_v11 = vadd.f32 %v2226_v59, %v10225_v58  ;;  %v2235_v47 = vmul.f32 %v3950_v39, %v1921_v3  ;;  %v10227_v59 = vld [vmem:[#allocation32_spill] sm:$0xff]  ;;  %v2228_v5 = vmul.f32 %v3951_v62, %v1920_v29  ;;  %v601_v12 = vld [vmem:[%s4482_s18 + $0xd08] sm:$0xff]  ;;  %v602_v58 = vld [vmem:[%s4482_s18 + $0xd10] sm:$0xff] }
 0x284   : > { %3241 = vst [vmem:[%s5588_s27 + $0x728] sm:$0xff] %v2729_v57  ;;  %v2233_v57 = vmul.f32 %v3948_v22, %v1921_v3  ;;  %v10229_v24 = vld [vmem:[#allocation25_spill] sm:$0xff]  ;;  %v10230_v62 = vld [vmem:[#allocation30_spill] sm:$0xff] }
 0x285   : > { %3242 = vst [vmem:[%s5588_s27 + $0x730] sm:$0xff] %v2730_v44  ;;  %v2744_v44 = vadd.f32 %v2232_v43, %v10227_v59  ;;  %v2746_v22 = vadd.f32 %v2234_v16, %v10229_v24  ;;  %v3952_v3 = vld [vmem:[%s4482_s18 + $0x788] sm:$0xff]  ;;  %v603_v43 = vld [vmem:[%s4482_s18 + $0xd18] sm:$0xff]  ;;  %v608_v39 = vld [vmem:[%s4482_s18 + $0xd40] sm:$0xff]  ;;  %v2747_v56 = vadd.f32 %v2235_v47, %v10230_v62  ;;  %v7874_v47 = vmul.f32 %v4499_v7, %v601_v12 }
 0x286   : > { %3243 = vst [vmem:[%s5588_s27 + $0x738] sm:$0xff] %v2731_v51  ;;  %v10228_v51 = vld [vmem:[#allocation24_spill] sm:$0xff]  ;;  %v2229_v37 = vmul.f32 %v3952_v3, %v1920_v29  ;;  %v609_v59 = vld [vmem:[%s4482_s18 + $0xd48] sm:$0xff]  ;;  %v610_v16 = vld [vmem:[%s4482_s18 + $0xd50] sm:$0xff]  ;;  %v7877_v62 = vmul.f32 %v4501_v8, %v602_v58  ;;  %v7889_v12 = vmul.f32 %v4497_v6, %v608_v39  ;;  %v1532_v58 = vpop.xlane.xlu2 %1531 }
 0x287   : > { %3248 = vst [vmem:[%s5588_s27 + $0x760] sm:$0xff] %v2736_v41  ;;  %v2745_v38 = vadd.f32 %v2233_v57, %v10228_v51  ;;  %v2230_v41 = vmul.f32 %v3953_v19, %v1920_v29  ;;  %v2231_v57 = vmul.f32 %v3954_v54, %v1920_v29  ;;  %v10231_v51 = vld [vmem:[#allocation35_spill] sm:$0xff]  ;;  %v605_v19 = vld [vmem:[%s4482_s18 + $0xd28] sm:$0xff]  ;;  %v7895_v32 = vmul.f32 %v4499_v7, %v609_v59  ;;  %v612_v39 = vld [vmem:[%s4482_s18 + $0xd60] sm:$0xff] }
 0x288   : > { %3249 = vst [vmem:[%s5588_s27 + $0x768] sm:$0xff] %v2737_v33  ;;  %v2740_v48 = vadd.f32 %v2228_v5, %v10231_v51  ;;  %v611_v24 = vld [vmem:[%s4482_s18 + $0xd58] sm:$0xff]  ;;  %v7871_v33 = vmul.f32 %v4497_v6, %v600_v14  ;;  %v606_v54 = vld [vmem:[%s4482_s18 + $0xd30] sm:$0xff]  ;;  %v7886_v14 = vmul.f32 %v4503_v9, %v603_v43 }
 0x289   : > { %3250 = vst [vmem:[%s5588_s27 + $0x770] sm:$0xff] %v2738_v11  ;;  %v10232_v3 = vld [vmem:[#allocation27_spill] sm:$0xff]  ;;  %v10234_v5 = vld [vmem:[#allocation28_spill] sm:$0xff]  ;;  %v7901_v43 = vmul.f32 %v4503_v9, %v611_v24  ;;  %v7913_v59 = vmul.f32 %v4501_v8, %v606_v54 }
 0x28a   : > { %v2741_v42 = vadd.f32 %v2229_v37, %v10232_v3  ;;  %10233 = vst [vmem:[#allocation183_spill] sm:$0xff] %v7877_v62  ;;  %v607_v29 = vld [vmem:[%s4482_s18 + $0xd38] sm:$0xff]  ;;  %v2742_v11 = vadd.f32 %v2230_v41, %v10234_v5  ;;  %v1542_v3 = vpop.xlane.xlu1 %1541  ;;  %v1738_v4 = vadd.f32 %v7874_v47, %v7871_v33  ;;  %v1537_v41 = vpop.xlane.xlu0 %1536  ;;  %v7910_v5 = vmul.f32 %v4499_v7, %v605_v19 }
 0x28b   : > { %3251 = vst [vmem:[%s5588_s27 + $0x778] sm:$0xff] %v2739_v31  ;;  %v10235_v51 = vld [vmem:[#allocation31_spill] sm:$0xff]  ;;  %v7898_v31 = vmul.f32 %v4501_v8, %v610_v16  ;;  %v7916_v16 = vmul.f32 %v4503_v9, %v607_v29  ;;  %v1924_v19 = vsub.f32 %v5513_v63, %v1542_v3  ;;  %v1923_v29 = vsub.f32 %v5513_v63, %v1537_v41 }
 0x28c   : > { %v2743_v37 = vadd.f32 %v2231_v57, %v10235_v51  ;;  %10236 = vst [vmem:[#allocation168_spill] sm:$0xff] %v7886_v14  ;;  %v613_v57 = vld [vmem:[%s4482_s18 + $0xd68] sm:$0xff]  ;;  %v1739_v24 = vadd.f32 %v1738_v4, %v7877_v62 }
 0x28d   : > { %10237 = vst [vmem:[#allocation169_spill] sm:$0xff] %v7889_v12  ;;  %v7932_v4 = vmul.f32 %v4499_v7, %v613_v57 }
 0x28e   : > { %3256 = vst [vmem:[%s5588_s27 + $0x7a0] sm:$0xff] %v2744_v44  ;;  %v7907_v44 = vmul.f32 %v4497_v6, %v604_v46  ;;  %v1922_v46 = vsub.f32 %v5513_v63, %v1532_v58  ;;  %v1740_v51 = vadd.f32 %v1739_v24, %v7886_v14 }
 0x28f   : > { %10238 = vst [vmem:[#allocation179_spill] sm:$0xff] %v7895_v32 }
 0x290   : > { %10239 = vst [vmem:[#allocation184_spill] sm:$0xff] %v7898_v31  ;;  %v1743_v54 = vadd.f32 %v7910_v5, %v7907_v44  ;;  %1741 = vadd.xlane.f32.xlu2 %v1740_v51  ;;  %v3961_v51 = vld [vmem:[%s4482_s18 + $0x810] sm:$0xff] }
 0x291   : > { %10240 = vst [vmem:[#allocation170_spill] sm:$0xff] %v7901_v43 }
 0x292   : > { %3257 = vst [vmem:[%s5588_s27 + $0x7a8] sm:$0xff] %v2745_v38  ;;  %v1748_v38 = vadd.f32 %v7895_v32, %v7889_v12  ;;  %v3956_v32 = vld [vmem:[%s4482_s18 + $0x7c8] sm:$0xff]  ;;  %v1744_v41 = vadd.f32 %v1743_v54, %v7913_v59  ;;  %v3958_v12 = vld [vmem:[%s4482_s18 + $0x7d8] sm:$0xff] }
 0x293   : > { %10241 = vst [vmem:[#allocation171_spill] sm:$0xff] %v7907_v44  ;;  %v2239_v57 = vmul.f32 %v3958_v12, %v1922_v46 }
 0x294   : > { %10242 = vst [vmem:[#allocation180_spill] sm:$0xff] %v7910_v5  ;;  %v1749_v58 = vadd.f32 %v1748_v38, %v7898_v31  ;;  %v2237_v5 = vmul.f32 %v3956_v32, %v1922_v46  ;;  %v10247_v38 = vld [vmem:[#allocation38_spill] sm:$0xff]  ;;  %v10255_v31 = vld [vmem:[#allocation47_spill] sm:$0xff] }
 0x295   : > { %10243 = vst [vmem:[#allocation185_spill] sm:$0xff] %v7913_v59  ;;  %v623_v59 = vld [vmem:[%s4482_s18 + $0xdb8] sm:$0xff] }
 0x296   : > { %10244 = vst [vmem:[#allocation174_spill] sm:$0xff] %v7916_v16  ;;  %v1750_v24 = vadd.f32 %v1749_v58, %v7901_v43  ;;  %v2246_v58 = vmul.f32 %v3961_v51, %v1924_v19 }
 0x297   : > { %3258 = vst [vmem:[%s5588_s27 + $0x7b0] sm:$0xff] %v2746_v22  ;;  %v7929_v22 = vmul.f32 %v4497_v6, %v612_v39  ;;  %v3957_v39 = vld [vmem:[%s4482_s18 + $0x7d0] sm:$0xff] }
 0x298   : > { %3259 = vst [vmem:[%s5588_s27 + $0x7b8] sm:$0xff] %v2747_v56  ;;  %v3955_v56 = vld [vmem:[%s4482_s18 + $0x7c0] sm:$0xff]  ;;  %v2238_v44 = vmul.f32 %v3957_v39, %v1922_v46  ;;  %1751 = vadd.xlane.f32.xlu1 %v1750_v24 }
 0x299   : > { %10245 = vst [vmem:[#allocation175_spill] sm:$0xff] %v7929_v22  ;;  %v2236_v3 = vmul.f32 %v3955_v56, %v1922_v46  ;;  %v1745_v56 = vadd.f32 %v1744_v41, %v7916_v16  ;;  %v10249_v46 = vld [vmem:[#allocation34_spill] sm:$0xff]  ;;  %v3963_v24 = vld [vmem:[%s4482_s18 + $0x7e0] sm:$0xff] }
 0x29a   : > { %10246 = vst [vmem:[#allocation181_spill] sm:$0xff] %v7932_v4  ;;  %v2750_v12 = vadd.f32 %v2238_v44, %v6167_v25  ;;  %v2751_v39 = vadd.f32 %v2239_v57, %v10249_v46  ;;  %v615_v25 = vld [vmem:[%s4482_s18 + $0xd78] sm:$0xff]  ;;  %v622_v16 = vld [vmem:[%s4482_s18 + $0xdb0] sm:$0xff] }
 0x29b   : > { %3252 = vst [vmem:[%s5588_s27 + $0x780] sm:$0xff] %v2740_v48  ;;  %v3959_v48 = vld [vmem:[%s4482_s18 + $0x800] sm:$0xff]  ;;  %v2748_v32 = vadd.f32 %v2236_v3, %v10247_v38  ;;  %v614_v38 = vld [vmem:[%s4482_s18 + $0xd70] sm:$0xff]  ;;  %1746 = vadd.xlane.f32.xlu0 %v1745_v56 }
 0x29c   : > { %3253 = vst [vmem:[%s5588_s27 + $0x788] sm:$0xff] %v2741_v42  ;;  %v2244_v62 = vmul.f32 %v3959_v48, %v1924_v19  ;;  %v10248_v42 = vld [vmem:[#allocation33_spill] sm:$0xff]  ;;  %v10251_v44 = vld [vmem:[#allocation44_spill] sm:$0xff]  ;;  %v7977_v14 = vmul.f32 %v4501_v8, %v614_v38 }
 0x29d   : > { %3254 = vst [vmem:[%s5588_s27 + $0x790] sm:$0xff] %v2742_v11  ;;  %v2749_v54 = vadd.f32 %v2237_v5, %v10248_v42  ;;  %v3960_v48 = vld [vmem:[%s4482_s18 + $0x808] sm:$0xff]  ;;  %v3962_v5 = vld [vmem:[%s4482_s18 + $0x818] sm:$0xff] }
 0x29e   : > { %3255 = vst [vmem:[%s5588_s27 + $0x798] sm:$0xff] %v2743_v37  ;;  %v2245_v11 = vmul.f32 %v3960_v48, %v1924_v19  ;;  %v2247_v37 = vmul.f32 %v3962_v5, %v1924_v19  ;;  %v10250_v3 = vld [vmem:[#allocation41_spill] sm:$0xff] }
 0x29f   : > { %3260 = vst [vmem:[%s5588_s27 + $0x7c0] sm:$0xff] %v2748_v32  ;;  %v2756_v41 = vadd.f32 %v2244_v62, %v10250_v3  ;;  %v2240_v32 = vmul.f32 %v3963_v24, %v1923_v29  ;;  %v3964_v42 = vld [vmem:[%s4482_s18 + $0x7e8] sm:$0xff]  ;;  %v620_v48 = vld [vmem:[%s4482_s18 + $0xda0] sm:$0xff] }
 0x2a0   : > { %3261 = vst [vmem:[%s5588_s27 + $0x7c8] sm:$0xff] %v2749_v54  ;;  %v2757_v57 = vadd.f32 %v2245_v11, %v10251_v44  ;;  %v2241_v46 = vmul.f32 %v3964_v42, %v1923_v29  ;;  %v621_v19 = vld [vmem:[%s4482_s18 + $0xda8] sm:$0xff]  ;;  %v10252_v62 = vld [vmem:[#allocation36_spill] sm:$0xff]  ;;  %v3965_v54 = vld [vmem:[%s4482_s18 + $0x7f0] sm:$0xff]  ;;  %v7991_v38 = vmul.f32 %v4497_v6, %v620_v48 }
 0x2a1   : > { %3262 = vst [vmem:[%s5588_s27 + $0x7d0] sm:$0xff] %v2750_v12  ;;  %v2758_v51 = vadd.f32 %v2246_v58, %v10252_v62  ;;  %v10253_v5 = vld [vmem:[#allocation37_spill] sm:$0xff]  ;;  %v2242_v3 = vmul.f32 %v3965_v54, %v1923_v29  ;;  %v3966_v11 = vld [vmem:[%s4482_s18 + $0x7f8] sm:$0xff]  ;;  %v10254_v42 = vld [vmem:[#allocation42_spill] sm:$0xff]  ;;  %v7980_v58 = vmul.f32 %v4503_v9, %v615_v25  ;;  %v1557_v25 = vpop.xlane.xlu1 %1556 }
 0x2a2   : > { %v2759_v56 = vadd.f32 %v2247_v37, %v10253_v5  ;;  %v2243_v44 = vmul.f32 %v3966_v11, %v1923_v29  ;;  %v616_v24 = vld [vmem:[%s4482_s18 + $0xd80] sm:$0xff]  ;;  %3263 = vst [vmem:[%s5588_s27 + $0x7d8] sm:$0xff] %v2751_v39  ;;  %v2752_v43 = vadd.f32 %v2240_v32, %v10254_v42  ;;  %v2753_v12 = vadd.f32 %v2241_v46, %v10255_v31  ;;  %v617_v37 = vld [vmem:[%s4482_s18 + $0xd88] sm:$0xff]  ;;  %v618_v62 = vld [vmem:[%s4482_s18 + $0xd90] sm:$0xff]  ;;  %v1547_v5 = vpop.xlane.xlu2 %1546  ;;  %v1552_v46 = vpop.xlane.xlu0 %1551 }
 0x2a3   : > { %10256 = vst [vmem:[#allocation186_spill] sm:$0xff] %v7977_v14  ;;  %v619_v29 = vld [vmem:[%s4482_s18 + $0xd98] sm:$0xff]  ;;  %v1753_v31 = vadd.f32 %v7932_v4, %v7929_v22  ;;  %v7995_v42 = vmul.f32 %v4499_v7, %v621_v19  ;;  %v8014_v19 = vmul.f32 %v4501_v8, %v618_v62 }
 0x2a4   : > { %10257 = vst [vmem:[#allocation187_spill] sm:$0xff] %v7980_v58  ;;  %v10258_v39 = vld [vmem:[#allocation39_spill] sm:$0xff]  ;;  %v10259_v11 = vld [vmem:[#allocation40_spill] sm:$0xff] }
 0x2a5   : > { %3268 = vst [vmem:[%s5588_s27 + $0x800] sm:$0xff] %v2756_v41  ;;  %v2754_v54 = vadd.f32 %v2242_v3, %v10258_v39  ;;  %v2755_v32 = vadd.f32 %v2243_v44, %v10259_v11  ;;  %v7998_v41 = vmul.f32 %v4501_v8, %v622_v16  ;;  %v8001_v3 = vmul.f32 %v4503_v9, %v623_v59  ;;  %v624_v39 = vld [vmem:[%s4482_s18 + $0xdc0] sm:$0xff]  ;;  %v625_v11 = vld [vmem:[%s4482_s18 + $0xdc8] sm:$0xff] }
 0x2a6   : > { %10260 = vst [vmem:[#allocation188_spill] sm:$0xff] %v7991_v38  ;;  %v8004_v44 = vmul.f32 %v4497_v6, %v616_v24  ;;  %v1754_v48 = vadd.f32 %v1753_v31, %v7977_v14  ;;  %v8017_v59 = vmul.f32 %v4503_v9, %v619_v29  ;;  %v1763_v16 = vadd.f32 %v7995_v42, %v7991_v38  ;;  %v3969_v38 = vld [vmem:[%s4482_s18 + $0x830] sm:$0xff]  ;;  %v635_v14 = vld [vmem:[%s4482_s18 + $0xe18] sm:$0xff] }
 0x2a7   : > { %3269 = vst [vmem:[%s5588_s27 + $0x808] sm:$0xff] %v2757_v57  ;;  %v8011_v57 = vmul.f32 %v4499_v7, %v617_v37  ;;  %v1927_v24 = vsub.f32 %v5513_v63, %v1557_v25  ;;  %v1926_v37 = vsub.f32 %v5513_v63, %v1552_v46  ;;  %v8033_v31 = vmul.f32 %v4499_v7, %v625_v11  ;;  %v3967_v25 = vld [vmem:[%s4482_s18 + $0x820] sm:$0xff] }
 0x2a8   : > { %10261 = vst [vmem:[#allocation193_spill] sm:$0xff] %v7995_v42  ;;  %v1755_v62 = vadd.f32 %v1754_v48, %v7980_v58 }
 0x2a9   : > { %10262 = vst [vmem:[#allocation189_spill] sm:$0xff] %v7998_v41  ;;  %v1758_v29 = vadd.f32 %v8011_v57, %v8004_v44 }
 0x2aa   : > { %10263 = vst [vmem:[#allocation190_spill] sm:$0xff] %v8001_v3  ;;  %1756 = vadd.xlane.f32.xlu2 %v1755_v62 }
 0x2ab   : > { %10264 = vst [vmem:[#allocation194_spill] sm:$0xff] %v8004_v44  ;;  %v3971_v44 = vld [vmem:[%s4482_s18 + $0x860] sm:$0xff] }
 0x2ac   : > { %3270 = vst [vmem:[%s5588_s27 + $0x810] sm:$0xff] %v2758_v51  ;;  %v1925_v51 = vsub.f32 %v5513_v63, %v1547_v5  ;;  %v1764_v5 = vadd.f32 %v1763_v16, %v7998_v41  ;;  %v10271_v41 = vld [vmem:[#allocation50_spill] sm:$0xff] }
 0x2ad   : > { %10265 = vst [vmem:[#allocation191_spill] sm:$0xff] %v8011_v57  ;;  %v3970_v57 = vld [vmem:[%s4482_s18 + $0x838] sm:$0xff] }
 0x2ae   : > { %10266 = vst [vmem:[#allocation192_spill] sm:$0xff] %v8014_v19  ;;  %v2248_v46 = vmul.f32 %v3967_v25, %v1925_v51  ;;  %v2250_v48 = vmul.f32 %v3969_v38, %v1925_v51  ;;  %v2251_v11 = vmul.f32 %v3970_v57, %v1925_v51  ;;  %v1765_v16 = vadd.f32 %v1764_v5, %v8001_v3  ;;  %v10270_v25 = vld [vmem:[#allocation43_spill] sm:$0xff]  ;;  %v10278_v3 = vld [vmem:[#allocation54_spill] sm:$0xff] }
 0x2af   : > { %10267 = vst [vmem:[#allocation14_spill] sm:$0xff] %v8017_v59  ;;  %v3974_v5 = vld [vmem:[%s4482_s18 + $0x878] sm:$0xff] }
 0x2b0   : > { %3271 = vst [vmem:[%s5588_s27 + $0x818] sm:$0xff] %v2759_v56  ;;  %v8030_v56 = vmul.f32 %v4497_v6, %v624_v39  ;;  %v1759_v39 = vadd.f32 %v1758_v29, %v8014_v19  ;;  %v10273_v19 = vld [vmem:[#allocation46_spill] sm:$0xff]  ;;  %1766 = vadd.xlane.f32.xlu1 %v1765_v16 }
 0x2b1   : > { %3264 = vst [vmem:[%s5588_s27 + $0x7e0] sm:$0xff] %v2752_v43  ;;  %v3968_v43 = vld [vmem:[%s4482_s18 + $0x828] sm:$0xff]  ;;  %v2763_v57 = vadd.f32 %v2251_v11, %v10273_v19  ;;  %v627_v19 = vld [vmem:[%s4482_s18 + $0xdd8] sm:$0xff] }
 0x2b2   : > { %10268 = vst [vmem:[#allocation20_spill] sm:$0xff] %v8030_v56  ;;  %v2249_v42 = vmul.f32 %v3968_v43, %v1925_v51  ;;  %v2760_v43 = vadd.f32 %v2248_v46, %v10270_v25  ;;  %v1760_v29 = vadd.f32 %v1759_v39, %v8017_v59  ;;  %v3972_v51 = vld [vmem:[%s4482_s18 + $0x868] sm:$0xff]  ;;  %v626_v25 = vld [vmem:[%s4482_s18 + $0xdd0] sm:$0xff]  ;;  %v10275_v11 = vld [vmem:[#allocation56_spill] sm:$0xff] }
 0x2b3   : > { %10269 = vst [vmem:[#allocation13_spill] sm:$0xff] %v8033_v31  ;;  %v2257_v58 = vmul.f32 %v3972_v51, %v1927_v24  ;;  %v3976_v51 = vld [vmem:[%s4482_s18 + $0x848] sm:$0xff] }
 0x2b4   : > { %3265 = vst [vmem:[%s5588_s27 + $0x7e8] sm:$0xff] %v2753_v12  ;;  %v2256_v12 = vmul.f32 %v3971_v44, %v1927_v24  ;;  %v2761_v38 = vadd.f32 %v2249_v42, %v10271_v41  ;;  %v2259_v42 = vmul.f32 %v3974_v5, %v1927_v24  ;;  %v10274_v41 = vld [vmem:[#allocation53_spill] sm:$0xff]  ;;  %1761 = vadd.xlane.f32.xlu0 %v1760_v29 }
 0x2b5   : > { %3266 = vst [vmem:[%s5588_s27 + $0x7f0] sm:$0xff] %v2754_v54  ;;  %v10272_v54 = vld [vmem:[#allocation45_spill] sm:$0xff]  ;;  %v2769_v16 = vadd.f32 %v2257_v58, %v10275_v11  ;;  %v634_v11 = vld [vmem:[%s4482_s18 + $0xe10] sm:$0xff] }
 0x2b6   : > { %3267 = vst [vmem:[%s5588_s27 + $0x7f8] sm:$0xff] %v2755_v32  ;;  %v2762_v62 = vadd.f32 %v2250_v48, %v10272_v54  ;;  %v3973_v32 = vld [vmem:[%s4482_s18 + $0x870] sm:$0xff]  ;;  %v2768_v46 = vadd.f32 %v2256_v12, %v10274_v41  ;;  %v3975_v48 = vld [vmem:[%s4482_s18 + $0x840] sm:$0xff]  ;;  %v633_v5 = vld [vmem:[%s4482_s18 + $0xe08] sm:$0xff]  ;;  %v8098_v22 = vmul.f32 %v4501_v8, %v634_v11 }
 0x2b7   : > { %v2258_v44 = vmul.f32 %v3973_v32, %v1927_v24  ;;  %3272 = vst [vmem:[%s5588_s27 + $0x820] sm:$0xff] %v2760_v43  ;;  %v2252_v39 = vmul.f32 %v3975_v48, %v1926_v37  ;;  %v10276_v54 = vld [vmem:[#allocation48_spill] sm:$0xff]  ;;  %v2253_v24 = vmul.f32 %v3976_v51, %v1926_v37  ;;  %v10277_v12 = vld [vmem:[#allocation49_spill] sm:$0xff]  ;;  %v3977_v48 = vld [vmem:[%s4482_s18 + $0x850] sm:$0xff] }
 0x2b8   : > { %3273 = vst [vmem:[%s5588_s27 + $0x828] sm:$0xff] %v2761_v38  ;;  %v632_v32 = vld [vmem:[%s4482_s18 + $0xe00] sm:$0xff]  ;;  %v2771_v41 = vadd.f32 %v2259_v42, %v10277_v12  ;;  %v2254_v29 = vmul.f32 %v3977_v48, %v1926_v37  ;;  %v3978_v38 = vld [vmem:[%s4482_s18 + $0x858] sm:$0xff]  ;;  %v8079_v42 = vmul.f32 %v4503_v9, %v627_v19  ;;  %v1768_v12 = vadd.f32 %v8033_v31, %v8030_v56  ;;  %v629_v48 = vld [vmem:[%s4482_s18 + $0xde8] sm:$0xff]  ;;  %v1572_v31 = vpop.xlane.xlu1 %1571  ;;  %v1567_v56 = vpop.xlane.xlu0 %1566 }
 0x2b9   : > { %v2770_v43 = vadd.f32 %v2258_v44, %v10276_v54  ;;  %3274 = vst [vmem:[%s5588_s27 + $0x830] sm:$0xff] %v2762_v62  ;;  %v2255_v59 = vmul.f32 %v3978_v38, %v1926_v37  ;;  %v2764_v58 = vadd.f32 %v2252_v39, %v10278_v3  ;;  %v628_v44 = vld [vmem:[%s4482_s18 + $0xde0] sm:$0xff]  ;;  %v10279_v54 = vld [vmem:[#allocation59_spill] sm:$0xff]  ;;  %v8076_v62 = vmul.f32 %v4501_v8, %v626_v25  ;;  %v1562_v39 = vpop.xlane.xlu2 %1561 }
 0x2ba   : > { %3275 = vst [vmem:[%s5588_s27 + $0x838] sm:$0xff] %v2763_v57  ;;  %v2765_v51 = vadd.f32 %v2253_v24, %v10279_v54  ;;  %v630_v37 = vld [vmem:[%s4482_s18 + $0xdf0] sm:$0xff]  ;;  %v631_v3 = vld [vmem:[%s4482_s18 + $0xdf8] sm:$0xff]  ;;  %v8090_v25 = vmul.f32 %v4497_v6, %v632_v32  ;;  %v8093_v19 = vmul.f32 %v4499_v7, %v633_v5  ;;  %v636_v32 = vld [vmem:[%s4482_s18 + $0xe20] sm:$0xff] }
 0x2bb   : > { %10280 = vst [vmem:[#allocation15_spill] sm:$0xff] %v8076_v62  ;;  %v10282_v57 = vld [vmem:[#allocation51_spill] sm:$0xff]  ;;  %v10283_v24 = vld [vmem:[#allocation52_spill] sm:$0xff]  ;;  %v1769_v4 = vadd.f32 %v1768_v12, %v8076_v62  ;;  %v8115_v11 = vmul.f32 %v4501_v8, %v630_v37  ;;  %v1930_v12 = vsub.f32 %v5513_v63, %v1572_v31 }
 0x2bc   : > { %10281 = vst [vmem:[#allocation18_spill] sm:$0xff] %v8079_v42  ;;  %v2766_v38 = vadd.f32 %v2254_v29, %v10282_v57  ;;  %v2767_v54 = vadd.f32 %v2255_v59, %v10283_v24  ;;  %v8104_v59 = vmul.f32 %v4497_v6, %v628_v44  ;;  %v637_v29 = vld [vmem:[%s4482_s18 + $0xe28] sm:$0xff]  ;;  %v1778_v5 = vadd.f32 %v8093_v19, %v8090_v25  ;;  %v3979_v31 = vld [vmem:[%s4482_s18 + $0x880] sm:$0xff] }
 0x2bd   : > { %3280 = vst [vmem:[%s5588_s27 + $0x860] sm:$0xff] %v2768_v46  ;;  %v8101_v46 = vmul.f32 %v4503_v9, %v635_v14  ;;  %v8118_v14 = vmul.f32 %v4503_v9, %v631_v3  ;;  %v1770_v44 = vadd.f32 %v1769_v4, %v8079_v42  ;;  %v1929_v57 = vsub.f32 %v5513_v63, %v1567_v56  ;;  %v3980_v56 = vld [vmem:[%s4482_s18 + $0x888] sm:$0xff]  ;;  %v10302_v42 = vld [vmem:[#allocation71_spill] sm:$0xff] }
 0x2be   : > { %10284 = vst [vmem:[#allocation23_spill] sm:$0xff] %v8090_v25  ;;  %v8133_v4 = vmul.f32 %v4499_v7, %v637_v29  ;;  %v10301_v25 = vld [vmem:[#allocation66_spill] sm:$0xff] }
 0x2bf   : > { %10285 = vst [vmem:[#allocation16_spill] sm:$0xff] %v8093_v19  ;;  %1771 = vadd.xlane.f32.xlu2 %v1770_v44  ;;  %v10293_v44 = vld [vmem:[#allocation55_spill] sm:$0xff]  ;;  %v3984_v19 = vld [vmem:[%s4482_s18 + $0x8c8] sm:$0xff] }
 0x2c0   : > { %3281 = vst [vmem:[%s5588_s27 + $0x868] sm:$0xff] %v2769_v16  ;;  %v8112_v16 = vmul.f32 %v4499_v7, %v629_v48  ;;  %v1779_v48 = vadd.f32 %v1778_v5, %v8098_v22 }
 0x2c1   : > { %10286 = vst [vmem:[#allocation17_spill] sm:$0xff] %v8098_v22  ;;  %v10294_v22 = vld [vmem:[#allocation62_spill] sm:$0xff] }
 0x2c2   : > { %10287 = vst [vmem:[#allocation19_spill] sm:$0xff] %v8101_v46  ;;  %v1773_v37 = vadd.f32 %v8112_v16, %v8104_v59  ;;  %v1780_v5 = vadd.f32 %v1779_v48, %v8101_v46  ;;  %v2269_v48 = vmul.f32 %v3984_v19, %v1930_v12  ;;  %v10298_v19 = vld [vmem:[#allocation68_spill] sm:$0xff] }
 0x2c3   : > { %10288 = vst [vmem:[#allocation26_spill] sm:$0xff] %v8104_v59  ;;  %v3983_v59 = vld [vmem:[%s4482_s18 + $0x8c0] sm:$0xff] }
 0x2c4   : > { %3282 = vst [vmem:[%s5588_s27 + $0x870] sm:$0xff] %v2770_v43  ;;  %v1928_v43 = vsub.f32 %v5513_v63, %v1562_v39  ;;  %v3981_v39 = vld [vmem:[%s4482_s18 + $0x890] sm:$0xff]  ;;  %1781 = vadd.xlane.f32.xlu1 %v1780_v5  ;;  %v3987_v5 = vld [vmem:[%s4482_s18 + $0x8a0] sm:$0xff] }
 0x2c5   : > { %10289 = vst [vmem:[#allocation21_spill] sm:$0xff] %v8112_v16  ;;  %v3982_v16 = vld [vmem:[%s4482_s18 + $0x898] sm:$0xff] }
 0x2c6   : > { %10290 = vst [vmem:[#allocation22_spill] sm:$0xff] %v8115_v11  ;;  %v2260_v3 = vmul.f32 %v3979_v31, %v1928_v43  ;;  %v2262_v24 = vmul.f32 %v3981_v39, %v1928_v43  ;;  %v2263_v29 = vmul.f32 %v3982_v16, %v1928_v43  ;;  %v10295_v39 = vld [vmem:[#allocation57_spill] sm:$0xff] }
 0x2c7   : > { %10291 = vst [vmem:[#allocation29_spill] sm:$0xff] %v8118_v14 }
 0x2c8   : > { %3283 = vst [vmem:[%s5588_s27 + $0x878] sm:$0xff] %v2771_v41  ;;  %v8130_v41 = vmul.f32 %v4497_v6, %v636_v32  ;;  %v1774_v32 = vadd.f32 %v1773_v37, %v8115_v11  ;;  %v2772_v31 = vadd.f32 %v2260_v3, %v10293_v44  ;;  %v3986_v11 = vld [vmem:[%s4482_s18 + $0x8d8] sm:$0xff]  ;;  %v638_v44 = vld [vmem:[%s4482_s18 + $0xe30] sm:$0xff] }
 0x2c9   : > { %3276 = vst [vmem:[%s5588_s27 + $0x840] sm:$0xff] %v2764_v58  ;;  %v2261_v58 = vmul.f32 %v3980_v56, %v1928_v43  ;;  %v10296_v43 = vld [vmem:[#allocation58_spill] sm:$0xff]  ;;  %v2271_v3 = vmul.f32 %v3986_v11, %v1930_v12  ;;  %v10299_v11 = vld [vmem:[#allocation60_spill] sm:$0xff]  ;;  %v8173_v62 = vmul.f32 %v4501_v8, %v638_v44  ;;  %v1577_v44 = vpop.xlane.xlu2 %1576 }
 0x2ca   : > { %10292 = vst [vmem:[#allocation32_spill] sm:$0xff] %v8133_v4  ;;  %v1775_v16 = vadd.f32 %v1774_v32, %v8118_v14  ;;  %v2775_v37 = vadd.f32 %v2263_v29, %v10296_v43  ;;  %v2264_v32 = vmul.f32 %v3987_v5, %v1929_v57  ;;  %v3988_v29 = vld [vmem:[%s4482_s18 + $0x8a8] sm:$0xff]  ;;  %v639_v43 = vld [vmem:[%s4482_s18 + $0xe38] sm:$0xff]  ;;  %v646_v14 = vld [vmem:[%s4482_s18 + $0xe70] sm:$0xff] }
 0x2cb   : > { %3277 = vst [vmem:[%s5588_s27 + $0x848] sm:$0xff] %v2765_v51  ;;  %v2268_v51 = vmul.f32 %v3983_v59, %v1930_v12  ;;  %v2773_v56 = vadd.f32 %v2261_v58, %v10294_v22  ;;  %v3985_v59 = vld [vmem:[%s4482_s18 + $0x8d0] sm:$0xff]  ;;  %v10297_v22 = vld [vmem:[#allocation65_spill] sm:$0xff]  ;;  %v647_v5 = vld [vmem:[%s4482_s18 + $0xe78] sm:$0xff] }
 0x2cc   : > { %3278 = vst [vmem:[%s5588_s27 + $0x850] sm:$0xff] %v2766_v38  ;;  %v2774_v38 = vadd.f32 %v2262_v24, %v10295_v39  ;;  %v2781_v24 = vadd.f32 %v2269_v48, %v10298_v19  ;;  %v2265_v39 = vmul.f32 %v3988_v29, %v1929_v57  ;;  %1776 = vadd.xlane.f32.xlu0 %v1775_v16  ;;  %v645_v19 = vld [vmem:[%s4482_s18 + $0xe68] sm:$0xff]  ;;  %v3990_v29 = vld [vmem:[%s4482_s18 + $0x8b8] sm:$0xff] }
 0x2cd   : > { %3279 = vst [vmem:[%s5588_s27 + $0x858] sm:$0xff] %v2767_v54  ;;  %v2270_v54 = vmul.f32 %v3985_v59, %v1930_v12  ;;  %v2780_v58 = vadd.f32 %v2268_v51, %v10297_v22  ;;  %v644_v59 = vld [vmem:[%s4482_s18 + $0xe60] sm:$0xff]  ;;  %v3989_v22 = vld [vmem:[%s4482_s18 + $0x8b0] sm:$0xff]  ;;  %v2267_v46 = vmul.f32 %v3990_v29, %v1929_v57  ;;  %v2776_v16 = vadd.f32 %v2264_v32, %v10301_v25  ;;  %v1587_v32 = vpop.xlane.xlu1 %1586 }
 0x2ce   : > { %3284 = vst [vmem:[%s5588_s27 + $0x880] sm:$0xff] %v2772_v31  ;;  %v10300_v31 = vld [vmem:[#allocation61_spill] sm:$0xff]  ;;  %v2266_v48 = vmul.f32 %v3989_v22, %v1929_v57  ;;  %v1783_v57 = vadd.f32 %v8133_v4, %v8130_v41  ;;  %v8186_v25 = vmul.f32 %v4497_v6, %v644_v59 }
 0x2cf   : > { %3285 = vst [vmem:[%s5588_s27 + $0x888] sm:$0xff] %v2773_v56  ;;  %v2782_v12 = vadd.f32 %v2270_v54, %v10299_v11  ;;  %v2783_v51 = vadd.f32 %v2271_v3, %v10300_v31  ;;  %v2777_v56 = vadd.f32 %v2265_v39, %v10302_v42  ;;  %v640_v54 = vld [vmem:[%s4482_s18 + $0xe40] sm:$0xff]  ;;  %v641_v11 = vld [vmem:[%s4482_s18 + $0xe48] sm:$0xff]  ;;  %v642_v3 = vld [vmem:[%s4482_s18 + $0xe50] sm:$0xff] }
 0x2d0   : > { %3286 = vst [vmem:[%s5588_s27 + $0x890] sm:$0xff] %v2774_v38  ;;  %v10304_v31 = vld [vmem:[#allocation63_spill] sm:$0xff]  ;;  %v8181_v38 = vmul.f32 %v4503_v9, %v639_v43  ;;  %v10307_v39 = vld [vmem:[#allocation64_spill] sm:$0xff]  ;;  %v8195_v43 = vmul.f32 %v4501_v8, %v646_v14  ;;  %v1784_v4 = vadd.f32 %v1783_v57, %v8173_v62  ;;  %v8210_v14 = vmul.f32 %v4501_v8, %v642_v3 }
 0x2d1   : > { %10303 = vst [vmem:[#allocation24_spill] sm:$0xff] %v8173_v62  ;;  %v2778_v22 = vadd.f32 %v2266_v48, %v10304_v31  ;;  %v643_v42 = vld [vmem:[%s4482_s18 + $0xe58] sm:$0xff]  ;;  %v2779_v29 = vadd.f32 %v2267_v46, %v10307_v39  ;;  %v8198_v48 = vmul.f32 %v4503_v9, %v647_v5  ;;  %v1582_v31 = vpop.xlane.xlu0 %1581  ;;  %v648_v59 = vld [vmem:[%s4482_s18 + $0xe80] sm:$0xff]  ;;  %v8207_v46 = vmul.f32 %v4499_v7, %v641_v11 }
 0x2d2   : > { %3287 = vst [vmem:[%s5588_s27 + $0x898] sm:$0xff] %v2775_v37  ;;  %v8192_v37 = vmul.f32 %v4499_v7, %v645_v19  ;;  %v1931_v5 = vsub.f32 %v5513_v63, %v1577_v44  ;;  %v1785_v11 = vadd.f32 %v1784_v4, %v8181_v38  ;;  %v8226_v57 = vmul.f32 %v4497_v6, %v648_v59  ;;  %v3991_v44 = vld [vmem:[%s4482_s18 + $0x8e0] sm:$0xff] }
 0x2d3   : > { %10305 = vst [vmem:[#allocation25_spill] sm:$0xff] %v8181_v38 }
 0x2d4   : > { %10306 = vst [vmem:[#allocation30_spill] sm:$0xff] %v8186_v25  ;;  %v1793_v19 = vadd.f32 %v8192_v37, %v8186_v25  ;;  %v2272_v39 = vmul.f32 %v3991_v44, %v1931_v5  ;;  %1786 = vadd.xlane.f32.xlu2 %v1785_v11 }
 0x2d5   : > { %3292 = vst [vmem:[%s5588_s27 + $0x8c0] sm:$0xff] %v2780_v58  ;;  %v8204_v58 = vmul.f32 %v4497_v6, %v640_v54  ;;  %v1933_v54 = vsub.f32 %v5513_v63, %v1587_v32  ;;  %v3992_v32 = vld [vmem:[%s4482_s18 + $0x8e8] sm:$0xff] }
 0x2d6   : > { %10308 = vst [vmem:[#allocation35_spill] sm:$0xff] %v8192_v37  ;;  %v3993_v37 = vld [vmem:[%s4482_s18 + $0x8f0] sm:$0xff]  ;;  %v2784_v44 = vadd.f32 %v2272_v39, %v6500_v34  ;;  %v3998_v34 = vld [vmem:[%s4482_s18 + $0x938] sm:$0xff]  ;;  %v10318_v39 = vld [vmem:[#allocation69_spill] sm:$0xff] }
 0x2d7   : > { %10309 = vst [vmem:[#allocation27_spill] sm:$0xff] %v8195_v43  ;;  %v1788_v3 = vadd.f32 %v8207_v46, %v8204_v58  ;;  %v2274_v4 = vmul.f32 %v3993_v37, %v1931_v5 }
 0x2d8   : > { %10310 = vst [vmem:[#allocation28_spill] sm:$0xff] %v8198_v48 }
 0x2d9   : > { %3293 = vst [vmem:[%s5588_s27 + $0x8c8] sm:$0xff] %v2781_v24  ;;  %v8216_v24 = vmul.f32 %v4503_v9, %v643_v42  ;;  %v1794_v42 = vadd.f32 %v1793_v19, %v8195_v43  ;;  %v659_v43 = vld [vmem:[%s4482_s18 + $0xed8] sm:$0xff]  ;;  %v1597_v25 = vpop.xlane.xlu0 %1596 }
 0x2da   : > { %10311 = vst [vmem:[#allocation31_spill] sm:$0xff] %v8204_v58  ;;  %v3995_v58 = vld [vmem:[%s4482_s18 + $0x920] sm:$0xff] }
 0x2db   : > { %10312 = vst [vmem:[#allocation38_spill] sm:$0xff] %v8207_v46  ;;  %v3994_v46 = vld [vmem:[%s4482_s18 + $0x8f8] sm:$0xff]  ;;  %v1795_v19 = vadd.f32 %v1794_v42, %v8198_v48 }
 0x2dc   : > { %10313 = vst [vmem:[#allocation33_spill] sm:$0xff] %v8210_v14  ;;  %v2275_v59 = vmul.f32 %v3994_v46, %v1931_v5  ;;  %v10322_v48 = vld [vmem:[#allocation72_spill] sm:$0xff] }
 0x2dd   : > { %3294 = vst [vmem:[%s5588_s27 + $0x8d0] sm:$0xff] %v2782_v12  ;;  %v1932_v12 = vsub.f32 %v5513_v63, %v1582_v31  ;;  %v1789_v31 = vadd.f32 %v1788_v3, %v8210_v14  ;;  %v3997_v3 = vld [vmem:[%s4482_s18 + $0x930] sm:$0xff]  ;;  %1796 = vadd.xlane.f32.xlu1 %v1795_v19 }
 0x2de   : > { %10314 = vst [vmem:[#allocation34_spill] sm:$0xff] %v8216_v24  ;;  %v2282_v42 = vmul.f32 %v3997_v3, %v1933_v54  ;;  %v10319_v19 = vld [vmem:[#allocation70_spill] sm:$0xff] }
 0x2df   : > { %3295 = vst [vmem:[%s5588_s27 + $0x8d8] sm:$0xff] %v2783_v51  ;;  %v2273_v51 = vmul.f32 %v3992_v32, %v1931_v5  ;;  %v10316_v32 = vld [vmem:[#allocation67_spill] sm:$0xff]  ;;  %v1790_v46 = vadd.f32 %v1789_v31, %v8216_v24  ;;  %v10317_v5 = vld [vmem:[#allocation74_spill] sm:$0xff] }
 0x2e0   : > { %10315 = vst [vmem:[#allocation41_spill] sm:$0xff] %v8226_v57  ;;  %v2787_v11 = vadd.f32 %v2275_v59, %v10317_v5  ;;  %v649_v31 = vld [vmem:[%s4482_s18 + $0xe88] sm:$0xff]  ;;  %v650_v59 = vld [vmem:[%s4482_s18 + $0xe90] sm:$0xff] }
 0x2e1   : > { %3288 = vst [vmem:[%s5588_s27 + $0x8a0] sm:$0xff] %v2776_v16  ;;  %v2280_v16 = vmul.f32 %v3995_v58, %v1933_v54  ;;  %v2785_v37 = vadd.f32 %v2273_v51, %v6503_v1  ;;  %v3996_v58 = vld [vmem:[%s4482_s18 + $0x928] sm:$0xff]  ;;  %v2283_v1 = vmul.f32 %v3998_v34, %v1933_v54  ;;  %v3999_v51 = vld [vmem:[%s4482_s18 + $0x900] sm:$0xff]  ;;  %1791 = vadd.xlane.f32.xlu0 %v1790_v46  ;;  %v4001_v24 = vld [vmem:[%s4482_s18 + $0x910] sm:$0xff] }
 0x2e2   : > { %3289 = vst [vmem:[%s5588_s27 + $0x8a8] sm:$0xff] %v2777_v56  ;;  %v2786_v56 = vadd.f32 %v2274_v4, %v10316_v32  ;;  %v2276_v4 = vmul.f32 %v3999_v51, %v1932_v12  ;;  %v651_v32 = vld [vmem:[%s4482_s18 + $0xe98] sm:$0xff]  ;;  %v10320_v5 = vld [vmem:[#allocation77_spill] sm:$0xff]  ;;  %v2278_v46 = vmul.f32 %v4001_v24, %v1932_v12 }
 0x2e3   : > { %3290 = vst [vmem:[%s5588_s27 + $0x8b0] sm:$0xff] %v2778_v22  ;;  %v2281_v22 = vmul.f32 %v3996_v58, %v1933_v54  ;;  %v2794_v58 = vadd.f32 %v2282_v42, %v10320_v5  ;;  %v4000_v54 = vld [vmem:[%s4482_s18 + $0x908] sm:$0xff]  ;;  %v652_v42 = vld [vmem:[%s4482_s18 + $0xea0] sm:$0xff]  ;;  %v8277_v24 = vmul.f32 %v4503_v9, %v651_v32  ;;  %v1602_v32 = vpop.xlane.xlu1 %1601 }
 0x2e4   : > { %3291 = vst [vmem:[%s5588_s27 + $0x8b8] sm:$0xff] %v2779_v29  ;;  %v2792_v29 = vadd.f32 %v2280_v16, %v10318_v39  ;;  %v2277_v3 = vmul.f32 %v4000_v54, %v1932_v12  ;;  %v656_v16 = vld [vmem:[%s4482_s18 + $0xec0] sm:$0xff]  ;;  %v657_v34 = vld [vmem:[%s4482_s18 + $0xec8] sm:$0xff] }
 0x2e5   : > { %3296 = vst [vmem:[%s5588_s27 + $0x8e0] sm:$0xff] %v2784_v44  ;;  %v2793_v44 = vadd.f32 %v2281_v22, %v10319_v19  ;;  %v10321_v39 = vld [vmem:[#allocation80_spill] sm:$0xff]  ;;  %v2788_v22 = vadd.f32 %v2276_v4, %v10322_v48  ;;  %v658_v19 = vld [vmem:[%s4482_s18 + $0xed0] sm:$0xff]  ;;  %v10323_v5 = vld [vmem:[#allocation73_spill] sm:$0xff]  ;;  %v1592_v4 = vpop.xlane.xlu2 %1591 }
 0x2e6   : > { %3297 = vst [vmem:[%s5588_s27 + $0x8e8] sm:$0xff] %v2785_v37  ;;  %v2795_v51 = vadd.f32 %v2283_v1, %v10321_v39  ;;  %v4002_v37 = vld [vmem:[%s4482_s18 + $0x918] sm:$0xff]  ;;  %v2789_v54 = vadd.f32 %v2277_v3, %v10323_v5  ;;  %v8274_v1 = vmul.f32 %v4501_v8, %v650_v59  ;;  %v653_v39 = vld [vmem:[%s4482_s18 + $0xea8] sm:$0xff]  ;;  %v8289_v59 = vmul.f32 %v4499_v7, %v657_v34 }
 0x2e7   : > { %3298 = vst [vmem:[%s5588_s27 + $0x8f0] sm:$0xff] %v2786_v56  ;;  %v2279_v14 = vmul.f32 %v4002_v37, %v1932_v12  ;;  %v8271_v56 = vmul.f32 %v4499_v7, %v649_v31  ;;  %v654_v12 = vld [vmem:[%s4482_s18 + $0xeb0] sm:$0xff]  ;;  %v655_v48 = vld [vmem:[%s4482_s18 + $0xeb8] sm:$0xff]  ;;  %v8286_v31 = vmul.f32 %v4497_v6, %v656_v16  ;;  %v660_v16 = vld [vmem:[%s4482_s18 + $0xee0] sm:$0xff]  ;;  %v8309_v34 = vmul.f32 %v4499_v7, %v653_v39 }
 0x2e8   : > { %3299 = vst [vmem:[%s5588_s27 + $0x8f8] sm:$0xff] %v2787_v11  ;;  %v10327_v11 = vld [vmem:[#allocation78_spill] sm:$0xff]  ;;  %v10328_v3 = vld [vmem:[#allocation83_spill] sm:$0xff] }
 0x2e9   : > { %10324 = vst [vmem:[#allocation44_spill] sm:$0xff] %v8271_v56  ;;  %v2790_v37 = vadd.f32 %v2278_v46, %v10327_v11  ;;  %v2791_v5 = vadd.f32 %v2279_v14, %v10328_v3  ;;  %v1798_v38 = vadd.f32 %v8271_v56, %v8226_v57  ;;  %v8298_v46 = vmul.f32 %v4503_v9, %v659_v43  ;;  %v661_v11 = vld [vmem:[%s4482_s18 + $0xee8] sm:$0xff]  ;;  %v10346_v56 = vld [vmem:[#allocation84_spill] sm:$0xff] }
 0x2ea   : > { %10325 = vst [vmem:[#allocation36_spill] sm:$0xff] %v8274_v1  ;;  %v8301_v14 = vmul.f32 %v4497_v6, %v652_v42  ;;  %v8315_v43 = vmul.f32 %v4503_v9, %v655_v48  ;;  %v1936_v3 = vsub.f32 %v5513_v63, %v1602_v32  ;;  %v664_v57 = vld [vmem:[%s4482_s18 + $0xf00] sm:$0xff] }
 0x2eb   : > { %10326 = vst [vmem:[#allocation37_spill] sm:$0xff] %v8277_v24  ;;  %v1799_v42 = vadd.f32 %v1798_v38, %v8274_v1  ;;  %v8330_v38 = vmul.f32 %v4499_v7, %v661_v11 }
 0x2ec   : > { %3304 = vst [vmem:[%s5588_s27 + $0x920] sm:$0xff] %v2792_v29  ;;  %v8295_v29 = vmul.f32 %v4501_v8, %v658_v19  ;;  %v8312_v19 = vmul.f32 %v4501_v8, %v654_v12  ;;  %v1803_v12 = vadd.f32 %v8309_v34, %v8301_v14 }
 0x2ed   : > { %10329 = vst [vmem:[#allocation42_spill] sm:$0xff] %v8286_v31  ;;  %v1800_v48 = vadd.f32 %v1799_v42, %v8277_v24  ;;  %v10338_v42 = vld [vmem:[#allocation75_spill] sm:$0xff] }
 0x2ee   : > { %10330 = vst [vmem:[#allocation47_spill] sm:$0xff] %v8289_v59 }
 0x2ef   : > { %3305 = vst [vmem:[%s5588_s27 + $0x928] sm:$0xff] %v2793_v44  ;;  %v1808_v44 = vadd.f32 %v8289_v59, %v8286_v31  ;;  %v1935_v59 = vsub.f32 %v5513_v63, %v1597_v25  ;;  %v4005_v31 = vld [vmem:[%s4482_s18 + $0x950] sm:$0xff]  ;;  %1801 = vadd.xlane.f32.xlu2 %v1800_v48  ;;  %v4010_v48 = vld [vmem:[%s4482_s18 + $0x998] sm:$0xff] }
 0x2f0   : > { %10331 = vst [vmem:[#allocation39_spill] sm:$0xff] %v8295_v29 }
 0x2f1   : > { %10332 = vst [vmem:[#allocation40_spill] sm:$0xff] %v8298_v46  ;;  %v1809_v39 = vadd.f32 %v1808_v44, %v8295_v29 }
 0x2f2   : > { %10333 = vst [vmem:[#allocation43_spill] sm:$0xff] %v8301_v14  ;;  %v4006_v14 = vld [vmem:[%s4482_s18 + $0x958] sm:$0xff] }
 0x2f3   : > { %3306 = vst [vmem:[%s5588_s27 + $0x930] sm:$0xff] %v2794_v58  ;;  %v1934_v58 = vsub.f32 %v5513_v63, %v1592_v4  ;;  %v4003_v4 = vld [vmem:[%s4482_s18 + $0x940] sm:$0xff] }
 0x2f4   : > { %10334 = vst [vmem:[#allocation50_spill] sm:$0xff] %v8309_v34  ;;  %v1810_v34 = vadd.f32 %v1809_v39, %v8298_v46 }
 0x2f5   : > { %10335 = vst [vmem:[#allocation45_spill] sm:$0xff] %v8312_v19  ;;  %v2284_v25 = vmul.f32 %v4003_v4, %v1934_v58  ;;  %v2286_v44 = vmul.f32 %v4005_v31, %v1934_v58  ;;  %v2287_v11 = vmul.f32 %v4006_v14, %v1934_v58 }
 0x2f6   : > { %10336 = vst [vmem:[#allocation46_spill] sm:$0xff] %v8315_v43  ;;  %1811 = vadd.xlane.f32.xlu1 %v1810_v34  ;;  %v4011_v34 = vld [vmem:[%s4482_s18 + $0x960] sm:$0xff] }
 0x2f7   : > { %3307 = vst [vmem:[%s5588_s27 + $0x938] sm:$0xff] %v2795_v51  ;;  %v8327_v51 = vmul.f32 %v4497_v6, %v660_v16  ;;  %v1804_v16 = vadd.f32 %v1803_v12, %v8312_v19  ;;  %v2796_v4 = vadd.f32 %v2284_v25, %v10338_v42  ;;  %v10340_v12 = vld [vmem:[#allocation79_spill] sm:$0xff]  ;;  %v2295_v25 = vmul.f32 %v4010_v48, %v1936_v3 }
 0x2f8   : > { %3300 = vst [vmem:[%s5588_s27 + $0x900] sm:$0xff] %v2788_v22  ;;  %v4004_v22 = vld [vmem:[%s4482_s18 + $0x948] sm:$0xff]  ;;  %v2799_v14 = vadd.f32 %v2287_v11, %v10340_v12  ;;  %v662_v42 = vld [vmem:[%s4482_s18 + $0xef0] sm:$0xff]  ;;  %v1607_v12 = vpop.xlane.xlu2 %1606 }
 0x2f9   : > { %10337 = vst [vmem:[#allocation53_spill] sm:$0xff] %v8330_v38  ;;  %v2285_v32 = vmul.f32 %v4004_v22, %v1934_v58  ;;  %v10339_v22 = vld [vmem:[#allocation76_spill] sm:$0xff]  ;;  %v1805_v39 = vadd.f32 %v1804_v16, %v8315_v43  ;;  %v4008_v58 = vld [vmem:[%s4482_s18 + $0x988] sm:$0xff]  ;;  %v670_v43 = vld [vmem:[%s4482_s18 + $0xf30] sm:$0xff]  ;;  %v8375_v62 = vmul.f32 %v4501_v8, %v662_v42 }
 0x2fa   : > { %3301 = vst [vmem:[%s5588_s27 + $0x908] sm:$0xff] %v2789_v54  ;;  %v4007_v54 = vld [vmem:[%s4482_s18 + $0x980] sm:$0xff]  ;;  %v4012_v16 = vld [vmem:[%s4482_s18 + $0x968] sm:$0xff]  ;;  %v8393_v42 = vmul.f32 %v4501_v8, %v670_v43 }
 0x2fb   : > { %3302 = vst [vmem:[%s5588_s27 + $0x910] sm:$0xff] %v2790_v37  ;;  %v2292_v29 = vmul.f32 %v4007_v54, %v1936_v3  ;;  %v2797_v31 = vadd.f32 %v2285_v32, %v10339_v22  ;;  %v2798_v37 = vadd.f32 %v2286_v44, %v6713_v49  ;;  %v2293_v54 = vmul.f32 %v4008_v58, %v1936_v3  ;;  %v10341_v32 = vld [vmem:[#allocation86_spill] sm:$0xff]  ;;  %v663_v22 = vld [vmem:[%s4482_s18 + $0xef8] sm:$0xff] }
 0x2fc   : > { %3303 = vst [vmem:[%s5588_s27 + $0x918] sm:$0xff] %v2791_v5  ;;  %v4009_v5 = vld [vmem:[%s4482_s18 + $0x990] sm:$0xff]  ;;  %v2288_v44 = vmul.f32 %v4011_v34, %v1935_v59  ;;  %v2289_v11 = vmul.f32 %v4012_v16, %v1935_v59  ;;  %1806 = vadd.xlane.f32.xlu0 %v1805_v39  ;;  %v669_v34 = vld [vmem:[%s4482_s18 + $0xf28] sm:$0xff]  ;;  %v4014_v39 = vld [vmem:[%s4482_s18 + $0x978] sm:$0xff] }
 0x2fd   : > { %v2294_v19 = vmul.f32 %v4009_v5, %v1936_v3  ;;  %3308 = vst [vmem:[%s5588_s27 + $0x940] sm:$0xff] %v2796_v4  ;;  %v2804_v49 = vadd.f32 %v2292_v29, %v10341_v32  ;;  %v10342_v4 = vld [vmem:[#allocation81_spill] sm:$0xff]  ;;  %v10343_v58 = vld [vmem:[#allocation82_spill] sm:$0xff]  ;;  %v2291_v24 = vmul.f32 %v4014_v39, %v1935_v59 }
 0x2fe   : > { %3309 = vst [vmem:[%s5588_s27 + $0x948] sm:$0xff] %v2797_v31  ;;  %v2805_v3 = vadd.f32 %v2293_v54, %v10342_v4  ;;  %v4013_v5 = vld [vmem:[%s4482_s18 + $0x970] sm:$0xff]  ;;  %v668_v32 = vld [vmem:[%s4482_s18 + $0xf20] sm:$0xff]  ;;  %v2801_v54 = vadd.f32 %v2289_v11, %v10346_v56  ;;  %v671_v4 = vld [vmem:[%s4482_s18 + $0xf38] sm:$0xff] }
 0x2ff   : > { %v2806_v29 = vadd.f32 %v2294_v19, %v10343_v58  ;;  %v2290_v48 = vmul.f32 %v4013_v5, %v1935_v59  ;;  %3310 = vst [vmem:[%s5588_s27 + $0x950] sm:$0xff] %v2798_v37  ;;  %v10344_v16 = vld [vmem:[#allocation89_spill] sm:$0xff]  ;;  %v10345_v31 = vld [vmem:[#allocation92_spill] sm:$0xff]  ;;  %v8378_v37 = vmul.f32 %v4503_v9, %v663_v22  ;;  %v1813_v59 = vadd.f32 %v8330_v38, %v8327_v51  ;;  %v10350_v56 = vld [vmem:[#allocation90_spill] sm:$0xff]  ;;  %v1617_v22 = vpop.xlane.xlu1 %1616 }
 0x300   : > { %v2807_v46 = vadd.f32 %v2295_v25, %v10344_v16  ;;  %v2800_v1 = vadd.f32 %v2288_v44, %v10345_v31  ;;  %v665_v19 = vld [vmem:[%s4482_s18 + $0xf08] sm:$0xff]  ;;  %3311 = vst [vmem:[%s5588_s27 + $0x958] sm:$0xff] %v2799_v14  ;;  %v666_v25 = vld [vmem:[%s4482_s18 + $0xf10] sm:$0xff]  ;;  %v667_v44 = vld [vmem:[%s4482_s18 + $0xf18] sm:$0xff]  ;;  %v2803_v11 = vadd.f32 %v2291_v24, %v10350_v56  ;;  %v8387_v14 = vmul.f32 %v4497_v6, %v668_v32  ;;  %v1612_v16 = vpop.xlane.xlu0 %1611 }
 0x301   : > { %v10347_v58 = vld [vmem:[#allocation85_spill] sm:$0xff]  ;;  %10348 = vst [vmem:[#allocation56_spill] sm:$0xff] %v8375_v62  ;;  %v1814_v39 = vadd.f32 %v1813_v59, %v8375_v62  ;;  %v8401_v24 = vmul.f32 %v4497_v6, %v664_v57  ;;  %v8404_v32 = vmul.f32 %v4499_v7, %v665_v19  ;;  %v1937_v31 = vsub.f32 %v5513_v63, %v1607_v12 }
 0x302   : > { %v2802_v5 = vadd.f32 %v2290_v48, %v10347_v58  ;;  %10349 = vst [vmem:[#allocation48_spill] sm:$0xff] %v8378_v37  ;;  %v8390_v48 = vmul.f32 %v4499_v7, %v669_v34  ;;  %v8413_v34 = vmul.f32 %v4503_v9, %v667_v44  ;;  %v1938_v19 = vsub.f32 %v5513_v63, %v1612_v16  ;;  %v4015_v59 = vld [vmem:[%s4482_s18 + $0x9a0] sm:$0xff]  ;;  %v4016_v44 = vld [vmem:[%s4482_s18 + $0x9a8] sm:$0xff] }
 0x303   : > { %3316 = vst [vmem:[%s5588_s27 + $0x980] sm:$0xff] %v2804_v49  ;;  %v8398_v49 = vmul.f32 %v4503_v9, %v671_v4  ;;  %v1815_v57 = vadd.f32 %v1814_v39, %v8378_v37  ;;  %v1939_v4 = vsub.f32 %v5513_v63, %v1617_v22  ;;  %v2297_v12 = vmul.f32 %v4016_v44, %v1937_v31  ;;  %v4018_v22 = vld [vmem:[%s4482_s18 + $0x9b8] sm:$0xff]  ;;  %v4019_v16 = vld [vmem:[%s4482_s18 + $0x9e0] sm:$0xff] }
 0x304   : > { %10351 = vst [vmem:[#allocation49_spill] sm:$0xff] %v8387_v14  ;;  %v1823_v43 = vadd.f32 %v8390_v48, %v8387_v14  ;;  %v10368_v14 = vld [vmem:[#allocation96_spill] sm:$0xff] }
 0x305   : > { %10352 = vst [vmem:[#allocation54_spill] sm:$0xff] %v8390_v48  ;;  %1816 = vadd.xlane.f32.xlu2 %v1815_v57  ;;  %v8436_v57 = vpop.xlane.xlu2 %1621 }
 0x306   : > { %10353 = vst [vmem:[#allocation59_spill] sm:$0xff] %v8393_v42  ;;  %v1824_v58 = vadd.f32 %v1823_v43, %v8393_v42 }
 0x307   : > { %3317 = vst [vmem:[%s5588_s27 + $0x988] sm:$0xff] %v2805_v3  ;;  %v8410_v3 = vmul.f32 %v4501_v8, %v666_v25  ;;  %v2296_v25 = vmul.f32 %v4015_v59, %v1937_v31  ;;  %v10359_v59 = vld [vmem:[#allocation95_spill] sm:$0xff] }
 0x308   : > { %10354 = vst [vmem:[#allocation51_spill] sm:$0xff] %v8398_v49  ;;  %v1825_v43 = vadd.f32 %v1824_v58, %v8398_v49  ;;  %v4026_v49 = vld [vmem:[%s4482_s18 + $0x9d8] sm:$0xff] }
 0x309   : > { %10355 = vst [vmem:[#allocation52_spill] sm:$0xff] %v8401_v24  ;;  %v2808_v44 = vadd.f32 %v2296_v25, %v10359_v59  ;;  %v4023_v59 = vld [vmem:[%s4482_s18 + $0x9c0] sm:$0xff] }
 0x30a   : > { %10356 = vst [vmem:[#allocation55_spill] sm:$0xff] %v8404_v32  ;;  %1826 = vadd.xlane.f32.xlu1 %v1825_v43  ;;  %v10364_v43 = vld [vmem:[#allocation93_spill] sm:$0xff] }
 0x30b   : > { %3318 = vst [vmem:[%s5588_s27 + $0x990] sm:$0xff] %v2806_v29  ;;  %v1818_v29 = vadd.f32 %v8404_v32, %v8401_v24  ;;  %v2299_v32 = vmul.f32 %v4018_v22, %v1937_v31  ;;  %v10360_v24 = vld [vmem:[#allocation87_spill] sm:$0xff] }
 0x30c   : > { %10357 = vst [vmem:[#allocation62_spill] sm:$0xff] %v8410_v3 }
 0x30d   : > { %10358 = vst [vmem:[#allocation57_spill] sm:$0xff] %v8413_v34  ;;  %v1819_v39 = vadd.f32 %v1818_v29, %v8410_v3  ;;  %v10362_v29 = vld [vmem:[#allocation91_spill] sm:$0xff] }
 0x30e   : > { %3319 = vst [vmem:[%s5588_s27 + $0x998] sm:$0xff] %v2807_v46  ;;  %v4017_v46 = vld [vmem:[%s4482_s18 + $0x9b0] sm:$0xff]  ;;  %v2811_v22 = vadd.f32 %v2299_v32, %v10362_v29  ;;  %v672_v32 = vld [vmem:[%s4482_s18 + $0xf40] sm:$0xff] }
 0x30f   : > { %3312 = vst [vmem:[%s5588_s27 + $0x960] sm:$0xff] %v2800_v1  ;;  %v2298_v56 = vmul.f32 %v4017_v46, %v1937_v31  ;;  %v2304_v1 = vmul.f32 %v4019_v16, %v1939_v4  ;;  %v2809_v46 = vadd.f32 %v2297_v12, %v10360_v24  ;;  %v1820_v31 = vadd.f32 %v1819_v39, %v8413_v34  ;;  %v4021_v16 = vld [vmem:[%s4482_s18 + $0x9f0] sm:$0xff]  ;;  %v4022_v24 = vld [vmem:[%s4482_s18 + $0x9f8] sm:$0xff]  ;;  %v681_v34 = vld [vmem:[%s4482_s18 + $0xf88] sm:$0xff] }
 0x310   : > { %3313 = vst [vmem:[%s5588_s27 + $0x968] sm:$0xff] %v2801_v54  ;;  %v10361_v54 = vld [vmem:[#allocation88_spill] sm:$0xff]  ;;  %v2306_v25 = vmul.f32 %v4021_v16, %v1939_v4  ;;  %v2307_v12 = vmul.f32 %v4022_v24, %v1939_v4  ;;  %v2300_v39 = vmul.f32 %v4023_v59, %v1938_v19  ;;  %v674_v29 = vld [vmem:[%s4482_s18 + $0xf50] sm:$0xff]  ;;  %v10366_v59 = vld [vmem:[#allocation101_spill] sm:$0xff]  ;;  %v8492_v62 = vmul.f32 %v4499_v7, %v681_v34 }
 0x311   : > { %3314 = vst [vmem:[%s5588_s27 + $0x970] sm:$0xff] %v2802_v5  ;;  %v2810_v42 = vadd.f32 %v2298_v56, %v10361_v54  ;;  %v4020_v5 = vld [vmem:[%s4482_s18 + $0x9e8] sm:$0xff]  ;;  %1821 = vadd.xlane.f32.xlu0 %v1820_v31  ;;  %v4025_v31 = vld [vmem:[%s4482_s18 + $0x9d0] sm:$0xff] }
 0x312   : > { %3315 = vst [vmem:[%s5588_s27 + $0x978] sm:$0xff] %v2803_v11  ;;  %v2305_v58 = vmul.f32 %v4020_v5, %v1939_v4  ;;  %v10363_v56 = vld [vmem:[#allocation98_spill] sm:$0xff]  ;;  %v2819_v3 = vadd.f32 %v2307_v12, %v10366_v59  ;;  %v8474_v59 = vmul.f32 %v4501_v8, %v674_v29  ;;  %v1632_v29 = vpop.xlane.xlu1 %1631 }
 0x313   : > { %3320 = vst [vmem:[%s5588_s27 + $0x9a0] sm:$0xff] %v2808_v44  ;;  %v2816_v11 = vadd.f32 %v2304_v1, %v10363_v56  ;;  %v673_v54 = vld [vmem:[%s4482_s18 + $0xf48] sm:$0xff]  ;;  %v675_v1 = vld [vmem:[%s4482_s18 + $0xf58] sm:$0xff]  ;;  %v680_v56 = vld [vmem:[%s4482_s18 + $0xf80] sm:$0xff] }
 0x314   : > { %3321 = vst [vmem:[%s5588_s27 + $0x9a8] sm:$0xff] %v2809_v46  ;;  %v2817_v44 = vadd.f32 %v2305_v58, %v10364_v43  ;;  %v10365_v5 = vld [vmem:[#allocation94_spill] sm:$0xff]  ;;  %v2302_v46 = vmul.f32 %v4025_v31, %v1938_v19  ;;  %v2303_v58 = vmul.f32 %v4026_v49, %v1938_v19  ;;  %v8471_v12 = vmul.f32 %v4499_v7, %v673_v54  ;;  %v10372_v31 = vld [vmem:[#allocation97_spill] sm:$0xff] }
 0x315   : > { %v2818_v16 = vadd.f32 %v2306_v25, %v10365_v5  ;;  %v4024_v4 = vld [vmem:[%s4482_s18 + $0x9c8] sm:$0xff]  ;;  %3322 = vst [vmem:[%s5588_s27 + $0x9b0] sm:$0xff] %v2810_v42  ;;  %v682_v25 = vld [vmem:[%s4482_s18 + $0xf90] sm:$0xff]  ;;  %v683_v5 = vld [vmem:[%s4482_s18 + $0xf98] sm:$0xff]  ;;  %v8468_v42 = vmul.f32 %v4497_v6, %v672_v32  ;;  %v8483_v32 = vmul.f32 %v4503_v9, %v675_v1  ;;  %v8486_v54 = vmul.f32 %v4497_v6, %v680_v56  ;;  %v1627_v1 = vpop.xlane.xlu0 %1626 }
 0x316   : > { %v2301_v24 = vmul.f32 %v4024_v4, %v1938_v19  ;;  %v10367_v43 = vld [vmem:[#allocation106_spill] sm:$0xff]  ;;  %v676_v4 = vld [vmem:[%s4482_s18 + $0xf60] sm:$0xff]  ;;  %3323 = vst [vmem:[%s5588_s27 + $0x9b8] sm:$0xff] %v2811_v22  ;;  %v2814_v22 = vadd.f32 %v2302_v46, %v10372_v31  ;;  %v8498_v46 = vmul.f32 %v4503_v9, %v683_v5 }
 0x317   : > { %v2812_v48 = vadd.f32 %v2300_v39, %v10367_v43  ;;  %10369 = vst [vmem:[#allocation58_spill] sm:$0xff] %v8468_v42  ;;  %v677_v49 = vld [vmem:[%s4482_s18 + $0xf68] sm:$0xff]  ;;  %v678_v19 = vld [vmem:[%s4482_s18 + $0xf70] sm:$0xff]  ;;  %v679_v39 = vld [vmem:[%s4482_s18 + $0xf78] sm:$0xff] }
 0x318   : > { %v2813_v37 = vadd.f32 %v2301_v24, %v10368_v14  ;;  %10370 = vst [vmem:[#allocation65_spill] sm:$0xff] %v8471_v12  ;;  %v10373_v43 = vld [vmem:[#allocation102_spill] sm:$0xff]  ;;  %v1828_v24 = vadd.f32 %v8471_v12, %v8468_v42  ;;  %v8507_v56 = vmul.f32 %v4499_v7, %v677_v49  ;;  %v8510_v34 = vmul.f32 %v4501_v8, %v678_v19  ;;  %v4031_v12 = vld [vmem:[%s4482_s18 + $0xa40] sm:$0xff] }
 0x319   : > { %10371 = vst [vmem:[#allocation68_spill] sm:$0xff] %v8474_v59  ;;  %v2815_v14 = vadd.f32 %v2303_v58, %v10373_v43  ;;  %v684_v58 = vld [vmem:[%s4482_s18 + $0xfa0] sm:$0xff]  ;;  %v685_v31 = vld [vmem:[%s4482_s18 + $0xfa8] sm:$0xff]  ;;  %v1942_v49 = vsub.f32 %v5513_v63, %v1632_v29 }
 0x31a   : > { %3328 = vst [vmem:[%s5588_s27 + $0x9e0] sm:$0xff] %v2816_v11  ;;  %v8495_v11 = vmul.f32 %v4501_v8, %v682_v25  ;;  %v8513_v25 = vmul.f32 %v4503_v9, %v679_v39  ;;  %v1829_v5 = vadd.f32 %v1828_v24, %v8474_v59  ;;  %v8527_v39 = vmul.f32 %v4497_v6, %v684_v58  ;;  %v8532_v24 = vpop.xlane.xlu2 %1636  ;;  %v4027_v29 = vld [vmem:[%s4482_s18 + $0xa00] sm:$0xff]  ;;  %v4029_v58 = vld [vmem:[%s4482_s18 + $0xa10] sm:$0xff] }
 0x31b   : > { %10374 = vst [vmem:[#allocation60_spill] sm:$0xff] %v8483_v32  ;;  %v8530_v43 = vmul.f32 %v4499_v7, %v685_v31  ;;  %v4030_v31 = vld [vmem:[%s4482_s18 + $0xa18] sm:$0xff] }
 0x31c   : > { %10375 = vst [vmem:[#allocation61_spill] sm:$0xff] %v8486_v54 }
 0x31d   : > { %3329 = vst [vmem:[%s5588_s27 + $0x9e8] sm:$0xff] %v2817_v44  ;;  %v8504_v44 = vmul.f32 %v4497_v6, %v676_v4  ;;  %v1940_v4 = vsub.f32 %v5513_v63, %v8436_v57  ;;  %v1830_v57 = vadd.f32 %v1829_v5, %v8483_v32  ;;  %v10392_v32 = vld [vmem:[#allocation108_spill] sm:$0xff] }
 0x31e   : > { %10376 = vst [vmem:[#allocation66_spill] sm:$0xff] %v8492_v62 }
 0x31f   : > { %10377 = vst [vmem:[#allocation71_spill] sm:$0xff] %v8495_v11  ;;  %v1833_v19 = vadd.f32 %v8507_v56, %v8504_v44  ;;  %v2311_v59 = vmul.f32 %v4030_v31, %v1940_v4  ;;  %1831 = vadd.xlane.f32.xlu2 %v1830_v57  ;;  %v4032_v31 = vld [vmem:[%s4482_s18 + $0xa48] sm:$0xff]  ;;  %v4034_v57 = vld [vmem:[%s4482_s18 + $0xa58] sm:$0xff] }
 0x320   : > { %10378 = vst [vmem:[#allocation63_spill] sm:$0xff] %v8498_v46 }
 0x321   : > { %3330 = vst [vmem:[%s5588_s27 + $0x9f0] sm:$0xff] %v2818_v16  ;;  %v1838_v16 = vadd.f32 %v8492_v62, %v8486_v54  ;;  %v2310_v54 = vmul.f32 %v4029_v58, %v1940_v4  ;;  %v10385_v58 = vld [vmem:[#allocation100_spill] sm:$0xff] }
 0x322   : > { %10379 = vst [vmem:[#allocation64_spill] sm:$0xff] %v8504_v44  ;;  %v4028_v44 = vld [vmem:[%s4482_s18 + $0xa08] sm:$0xff] }
 0x323   : > { %10380 = vst [vmem:[#allocation67_spill] sm:$0xff] %v8507_v56  ;;  %v2308_v56 = vmul.f32 %v4027_v29, %v1940_v4  ;;  %v2309_v62 = vmul.f32 %v4028_v44, %v1940_v4 }
 0x324   : > { %10381 = vst [vmem:[#allocation74_spill] sm:$0xff] %v8510_v34 }
 0x325   : > { %10382 = vst [vmem:[#allocation69_spill] sm:$0xff] %v8513_v25 }
 0x326   : > { %3331 = vst [vmem:[%s5588_s27 + $0x9f8] sm:$0xff] %v2819_v3  ;;  %v1941_v3 = vsub.f32 %v5513_v63, %v1627_v1  ;;  %v1834_v1 = vadd.f32 %v1833_v19, %v8510_v34  ;;  %v2822_v34 = vadd.f32 %v2310_v54, %v10385_v58  ;;  %v687_v58 = vld [vmem:[%s4482_s18 + $0xfb8] sm:$0xff] }
 0x327   : > { %3324 = vst [vmem:[%s5588_s27 + $0x9c0] sm:$0xff] %v2812_v48  ;;  %v1839_v48 = vadd.f32 %v1838_v16, %v8495_v11  ;;  %v10383_v16 = vld [vmem:[#allocation107_spill] sm:$0xff]  ;;  %v8583_v38 = vmul.f32 %v4503_v9, %v687_v58 }
 0x328   : > { %3325 = vst [vmem:[%s5588_s27 + $0x9c8] sm:$0xff] %v2813_v37  ;;  %v2316_v37 = vmul.f32 %v4031_v12, %v1942_v49  ;;  %v2820_v44 = vadd.f32 %v2308_v56, %v10383_v16  ;;  %v1835_v19 = vadd.f32 %v1834_v1, %v8513_v25  ;;  %v10386_v11 = vld [vmem:[#allocation103_spill] sm:$0xff]  ;;  %v2317_v12 = vmul.f32 %v4032_v31, %v1942_v49  ;;  %v692_v31 = vld [vmem:[%s4482_s18 + $0xfe0] sm:$0xff] }
 0x329   : > { %3326 = vst [vmem:[%s5588_s27 + $0x9d0] sm:$0xff] %v2814_v22  ;;  %v1840_v5 = vadd.f32 %v1839_v48, %v8498_v46  ;;  %v10384_v22 = vld [vmem:[#allocation99_spill] sm:$0xff]  ;;  %v2823_v4 = vadd.f32 %v2311_v59, %v10386_v11  ;;  %v10387_v48 = vld [vmem:[#allocation110_spill] sm:$0xff]  ;;  %v10388_v59 = vld [vmem:[#allocation104_spill] sm:$0xff] }
 0x32a   : > { %3327 = vst [vmem:[%s5588_s27 + $0x9d8] sm:$0xff] %v2815_v14  ;;  %v2821_v29 = vadd.f32 %v2309_v62, %v10384_v22  ;;  %v4033_v14 = vld [vmem:[%s4482_s18 + $0xa50] sm:$0xff]  ;;  %v2319_v62 = vmul.f32 %v4034_v57, %v1942_v49  ;;  %v2828_v1 = vadd.f32 %v2316_v37, %v10387_v48  ;;  %1836 = vadd.xlane.f32.xlu0 %v1835_v19  ;;  %v4035_v11 = vld [vmem:[%s4482_s18 + $0xa20] sm:$0xff]  ;;  %v693_v48 = vld [vmem:[%s4482_s18 + $0xfe8] sm:$0xff] }
 0x32b   : > { %1841 = vadd.xlane.f32.xlu1 %v1840_v5  ;;  %3332 = vst [vmem:[%s5588_s27 + $0xa00] sm:$0xff] %v2820_v44  ;;  %v2318_v56 = vmul.f32 %v4033_v14, %v1942_v49  ;;  %v686_v16 = vld [vmem:[%s4482_s18 + $0xfb0] sm:$0xff]  ;;  %v2829_v54 = vadd.f32 %v2317_v12, %v10388_v59  ;;  %v2312_v5 = vmul.f32 %v4035_v11, %v1941_v3  ;;  %v4036_v44 = vld [vmem:[%s4482_s18 + $0xa28] sm:$0xff]  ;;  %v688_v59 = vld [vmem:[%s4482_s18 + $0xfc0] sm:$0xff] }
 0x32c   : > { %3333 = vst [vmem:[%s5588_s27 + $0xa08] sm:$0xff] %v2821_v29  ;;  %v2313_v22 = vmul.f32 %v4036_v44, %v1941_v3  ;;  %v10389_v49 = vld [vmem:[#allocation105_spill] sm:$0xff]  ;;  %v4037_v19 = vld [vmem:[%s4482_s18 + $0xa30] sm:$0xff]  ;;  %v4038_v29 = vld [vmem:[%s4482_s18 + $0xa38] sm:$0xff]  ;;  %v8575_v42 = vmul.f32 %v4501_v8, %v686_v16  ;;  %v8600_v58 = vmul.f32 %v4497_v6, %v688_v59 }
 0x32d   : > { %3334 = vst [vmem:[%s5588_s27 + $0xa10] sm:$0xff] %v2822_v34  ;;  %v2830_v37 = vadd.f32 %v2318_v56, %v10389_v49  ;;  %v2314_v14 = vmul.f32 %v4037_v19, %v1941_v3  ;;  %v2315_v57 = vmul.f32 %v4038_v29, %v1941_v3  ;;  %v694_v12 = vld [vmem:[%s4482_s18 + $0xff0] sm:$0xff]  ;;  %v10390_v11 = vld [vmem:[#allocation113_spill] sm:$0xff]  ;;  %v10391_v25 = vld [vmem:[#allocation116_spill] sm:$0xff] }
 0x32e   : > { %3335 = vst [vmem:[%s5588_s27 + $0xa18] sm:$0xff] %v2823_v4  ;;  %v2831_v44 = vadd.f32 %v2319_v62, %v10390_v11  ;;  %v2824_v46 = vadd.f32 %v2312_v5, %v10391_v25  ;;  %v2825_v34 = vadd.f32 %v2313_v22, %v10392_v32  ;;  %v695_v56 = vld [vmem:[%s4482_s18 + $0xff8] sm:$0xff]  ;;  %v689_v49 = vld [vmem:[%s4482_s18 + $0xfc8] sm:$0xff]  ;;  %v690_v19 = vld [vmem:[%s4482_s18 + $0xfd0] sm:$0xff]  ;;  %v1843_v4 = vadd.f32 %v8530_v43, %v8527_v39  ;;  %v1647_v62 = vpop.xlane.xlu1 %1646  ;;  %v1652_v11 = vpop.xlane.xlu2 %1651 }
 0x32f   : > { %3340 = vst [vmem:[%s5588_s27 + $0xa40] sm:$0xff] %v2828_v1  ;;  %v10393_v3 = vld [vmem:[#allocation109_spill] sm:$0xff]  ;;  %v8588_v25 = vmul.f32 %v4497_v6, %v692_v31  ;;  %v691_v32 = vld [vmem:[%s4482_s18 + $0xfd8] sm:$0xff]  ;;  %v10394_v16 = vld [vmem:[#allocation114_spill] sm:$0xff]  ;;  %v8594_v1 = vmul.f32 %v4499_v7, %v693_v48  ;;  %v8597_v22 = vmul.f32 %v4501_v8, %v694_v12  ;;  %v8611_v48 = vmul.f32 %v4501_v8, %v690_v19 }
 0x330   : > { %v2826_v29 = vadd.f32 %v2314_v14, %v10393_v3  ;;  %3341 = vst [vmem:[%s5588_s27 + $0xa48] sm:$0xff] %v2829_v54  ;;  %v2827_v5 = vadd.f32 %v2315_v57, %v10394_v16  ;;  %v1642_v14 = vpop.xlane.xlu0 %1641  ;;  %v1844_v31 = vadd.f32 %v1843_v4, %v8575_v42  ;;  %v8605_v54 = vmul.f32 %v4503_v9, %v695_v56  ;;  %v4040_v19 = vld [vmem:[%s4482_s18 + $0xa68] sm:$0xff]  ;;  %v4041_v3 = vld [vmem:[%s4482_s18 + $0xa70] sm:$0xff] }
 0x331   : > { %3342 = vst [vmem:[%s5588_s27 + $0xa50] sm:$0xff] %v2830_v37  ;;  %v8608_v57 = vmul.f32 %v4499_v7, %v689_v49  ;;  %v1853_v6 = vadd.f32 %v8594_v1, %v8588_v25  ;;  %v8617_v37 = vmul.f32 %v4503_v9, %v691_v32  ;;  %v1943_v12 = vsub.f32 %v5513_v63, %v8532_v24  ;;  %v4039_v24 = vld [vmem:[%s4482_s18 + $0xa60] sm:$0xff] }
 0x332   : > { %3343 = vst [vmem:[%s5588_s27 + $0xa58] sm:$0xff] %v2831_v44  ;;  %v1945_v59 = vsub.f32 %v5513_v63, %v1647_v62  ;;  %v1845_v7 = vadd.f32 %v1844_v31, %v8583_v38  ;;  %v1944_v44 = vsub.f32 %v5513_v63, %v1642_v14  ;;  %v8628_v56 = vsub.f32 %v5513_v63, %v1652_v11  ;;  %v4042_v62 = vld [vmem:[%s4482_s18 + $0xa78] sm:$0xff]  ;;  %v4043_v14 = vld [vmem:[%s4482_s18 + $0xaa0] sm:$0xff] }
 0x333   : > { %3336 = vst [vmem:[%s5588_s27 + $0xa20] sm:$0xff] %v2824_v46  ;;  %v1848_v8 = vadd.f32 %v8608_v57, %v8600_v58  ;;  %v1854_v9 = vadd.f32 %v1853_v6, %v8597_v22  ;;  %v2320_v49 = vmul.f32 %v4039_v24, %v1943_v12  ;;  %v2321_v46 = vmul.f32 %v4040_v19, %v1943_v12  ;;  %v10395_v24 = vld [vmem:[#allocation121_spill] sm:$0xff] }
 0x334   : > { %3337 = vst [vmem:[%s5588_s27 + $0xa28] sm:$0xff] %v2825_v34  ;;  %v2322_v4 = vmul.f32 %v4041_v3, %v1943_v12  ;;  %1846 = vadd.xlane.f32.xlu2 %v1845_v7  ;;  %v2323_v16 = vmul.f32 %v4042_v62, %v1943_v12  ;;  %v2328_v34 = vmul.f32 %v4043_v14, %v1945_v59  ;;  %v4044_v12 = vld [vmem:[%s4482_s18 + $0xaa8] sm:$0xff]  ;;  %v4045_v62 = vld [vmem:[%s4482_s18 + $0xab0] sm:$0xff] }
 0x335   : > { %3338 = vst [vmem:[%s5588_s27 + $0xa30] sm:$0xff] %v2826_v29  ;;  %v1849_v32 = vadd.f32 %v1848_v8, %v8611_v48  ;;  %v1855_v11 = vadd.f32 %v1854_v9, %v8605_v54  ;;  %v2832_v31 = vadd.f32 %v2320_v49, %v7046_v28  ;;  %v2833_v6 = vadd.f32 %v2321_v46, %v7049_v40  ;;  %v10396_v8 = vld [vmem:[#allocation111_spill] sm:$0xff]  ;;  %v10397_v40 = vld [vmem:[#allocation112_spill] sm:$0xff]  ;;  %v4048_v14 = vld [vmem:[%s4482_s18 + $0xa88] sm:$0xff] }
 0x336   : > { %3339 = vst [vmem:[%s5588_s27 + $0xa38] sm:$0xff] %v2827_v5  ;;  %v2834_v29 = vadd.f32 %v2322_v4, %v10395_v24  ;;  %v2835_v19 = vadd.f32 %v2323_v16, %v10396_v8  ;;  %v2329_v3 = vmul.f32 %v4044_v12, %v1945_v59  ;;  %v2330_v5 = vmul.f32 %v4045_v62, %v1945_v59  ;;  %v4046_v28 = vld [vmem:[%s4482_s18 + $0xab8] sm:$0xff]  ;;  %v4047_v46 = vld [vmem:[%s4482_s18 + $0xa80] sm:$0xff]  ;;  %v1662_v8 = vpop.xlane.xlu1 %1661 }
 0x337   : > { %v1850_v7 = vadd.f32 %v1849_v32, %v8617_v37  ;;  %1856 = vadd.xlane.f32.xlu1 %v1855_v11  ;;  %3344 = vst [vmem:[%s5588_s27 + $0xa60] sm:$0xff] %v2832_v31  ;;  %v2331_v9 = vmul.f32 %v4046_v28, %v1945_v59  ;;  %v2840_v49 = vadd.f32 %v2328_v34, %v10397_v40  ;;  %v10398_v32 = vld [vmem:[#allocation115_spill] sm:$0xff]  ;;  %v10399_v11 = vld [vmem:[#allocation124_spill] sm:$0xff]  ;;  %v10400_v34 = vld [vmem:[#allocation117_spill] sm:$0xff] }
 0x338   : > { %v2324_v4 = vmul.f32 %v4047_v46, %v1944_v44  ;;  %3345 = vst [vmem:[%s5588_s27 + $0xa68] sm:$0xff] %v2833_v6  ;;  %v2841_v16 = vadd.f32 %v2329_v3, %v10398_v32  ;;  %v2325_v24 = vmul.f32 %v4048_v14, %v1944_v44  ;;  %v2842_v31 = vadd.f32 %v2330_v5, %v10399_v11  ;;  %v4049_v59 = vld [vmem:[%s4482_s18 + $0xa90] sm:$0xff]  ;;  %v4051_v40 = vld [vmem:[%s4482_s18 + $0xac0] sm:$0xff]  ;;  %v4052_v32 = vld [vmem:[%s4482_s18 + $0xac8] sm:$0xff]  ;;  %v1657_v14 = vpop.xlane.xlu0 %1656 }
 0x339   : > { %1851 = vadd.xlane.f32.xlu0 %v1850_v7  ;;  %3346 = vst [vmem:[%s5588_s27 + $0xa70] sm:$0xff] %v2834_v29  ;;  %v2326_v12 = vmul.f32 %v4049_v59, %v1944_v44  ;;  %v2843_v62 = vadd.f32 %v2331_v9, %v10400_v34  ;;  %v4050_v7 = vld [vmem:[%s4482_s18 + $0xa98] sm:$0xff]  ;;  %v10401_v3 = vld [vmem:[#allocation118_spill] sm:$0xff]  ;;  %v2332_v29 = vmul.f32 %v4051_v40, %v8628_v56  ;;  %v10402_v46 = vld [vmem:[#allocation125_spill] sm:$0xff] }
 0x33a   : > { %3347 = vst [vmem:[%s5588_s27 + $0xa78] sm:$0xff] %v2835_v19  ;;  %v2327_v6 = vmul.f32 %v4050_v7, %v1944_v44  ;;  %v2836_v28 = vadd.f32 %v2324_v4, %v10401_v3  ;;  %v1948_v5 = vsub.f32 %v5513_v63, %v1662_v8  ;;  %v2837_v19 = vadd.f32 %v2325_v24, %v10402_v46  ;;  %v10403_v44 = vld [vmem:[#allocation128_spill] sm:$0xff]  ;;  %v4053_v4 = vld [vmem:[%s4482_s18 + $0xad0] sm:$0xff]  ;;  %v4056_v46 = vld [vmem:[%s4482_s18 + $0xb08] sm:$0xff] }
 0x33b   : > { %3352 = vst [vmem:[%s5588_s27 + $0xaa0] sm:$0xff] %v2840_v49  ;;  %v2333_v9 = vmul.f32 %v4052_v32, %v8628_v56  ;;  %v2838_v49 = vadd.f32 %v2326_v12, %v10403_v44  ;;  %v2334_v11 = vmul.f32 %v4053_v4, %v8628_v56  ;;  %v10404_v59 = vld [vmem:[#allocation119_spill] sm:$0xff]  ;;  %v10405_v34 = vld [vmem:[#allocation120_spill] sm:$0xff]  ;;  %v1947_v12 = vsub.f32 %v5513_v63, %v1657_v14  ;;  %v10406_v40 = vld [vmem:[#allocation126_spill] sm:$0xff]  ;;  %v1667_v32 = vpop.xlane.xlu2 %1666 }
 0x33c   : > { %3353 = vst [vmem:[%s5588_s27 + $0xaa8] sm:$0xff] %v2841_v16  ;;  %v2839_v8 = vadd.f32 %v2327_v6, %v10404_v59  ;;  %v4054_v16 = vld [vmem:[%s4482_s18 + $0xad8] sm:$0xff]  ;;  %v2844_v7 = vadd.f32 %v2332_v29, %v10405_v34  ;;  %v4055_v3 = vld [vmem:[%s4482_s18 + $0xb00] sm:$0xff]  ;;  %v2341_v6 = vmul.f32 %v4056_v46, %v1948_v5  ;;  %v4057_v44 = vld [vmem:[%s4482_s18 + $0xb10] sm:$0xff] }
 0x33d   : > { %3354 = vst [vmem:[%s5588_s27 + $0xab0] sm:$0xff] %v2842_v31  ;;  %v2335_v24 = vmul.f32 %v4054_v16, %v8628_v56  ;;  %v2340_v31 = vmul.f32 %v4055_v3, %v1948_v5  ;;  %v10407_v56 = vld [vmem:[#allocation129_spill] sm:$0xff]  ;;  %v2342_v29 = vmul.f32 %v4057_v44, %v1948_v5  ;;  %v10408_v4 = vld [vmem:[#allocation122_spill] sm:$0xff]  ;;  %v4058_v14 = vld [vmem:[%s4482_s18 + $0xb18] sm:$0xff] }
 0x33e   : > { %3355 = vst [vmem:[%s5588_s27 + $0xab8] sm:$0xff] %v2843_v62  ;;  %v2845_v62 = vadd.f32 %v2333_v9, %v10406_v40  ;;  %v10409_v9 = vld [vmem:[#allocation123_spill] sm:$0xff]  ;;  %v4059_v34 = vld [vmem:[%s4482_s18 + $0xae0] sm:$0xff]  ;;  %v10412_v44 = vld [vmem:[#allocation130_spill] sm:$0xff] }
 0x33f   : > { %3348 = vst [vmem:[%s5588_s27 + $0xa80] sm:$0xff] %v2836_v28  ;;  %v2846_v28 = vadd.f32 %v2334_v11, %v10407_v56  ;;  %v2847_v59 = vadd.f32 %v2335_v24, %v10408_v4  ;;  %v2852_v16 = vadd.f32 %v2340_v31, %v10409_v9  ;;  %v2336_v3 = vmul.f32 %v4059_v34, %v1947_v12  ;;  %v10410_v11 = vld [vmem:[#allocation127_spill] sm:$0xff]  ;;  %v1677_v24 = vpop.xlane.xlu1 %1676  ;;  %v4063_v9 = vld [vmem:[%s4482_s18 + $0xb20] sm:$0xff] }
 0x340   : > { %3349 = vst [vmem:[%s5588_s27 + $0xa88] sm:$0xff] %v2837_v19  ;;  %v2343_v19 = vmul.f32 %v4058_v14, %v1948_v5  ;;  %v2853_v40 = vadd.f32 %v2341_v6, %v10410_v11  ;;  %v10411_v5 = vld [vmem:[#allocation132_spill] sm:$0xff]  ;;  %v4061_v56 = vld [vmem:[%s4482_s18 + $0xaf0] sm:$0xff] }
 0x341   : > { %3350 = vst [vmem:[%s5588_s27 + $0xa90] sm:$0xff] %v2838_v49  ;;  %v1949_v49 = vsub.f32 %v5513_v63, %v1667_v32  ;;  %v2338_v31 = vmul.f32 %v4061_v56, %v1947_v12  ;;  %v4062_v32 = vld [vmem:[%s4482_s18 + $0xaf8] sm:$0xff]  ;;  %v10416_v56 = vld [vmem:[#allocation133_spill] sm:$0xff] }
 0x342   : > { %3351 = vst [vmem:[%s5588_s27 + $0xa98] sm:$0xff] %v2839_v8  ;;  %v4060_v8 = vld [vmem:[%s4482_s18 + $0xae8] sm:$0xff]  ;;  %v2855_v4 = vadd.f32 %v2343_v19, %v10412_v44  ;;  %v10413_v6 = vld [vmem:[#allocation131_spill] sm:$0xff]  ;;  %v1672_v19 = vpop.xlane.xlu0 %1671 }
 0x343   : > { %3356 = vst [vmem:[%s5588_s27 + $0xac0] sm:$0xff] %v2844_v7  ;;  %v2337_v46 = vmul.f32 %v4060_v8, %v1947_v12  ;;  %v2854_v7 = vadd.f32 %v2342_v29, %v10411_v5  ;;  %v2848_v14 = vadd.f32 %v2336_v3, %v10413_v6  ;;  %v2344_v34 = vmul.f32 %v4063_v9, %v1949_v49  ;;  %v10414_v29 = vld [vmem:[#allocation137_spill] sm:$0xff]  ;;  %v4065_v5 = vld [vmem:[%s4482_s18 + $0xb30] sm:$0xff] }
 0x344   : > { %3357 = vst [vmem:[%s5588_s27 + $0xac8] sm:$0xff] %v2845_v62  ;;  %v2339_v62 = vmul.f32 %v4062_v32, %v1947_v12  ;;  %v10415_v12 = vld [vmem:[#allocation144_spill] sm:$0xff]  ;;  %v2346_v3 = vmul.f32 %v4065_v5, %v1949_v49 }
 0x345   : > { %3358 = vst [vmem:[%s5588_s27 + $0xad0] sm:$0xff] %v2846_v28  ;;  %v1951_v28 = vsub.f32 %v5513_v63, %v1677_v24  ;;  %v2849_v11 = vadd.f32 %v2337_v46, %v10414_v29  ;;  %v4066_v24 = vld [vmem:[%s4482_s18 + $0xb38] sm:$0xff]  ;;  %v2856_v46 = vadd.f32 %v2344_v34, %v7309_v35  ;;  %v4067_v32 = vld [vmem:[%s4482_s18 + $0xb60] sm:$0xff] }
 0x346   : > { %3359 = vst [vmem:[%s5588_s27 + $0xad8] sm:$0xff] %v2847_v59  ;;  %v4064_v59 = vld [vmem:[%s4482_s18 + $0xb28] sm:$0xff]  ;;  %v2851_v44 = vadd.f32 %v2339_v62, %v10416_v56  ;;  %v1682_v62 = vpop.xlane.xlu2 %1681  ;;  %v10419_v34 = vld [vmem:[#allocation147_spill] sm:$0xff]  ;;  %v4071_v56 = vld [vmem:[%s4482_s18 + $0xb40] sm:$0xff] }
 0x347   : > { %3364 = vst [vmem:[%s5588_s27 + $0xb00] sm:$0xff] %v2852_v16  ;;  %v2345_v8 = vmul.f32 %v4064_v59, %v1949_v49  ;;  %v2850_v16 = vadd.f32 %v2338_v31, %v10415_v12  ;;  %v2352_v6 = vmul.f32 %v4067_v32, %v1951_v28  ;;  %v10417_v31 = vld [vmem:[#allocation134_spill] sm:$0xff] }
 0x348   : > { %3365 = vst [vmem:[%s5588_s27 + $0xb08] sm:$0xff] %v2853_v40  ;;  %v2347_v40 = vmul.f32 %v4066_v24, %v1949_v49  ;;  %v10418_v49 = vld [vmem:[#allocation138_spill] sm:$0xff] }
 0x349   : > { %3366 = vst [vmem:[%s5588_s27 + $0xb10] sm:$0xff] %v2854_v7  ;;  %v1950_v7 = vsub.f32 %v5513_v63, %v1672_v19  ;;  %v2857_v9 = vadd.f32 %v2345_v8, %v10417_v31  ;;  %v4069_v59 = vld [vmem:[%s4482_s18 + $0xb70] sm:$0xff]  ;;  %v4070_v19 = vld [vmem:[%s4482_s18 + $0xb78] sm:$0xff] }
 0x34a   : > { %3367 = vst [vmem:[%s5588_s27 + $0xb18] sm:$0xff] %v2855_v4  ;;  %v4068_v4 = vld [vmem:[%s4482_s18 + $0xb68] sm:$0xff]  ;;  %v2354_v35 = vmul.f32 %v4069_v59, %v1951_v28  ;;  %v2859_v12 = vadd.f32 %v2347_v40, %v10419_v34  ;;  %v10420_v8 = vld [vmem:[#allocation135_spill] sm:$0xff]  ;;  %v1692_v40 = vpop.xlane.xlu1 %1691 }
 0x34b   : > { %3360 = vst [vmem:[%s5588_s27 + $0xae0] sm:$0xff] %v2848_v14  ;;  %v2353_v29 = vmul.f32 %v4068_v4, %v1951_v28  ;;  %v2858_v14 = vadd.f32 %v2346_v3, %v10418_v49  ;;  %v2864_v5 = vadd.f32 %v2352_v6, %v10420_v8  ;;  %v2348_v24 = vmul.f32 %v4071_v56, %v1950_v7  ;;  %v10421_v3 = vld [vmem:[#allocation136_spill] sm:$0xff]  ;;  %v4073_v4 = vld [vmem:[%s4482_s18 + $0xb50] sm:$0xff] }
 0x34c   : > { %3361 = vst [vmem:[%s5588_s27 + $0xae8] sm:$0xff] %v2849_v11  ;;  %v2355_v11 = vmul.f32 %v4070_v19, %v1951_v28  ;;  %v10422_v28 = vld [vmem:[#allocation139_spill] sm:$0xff]  ;;  %v2350_v6 = vmul.f32 %v4073_v4, %v1950_v7  ;;  %v10423_v49 = vld [vmem:[#allocation148_spill] sm:$0xff] }
 0x34d   : > { %3362 = vst [vmem:[%s5588_s27 + $0xaf0] sm:$0xff] %v2850_v16  ;;  %v1952_v16 = vsub.f32 %v5513_v63, %v1682_v62  ;;  %v2865_v32 = vadd.f32 %v2353_v29, %v10421_v3  ;;  %v4074_v62 = vld [vmem:[%s4482_s18 + $0xb58] sm:$0xff]  ;;  %v4075_v19 = vld [vmem:[%s4482_s18 + $0xb80] sm:$0xff] }
 0x34e   : > { %3363 = vst [vmem:[%s5588_s27 + $0xaf8] sm:$0xff] %v2851_v44  ;;  %v4072_v44 = vld [vmem:[%s4482_s18 + $0xb48] sm:$0xff]  ;;  %v2867_v59 = vadd.f32 %v2355_v11, %v10423_v49  ;;  %v10424_v29 = vld [vmem:[#allocation140_spill] sm:$0xff]  ;;  %v1687_v11 = vpop.xlane.xlu0 %1686 }
 0x34f   : > { %3368 = vst [vmem:[%s5588_s27 + $0xb20] sm:$0xff] %v2856_v46  ;;  %v2349_v31 = vmul.f32 %v4072_v44, %v1950_v7  ;;  %v2866_v46 = vadd.f32 %v2354_v35, %v10422_v28  ;;  %v2860_v34 = vadd.f32 %v2348_v24, %v10424_v29  ;;  %v2356_v8 = vmul.f32 %v4075_v19, %v1952_v16  ;;  %v10425_v35 = vld [vmem:[#allocation141_spill] sm:$0xff]  ;;  %v4077_v44 = vld [vmem:[%s4482_s18 + $0xb90] sm:$0xff]  ;;  %v10427_v28 = vld [vmem:[#allocation152_spill] sm:$0xff] }
 0x350   : > { %3369 = vst [vmem:[%s5588_s27 + $0xb28] sm:$0xff] %v2857_v9  ;;  %v2351_v9 = vmul.f32 %v4074_v62, %v1950_v7  ;;  %v10426_v7 = vld [vmem:[#allocation149_spill] sm:$0xff]  ;;  %v2358_v24 = vmul.f32 %v4077_v44, %v1952_v16 }
 0x351   : > { %3370 = vst [vmem:[%s5588_s27 + $0xb30] sm:$0xff] %v2858_v14  ;;  %v1954_v14 = vsub.f32 %v5513_v63, %v1692_v40  ;;  %v2861_v56 = vadd.f32 %v2349_v31, %v10425_v35  ;;  %v4078_v40 = vld [vmem:[%s4482_s18 + $0xb98] sm:$0xff]  ;;  %v2868_v31 = vadd.f32 %v2356_v8, %v7465_v52  ;;  %v4079_v49 = vld [vmem:[%s4482_s18 + $0xbc0] sm:$0xff]  ;;  %v4081_v35 = vld [vmem:[%s4482_s18 + $0xbd0] sm:$0xff] }
 0x352   : > { %3371 = vst [vmem:[%s5588_s27 + $0xb38] sm:$0xff] %v2859_v12  ;;  %v4076_v12 = vld [vmem:[%s4482_s18 + $0xb88] sm:$0xff]  ;;  %v2863_v4 = vadd.f32 %v2351_v9, %v10427_v28  ;;  %v1697_v9 = vpop.xlane.xlu2 %1696 }
 0x353   : > { %3376 = vst [vmem:[%s5588_s27 + $0xb60] sm:$0xff] %v2864_v5  ;;  %v2357_v3 = vmul.f32 %v4076_v12, %v1952_v16  ;;  %v2862_v5 = vadd.f32 %v2350_v6, %v10426_v7  ;;  %v2364_v62 = vmul.f32 %v4079_v49, %v1954_v14  ;;  %v10428_v6 = vld [vmem:[#allocation142_spill] sm:$0xff]  ;;  %v2366_v52 = vmul.f32 %v4081_v35, %v1954_v14  ;;  %v4082_v12 = vld [vmem:[%s4482_s18 + $0xbd8] sm:$0xff]  ;;  %v4083_v7 = vld [vmem:[%s4482_s18 + $0xba0] sm:$0xff] }
 0x354   : > { %3377 = vst [vmem:[%s5588_s27 + $0xb68] sm:$0xff] %v2865_v32  ;;  %v2359_v32 = vmul.f32 %v4078_v40, %v1952_v16  ;;  %v10429_v16 = vld [vmem:[#allocation143_spill] sm:$0xff] }
 0x355   : > { %3378 = vst [vmem:[%s5588_s27 + $0xb70] sm:$0xff] %v2866_v46  ;;  %v1953_v46 = vsub.f32 %v5513_v63, %v1687_v11  ;;  %v2869_v29 = vadd.f32 %v2357_v3, %v10428_v6  ;;  %v10430_v3 = vld [vmem:[#allocation150_spill] sm:$0xff] }
 0x356   : > { %3379 = vst [vmem:[%s5588_s27 + $0xb78] sm:$0xff] %v2867_v59  ;;  %v4080_v59 = vld [vmem:[%s4482_s18 + $0xbc8] sm:$0xff]  ;;  %v2871_v8 = vadd.f32 %v2359_v32, %v7484_v0  ;;  %v2876_v11 = vadd.f32 %v2364_v62, %v10430_v3  ;;  %v1707_v0 = vpop.xlane.xlu1 %1706 }
 0x357   : > { %3372 = vst [vmem:[%s5588_s27 + $0xb40] sm:$0xff] %v2860_v34  ;;  %v2365_v19 = vmul.f32 %v4080_v59, %v1954_v14  ;;  %v2870_v34 = vadd.f32 %v2358_v24, %v10429_v16  ;;  %v2360_v44 = vmul.f32 %v4083_v7, %v1953_v46  ;;  %v10431_v24 = vld [vmem:[#allocation153_spill] sm:$0xff]  ;;  %v10433_v62 = vld [vmem:[#allocation146_spill] sm:$0xff]  ;;  %v4086_v59 = vld [vmem:[%s4482_s18 + $0xbb8] sm:$0xff] }
 0x358   : > { %3373 = vst [vmem:[%s5588_s27 + $0xb48] sm:$0xff] %v2861_v56  ;;  %v2367_v56 = vmul.f32 %v4082_v12, %v1954_v14  ;;  %v10432_v14 = vld [vmem:[#allocation145_spill] sm:$0xff]  ;;  %v4089_v7 = vld [vmem:[%s4482_s18 + $0xbf0] sm:$0xff] }
 0x359   : > { %3374 = vst [vmem:[%s5588_s27 + $0xb50] sm:$0xff] %v2862_v5  ;;  %v1955_v5 = vsub.f32 %v5513_v63, %v1697_v9  ;;  %v2877_v28 = vadd.f32 %v2365_v19, %v10431_v24  ;;  %v2878_v32 = vadd.f32 %v2366_v52, %v10432_v14  ;;  %v10434_v19 = vld [vmem:[#allocation151_spill] sm:$0xff]  ;;  %v4087_v16 = vld [vmem:[%s4482_s18 + $0xbe0] sm:$0xff] }
 0x35a   : > { %3375 = vst [vmem:[%s5588_s27 + $0xb58] sm:$0xff] %v2863_v4  ;;  %v4084_v4 = vld [vmem:[%s4482_s18 + $0xba8] sm:$0xff]  ;;  %v2879_v6 = vadd.f32 %v2367_v56, %v10433_v62  ;;  %v2872_v9 = vadd.f32 %v2360_v44, %v10434_v19  ;;  %v10435_v52 = vld [vmem:[#allocation156_spill] sm:$0xff]  ;;  %v1702_v56 = vpop.xlane.xlu0 %1701  ;;  %v10437_v24 = vld [vmem:[#allocation155_spill] sm:$0xff] }
 0x35b   : > { %3380 = vst [vmem:[%s5588_s27 + $0xb80] sm:$0xff] %v2868_v31  ;;  %v2361_v40 = vmul.f32 %v4084_v4, %v1953_v46  ;;  %v4085_v31 = vld [vmem:[%s4482_s18 + $0xbb0] sm:$0xff]  ;;  %v2368_v35 = vmul.f32 %v4087_v16, %v1955_v5  ;;  %v2370_v44 = vmul.f32 %v4089_v7, %v1955_v5  ;;  %v4091_v14 = vld [vmem:[%s4482_s18 + $0xc20] sm:$0xff]  ;;  %v4092_v62 = vld [vmem:[%s4482_s18 + $0xc28] sm:$0xff] }
 0x35c   : > { %3381 = vst [vmem:[%s5588_s27 + $0xb88] sm:$0xff] %v2869_v29  ;;  %v2362_v49 = vmul.f32 %v4085_v31, %v1953_v46  ;;  %v2363_v29 = vmul.f32 %v4086_v59, %v1953_v46  ;;  %v10436_v46 = vld [vmem:[#allocation154_spill] sm:$0xff]  ;;  %v1712_v59 = vpop.xlane.xlu2 %1711 }
 0x35d   : > { %3382 = vst [vmem:[%s5588_s27 + $0xb90] sm:$0xff] %v2870_v34  ;;  %v1957_v34 = vsub.f32 %v5513_v63, %v1707_v0  ;;  %v2873_v12 = vadd.f32 %v2361_v40, %v10435_v52  ;;  %v4090_v0 = vld [vmem:[%s4482_s18 + $0xbf8] sm:$0xff]  ;;  %v2880_v40 = vadd.f32 %v2368_v35, %v7527_v27  ;;  %v4095_v35 = vld [vmem:[%s4482_s18 + $0xc00] sm:$0xff] }
 0x35e   : > { %3383 = vst [vmem:[%s5588_s27 + $0xb98] sm:$0xff] %v2871_v8  ;;  %v4088_v8 = vld [vmem:[%s4482_s18 + $0xbe8] sm:$0xff]  ;;  %v2875_v4 = vadd.f32 %v2363_v29, %v10437_v24  ;;  %v4093_v29 = vld [vmem:[%s4482_s18 + $0xc30] sm:$0xff]  ;;  %v4099_v24 = vld [vmem:[%s4482_s18 + $0xc40] sm:$0xff] }
 0x35f   : > { %3388 = vst [vmem:[%s5588_s27 + $0xbc0] sm:$0xff] %v2876_v11  ;;  %v2369_v3 = vmul.f32 %v4088_v8, %v1955_v5  ;;  %v2874_v11 = vadd.f32 %v2362_v49, %v10436_v46  ;;  %v2376_v31 = vmul.f32 %v4091_v14, %v1957_v34  ;;  %v2378_v27 = vmul.f32 %v4093_v29, %v1957_v34  ;;  %v4096_v8 = vld [vmem:[%s4482_s18 + $0xc08] sm:$0xff]  ;;  %v4103_v29 = vld [vmem:[%s4482_s18 + $0xc80] sm:$0xff] }
 0x360   : > { %3389 = vst [vmem:[%s5588_s27 + $0xbc8] sm:$0xff] %v2877_v28  ;;  %v2371_v28 = vmul.f32 %v4090_v0, %v1955_v5  ;;  %v2882_v5 = vadd.f32 %v2370_v44, %v7578_v15 }
 0x361   : > { %3390 = vst [vmem:[%s5588_s27 + $0xbd0] sm:$0xff] %v2878_v32  ;;  %v1956_v32 = vsub.f32 %v5513_v63, %v1702_v56  ;;  %v2881_v49 = vadd.f32 %v2369_v3, %v7530_v10  ;;  %v2888_v10 = vadd.f32 %v2376_v31, %v7592_v18  ;;  %v4097_v56 = vld [vmem:[%s4482_s18 + $0xc10] sm:$0xff] }
 0x362   : > { %3391 = vst [vmem:[%s5588_s27 + $0xbd8] sm:$0xff] %v2879_v6  ;;  %v2377_v6 = vmul.f32 %v4092_v62, %v1957_v34  ;;  %v2883_v19 = vadd.f32 %v2371_v28, %v7581_v20  ;;  %v1722_v20 = vpop.xlane.xlu1 %1721 }
 0x363   : > { %3384 = vst [vmem:[%s5588_s27 + $0xba0] sm:$0xff] %v2872_v9  ;;  %v4094_v9 = vld [vmem:[%s4482_s18 + $0xc38] sm:$0xff]  ;;  %v2372_v52 = vmul.f32 %v4095_v35, %v1956_v32  ;;  %v2373_v3 = vmul.f32 %v4096_v8, %v1956_v32  ;;  %v2374_v18 = vmul.f32 %v4097_v56, %v1956_v32  ;;  %v1960_v0 = vsub.f32 %v5513_v63, %v1722_v20  ;;  %v4105_v35 = vld [vmem:[%s4482_s18 + $0xc90] sm:$0xff]  ;;  %v4107_v8 = vld [vmem:[%s4482_s18 + $0xc60] sm:$0xff] }
 0x364   : > { %3385 = vst [vmem:[%s5588_s27 + $0xba8] sm:$0xff] %v2873_v12  ;;  %v2379_v16 = vmul.f32 %v4094_v9, %v1957_v34  ;;  %v1958_v12 = vsub.f32 %v5513_v63, %v1712_v59  ;;  %v2889_v15 = vadd.f32 %v2377_v6, %v7596_v26  ;;  %v2890_v34 = vadd.f32 %v2378_v27, %v7599_v17  ;;  %v10438_v26 = vld [vmem:[#allocation161_spill] sm:$0xff]  ;;  %v10439_v17 = vld [vmem:[#allocation172_spill] sm:$0xff] }
 0x365   : > { %3386 = vst [vmem:[%s5588_s27 + $0xbb0] sm:$0xff] %v2874_v11  ;;  %v4098_v11 = vld [vmem:[%s4482_s18 + $0xc18] sm:$0xff]  ;;  %v2884_v44 = vadd.f32 %v2372_v52, %v10438_v26  ;;  %v2885_v28 = vadd.f32 %v2373_v3, %v10439_v17  ;;  %v2886_v31 = vadd.f32 %v2374_v18, %v7615_v21  ;;  %v2388_v27 = vmul.f32 %v4103_v29, %v1960_v0  ;;  %v4104_v9 = vld [vmem:[%s4482_s18 + $0xc88] sm:$0xff] }
 0x366   : > { %3387 = vst [vmem:[%s5588_s27 + $0xbb8] sm:$0xff] %v2875_v4  ;;  %v2891_v46 = vadd.f32 %v2379_v16, %v7602_v50  ;;  %v2375_v7 = vmul.f32 %v4098_v11, %v1956_v32  ;;  %v2380_v4 = vmul.f32 %v4099_v24, %v1958_v12  ;;  %v1717_v50 = vpop.xlane.xlu0 %1716  ;;  %v4101_v32 = vld [vmem:[%s4482_s18 + $0xc50] sm:$0xff]  ;;  %v4102_v6 = vld [vmem:[%s4482_s18 + $0xc58] sm:$0xff]  ;;  %v2389_v16 = vmul.f32 %v4104_v9, %v1960_v0  ;;  %v10440_v18 = vld [vmem:[#allocation157_spill] sm:$0xff] }
 0x367   : > { %3392 = vst [vmem:[%s5588_s27 + $0xbe0] sm:$0xff] %v2880_v40  ;;  %v4100_v40 = vld [vmem:[%s4482_s18 + $0xc48] sm:$0xff]  ;;  %v2383_v59 = vmul.f32 %v4102_v6, %v1958_v12  ;;  %v4109_v11 = vld [vmem:[%s4482_s18 + $0xc70] sm:$0xff]  ;;  %v4115_v9 = vld [vmem:[%s4482_s18 + $0xce0] sm:$0xff] }
 0x368   : > { %3393 = vst [vmem:[%s5588_s27 + $0xbe8] sm:$0xff] %v2881_v49  ;;  %v2381_v14 = vmul.f32 %v4100_v40, %v1958_v12  ;;  %v2382_v49 = vmul.f32 %v4101_v32, %v1958_v12  ;;  %v2887_v62 = vadd.f32 %v2375_v7, %v7618_v36  ;;  %v1727_v36 = vpop.xlane.xlu2 %1726  ;;  %v4106_v12 = vld [vmem:[%s4482_s18 + $0xc98] sm:$0xff]  ;;  %v10441_v7 = vld [vmem:[#allocation158_spill] sm:$0xff]  ;;  %v10443_v40 = vld [vmem:[#allocation173_spill] sm:$0xff] }
 0x369   : > { %3394 = vst [vmem:[%s5588_s27 + $0xbf0] sm:$0xff] %v2882_v5  ;;  %v2892_v5 = vadd.f32 %v2380_v4, %v7631_v61  ;;  %v2390_v61 = vmul.f32 %v4105_v35, %v1960_v0  ;;  %v2895_v52 = vadd.f32 %v2383_v59, %v7681_v55  ;;  %v1961_v20 = vsub.f32 %v5513_v63, %v1727_v36  ;;  %v4113_v6 = vld [vmem:[%s4482_s18 + $0xcb0] sm:$0xff]  ;;  %v4116_v35 = vld [vmem:[%s4482_s18 + $0xce8] sm:$0xff] }
 0x36a   : > { %3395 = vst [vmem:[%s5588_s27 + $0xbf8] sm:$0xff] %v2883_v19  ;;  %v1959_v19 = vsub.f32 %v5513_v63, %v1717_v50  ;;  %v2893_v21 = vadd.f32 %v2381_v14, %v7634_v23  ;;  %v2900_v23 = vadd.f32 %v2388_v27, %v7692_v60  ;;  %v1737_v55 = vpop.xlane.xlu1 %1736  ;;  %v4112_v50 = vld [vmem:[%s4482_s18 + $0xca8] sm:$0xff]  ;;  %v4114_v27 = vld [vmem:[%s4482_s18 + $0xcb8] sm:$0xff] }
 0x36b   : > { %3400 = vst [vmem:[%s5588_s27 + $0xc20] sm:$0xff] %v2888_v10  ;;  %v2894_v10 = vadd.f32 %v2382_v49, %v7678_v2  ;;  %v2901_v2 = vadd.f32 %v2389_v16, %v7695_v30  ;;  %v10442_v30 = vld [vmem:[#allocation162_spill] sm:$0xff]  ;;  %v10444_v49 = vld [vmem:[#allocation159_spill] sm:$0xff]  ;;  %v2394_v59 = vmul.f32 %v4113_v6, %v1961_v20 }
 0x36c   : > { %3401 = vst [vmem:[%s5588_s27 + $0xc28] sm:$0xff] %v2889_v15  ;;  %v2391_v15 = vmul.f32 %v4106_v12, %v1960_v0  ;;  %v2384_v3 = vmul.f32 %v4107_v8, %v1959_v19  ;;  %v2386_v60 = vmul.f32 %v4109_v11, %v1959_v19  ;;  %v4111_v0 = vld [vmem:[%s4482_s18 + $0xca0] sm:$0xff] }
 0x36d   : > { %3402 = vst [vmem:[%s5588_s27 + $0xc30] sm:$0xff] %v2890_v34  ;;  %v4108_v34 = vld [vmem:[%s4482_s18 + $0xc68] sm:$0xff]  ;;  %v2392_v17 = vmul.f32 %v4111_v0, %v1961_v20  ;;  %v2906_v12 = vadd.f32 %v2394_v59, %v7774_v45  ;;  %v10448_v45 = vld [vmem:[#allocation163_spill] sm:$0xff] }
 0x36e   : > { %3403 = vst [vmem:[%s5588_s27 + $0xc38] sm:$0xff] %v2891_v46  ;;  %v2385_v56 = vmul.f32 %v4108_v34, %v1959_v19  ;;  %v2902_v46 = vadd.f32 %v2390_v61, %v10440_v18  ;;  %v2903_v26 = vadd.f32 %v2391_v15, %v10441_v7  ;;  %v2896_v4 = vadd.f32 %v2384_v3, %v10442_v30  ;;  %v1732_v32 = vpop.xlane.xlu0 %1731  ;;  %v4117_v15 = vld [vmem:[%s4482_s18 + $0xcf0] sm:$0xff]  ;;  %v4118_v3 = vld [vmem:[%s4482_s18 + $0xcf8] sm:$0xff]  ;;  %v4119_v34 = vld [vmem:[%s4482_s18 + $0xcc0] sm:$0xff] }
 0x36f   : > { %3396 = vst [vmem:[%s5588_s27 + $0xc00] sm:$0xff] %v2884_v44  ;;  %v4110_v44 = vld [vmem:[%s4482_s18 + $0xc78] sm:$0xff]  ;;  %v1962_v36 = vsub.f32 %v5513_v63, %v1732_v32  ;;  %v10452_v32 = vld [vmem:[#allocation166_spill] sm:$0xff] }
 0x370   : > { %3397 = vst [vmem:[%s5588_s27 + $0xc08] sm:$0xff] %v2885_v28  ;;  %v2387_v24 = vmul.f32 %v4110_v44, %v1959_v19  ;;  %v1963_v28 = vsub.f32 %v5513_v63, %v1737_v55  ;;  %v2897_v14 = vadd.f32 %v2385_v56, %v10443_v40  ;;  %v2395_v19 = vmul.f32 %v4114_v27, %v1961_v20  ;;  %v10449_v7 = vld [vmem:[#allocation164_spill] sm:$0xff]  ;;  %v4121_v44 = vld [vmem:[%s4482_s18 + $0xcd0] sm:$0xff] }
 0x371   : > { %3398 = vst [vmem:[%s5588_s27 + $0xc10] sm:$0xff] %v2886_v31  ;;  %v2393_v31 = vmul.f32 %v4112_v50, %v1961_v20  ;;  %v2396_v56 = vmul.f32 %v4119_v34, %v1962_v36  ;;  %v10450_v30 = vld [vmem:[#allocation176_spill] sm:$0xff]  ;;  %v4125_v27 = vld [vmem:[%s4482_s18 + $0xd10] sm:$0xff] }
 0x372   : > { %3399 = vst [vmem:[%s5588_s27 + $0xc18] sm:$0xff] %v2887_v62  ;;  %v2898_v62 = vadd.f32 %v2386_v60, %v10444_v49  ;;  %v2400_v16 = vmul.f32 %v4115_v9, %v1963_v28  ;;  %v2401_v61 = vmul.f32 %v4116_v35, %v1963_v28  ;;  %v2403_v20 = vmul.f32 %v4118_v3, %v1963_v28  ;;  %v1752_v60 = vpop.xlane.xlu1 %1751  ;;  %v4122_v0 = vld [vmem:[%s4482_s18 + $0xcd8] sm:$0xff]  ;;  %v4127_v35 = vld [vmem:[%s4482_s18 + $0xd40] sm:$0xff] }
 0x373   : > { %3404 = vst [vmem:[%s5588_s27 + $0xc40] sm:$0xff] %v2892_v5  ;;  %v10445_v5 = vld [vmem:[#allocation160_spill] sm:$0xff] }
 0x374   : > { %3405 = vst [vmem:[%s5588_s27 + $0xc48] sm:$0xff] %v2893_v21  ;;  %v2899_v29 = vadd.f32 %v2387_v24, %v10445_v5  ;;  %v2904_v21 = vadd.f32 %v2392_v17, %v7732_v13  ;;  %v2402_v13 = vmul.f32 %v4117_v15, %v1963_v28  ;;  %v2913_v18 = vadd.f32 %v2401_v61, %v10448_v45  ;;  %v10451_v28 = vld [vmem:[#allocation182_spill] sm:$0xff]  ;;  %v10453_v5 = vld [vmem:[#allocation167_spill] sm:$0xff]  ;;  %v4131_v45 = vld [vmem:[%s4482_s18 + $0xd20] sm:$0xff] }
 0x375   : > { %3406 = vst [vmem:[%s5588_s27 + $0xc50] sm:$0xff] %v2894_v10  ;;  %v2905_v10 = vadd.f32 %v2393_v31, %v7735_v53  ;;  %v10447_v53 = vld [vmem:[#allocation178_spill] sm:$0xff]  ;;  %v2398_v24 = vmul.f32 %v4121_v44, %v1962_v36  ;;  %v2399_v17 = vmul.f32 %v4122_v0, %v1962_v36  ;;  %v2908_v40 = vadd.f32 %v2396_v56, %v10451_v28  ;;  %v4130_v34 = vld [vmem:[%s4482_s18 + $0xd58] sm:$0xff] }
 0x376   : > { %3407 = vst [vmem:[%s5588_s27 + $0xc58] sm:$0xff] %v2895_v52  ;;  %v1742_v52 = vpop.xlane.xlu2 %1741  ;;  %v1966_v31 = vsub.f32 %v5513_v63, %v1752_v60  ;;  %v1747_v59 = vpop.xlane.xlu0 %1746  ;;  %v4128_v15 = vld [vmem:[%s4482_s18 + $0xd48] sm:$0xff] }
 0x377   : > { %3412 = vst [vmem:[%s5588_s27 + $0xc80] sm:$0xff] %v2900_v23  ;;  %v10446_v23 = vld [vmem:[#allocation165_spill] sm:$0xff]  ;;  %v1964_v55 = vsub.f32 %v5513_v63, %v1742_v52  ;;  %v1965_v52 = vsub.f32 %v5513_v63, %v1747_v59 }
 0x378   : > { %3413 = vst [vmem:[%s5588_s27 + $0xc88] sm:$0xff] %v2901_v2  ;;  %v2907_v8 = vadd.f32 %v2395_v19, %v10446_v23  ;;  %v2912_v2 = vadd.f32 %v2400_v16, %v10447_v53  ;;  %v4126_v16 = vld [vmem:[%s4482_s18 + $0xd18] sm:$0xff]  ;;  %v2412_v61 = vmul.f32 %v4127_v35, %v1966_v31  ;;  %v2415_v56 = vmul.f32 %v4130_v34, %v1966_v31 }
 0x379   : > { %3414 = vst [vmem:[%s5588_s27 + $0xc90] sm:$0xff] %v2902_v46  ;;  %v4120_v46 = vld [vmem:[%s4482_s18 + $0xcc8] sm:$0xff]  ;;  %v2406_v19 = vmul.f32 %v4125_v27, %v1964_v55  ;;  %v10456_v53 = vld [vmem:[#allocation168_spill] sm:$0xff] }
 0x37a   : > { %3415 = vst [vmem:[%s5588_s27 + $0xc98] sm:$0xff] %v2903_v26  ;;  %v2397_v11 = vmul.f32 %v4120_v46, %v1962_v36  ;;  %v2914_v26 = vadd.f32 %v2402_v13, %v10449_v7  ;;  %v2407_v36 = vmul.f32 %v4126_v16, %v1964_v55  ;;  %v2413_v13 = vmul.f32 %v4128_v15, %v1966_v31  ;;  %v4132_v7 = vld [vmem:[%s4482_s18 + $0xd28] sm:$0xff]  ;;  %v1767_v44 = vpop.xlane.xlu1 %1766  ;;  %v4138_v35 = vld [vmem:[%s4482_s18 + $0xd78] sm:$0xff]  ;;  %v4139_v15 = vld [vmem:[%s4482_s18 + $0xda0] sm:$0xff] }
 0x37b   : > { %3408 = vst [vmem:[%s5588_s27 + $0xc60] sm:$0xff] %v2896_v4  ;;  %v2915_v4 = vadd.f32 %v2403_v20, %v10450_v30  ;;  %v4129_v20 = vld [vmem:[%s4482_s18 + $0xd50] sm:$0xff] }
 0x37c   : > { %3409 = vst [vmem:[%s5588_s27 + $0xc68] sm:$0xff] %v2897_v14  ;;  %v4123_v14 = vld [vmem:[%s4482_s18 + $0xd00] sm:$0xff]  ;;  %v2909_v49 = vadd.f32 %v2397_v11, %v10452_v32  ;;  %v10458_v11 = vld [vmem:[#allocation179_spill] sm:$0xff] }
 0x37d   : > { %3410 = vst [vmem:[%s5588_s27 + $0xc70] sm:$0xff] %v2898_v62  ;;  %v2404_v50 = vmul.f32 %v4123_v14, %v1964_v55  ;;  %v4124_v62 = vld [vmem:[%s4482_s18 + $0xd08] sm:$0xff]  ;;  %v2925_v60 = vadd.f32 %v2413_v13, %v10458_v11  ;;  %v4135_v32 = vld [vmem:[%s4482_s18 + $0xd60] sm:$0xff] }
 0x37e   : > { %3411 = vst [vmem:[%s5588_s27 + $0xc78] sm:$0xff] %v2899_v29  ;;  %v2405_v6 = vmul.f32 %v4124_v62, %v1964_v55  ;;  %v2910_v29 = vadd.f32 %v2398_v24, %v10453_v5  ;;  %v1757_v23 = vpop.xlane.xlu2 %1756  ;;  %v10459_v24 = vld [vmem:[#allocation184_spill] sm:$0xff]  ;;  %v1969_v62 = vsub.f32 %v5513_v63, %v1767_v44  ;;  %v4136_v5 = vld [vmem:[%s4482_s18 + $0xd68] sm:$0xff]  ;;  %v1762_v27 = vpop.xlane.xlu0 %1761 }
 0x37f   : > { %3416 = vst [vmem:[%s5588_s27 + $0xca0] sm:$0xff] %v2904_v21  ;;  %v10454_v21 = vld [vmem:[#allocation177_spill] sm:$0xff]  ;;  %v1967_v46 = vsub.f32 %v5513_v63, %v1757_v23  ;;  %v1968_v23 = vsub.f32 %v5513_v63, %v1762_v27  ;;  %v10469_v11 = vld [vmem:[#allocation188_spill] sm:$0xff] }
 0x380   : > { %3417 = vst [vmem:[%s5588_s27 + $0xca8] sm:$0xff] %v2905_v10  ;;  %v2911_v9 = vadd.f32 %v2399_v17, %v10454_v21  ;;  %v2916_v10 = vadd.f32 %v2404_v50, %v7871_v33  ;;  %v2414_v33 = vmul.f32 %v4129_v20, %v1966_v31  ;;  %v10460_v17 = vld [vmem:[#allocation170_spill] sm:$0xff]  ;;  %v10461_v50 = vld [vmem:[#allocation171_spill] sm:$0xff]  ;;  %v2424_v13 = vmul.f32 %v4139_v15, %v1969_v62 }
 0x381   : > { %3418 = vst [vmem:[%s5588_s27 + $0xcb0] sm:$0xff] %v2906_v12  ;;  %v2917_v12 = vadd.f32 %v2405_v6, %v7874_v47  ;;  %v10457_v47 = vld [vmem:[#allocation169_spill] sm:$0xff]  ;;  %v2927_v28 = vadd.f32 %v2415_v56, %v10460_v17  ;;  %v10462_v6 = vld [vmem:[#allocation180_spill] sm:$0xff]  ;;  %v4141_v56 = vld [vmem:[%s4482_s18 + $0xdb0] sm:$0xff] }
 0x382   : > { %3419 = vst [vmem:[%s5588_s27 + $0xcb8] sm:$0xff] %v2907_v8  ;;  %v10455_v8 = vld [vmem:[#allocation183_spill] sm:$0xff]  ;;  %v2924_v55 = vadd.f32 %v2412_v61, %v10457_v47  ;;  %v2926_v30 = vadd.f32 %v2414_v33, %v10459_v24  ;;  %v2419_v61 = vmul.f32 %v4138_v35, %v1967_v46  ;;  %v4140_v20 = vld [vmem:[%s4482_s18 + $0xda8] sm:$0xff]  ;;  %v2426_v47 = vmul.f32 %v4141_v56, %v1969_v62  ;;  %v1782_v17 = vpop.xlane.xlu1 %1781 }
 0x383   : > { %3424 = vst [vmem:[%s5588_s27 + $0xce0] sm:$0xff] %v2912_v2  ;;  %v2918_v3 = vadd.f32 %v2406_v19, %v10455_v8  ;;  %v2919_v2 = vadd.f32 %v2407_v36, %v10456_v53  ;;  %v10463_v19 = vld [vmem:[#allocation185_spill] sm:$0xff]  ;;  %v10464_v36 = vld [vmem:[#allocation174_spill] sm:$0xff]  ;;  %v2425_v33 = vmul.f32 %v4140_v20, %v1969_v62  ;;  %v1972_v27 = vsub.f32 %v5513_v63, %v1782_v17 }
 0x384   : > { %3425 = vst [vmem:[%s5588_s27 + $0xce8] sm:$0xff] %v2913_v18  ;;  %v2408_v18 = vmul.f32 %v4131_v45, %v1965_v52  ;;  %v10466_v8 = vld [vmem:[#allocation181_spill] sm:$0xff] }
 0x385   : > { %3426 = vst [vmem:[%s5588_s27 + $0xcf0] sm:$0xff] %v2914_v26  ;;  %v2409_v26 = vmul.f32 %v4132_v7, %v1965_v52  ;;  %v4143_v7 = vld [vmem:[%s4482_s18 + $0xd80] sm:$0xff]  ;;  %v4152_v56 = vld [vmem:[%s4482_s18 + $0xe08] sm:$0xff] }
 0x386   : > { %3427 = vst [vmem:[%s5588_s27 + $0xcf8] sm:$0xff] %v2915_v4  ;;  %v4133_v4 = vld [vmem:[%s4482_s18 + $0xd30] sm:$0xff]  ;;  %v2920_v31 = vadd.f32 %v2408_v18, %v10461_v50  ;;  %v1772_v53 = vpop.xlane.xlu2 %1771  ;;  %v4142_v18 = vld [vmem:[%s4482_s18 + $0xdb8] sm:$0xff]  ;;  %v10470_v24 = vld [vmem:[#allocation193_spill] sm:$0xff] }
 0x387   : > { %3420 = vst [vmem:[%s5588_s27 + $0xcc0] sm:$0xff] %v2908_v40  ;;  %v2410_v0 = vmul.f32 %v4133_v4, %v1965_v52  ;;  %v4134_v40 = vld [vmem:[%s4482_s18 + $0xd38] sm:$0xff]  ;;  %v2921_v59 = vadd.f32 %v2409_v26, %v10462_v6  ;;  %v2420_v26 = vmul.f32 %v4143_v7, %v1968_v23  ;;  %v1970_v44 = vsub.f32 %v5513_v63, %v1772_v53  ;;  %v4144_v4 = vld [vmem:[%s4482_s18 + $0xd88] sm:$0xff]  ;;  %v4151_v20 = vld [vmem:[%s4482_s18 + $0xe00] sm:$0xff] }
 0x388   : > { %3421 = vst [vmem:[%s5588_s27 + $0xcc8] sm:$0xff] %v2909_v49  ;;  %v2411_v14 = vmul.f32 %v4134_v40, %v1965_v52  ;;  %v2416_v49 = vmul.f32 %v4135_v32, %v1967_v46  ;;  %v10465_v52 = vld [vmem:[#allocation175_spill] sm:$0xff]  ;;  %v10473_v6 = vld [vmem:[#allocation194_spill] sm:$0xff] }
 0x389   : > { %3422 = vst [vmem:[%s5588_s27 + $0xcd0] sm:$0xff] %v2910_v29  ;;  %v2417_v29 = vmul.f32 %v4136_v5, %v1967_v46  ;;  %v2922_v21 = vadd.f32 %v2410_v0, %v10463_v19  ;;  %v2421_v0 = vmul.f32 %v4144_v4, %v1968_v23  ;;  %v4147_v5 = vld [vmem:[%s4482_s18 + $0xdc0] sm:$0xff]  ;;  %v10474_v19 = vld [vmem:[#allocation191_spill] sm:$0xff] }
 0x38a   : > { %3423 = vst [vmem:[%s5588_s27 + $0xcd8] sm:$0xff] %v2911_v9  ;;  %v4137_v9 = vld [vmem:[%s4482_s18 + $0xd70] sm:$0xff]  ;;  %v4155_v4 = vld [vmem:[%s4482_s18 + $0xde0] sm:$0xff] }
 0x38b   : > { %3428 = vst [vmem:[%s5588_s27 + $0xd00] sm:$0xff] %v2916_v10  ;;  %v2418_v16 = vmul.f32 %v4137_v9, %v1967_v46  ;;  %v2923_v10 = vadd.f32 %v2411_v14, %v10464_v36  ;;  %v2427_v46 = vmul.f32 %v4142_v18, %v1969_v62  ;;  %v4145_v14 = vld [vmem:[%s4482_s18 + $0xd90] sm:$0xff]  ;;  %v4148_v9 = vld [vmem:[%s4482_s18 + $0xdc8] sm:$0xff]  ;;  %v1777_v36 = vpop.xlane.xlu0 %1776 }
 0x38c   : > { %3429 = vst [vmem:[%s5588_s27 + $0xd08] sm:$0xff] %v2917_v12  ;;  %v2928_v12 = vadd.f32 %v2416_v49, %v10465_v52  ;;  %v2422_v50 = vmul.f32 %v4145_v14, %v1968_v23  ;;  %v4146_v49 = vld [vmem:[%s4482_s18 + $0xd98] sm:$0xff]  ;;  %v1971_v53 = vsub.f32 %v5513_v63, %v1777_v36  ;;  %v4156_v14 = vld [vmem:[%s4482_s18 + $0xde8] sm:$0xff] }
 0x38d   : > { %3430 = vst [vmem:[%s5588_s27 + $0xd10] sm:$0xff] %v2918_v3  ;;  %v2929_v3 = vadd.f32 %v2417_v29, %v10466_v8  ;;  %v2423_v62 = vmul.f32 %v4146_v49, %v1968_v23  ;;  %v2428_v29 = vmul.f32 %v4147_v5, %v1970_v44  ;;  %v10477_v8 = vld [vmem:[#allocation20_spill] sm:$0xff] }
 0x38e   : > { %3431 = vst [vmem:[%s5588_s27 + $0xd18] sm:$0xff] %v2919_v2  ;;  %v10467_v2 = vld [vmem:[#allocation186_spill] sm:$0xff] }
 0x38f   : > { %3436 = vst [vmem:[%s5588_s27 + $0xd40] sm:$0xff] %v2924_v55  ;;  %v2930_v34 = vadd.f32 %v2418_v16, %v10467_v2  ;;  %v10468_v55 = vld [vmem:[#allocation187_spill] sm:$0xff]  ;;  %v2429_v16 = vmul.f32 %v4148_v9, %v1970_v44  ;;  %v10478_v2 = vld [vmem:[#allocation13_spill] sm:$0xff] }
 0x390   : > { %3437 = vst [vmem:[%s5588_s27 + $0xd48] sm:$0xff] %v2925_v60  ;;  %v2931_v45 = vadd.f32 %v2419_v61, %v10468_v55  ;;  %v2936_v60 = vadd.f32 %v2424_v13, %v10469_v11  ;;  %v4149_v61 = vld [vmem:[%s4482_s18 + $0xdd0] sm:$0xff]  ;;  %v4150_v13 = vld [vmem:[%s4482_s18 + $0xdd8] sm:$0xff]  ;;  %v1787_v55 = vpop.xlane.xlu2 %1786  ;;  %v4159_v9 = vld [vmem:[%s4482_s18 + $0xe20] sm:$0xff] }
 0x391   : > { %3438 = vst [vmem:[%s5588_s27 + $0xd50] sm:$0xff] %v2926_v30  ;;  %v2937_v30 = vadd.f32 %v2425_v33, %v10470_v24  ;;  %v2430_v52 = vmul.f32 %v4149_v61, %v1970_v44  ;;  %v2431_v23 = vmul.f32 %v4150_v13, %v1970_v44  ;;  %v2436_v33 = vmul.f32 %v4151_v20, %v1972_v27  ;;  %v10481_v24 = vld [vmem:[#allocation23_spill] sm:$0xff]  ;;  %v4160_v61 = vld [vmem:[%s4482_s18 + $0xe28] sm:$0xff] }
 0x392   : > { %3439 = vst [vmem:[%s5588_s27 + $0xd58] sm:$0xff] %v2927_v28  ;;  %v10471_v28 = vld [vmem:[#allocation189_spill] sm:$0xff]  ;;  %v1973_v17 = vsub.f32 %v5513_v63, %v1787_v55  ;;  %v10489_v55 = vld [vmem:[#allocation32_spill] sm:$0xff] }
 0x393   : > { %3432 = vst [vmem:[%s5588_s27 + $0xd20] sm:$0xff] %v2920_v31  ;;  %v2938_v40 = vadd.f32 %v2426_v47, %v10471_v28  ;;  %v10472_v31 = vld [vmem:[#allocation190_spill] sm:$0xff]  ;;  %v2437_v47 = vmul.f32 %v4152_v56, %v1972_v27  ;;  %v10482_v28 = vld [vmem:[#allocation16_spill] sm:$0xff] }
 0x394   : > { %3433 = vst [vmem:[%s5588_s27 + $0xd28] sm:$0xff] %v2921_v59  ;;  %v2939_v32 = vadd.f32 %v2427_v46, %v10472_v31  ;;  %v2932_v59 = vadd.f32 %v2420_v26, %v10473_v6  ;;  %v4153_v46 = vld [vmem:[%s4482_s18 + $0xe10] sm:$0xff]  ;;  %v4154_v26 = vld [vmem:[%s4482_s18 + $0xe18] sm:$0xff]  ;;  %v1797_v31 = vpop.xlane.xlu1 %1796 }
 0x395   : > { %3434 = vst [vmem:[%s5588_s27 + $0xd30] sm:$0xff] %v2922_v21  ;;  %v2933_v21 = vadd.f32 %v2421_v0, %v10474_v19  ;;  %v2438_v11 = vmul.f32 %v4153_v46, %v1972_v27  ;;  %v2439_v44 = vmul.f32 %v4154_v26, %v1972_v27  ;;  %v2432_v0 = vmul.f32 %v4155_v4, %v1971_v53  ;;  %v10485_v19 = vld [vmem:[#allocation26_spill] sm:$0xff] }
 0x396   : > { %3435 = vst [vmem:[%s5588_s27 + $0xd38] sm:$0xff] %v2923_v10  ;;  %v10475_v10 = vld [vmem:[#allocation192_spill] sm:$0xff]  ;;  %v1975_v36 = vsub.f32 %v5513_v63, %v1797_v31  ;;  %v4165_v26 = vld [vmem:[%s4482_s18 + $0xe70] sm:$0xff] }
 0x397   : > { %3440 = vst [vmem:[%s5588_s27 + $0xd60] sm:$0xff] %v2928_v12  ;;  %v2934_v35 = vadd.f32 %v2422_v50, %v10475_v10  ;;  %v10476_v12 = vld [vmem:[#allocation14_spill] sm:$0xff]  ;;  %v2433_v50 = vmul.f32 %v4156_v14, %v1971_v53  ;;  %v10486_v10 = vld [vmem:[#allocation21_spill] sm:$0xff] }
 0x398   : > { %3441 = vst [vmem:[%s5588_s27 + $0xd68] sm:$0xff] %v2929_v3  ;;  %v2935_v15 = vadd.f32 %v2423_v62, %v10476_v12  ;;  %v2940_v3 = vadd.f32 %v2428_v29, %v10477_v8  ;;  %v4157_v62 = vld [vmem:[%s4482_s18 + $0xdf0] sm:$0xff]  ;;  %v4158_v29 = vld [vmem:[%s4482_s18 + $0xdf8] sm:$0xff]  ;;  %v1792_v12 = vpop.xlane.xlu0 %1791 }
 0x399   : > { %3442 = vst [vmem:[%s5588_s27 + $0xd70] sm:$0xff] %v2930_v34  ;;  %v2941_v34 = vadd.f32 %v2429_v16, %v10478_v2  ;;  %v2434_v6 = vmul.f32 %v4157_v62, %v1971_v53  ;;  %v2435_v27 = vmul.f32 %v4158_v29, %v1971_v53  ;;  %v2440_v16 = vmul.f32 %v4159_v9, %v1973_v17 }
 0x39a   : > { %3443 = vst [vmem:[%s5588_s27 + $0xd78] sm:$0xff] %v2931_v45  ;;  %v10479_v45 = vld [vmem:[#allocation15_spill] sm:$0xff] }
 0x39b   : > { %3448 = vst [vmem:[%s5588_s27 + $0xda0] sm:$0xff] %v2936_v60  ;;  %v2942_v18 = vadd.f32 %v2430_v52, %v10479_v45  ;;  %v10480_v60 = vld [vmem:[#allocation18_spill] sm:$0xff]  ;;  %v2441_v52 = vmul.f32 %v4160_v61, %v1973_v17  ;;  %v2952_v2 = vadd.f32 %v2440_v16, %v8130_v41  ;;  %v2450_v41 = vmul.f32 %v4165_v26, %v1975_v36  ;;  %v10496_v16 = vld [vmem:[#allocation31_spill] sm:$0xff] }
 0x39c   : > { %3449 = vst [vmem:[%s5588_s27 + $0xda8] sm:$0xff] %v2937_v30  ;;  %v2943_v7 = vadd.f32 %v2431_v23, %v10480_v60  ;;  %v2948_v30 = vadd.f32 %v2436_v33, %v10481_v24  ;;  %v4161_v23 = vld [vmem:[%s4482_s18 + $0xe30] sm:$0xff]  ;;  %v4162_v33 = vld [vmem:[%s4482_s18 + $0xe38] sm:$0xff]  ;;  %v1812_v62 = vpop.xlane.xlu1 %1811 }
 0x39d   : > { %3450 = vst [vmem:[%s5588_s27 + $0xdb0] sm:$0xff] %v2938_v40  ;;  %v2949_v40 = vadd.f32 %v2437_v47, %v10482_v28  ;;  %v2442_v8 = vmul.f32 %v4161_v23, %v1973_v17  ;;  %v2443_v53 = vmul.f32 %v4162_v33, %v1973_v17  ;;  %v1974_v47 = vsub.f32 %v5513_v63, %v1792_v12  ;;  %v10490_v60 = vld [vmem:[#allocation24_spill] sm:$0xff] }
 0x39e   : > { %3451 = vst [vmem:[%s5588_s27 + $0xdb8] sm:$0xff] %v2939_v32  ;;  %v10483_v32 = vld [vmem:[#allocation17_spill] sm:$0xff]  ;;  %v2953_v45 = vadd.f32 %v2441_v52, %v10489_v55  ;;  %v1978_v61 = vsub.f32 %v5513_v63, %v1812_v62  ;;  %v10497_v52 = vld [vmem:[#allocation38_spill] sm:$0xff]  ;;  %v10505_v62 = vld [vmem:[#allocation47_spill] sm:$0xff] }
 0x39f   : > { %3444 = vst [vmem:[%s5588_s27 + $0xd80] sm:$0xff] %v2932_v59  ;;  %v2950_v49 = vadd.f32 %v2438_v11, %v10483_v32  ;;  %v10484_v59 = vld [vmem:[#allocation19_spill] sm:$0xff]  ;;  %v1802_v11 = vpop.xlane.xlu2 %1801  ;;  %v4167_v28 = vld [vmem:[%s4482_s18 + $0xe40] sm:$0xff]  ;;  %v4168_v32 = vld [vmem:[%s4482_s18 + $0xe48] sm:$0xff] }
 0x3a0   : > { %3445 = vst [vmem:[%s5588_s27 + $0xd88] sm:$0xff] %v2933_v21  ;;  %v2951_v5 = vadd.f32 %v2439_v44, %v10484_v59  ;;  %v2944_v21 = vadd.f32 %v2432_v0, %v10485_v19  ;;  %v10491_v44 = vld [vmem:[#allocation25_spill] sm:$0xff]  ;;  %v10492_v0 = vld [vmem:[#allocation30_spill] sm:$0xff]  ;;  %v1976_v14 = vsub.f32 %v5513_v63, %v1802_v11  ;;  %v1807_v23 = vpop.xlane.xlu0 %1806  ;;  %v10501_v11 = vld [vmem:[#allocation44_spill] sm:$0xff] }
 0x3a1   : > { %3446 = vst [vmem:[%s5588_s27 + $0xd90] sm:$0xff] %v2934_v35  ;;  %v2945_v35 = vadd.f32 %v2433_v50, %v10486_v10  ;;  %v2955_v24 = vadd.f32 %v2443_v53, %v10491_v44  ;;  %v10493_v50 = vld [vmem:[#allocation35_spill] sm:$0xff]  ;;  %v4171_v10 = vld [vmem:[%s4482_s18 + $0xe80] sm:$0xff]  ;;  %v10499_v53 = vld [vmem:[#allocation34_spill] sm:$0xff] }
 0x3a2   : > { %3447 = vst [vmem:[%s5588_s27 + $0xd98] sm:$0xff] %v2935_v15  ;;  %v10487_v15 = vld [vmem:[#allocation22_spill] sm:$0xff]  ;;  %v10502_v44 = vld [vmem:[#allocation36_spill] sm:$0xff] }
 0x3a3   : > { %3452 = vst [vmem:[%s5588_s27 + $0xdc0] sm:$0xff] %v2940_v3  ;;  %v2946_v13 = vadd.f32 %v2434_v6, %v10487_v15  ;;  %v10488_v3 = vld [vmem:[#allocation29_spill] sm:$0xff]  ;;  %v10494_v6 = vld [vmem:[#allocation27_spill] sm:$0xff] }
 0x3a4   : > { %3453 = vst [vmem:[%s5588_s27 + $0xdc8] sm:$0xff] %v2941_v34  ;;  %v2947_v20 = vadd.f32 %v2435_v27, %v10488_v3  ;;  %v4163_v34 = vld [vmem:[%s4482_s18 + $0xe60] sm:$0xff]  ;;  %v2962_v59 = vadd.f32 %v2450_v41, %v10494_v6  ;;  %v4172_v15 = vld [vmem:[%s4482_s18 + $0xe88] sm:$0xff] }
 0x3a5   : > { %3454 = vst [vmem:[%s5588_s27 + $0xdd0] sm:$0xff] %v2942_v18  ;;  %v2448_v56 = vmul.f32 %v4163_v34, %v1975_v36  ;;  %v4164_v18 = vld [vmem:[%s4482_s18 + $0xe68] sm:$0xff]  ;;  %v10495_v27 = vld [vmem:[#allocation28_spill] sm:$0xff] }
 0x3a6   : > { %3455 = vst [vmem:[%s5588_s27 + $0xdd8] sm:$0xff] %v2943_v7  ;;  %v2449_v46 = vmul.f32 %v4164_v18, %v1975_v36  ;;  %v2954_v7 = vadd.f32 %v2442_v8, %v10490_v60  ;;  %v10498_v8 = vld [vmem:[#allocation33_spill] sm:$0xff]  ;;  %v4174_v34 = vld [vmem:[%s4482_s18 + $0xe98] sm:$0xff] }
 0x3a7   : > { %3460 = vst [vmem:[%s5588_s27 + $0xe00] sm:$0xff] %v2948_v30  ;;  %v4166_v30 = vld [vmem:[%s4482_s18 + $0xe78] sm:$0xff]  ;;  %v2960_v17 = vadd.f32 %v2448_v56, %v10492_v0  ;;  %v2455_v56 = vmul.f32 %v4174_v34, %v1976_v14  ;;  %v1817_v41 = vpop.xlane.xlu2 %1816  ;;  %v10503_v0 = vld [vmem:[#allocation37_spill] sm:$0xff]  ;;  %v4185_v34 = vld [vmem:[%s4482_s18 + $0xef0] sm:$0xff] }
 0x3a8   : > { %3461 = vst [vmem:[%s5588_s27 + $0xe08] sm:$0xff] %v2949_v40  ;;  %v2451_v4 = vmul.f32 %v4166_v30, %v1975_v36  ;;  %v2444_v40 = vmul.f32 %v4167_v28, %v1974_v47  ;;  %v2961_v31 = vadd.f32 %v2449_v46, %v10493_v50  ;;  %v1977_v46 = vsub.f32 %v5513_v63, %v1807_v23  ;;  %v4177_v30 = vld [vmem:[%s4482_s18 + $0xed0] sm:$0xff]  ;;  %v4178_v28 = vld [vmem:[%s4482_s18 + $0xed8] sm:$0xff] }
 0x3a9   : > { %3462 = vst [vmem:[%s5588_s27 + $0xe10] sm:$0xff] %v2950_v49  ;;  %v2445_v49 = vmul.f32 %v4168_v32, %v1974_v47  ;;  %v10509_v23 = vld [vmem:[#allocation50_spill] sm:$0xff] }
 0x3aa   : > { %3463 = vst [vmem:[%s5588_s27 + $0xe18] sm:$0xff] %v2951_v5  ;;  %v4169_v5 = vld [vmem:[%s4482_s18 + $0xe50] sm:$0xff]  ;;  %v2963_v19 = vadd.f32 %v2451_v4, %v10495_v27  ;;  %v2956_v36 = vadd.f32 %v2444_v40, %v10496_v16  ;;  %v2462_v4 = vmul.f32 %v4177_v30, %v1978_v61  ;;  %v2463_v40 = vmul.f32 %v4178_v28, %v1978_v61  ;;  %v10507_v16 = vld [vmem:[#allocation40_spill] sm:$0xff] }
 0x3ab   : > { %3456 = vst [vmem:[%s5588_s27 + $0xde0] sm:$0xff] %v2944_v21  ;;  %v2446_v29 = vmul.f32 %v4169_v5, %v1974_v47  ;;  %v4170_v21 = vld [vmem:[%s4482_s18 + $0xe58] sm:$0xff]  ;;  %v2957_v12 = vadd.f32 %v2445_v49, %v10497_v52  ;;  %v1979_v49 = vsub.f32 %v5513_v63, %v1817_v41 }
 0x3ac   : > { %3457 = vst [vmem:[%s5588_s27 + $0xde8] sm:$0xff] %v2945_v35  ;;  %v2447_v9 = vmul.f32 %v4170_v21, %v1974_v47  ;;  %v2452_v35 = vmul.f32 %v4171_v10, %v1976_v14  ;;  %v10500_v47 = vld [vmem:[#allocation41_spill] sm:$0xff]  ;;  %v10506_v27 = vld [vmem:[#allocation39_spill] sm:$0xff]  ;;  %v10514_v28 = vld [vmem:[#allocation48_spill] sm:$0xff] }
 0x3ad   : > { %3458 = vst [vmem:[%s5588_s27 + $0xdf0] sm:$0xff] %v2946_v13  ;;  %v2453_v13 = vmul.f32 %v4172_v15, %v1976_v14  ;;  %v2958_v3 = vadd.f32 %v2446_v29, %v10498_v8  ;;  %v1827_v29 = vpop.xlane.xlu1 %1826  ;;  %v4181_v21 = vld [vmem:[%s4482_s18 + $0xeb0] sm:$0xff]  ;;  %v4182_v10 = vld [vmem:[%s4482_s18 + $0xeb8] sm:$0xff] }
 0x3ae   : > { %3459 = vst [vmem:[%s5588_s27 + $0xdf8] sm:$0xff] %v2947_v20  ;;  %v4173_v20 = vld [vmem:[%s4482_s18 + $0xe90] sm:$0xff]  ;;  %v2964_v55 = vadd.f32 %v2452_v35, %v10500_v47  ;;  %v2459_v35 = vmul.f32 %v4182_v10, %v1977_v46 }
 0x3af   : > { %3464 = vst [vmem:[%s5588_s27 + $0xe20] sm:$0xff] %v2952_v2  ;;  %v2454_v33 = vmul.f32 %v4173_v20, %v1976_v14  ;;  %v2959_v2 = vadd.f32 %v2447_v9, %v10499_v53  ;;  %v2965_v60 = vadd.f32 %v2453_v13, %v10501_v11  ;;  %v10504_v14 = vld [vmem:[#allocation42_spill] sm:$0xff]  ;;  %v2458_v9 = vmul.f32 %v4181_v21, %v1977_v46  ;;  %v10510_v53 = vld [vmem:[#allocation45_spill] sm:$0xff]  ;;  %v1832_v30 = vpop.xlane.xlu2 %1831  ;;  %v10517_v21 = vld [vmem:[#allocation59_spill] sm:$0xff] }
 0x3b0   : > { %3465 = vst [vmem:[%s5588_s27 + $0xe28] sm:$0xff] %v2953_v45  ;;  %v4175_v45 = vld [vmem:[%s4482_s18 + $0xec0] sm:$0xff]  ;;  %v1981_v13 = vsub.f32 %v5513_v63, %v1827_v29  ;;  %v10511_v47 = vld [vmem:[#allocation46_spill] sm:$0xff]  ;;  %v10518_v10 = vld [vmem:[#allocation51_spill] sm:$0xff] }
 0x3b1   : > { %3466 = vst [vmem:[%s5588_s27 + $0xe30] sm:$0xff] %v2954_v7  ;;  %v2460_v18 = vmul.f32 %v4175_v45, %v1978_v61  ;;  %v4176_v7 = vld [vmem:[%s4482_s18 + $0xec8] sm:$0xff]  ;;  %v4186_v45 = vld [vmem:[%s4482_s18 + $0xef8] sm:$0xff]  ;;  %v4187_v11 = vld [vmem:[%s4482_s18 + $0xf20] sm:$0xff] }
 0x3b2   : > { %3467 = vst [vmem:[%s5588_s27 + $0xe38] sm:$0xff] %v2955_v24  ;;  %v2461_v26 = vmul.f32 %v4176_v7, %v1978_v61  ;;  %v2966_v24 = vadd.f32 %v2454_v33, %v10502_v44  ;;  %v10508_v61 = vld [vmem:[#allocation43_spill] sm:$0xff]  ;;  %v1822_v33 = vpop.xlane.xlu0 %1821  ;;  %v4188_v44 = vld [vmem:[%s4482_s18 + $0xf28] sm:$0xff] }
 0x3b3   : > { %3472 = vst [vmem:[%s5588_s27 + $0xe60] sm:$0xff] %v2960_v17  ;;  %v2967_v17 = vadd.f32 %v2455_v56, %v10503_v0  ;;  %v2972_v50 = vadd.f32 %v2460_v18, %v10504_v14  ;;  %v2466_v56 = vmul.f32 %v4185_v34, %v1979_v49  ;;  %v2467_v18 = vmul.f32 %v4186_v45, %v1979_v49  ;;  %v4190_v14 = vld [vmem:[%s4482_s18 + $0xf38] sm:$0xff]  ;;  %v4192_v29 = vld [vmem:[%s4482_s18 + $0xf08] sm:$0xff] }
 0x3b4   : > { %3473 = vst [vmem:[%s5588_s27 + $0xe68] sm:$0xff] %v2961_v31  ;;  %v4179_v31 = vld [vmem:[%s4482_s18 + $0xea0] sm:$0xff]  ;;  %v2973_v6 = vadd.f32 %v2461_v26, %v10505_v62  ;;  %v1980_v7 = vsub.f32 %v5513_v63, %v1822_v33  ;;  %v4196_v33 = vld [vmem:[%s4482_s18 + $0xf48] sm:$0xff] }
 0x3b5   : > { %3474 = vst [vmem:[%s5588_s27 + $0xe70] sm:$0xff] %v2962_v59  ;;  %v2456_v32 = vmul.f32 %v4179_v31, %v1977_v46  ;;  %v4180_v59 = vld [vmem:[%s4482_s18 + $0xea8] sm:$0xff] }
 0x3b6   : > { %3475 = vst [vmem:[%s5588_s27 + $0xe78] sm:$0xff] %v2963_v19  ;;  %v2457_v5 = vmul.f32 %v4180_v59, %v1977_v46  ;;  %v2974_v19 = vadd.f32 %v2462_v4, %v10506_v27  ;;  %v10512_v26 = vld [vmem:[#allocation53_spill] sm:$0xff]  ;;  %v10513_v4 = vld [vmem:[#allocation56_spill] sm:$0xff]  ;;  %v10516_v59 = vld [vmem:[#allocation54_spill] sm:$0xff]  ;;  %v2469_v27 = vmul.f32 %v4192_v29, %v1980_v7 }
 0x3b7   : > { %3468 = vst [vmem:[%s5588_s27 + $0xe40] sm:$0xff] %v2956_v36  ;;  %v2975_v36 = vadd.f32 %v2463_v40, %v10507_v16  ;;  %v2968_v52 = vadd.f32 %v2456_v32, %v10508_v61  ;;  %v2978_v0 = vadd.f32 %v2466_v56, %v10513_v4  ;;  %v2979_v40 = vadd.f32 %v2467_v18, %v10514_v28  ;;  %v10515_v31 = vld [vmem:[#allocation49_spill] sm:$0xff]  ;;  %v4193_v16 = vld [vmem:[%s4482_s18 + $0xf10] sm:$0xff]  ;;  %v4194_v61 = vld [vmem:[%s4482_s18 + $0xf18] sm:$0xff] }
 0x3b8   : > { %3469 = vst [vmem:[%s5588_s27 + $0xe48] sm:$0xff] %v2957_v12  ;;  %v4183_v12 = vld [vmem:[%s4482_s18 + $0xee0] sm:$0xff]  ;;  %v2969_v8 = vadd.f32 %v2457_v5, %v10509_v23  ;;  %v10521_v34 = vld [vmem:[#allocation62_spill] sm:$0xff] }
 0x3b9   : > { %3470 = vst [vmem:[%s5588_s27 + $0xe50] sm:$0xff] %v2958_v3  ;;  %v2464_v15 = vmul.f32 %v4183_v12, %v1979_v49  ;;  %v4184_v3 = vld [vmem:[%s4482_s18 + $0xee8] sm:$0xff]  ;;  %v10519_v12 = vld [vmem:[#allocation52_spill] sm:$0xff] }
 0x3ba   : > { %3471 = vst [vmem:[%s5588_s27 + $0xe58] sm:$0xff] %v2959_v2  ;;  %v2465_v20 = vmul.f32 %v4184_v3, %v1979_v49  ;;  %v2970_v2 = vadd.f32 %v2458_v9, %v10510_v53  ;;  %v4191_v49 = vld [vmem:[%s4482_s18 + $0xf00] sm:$0xff]  ;;  %v10520_v3 = vld [vmem:[#allocation55_spill] sm:$0xff]  ;;  %v4200_v4 = vld [vmem:[%s4482_s18 + $0xf88] sm:$0xff] }
 0x3bb   : > { %3476 = vst [vmem:[%s5588_s27 + $0xe80] sm:$0xff] %v2964_v55  ;;  %v2971_v55 = vadd.f32 %v2459_v35, %v10511_v47  ;;  %v2976_v46 = vadd.f32 %v2464_v15, %v8327_v51  ;;  %v2468_v62 = vmul.f32 %v4191_v49, %v1980_v7  ;;  %v4197_v47 = vld [vmem:[%s4482_s18 + $0xf50] sm:$0xff]  ;;  %v10522_v45 = vld [vmem:[#allocation57_spill] sm:$0xff] }
 0x3bc   : > { %3477 = vst [vmem:[%s5588_s27 + $0xe88] sm:$0xff] %v2965_v60  ;;  %v2472_v60 = vmul.f32 %v4187_v11, %v1981_v13  ;;  %v2977_v41 = vadd.f32 %v2465_v20, %v10512_v26  ;;  %v2981_v20 = vadd.f32 %v2469_v27, %v10520_v3  ;;  %v4199_v26 = vld [vmem:[%s4482_s18 + $0xf80] sm:$0xff]  ;;  %v10528_v27 = vld [vmem:[#allocation66_spill] sm:$0xff] }
 0x3bd   : > { %3478 = vst [vmem:[%s5588_s27 + $0xe90] sm:$0xff] %v2966_v24  ;;  %v2473_v24 = vmul.f32 %v4188_v44, %v1981_v13  ;;  %v2980_v15 = vadd.f32 %v2468_v62, %v10519_v12  ;;  %v10527_v62 = vld [vmem:[#allocation61_spill] sm:$0xff] }
 0x3be   : > { %3479 = vst [vmem:[%s5588_s27 + $0xe98] sm:$0xff] %v2967_v17  ;;  %v4189_v17 = vld [vmem:[%s4482_s18 + $0xf30] sm:$0xff]  ;;  %v2984_v32 = vadd.f32 %v2472_v60, %v10515_v31  ;;  %v4207_v3 = vld [vmem:[%s4482_s18 + $0xfa0] sm:$0xff] }
 0x3bf   : > { %3484 = vst [vmem:[%s5588_s27 + $0xec0] sm:$0xff] %v2972_v50  ;;  %v2474_v51 = vmul.f32 %v4189_v17, %v1981_v13  ;;  %v2475_v50 = vmul.f32 %v4190_v14, %v1981_v13  ;;  %v2985_v5 = vadd.f32 %v2473_v24, %v10516_v59  ;;  %v4195_v13 = vld [vmem:[%s4482_s18 + $0xf40] sm:$0xff]  ;;  %v10523_v60 = vld [vmem:[#allocation58_spill] sm:$0xff]  ;;  %v1847_v17 = vpop.xlane.xlu2 %1846 }
 0x3c0   : > { %3485 = vst [vmem:[%s5588_s27 + $0xec8] sm:$0xff] %v2973_v6  ;;  %v1982_v6 = vsub.f32 %v5513_v63, %v1832_v30  ;;  %v10524_v24 = vld [vmem:[#allocation65_spill] sm:$0xff]  ;;  %v1985_v29 = vsub.f32 %v5513_v63, %v1847_v17 }
 0x3c1   : > { %3486 = vst [vmem:[%s5588_s27 + $0xed0] sm:$0xff] %v2974_v19  ;;  %v1842_v19 = vpop.xlane.xlu1 %1841  ;;  %v2986_v9 = vadd.f32 %v2474_v51, %v10517_v21  ;;  %v2987_v35 = vadd.f32 %v2475_v50, %v10518_v10  ;;  %v10525_v51 = vld [vmem:[#allocation68_spill] sm:$0xff]  ;;  %v4204_v21 = vld [vmem:[%s4482_s18 + $0xf68] sm:$0xff] }
 0x3c2   : > { %3487 = vst [vmem:[%s5588_s27 + $0xed8] sm:$0xff] %v2975_v36  ;;  %v2470_v36 = vmul.f32 %v4193_v16, %v1980_v7  ;;  %v2476_v23 = vmul.f32 %v4195_v13, %v1982_v6  ;;  %v2477_v53 = vmul.f32 %v4196_v33, %v1982_v6  ;;  %v10526_v50 = vld [vmem:[#allocation60_spill] sm:$0xff] }
 0x3c3   : > { %3480 = vst [vmem:[%s5588_s27 + $0xea0] sm:$0xff] %v2968_v52  ;;  %v2471_v52 = vmul.f32 %v4194_v61, %v1980_v7  ;;  %v4203_v59 = vld [vmem:[%s4482_s18 + $0xf60] sm:$0xff] }
 0x3c4   : > { %3481 = vst [vmem:[%s5588_s27 + $0xea8] sm:$0xff] %v2969_v8  ;;  %v1984_v8 = vsub.f32 %v5513_v63, %v1842_v19  ;;  %v2982_v56 = vadd.f32 %v2470_v36, %v10521_v34  ;;  %v2988_v7 = vadd.f32 %v2476_v23, %v10523_v60  ;;  %v2989_v30 = vadd.f32 %v2477_v53, %v10524_v24  ;;  %v10529_v36 = vld [vmem:[#allocation71_spill] sm:$0xff]  ;;  %v10531_v23 = vld [vmem:[#allocation64_spill] sm:$0xff]  ;;  %v4208_v34 = vld [vmem:[%s4482_s18 + $0xfa8] sm:$0xff] }
 0x3c5   : > { %3482 = vst [vmem:[%s5588_s27 + $0xeb0] sm:$0xff] %v2970_v2  ;;  %v1837_v2 = vpop.xlane.xlu0 %1836  ;;  %v2983_v18 = vadd.f32 %v2471_v52, %v10522_v45  ;;  %v10530_v52 = vld [vmem:[#allocation63_spill] sm:$0xff] }
 0x3c6   : > { %3483 = vst [vmem:[%s5588_s27 + $0xeb8] sm:$0xff] %v2971_v55  ;;  %v2478_v55 = vmul.f32 %v4197_v47, %v1982_v6  ;;  %v1983_v44 = vsub.f32 %v5513_v63, %v1837_v2  ;;  %v10532_v53 = vld [vmem:[#allocation67_spill] sm:$0xff] }
 0x3c7   : > { %3488 = vst [vmem:[%s5588_s27 + $0xee0] sm:$0xff] %v2976_v46  ;;  %v4198_v46 = vld [vmem:[%s4482_s18 + $0xf58] sm:$0xff] }
 0x3c8   : > { %3489 = vst [vmem:[%s5588_s27 + $0xee8] sm:$0xff] %v2977_v41  ;;  %v2479_v11 = vmul.f32 %v4198_v46, %v1982_v6  ;;  %v2484_v41 = vmul.f32 %v4199_v26, %v1984_v8  ;;  %v2990_v28 = vadd.f32 %v2478_v55, %v10525_v51  ;;  %v10533_v55 = vld [vmem:[#allocation74_spill] sm:$0xff] }
 0x3c9   : > { %3490 = vst [vmem:[%s5588_s27 + $0xef0] sm:$0xff] %v2978_v0  ;;  %v2485_v0 = vmul.f32 %v4200_v4, %v1984_v8  ;;  %v1857_v16 = vpop.xlane.xlu1 %1856 }
 0x3ca   : > { %3491 = vst [vmem:[%s5588_s27 + $0xef8] sm:$0xff] %v2979_v40  ;;  %v4201_v40 = vld [vmem:[%s4482_s18 + $0xf90] sm:$0xff]  ;;  %v2991_v31 = vadd.f32 %v2479_v11, %v10526_v50  ;;  %v2996_v6 = vadd.f32 %v2484_v41, %v10527_v62  ;;  %v1987_v33 = vsub.f32 %v5513_v63, %v1857_v16  ;;  %v10534_v11 = vld [vmem:[#allocation69_spill] sm:$0xff] }
 0x3cb   : > { %3496 = vst [vmem:[%s5588_s27 + $0xf20] sm:$0xff] %v2984_v32  ;;  %v2486_v14 = vmul.f32 %v4201_v40, %v1984_v8  ;;  %v4202_v32 = vld [vmem:[%s4482_s18 + $0xf98] sm:$0xff]  ;;  %v2997_v19 = vadd.f32 %v2485_v0, %v10528_v27  ;;  %v4212_v0 = vld [vmem:[%s4482_s18 + $0xfe8] sm:$0xff]  ;;  %v4215_v50 = vld [vmem:[%s4482_s18 + $0xfc0] sm:$0xff] }
 0x3cc   : > { %3497 = vst [vmem:[%s5588_s27 + $0xf28] sm:$0xff] %v2985_v5  ;;  %v2487_v49 = vmul.f32 %v4202_v32, %v1984_v8  ;;  %v2480_v5 = vmul.f32 %v4203_v59, %v1983_v44  ;;  %v2497_v17 = vmul.f32 %v4212_v0, %v1987_v33  ;;  %v4216_v32 = vld [vmem:[%s4482_s18 + $0xfc8] sm:$0xff]  ;;  %v4217_v62 = vld [vmem:[%s4482_s18 + $0xfd0] sm:$0xff] }
 0x3cd   : > { %3498 = vst [vmem:[%s5588_s27 + $0xf30] sm:$0xff] %v2986_v9  ;;  %v2481_v9 = vmul.f32 %v4204_v21, %v1983_v44  ;;  %v2998_v10 = vadd.f32 %v2486_v14, %v10529_v36  ;;  %v1852_v47 = vpop.xlane.xlu0 %1851  ;;  %v4214_v14 = vld [vmem:[%s4482_s18 + $0xff8] sm:$0xff] }
 0x3ce   : > { %3499 = vst [vmem:[%s5588_s27 + $0xf38] sm:$0xff] %v2987_v35  ;;  %v4205_v35 = vld [vmem:[%s4482_s18 + $0xf70] sm:$0xff]  ;;  %v2999_v12 = vadd.f32 %v2487_v49, %v10530_v52  ;;  %v2992_v8 = vadd.f32 %v2480_v5, %v10531_v23 }
 0x3cf   : > { %3492 = vst [vmem:[%s5588_s27 + $0xf00] sm:$0xff] %v2980_v15  ;;  %v2482_v61 = vmul.f32 %v4205_v35, %v1983_v44  ;;  %v4206_v15 = vld [vmem:[%s4482_s18 + $0xf78] sm:$0xff]  ;;  %v2993_v2 = vadd.f32 %v2481_v9, %v10532_v53 }
 0x3d0   : > { %3493 = vst [vmem:[%s5588_s27 + $0xf08] sm:$0xff] %v2981_v20  ;;  %v2483_v13 = vmul.f32 %v4206_v15, %v1983_v44  ;;  %v2488_v20 = vmul.f32 %v4207_v3, %v1985_v29  ;;  %v4211_v44 = vld [vmem:[%s4482_s18 + $0xfe0] sm:$0xff] }
 0x3d1   : > { %3494 = vst [vmem:[%s5588_s27 + $0xf10] sm:$0xff] %v2982_v56  ;;  %v2489_v56 = vmul.f32 %v4208_v34, %v1985_v29  ;;  %v2994_v45 = vadd.f32 %v2482_v61, %v10533_v55  ;;  %v2496_v24 = vmul.f32 %v4211_v44, %v1987_v33 }
 0x3d2   : > { %3495 = vst [vmem:[%s5588_s27 + $0xf18] sm:$0xff] %v2983_v18  ;;  %v4209_v18 = vld [vmem:[%s4482_s18 + $0xfb0] sm:$0xff]  ;;  %v2995_v60 = vadd.f32 %v2483_v13, %v10534_v11  ;;  %v3000_v41 = vadd.f32 %v2488_v20, %v8527_v39 }
 0x3d3   : > { %3500 = vst [vmem:[%s5588_s27 + $0xf40] sm:$0xff] %v2988_v7  ;;  %v2490_v46 = vmul.f32 %v4209_v18, %v1985_v29  ;;  %v4210_v7 = vld [vmem:[%s4482_s18 + $0xfb8] sm:$0xff]  ;;  %v3001_v4 = vadd.f32 %v2489_v56, %v8530_v43  ;;  %v3008_v43 = vadd.f32 %v2496_v24, %v8588_v25 }
 0x3d4   : > { %3501 = vst [vmem:[%s5588_s27 + $0xf48] sm:$0xff] %v2989_v30  ;;  %v2491_v26 = vmul.f32 %v4210_v7, %v1985_v29  ;;  %v1986_v30 = vsub.f32 %v5513_v63, %v1852_v47  ;;  %v2499_v63 = vmul.f32 %v4214_v14, %v1987_v33 }
 0x3d5   : > { %3502 = vst [vmem:[%s5588_s27 + $0xf50] sm:$0xff] %v2990_v28  ;;  %v3002_v51 = vadd.f32 %v2490_v46, %v8575_v42  ;;  %v4213_v28 = vld [vmem:[%s4482_s18 + $0xff0] sm:$0xff]  ;;  %v3009_v42 = vadd.f32 %v2497_v17, %v8594_v1  ;;  %v4218_v1 = vld [vmem:[%s4482_s18 + $0xfd8] sm:$0xff] }
 0x3d6   : > { %3503 = vst [vmem:[%s5588_s27 + $0xf58] sm:$0xff] %v2991_v31  ;;  %v2498_v39 = vmul.f32 %v4213_v28, %v1987_v33  ;;  %v3003_v40 = vadd.f32 %v2491_v26, %v8583_v38  ;;  %v2492_v31 = vmul.f32 %v4215_v50, %v1986_v30  ;;  %v2493_v49 = vmul.f32 %v4216_v32, %v1986_v30 }
 0x3d7   : > { %3508 = vst [vmem:[%s5588_s27 + $0xf80] sm:$0xff] %v2996_v6  ;;  %v2494_v6 = vmul.f32 %v4217_v62, %v1986_v30  ;;  %v3011_v25 = vadd.f32 %v2499_v63, %v8605_v54  ;;  %v2495_v59 = vmul.f32 %v4218_v1, %v1986_v30 }
 0x3d8   : > { %3509 = vst [vmem:[%s5588_s27 + $0xf88] sm:$0xff] %v2997_v19  ;;  %v3010_v38 = vadd.f32 %v2498_v39, %v8597_v22  ;;  %v3004_v22 = vadd.f32 %v2492_v31, %v8600_v58  ;;  %v3005_v5 = vadd.f32 %v2493_v49, %v8608_v57 }
 0x3d9   : > { %3510 = vst [vmem:[%s5588_s27 + $0xf90] sm:$0xff] %v2998_v10  ;;  %v3006_v29 = vadd.f32 %v2494_v6, %v8611_v48  ;;  %v3007_v54 = vadd.f32 %v2495_v59, %v8617_v37 }
 0x3da   : > { %3511 = vst [vmem:[%s5588_s27 + $0xf98] sm:$0xff] %v2999_v12 }
 0x3db   : > { %3504 = vst [vmem:[%s5588_s27 + $0xf60] sm:$0xff] %v2992_v8 }
 0x3dc   : > { %3505 = vst [vmem:[%s5588_s27 + $0xf68] sm:$0xff] %v2993_v2 }
 0x3dd   : > { %3506 = vst [vmem:[%s5588_s27 + $0xf70] sm:$0xff] %v2994_v45 }
 0x3de   : > { %3507 = vst [vmem:[%s5588_s27 + $0xf78] sm:$0xff] %v2995_v60 }
 0x3df   : > { %3512 = vst [vmem:[%s5588_s27 + $0xfa0] sm:$0xff] %v3000_v41 }
 0x3e0   : > { %3513 = vst [vmem:[%s5588_s27 + $0xfa8] sm:$0xff] %v3001_v4 }
 0x3e1   : > { %3514 = vst [vmem:[%s5588_s27 + $0xfb0] sm:$0xff] %v3002_v51 }
 0x3e2   : > { %3515 = vst [vmem:[%s5588_s27 + $0xfb8] sm:$0xff] %v3003_v40 }
 0x3e3   : > { %3520 = vst [vmem:[%s5588_s27 + $0xfe0] sm:$0xff] %v3008_v43 }
 0x3e4   : > { %3521 = vst [vmem:[%s5588_s27 + $0xfe8] sm:$0xff] %v3009_v42 }
 0x3e5   : > { %3522 = vst [vmem:[%s5588_s27 + $0xff0] sm:$0xff] %v3010_v38 }
 0x3e6   : > { %3523 = vst [vmem:[%s5588_s27 + $0xff8] sm:$0xff] %v3011_v25 }
 0x3e7   : > { %3516 = vst [vmem:[%s5588_s27 + $0xfc0] sm:$0xff] %v3004_v22 }
 0x3e8   : > { %3517 = vst [vmem:[%s5588_s27 + $0xfc8] sm:$0xff] %v3005_v5 }
 0x3e9   : > { %3518 = vst [vmem:[%s5588_s27 + $0xfd0] sm:$0xff] %v3006_v29 }
 0x3ea   : > { %3519 = vst [vmem:[%s5588_s27 + $0xfd8] sm:$0xff] %v3007_v54 }
 0x3eb   : > { %4306 = shalt.err (!%p4303_p8)
}
 0x3ec   : > { %s4354_s10 = smov 512   ;;  %s4355_s11 = smov 32  }
 0x3ed   : > { %3652 = dma.vmem_to_hbm [thread:$0]  (%p4431_p11), %s3539_s21, 65536, %s3541_s28, %s3525_s23, %s4354_s10, %s4354_s10, %s4355_s11  }
 0x3ee PF: > { %s3555_s12 = sand.u32 1, %s4337_s14   ;;  %p10535_p9 = scmp.ge.s32.totalorder %s4349_s17, 2 }
 0x3ef   : > { %s3556_s18 = scalar_lea.sflag [#allocation6], %s3555_s12 }
 0x3f0   : > { %p3663_p10 = pnand %p10535_p9, %p4435_p12 }
 0x3f2   : > { %p3664_p1 = pneg %p3663_p10 }
 0x3f4   : > { %4332 = dma.done.wait (%p3664_p1), %s3556_s18, 65536  }
 0x3f5   : > { %4334 = vsyncadd (%p3664_p1), %s3556_s18, 4294901760  ;;  %p18_p2 = scmp.ge.s32.totalorder %s4404_s19, 4   ;;  %s10536_s14 = smov %s4341_s15 }
 0x3f6   : > { %s10537_s15 = smov %s4345_s16  ;;  %s10538_s16 = smov %s4416_s22 }
 0x3f7   : > { %s10539_s17 = smov %s4404_s19  ;;  %20 = sbr.rel (!%p18_p2) target bundleno = 8 (0x8), region = 77 }
 0x3fc   :  { %3562 = vsyncpa [#allocation5], 1 }
 0x3fd   :  { %3564 = vsyncpa [#allocation5 + $0x1], 1 }
 0x3fe   :  { %3565 = vsyncpa [#allocation8], 1 }
 0x3ff   :  { %3566 = vsyncpa [#allocation6], 1 }
 0x400   :  { %3568 = vsyncpa [#allocation6 + $0x1], 1 }

</bundles_post_ra>
